<compile_context>
chip_gen: v6e
topology: v6e:2x2x1
jax: 0.10.0
libtpu: 0.0.40
codegen_flags: <defaults>
</compile_context>

<pallas_src>
import functools
import math

import jax
import jax.numpy as jnp
from jax.experimental import pallas as pl
from jax.experimental.pallas import tpu as pltpu

# ---------------------------------------------------------------------------
# Model hyper-parameters (small, consistent with the module's constructor).
# ---------------------------------------------------------------------------
D_MODEL = 32
NHEAD = 4
DIM_FF = 64
NUM_LAYERS = 2
LN_EPS = 1e-5


# ---------------------------------------------------------------------------
# Shared math helper (used inside the kernel and in the pure-JAX reference).
# ---------------------------------------------------------------------------
def _layernorm(x, gamma, beta):
    mean = jnp.mean(x, axis=-1, keepdims=True)
    var = jnp.mean(jnp.square(x - mean), axis=-1, keepdims=True)
    return (x - mean) * jax.lax.rsqrt(var + LN_EPS) * gamma + beta


# ---------------------------------------------------------------------------
# Fused Pallas kernel: the entire FeatureFusionNetwork for ONE batch element.
# ---------------------------------------------------------------------------
def fused_fusion_kernel(s_t_ref, p_t_ref, s_s_ref, p_s_ref, bias_ref,
                        wqk_ref, bqk_ref, wv_ref, bv_ref, wo_ref, bo_ref,
                        w1_ref, b1_ref, w2_ref, b2_ref,
                        g1_ref, be1_ref, g2_ref, be2_ref,
                        out_ref, *, nhead, num_layers, d_model):
    d = d_model
    hd = d // nhead
    bias = bias_ref[...]                     # (1, S2) additive key mask (0 / -1e30)

    def mha_ln(layer, q_in, k_in, v_in, resid, fuse_qk):
        wqk = wqk_ref[layer]                 # (D, 2D)  = [wq.T * scale | wk.T]
        bqk = bqk_ref[layer]                 # (1, 2D)
        if fuse_qk:                          # self-attention: q_in is k_in
            qk = jnp.dot(q_in, wqk, preferred_element_type=jnp.float32) + bqk
            q, k = qk[:, :d], qk[:, d:]
        else:                                # cross-attention
            q = jnp.dot(q_in, wqk[:, :d], preferred_element_type=jnp.float32) + bqk[:, :d]
            k = jnp.dot(k_in, wqk[:, d:], preferred_element_type=jnp.float32) + bqk[:, d:]
        v = jnp.dot(v_in, wv_ref[layer], preferred_element_type=jnp.float32) + bv_ref[layer]

        wo = wo_ref[layer]                   # (D, D) == original wo.T
        proj = jnp.zeros_like(resid)
        for h in range(nhead):               # static unroll; accumulate through wo slices
            sl = slice(h * hd, (h + 1) * hd)
            s = jnp.dot(q[:, sl], k[:, sl].T,
                        preferred_element_type=jnp.float32) + bias      # (Sq, Sk)
            m = jnp.max(s, axis=-1, keepdims=True)
            e = jnp.exp(s - m)
            p = e * pl.reciprocal(jnp.sum(e, axis=-1, keepdims=True), approx=True)
            oh = jnp.dot(p, v[:, sl], preferred_element_type=jnp.float32)   # (Sq, hd)
            proj = proj + jnp.dot(oh, wo[sl, :], preferred_element_type=jnp.float32)

        x = resid + proj + bo_ref[layer]     # dropout == identity
        return _layernorm(x, g1_ref[layer], be1_ref[layer])

    def ffn_ln(layer, x):
        h = jnp.dot(x, w1_ref[layer], preferred_element_type=jnp.float32) + b1_ref[layer]
        h = jnp.maximum(h, 0.0)              # relu (dropout == identity)
        y = jnp.dot(h, w2_ref[layer], preferred_element_type=jnp.float32) + b2_ref[layer]
        return _layernorm(x + y, g2_ref[layer], be2_ref[layer])

    # ---- SA branch: refine the search features (layers 0 .. L-1) ----------
    s_s = s_s_ref[...]
    p_s = p_s_ref[...]
    src2 = s_s
    for l in range(num_layers):
        qk = src2 + p_s
        src2 = mha_ln(l, qk, qk, src2, src2, fuse_qk=True)
        src2 = ffn_ln(l, src2)

    # ---- CA branch: template queries attend to refined search (L .. 2L-1) --
    out1 = s_t_ref[...]
    p_t = p_t_ref[...]
    k_ca = src2 + p_s                        # keys are identical for every CA layer
    for l in range(num_layers, 2 * num_layers):
        q = out1 + p_t
        out1 = mha_ln(l, q, k_ca, src2, out1, fuse_qk=False)
        out1 = ffn_ln(l, out1)

    out_ref[...] = out1.astype(out_ref.dtype)


# ---------------------------------------------------------------------------
# Host-side parameter packing: stack layers, pre-transpose, fold softmax scale.
# ---------------------------------------------------------------------------
def pack_params(params, nhead=NHEAD):
    layers = params['sa'] + params['ca']          # SA layers first, then CA
    hd = D_MODEL // nhead
    scale = 1.0 / math.sqrt(hd)
    stack = lambda f: jnp.stack([f(lp) for lp in layers], axis=0)
    return {
        # Q/K projections concatenated; 1/sqrt(hd) folded into the Q half.
        'wqk': stack(lambda lp: jnp.concatenate([lp['wq'].T * scale, lp['wk'].T], axis=1)),
        'bqk': stack(lambda lp: jnp.concatenate([lp['bq'] * scale, lp['bk']], axis=1)),
        'wv': stack(lambda lp: lp['wv'].T), 'bv': stack(lambda lp: lp['bv']),
        'wo': stack(lambda lp: lp['wo'].T), 'bo': stack(lambda lp: lp['bo']),
        'w1': stack(lambda lp: lp['w1'].T), 'b1': stack(lambda lp: lp['b1']),
        'w2': stack(lambda lp: lp['w2'].T), 'b2': stack(lambda lp: lp['b2']),
        'g1': stack(lambda lp: lp['ln_attn_g']), 'be1': stack(lambda lp: lp['ln_attn_b']),
        'g2': stack(lambda lp: lp['ln_ffn_g']), 'be2': stack(lambda lp: lp['ln_ffn_b']),
    }


# ---------------------------------------------------------------------------
# Single-pallas_call forward wrapper.
# ---------------------------------------------------------------------------
@jax.jit
def pallas_forward(params, src_temp, mask_temp, src_search, mask_search,
                   pos_temp, pos_search):
    B, C, Ht, Wt = src_temp.shape
    _, _, Hs, Ws = src_search.shape
    S1, S2, D = Ht * Wt, Hs * Ws, C

    # flatten(2).permute(2,0,1) in PyTorch == (B, S, C) batch-major here.
    s_t = src_temp.reshape(B, C, S1).transpose(0, 2, 1).astype(jnp.float32)
    p_t = pos_temp.reshape(B, C, S1).transpose(0, 2, 1).astype(jnp.float32)
    s_s = src_search.reshape(B, C, S2).transpose(0, 2, 1).astype(jnp.float32)
    p_s = pos_search.reshape(B, C, S2).transpose(0, 2, 1).astype(jnp.float32)
    # Additive key-padding bias for the search keys (True => key ignored).
    bias = jnp.where(mask_search.reshape(B, 1, S2), jnp.float32(-1e30), jnp.float32(0.0))
    # mask_temp is flattened by the PyTorch module but never used as a
    # key_padding_mask inside either attention call; kept for signature parity.
    del mask_temp

    pp = pack_params(params)
    L2 = 2 * NUM_LAYERS
    Dff = pp['w1'].shape[2]

    per_batch = lambda *tail: pl.BlockSpec((None,) + tail, lambda b: (b,) + (0,) * len(tail))
    shared = lambda *shape: pl.BlockSpec(shape, lambda b: (0,) * len(shape))

    kern = functools.partial(fused_fusion_kernel, nhead=NHEAD,
                             num_layers=NUM_LAYERS, d_model=D)

    out = pl.pallas_call(
        kern,
        out_shape=jax.ShapeDtypeStruct((B, S1, D), jnp.float32),
        grid=(B,),
        in_specs=[
            per_batch(S1, D), per_batch(S1, D),            # template src / pos
            per_batch(S2, D), per_batch(S2, D),            # search src / pos
            per_batch(1, S2),                              # additive key mask bias
            shared(L2, D, 2 * D), shared(L2, 1, 2 * D),    # wqk, bqk
            shared(L2, D, D), shared(L2, 1, D),            # wv, bv
            shared(L2, D, D), shared(L2, 1, D),            # wo, bo
            shared(L2, D, Dff), shared(L2, 1, Dff),        # w1, b1
            shared(L2, Dff, D), shared(L2, 1, D),          # w2, b2
            shared(L2, 1, D), shared(L2, 1, D),            # ln_attn gamma / beta
            shared(L2, 1, D), shared(L2, 1, D),            # ln_ffn gamma / beta
        ],
        out_specs=per_batch(S1, D),
        compiler_params=pltpu.CompilerParams(
            dimension_semantics=("parallel",)),            # v7x: one batch elem per TC
    )(s_t, p_t, s_s, p_s, bias,
      pp['wqk'], pp['bqk'], pp['wv'], pp['bv'], pp['wo'], pp['bo'],
      pp['w1'], pp['b1'], pp['w2'], pp['b2'],
      pp['g1'], pp['be1'], pp['g2'], pp['be2'])

    # PyTorch does h = w = int(sqrt(HW)) (square templates); (Ht, Wt) is identical there.
    return out.transpose(0, 2, 1).reshape(B, C, Ht, Wt)


# ---------------------------------------------------------------------------
# Pure-JAX reference (for correctness check).
# ---------------------------------------------------------------------------
def ref_attention_block(q_in, k_in, v_in, res, mask, p, nhead):
    B, S1, D = q_in.shape
    S2 = k_in.shape[1]
    hd = D // nhead
    q = q_in @ p['wq'].T + p['bq']
    k = k_in @ p['wk'].T + p['bk']
    v = v_in @ p['wv'].T + p['bv']
    qh = q.reshape(B, S1, nhead, hd).transpose(0, 2, 1, 3)
    kh = k.reshape(B, S2, nhead, hd).transpose(0, 2, 1, 3)
    vh = v.reshape(B, S2, nhead, hd).transpose(0, 2, 1, 3)
    scores = jnp.einsum('bhqd,bhkd->bhqk', qh, kh) / math.sqrt(hd)
    scores = jnp.where(mask[:, None, :, :] > 0.5, -1e30, scores)
    attn = jax.nn.softmax(scores, axis=-1)
    o = jnp.einsum('bhqk,bhkd->bhqd', attn, vh).transpose(0, 2, 1, 3).reshape(B, S1, D)
    x = res + (o @ p['wo'].T + p['bo'])
    return _layernorm(x, p['ln_attn_g'], p['ln_attn_b'])


def ref_ffn_block(x, p):
    h = jnp.maximum(x @ p['w1'].T + p['b1'], 0.0)
    z = x + (h @ p['w2'].T + p['b2'])
    return _layernorm(z, p['ln_ffn_g'], p['ln_ffn_b'])


def reference_forward(params, src_temp, mask_temp, src_search, mask_search,
                      pos_temp, pos_search):
    B, C, Ht, Wt = src_temp.shape
    _, _, Hs, Ws = src_search.shape
    S1, S2 = Ht * Wt, Hs * Ws
    s_t = src_temp.reshape(B, C, S1).transpose(0, 2, 1).astype(jnp.float32)
    p_t = pos_temp.reshape(B, C, S1).transpose(0, 2, 1).astype(jnp.float32)
    s_s = src_search.reshape(B, C, S2).transpose(0, 2, 1).astype(jnp.float32)
    p_s = pos_search.reshape(B, C, S2).transpose(0, 2, 1).astype(jnp.float32)
    m_s = mask_search.reshape(B, 1, S2).astype(jnp.float32)
    del mask_temp  # flattened but unused in the PyTorch module's attention calls

    src2 = s_s
    for lp in params['sa']:
        qk = src2 + p_s
        src2 = ref_attention_block(qk, qk, src2, src2, m_s, lp, NHEAD)
        src2 = ref_ffn_block(src2, lp)

    out1 = s_t
    for lp in params['ca']:
        out1 = ref_attention_block(out1 + p_t, src2 + p_s, src2, out1, m_s, lp, NHEAD)
        out1 = ref_ffn_block(out1, lp)

    return out1.transpose(0, 2, 1).reshape(B, C, Ht, Wt)


# ---------------------------------------------------------------------------
# Parameter initialization (deterministic, xavier_uniform on matrices).
# ---------------------------------------------------------------------------
def _xavier(key, shape):
    fan_out, fan_in = shape
    limit = math.sqrt(6.0 / (fan_in + fan_out))
    return jax.random.uniform(key, shape, jnp.float32, -limit, limit)


def init_layer_params(key, d_model, dff):
    k0, k1, k2, k3 = jax.random.split(key, 4)
    in_proj = _xavier(k0, (3 * d_model, d_model))
    zeros_d = jnp.zeros((1, d_model), jnp.float32)
    return {
        'wq': in_proj[:d_model], 'wk': in_proj[d_model:2 * d_model], 'wv': in_proj[2 * d_model:],
        'bq': zeros_d, 'bk': zeros_d, 'bv': zeros_d,
        'wo': _xavier(k1, (d_model, d_model)), 'bo': zeros_d,
        'w1': _xavier(k2, (dff, d_model)), 'b1': jnp.zeros((1, dff), jnp.float32),
        'w2': _xavier(k3, (d_model, dff)), 'b2': zeros_d,
        'ln_attn_g': jnp.ones((1, d_model), jnp.float32), 'ln_attn_b': zeros_d,
        'ln_ffn_g': jnp.ones((1, d_model), jnp.float32), 'ln_ffn_b': zeros_d,
    }


def init_params(key, d_model, dff, num_layers):
    keys = jax.random.split(key, 2 * num_layers)
    return {
        'sa': [init_layer_params(keys[i], d_model, dff) for i in range(num_layers)],
        'ca': [init_layer_params(keys[num_layers + i], d_model, dff) for i in range(num_layers)],
    }


# ---------------------------------------------------------------------------
if __name__ == "__main__":
    key = jax.random.PRNGKey(0)
    kp, k1, k2, k3, k4 = jax.random.split(key, 5)

    B, C = 2, D_MODEL
    Ht = Wt = 4      # template 4x4  -> S1 = 16
    Hs = Ws = 8      # search   8x8  -> S2 = 64

    params = init_params(kp, D_MODEL, DIM_FF, NUM_LAYERS)

    src_temp = jax.random.normal(k1, (B, C, Ht, Wt), jnp.float32)
    pos_temp = jax.random.normal(k2, (B, C, Ht, Wt), jnp.float32)
    src_search = jax.random.normal(k3, (B, C, Hs, Ws), jnp.float32)
    pos_search = jax.random.normal(k4, (B, C, Hs, Ws), jnp.float32)
    mask_temp = jnp.zeros((B, Ht, Wt), jnp.bool_)      # no padding
    mask_search = jnp.zeros((B, Hs, Ws), jnp.bool_)    # no padding

    out = pallas_forward(params, src_temp, mask_temp, src_search, mask_search,
                         pos_temp, pos_search)
    out = jax.block_until_ready(out)

    ref = reference_forward(params, src_temp, mask_temp, src_search, mask_search,
                            pos_temp, pos_search)
    ref = jax.block_until_ready(ref)

    assert out.shape == (B, C, Ht, Wt), out.shape
    assert bool(jnp.all(jnp.isfinite(out)))
    err = float(jnp.max(jnp.abs(out - ref)))
    assert err < 1e-2, err

    print("KERNEL_OK")
</pallas_src>

<mosaic_0001>
module attributes {stable_mosaic.version = 11 : i64} {
  func.func @fused_fusion_kernel(%arg0: i32, %arg1: memref<1x16x32xf32, #tpu.memory_space<vmem>>, %arg2: memref<1x16x32xf32, #tpu.memory_space<vmem>>, %arg3: memref<1x64x32xf32, #tpu.memory_space<vmem>>, %arg4: memref<1x64x32xf32, #tpu.memory_space<vmem>>, %arg5: memref<1x1x64xf32, #tpu.memory_space<vmem>>, %arg6: memref<4x32x64xf32, #tpu.memory_space<vmem>>, %arg7: memref<4x1x64xf32, #tpu.memory_space<vmem>>, %arg8: memref<4x32x32xf32, #tpu.memory_space<vmem>>, %arg9: memref<4x1x32xf32, #tpu.memory_space<vmem>>, %arg10: memref<4x32x32xf32, #tpu.memory_space<vmem>>, %arg11: memref<4x1x32xf32, #tpu.memory_space<vmem>>, %arg12: memref<4x32x64xf32, #tpu.memory_space<vmem>>, %arg13: memref<4x1x64xf32, #tpu.memory_space<vmem>>, %arg14: memref<4x64x32xf32, #tpu.memory_space<vmem>>, %arg15: memref<4x1x32xf32, #tpu.memory_space<vmem>>, %arg16: memref<4x1x32xf32, #tpu.memory_space<vmem>>, %arg17: memref<4x1x32xf32, #tpu.memory_space<vmem>>, %arg18: memref<4x1x32xf32, #tpu.memory_space<vmem>>, %arg19: memref<4x1x32xf32, #tpu.memory_space<vmem>>, %arg20: memref<1x16x32xf32, #tpu.memory_space<vmem>>) attributes {dimension_semantics = [#tpu.dimension_semantics<parallel>], iteration_bounds = array<i64: 2>, scalar_prefetch = 0 : i64, scratch_operands = 0 : i64, tpu.core_type = #tpu.core_type<tc>, window_params = [{transform_indices = @transform_0, window_bounds = array<i64: 1, 16, 32>}, {transform_indices = @transform_1, window_bounds = array<i64: 1, 16, 32>}, {transform_indices = @transform_2, window_bounds = array<i64: 1, 64, 32>}, {transform_indices = @transform_3, window_bounds = array<i64: 1, 64, 32>}, {transform_indices = @transform_4, window_bounds = array<i64: 1, 1, 64>}, {pipeline_mode = #tpu.pipeline_mode<synchronous>, transform_indices = @transform_5, window_bounds = array<i64: 4, 32, 64>}, {pipeline_mode = #tpu.pipeline_mode<synchronous>, transform_indices = @transform_6, window_bounds = array<i64: 4, 1, 64>}, {pipeline_mode = #tpu.pipeline_mode<synchronous>, transform_indices = @transform_7, window_bounds = array<i64: 4, 32, 32>}, {pipeline_mode = #tpu.pipeline_mode<synchronous>, transform_indices = @transform_8, window_bounds = array<i64: 4, 1, 32>}, {pipeline_mode = #tpu.pipeline_mode<synchronous>, transform_indices = @transform_9, window_bounds = array<i64: 4, 32, 32>}, {pipeline_mode = #tpu.pipeline_mode<synchronous>, transform_indices = @transform_10, window_bounds = array<i64: 4, 1, 32>}, {pipeline_mode = #tpu.pipeline_mode<synchronous>, transform_indices = @transform_11, window_bounds = array<i64: 4, 32, 64>}, {pipeline_mode = #tpu.pipeline_mode<synchronous>, transform_indices = @transform_12, window_bounds = array<i64: 4, 1, 64>}, {pipeline_mode = #tpu.pipeline_mode<synchronous>, transform_indices = @transform_13, window_bounds = array<i64: 4, 64, 32>}, {pipeline_mode = #tpu.pipeline_mode<synchronous>, transform_indices = @transform_14, window_bounds = array<i64: 4, 1, 32>}, {pipeline_mode = #tpu.pipeline_mode<synchronous>, transform_indices = @transform_15, window_bounds = array<i64: 4, 1, 32>}, {pipeline_mode = #tpu.pipeline_mode<synchronous>, transform_indices = @transform_16, window_bounds = array<i64: 4, 1, 32>}, {pipeline_mode = #tpu.pipeline_mode<synchronous>, transform_indices = @transform_17, window_bounds = array<i64: 4, 1, 32>}, {pipeline_mode = #tpu.pipeline_mode<synchronous>, transform_indices = @transform_18, window_bounds = array<i64: 4, 1, 32>}, {transform_indices = @transform_19, window_bounds = array<i64: 1, 16, 32>}]} {
    %c0 = arith.constant 0 : index
    %c0_0 = arith.constant 0 : index
    %c0_1 = arith.constant 0 : index
    %0 = vector.load %arg5[%c0, %c0_0, %c0_1] : memref<1x1x64xf32, #tpu.memory_space<vmem>>, vector<1x1x64xf32>
    %1 = vector.shape_cast %0 : vector<1x1x64xf32> to vector<1x64xf32>
    %c0_2 = arith.constant 0 : index
    %c0_3 = arith.constant 0 : index
    %c0_4 = arith.constant 0 : index
    %2 = vector.load %arg3[%c0_2, %c0_3, %c0_4] : memref<1x64x32xf32, #tpu.memory_space<vmem>>, vector<1x64x32xf32>
    %3 = vector.shape_cast %2 : vector<1x64x32xf32> to vector<64x32xf32>
    %c0_5 = arith.constant 0 : index
    %c0_6 = arith.constant 0 : index
    %c0_7 = arith.constant 0 : index
    %4 = vector.load %arg4[%c0_5, %c0_6, %c0_7] : memref<1x64x32xf32, #tpu.memory_space<vmem>>, vector<1x64x32xf32>
    %5 = vector.shape_cast %4 : vector<1x64x32xf32> to vector<64x32xf32>
    %6 = arith.addf %3, %5 : vector<64x32xf32>
    %c0_8 = arith.constant 0 : index
    %c0_9 = arith.constant 0 : index
    %c0_10 = arith.constant 0 : index
    %7 = vector.load %arg6[%c0_8, %c0_9, %c0_10] : memref<4x32x64xf32, #tpu.memory_space<vmem>>, vector<1x32x64xf32>
    %8 = vector.shape_cast %7 : vector<1x32x64xf32> to vector<32x64xf32>
    %c0_11 = arith.constant 0 : index
    %c0_12 = arith.constant 0 : index
    %c0_13 = arith.constant 0 : index
    %9 = vector.load %arg7[%c0_11, %c0_12, %c0_13] : memref<4x1x64xf32, #tpu.memory_space<vmem>>, vector<1x1x64xf32>
    %10 = vector.shape_cast %9 : vector<1x1x64xf32> to vector<1x64xf32>
    %cst = arith.constant dense<0.000000e+00> : vector<64x64xf32>
    %11 = tpu.matmul %6, %8, %cst {dimension_numbers = #tpu.dot_dimension_numbers<[1], [0], [0], [1], [0, 0, 1, 1], [], []>} : vector<64x32xf32>, vector<32x64xf32>, vector<64x64xf32> -> vector<64x64xf32>
    %12 = vector.broadcast %10 : vector<1x64xf32> to vector<64x64xf32>
    %13 = arith.addf %11, %12 : vector<64x64xf32>
    %14 = vector.extract_strided_slice %13 {offsets = [0, 0], sizes = [64, 32], strides = [1, 1]} : vector<64x64xf32> to vector<64x32xf32>
    %15 = vector.extract_strided_slice %13 {offsets = [0, 32], sizes = [64, 32], strides = [1, 1]} : vector<64x64xf32> to vector<64x32xf32>
    %c0_14 = arith.constant 0 : index
    %c0_15 = arith.constant 0 : index
    %c0_16 = arith.constant 0 : index
    %16 = vector.load %arg8[%c0_14, %c0_15, %c0_16] : memref<4x32x32xf32, #tpu.memory_space<vmem>>, vector<1x32x32xf32>
    %17 = vector.shape_cast %16 : vector<1x32x32xf32> to vector<32x32xf32>
    %cst_17 = arith.constant dense<0.000000e+00> : vector<64x32xf32>
    %18 = tpu.matmul %3, %17, %cst_17 {dimension_numbers = #tpu.dot_dimension_numbers<[1], [0], [0], [1], [0, 0, 1, 1], [], []>} : vector<64x32xf32>, vector<32x32xf32>, vector<64x32xf32> -> vector<64x32xf32>
    %c0_18 = arith.constant 0 : index
    %c0_19 = arith.constant 0 : index
    %c0_20 = arith.constant 0 : index
    %19 = vector.load %arg9[%c0_18, %c0_19, %c0_20] : memref<4x1x32xf32, #tpu.memory_space<vmem>>, vector<1x1x32xf32>
    %20 = vector.shape_cast %19 : vector<1x1x32xf32> to vector<1x32xf32>
    %21 = vector.broadcast %20 : vector<1x32xf32> to vector<64x32xf32>
    %22 = arith.addf %18, %21 : vector<64x32xf32>
    %c0_21 = arith.constant 0 : index
    %c0_22 = arith.constant 0 : index
    %c0_23 = arith.constant 0 : index
    %23 = vector.load %arg10[%c0_21, %c0_22, %c0_23] : memref<4x32x32xf32, #tpu.memory_space<vmem>>, vector<1x32x32xf32>
    %24 = vector.shape_cast %23 : vector<1x32x32xf32> to vector<32x32xf32>
    %cst_24 = arith.constant 0.000000e+00 : f32
    %25 = vector.broadcast %cst_24 : f32 to vector<64x32xf32>
    %26 = vector.extract_strided_slice %14 {offsets = [0, 0], sizes = [64, 8], strides = [1, 1]} : vector<64x32xf32> to vector<64x8xf32>
    %27 = vector.extract_strided_slice %15 {offsets = [0, 0], sizes = [64, 8], strides = [1, 1]} : vector<64x32xf32> to vector<64x8xf32>
    %28 = tpu.transpose %27, [1, 0] : vector<64x8xf32> -> vector<8x64xf32>
    %cst_25 = arith.constant dense<0.000000e+00> : vector<64x64xf32>
    %29 = tpu.matmul %26, %28, %cst_25 {dimension_numbers = #tpu.dot_dimension_numbers<[1], [0], [0], [1], [0, 0, 1, 1], [], []>} : vector<64x8xf32>, vector<8x64xf32>, vector<64x64xf32> -> vector<64x64xf32>
    %30 = vector.broadcast %1 : vector<1x64xf32> to vector<64x64xf32>
    %31 = arith.addf %29, %30 : vector<64x64xf32>
    %cst_26 = arith.constant dense<0xFF800000> : vector<64xf32>
    %32 = vector.multi_reduction <maximumf>, %31, %cst_26 [1] : vector<64x64xf32> to vector<64xf32>
    %33 = vector.shape_cast %32 : vector<64xf32> to vector<64x1xf32>
    %34 = vector.broadcast %33 : vector<64x1xf32> to vector<64x64xf32>
    %35 = arith.subf %31, %34 : vector<64x64xf32>
    %36 = math.exp %35 : vector<64x64xf32>
    %cst_27 = arith.constant dense<0.000000e+00> : vector<64xf32>
    %37 = vector.multi_reduction <add>, %36, %cst_27 [1] : vector<64x64xf32> to vector<64xf32>
    %38 = vector.shape_cast %37 : vector<64xf32> to vector<64x1xf32>
    %39 = tpu.reciprocal %38 {approx = true} : vector<64x1xf32> -> vector<64x1xf32>
    %40 = vector.broadcast %39 : vector<64x1xf32> to vector<64x64xf32>
    %41 = arith.mulf %36, %40 : vector<64x64xf32>
    %42 = vector.extract_strided_slice %22 {offsets = [0, 0], sizes = [64, 8], strides = [1, 1]} : vector<64x32xf32> to vector<64x8xf32>
    %cst_28 = arith.constant dense<0.000000e+00> : vector<64x8xf32>
    %43 = tpu.matmul %41, %42, %cst_28 {dimension_numbers = #tpu.dot_dimension_numbers<[1], [0], [0], [1], [0, 0, 1, 1], [], []>} : vector<64x64xf32>, vector<64x8xf32>, vector<64x8xf32> -> vector<64x8xf32>
    %44 = vector.extract_strided_slice %24 {offsets = [0, 0], sizes = [8, 32], strides = [1, 1]} : vector<32x32xf32> to vector<8x32xf32>
    %cst_29 = arith.constant dense<0.000000e+00> : vector<64x32xf32>
    %45 = tpu.matmul %43, %44, %cst_29 {dimension_numbers = #tpu.dot_dimension_numbers<[1], [0], [0], [1], [0, 0, 1, 1], [], []>} : vector<64x8xf32>, vector<8x32xf32>, vector<64x32xf32> -> vector<64x32xf32>
    %46 = arith.addf %25, %45 : vector<64x32xf32>
    %47 = vector.extract_strided_slice %14 {offsets = [0, 8], sizes = [64, 8], strides = [1, 1]} : vector<64x32xf32> to vector<64x8xf32>
    %48 = vector.extract_strided_slice %15 {offsets = [0, 8], sizes = [64, 8], strides = [1, 1]} : vector<64x32xf32> to vector<64x8xf32>
    %49 = tpu.transpose %48, [1, 0] : vector<64x8xf32> -> vector<8x64xf32>
    %cst_30 = arith.constant dense<0.000000e+00> : vector<64x64xf32>
    %50 = tpu.matmul %47, %49, %cst_30 {dimension_numbers = #tpu.dot_dimension_numbers<[1], [0], [0], [1], [0, 0, 1, 1], [], []>} : vector<64x8xf32>, vector<8x64xf32>, vector<64x64xf32> -> vector<64x64xf32>
    %51 = vector.broadcast %1 : vector<1x64xf32> to vector<64x64xf32>
    %52 = arith.addf %50, %51 : vector<64x64xf32>
    %cst_31 = arith.constant dense<0xFF800000> : vector<64xf32>
    %53 = vector.multi_reduction <maximumf>, %52, %cst_31 [1] : vector<64x64xf32> to vector<64xf32>
    %54 = vector.shape_cast %53 : vector<64xf32> to vector<64x1xf32>
    %55 = vector.broadcast %54 : vector<64x1xf32> to vector<64x64xf32>
    %56 = arith.subf %52, %55 : vector<64x64xf32>
    %57 = math.exp %56 : vector<64x64xf32>
    %cst_32 = arith.constant dense<0.000000e+00> : vector<64xf32>
    %58 = vector.multi_reduction <add>, %57, %cst_32 [1] : vector<64x64xf32> to vector<64xf32>
    %59 = vector.shape_cast %58 : vector<64xf32> to vector<64x1xf32>
    %60 = tpu.reciprocal %59 {approx = true} : vector<64x1xf32> -> vector<64x1xf32>
    %61 = vector.broadcast %60 : vector<64x1xf32> to vector<64x64xf32>
    %62 = arith.mulf %57, %61 : vector<64x64xf32>
    %63 = vector.extract_strided_slice %22 {offsets = [0, 8], sizes = [64, 8], strides = [1, 1]} : vector<64x32xf32> to vector<64x8xf32>
    %cst_33 = arith.constant dense<0.000000e+00> : vector<64x8xf32>
    %64 = tpu.matmul %62, %63, %cst_33 {dimension_numbers = #tpu.dot_dimension_numbers<[1], [0], [0], [1], [0, 0, 1, 1], [], []>} : vector<64x64xf32>, vector<64x8xf32>, vector<64x8xf32> -> vector<64x8xf32>
    %65 = vector.extract_strided_slice %24 {offsets = [8, 0], sizes = [8, 32], strides = [1, 1]} : vector<32x32xf32> to vector<8x32xf32>
    %cst_34 = arith.constant dense<0.000000e+00> : vector<64x32xf32>
    %66 = tpu.matmul %64, %65, %cst_34 {dimension_numbers = #tpu.dot_dimension_numbers<[1], [0], [0], [1], [0, 0, 1, 1], [], []>} : vector<64x8xf32>, vector<8x32xf32>, vector<64x32xf32> -> vector<64x32xf32>
    %67 = arith.addf %46, %66 : vector<64x32xf32>
    %68 = vector.extract_strided_slice %14 {offsets = [0, 16], sizes = [64, 8], strides = [1, 1]} : vector<64x32xf32> to vector<64x8xf32>
    %69 = vector.extract_strided_slice %15 {offsets = [0, 16], sizes = [64, 8], strides = [1, 1]} : vector<64x32xf32> to vector<64x8xf32>
    %70 = tpu.transpose %69, [1, 0] : vector<64x8xf32> -> vector<8x64xf32>
    %cst_35 = arith.constant dense<0.000000e+00> : vector<64x64xf32>
    %71 = tpu.matmul %68, %70, %cst_35 {dimension_numbers = #tpu.dot_dimension_numbers<[1], [0], [0], [1], [0, 0, 1, 1], [], []>} : vector<64x8xf32>, vector<8x64xf32>, vector<64x64xf32> -> vector<64x64xf32>
    %72 = vector.broadcast %1 : vector<1x64xf32> to vector<64x64xf32>
    %73 = arith.addf %71, %72 : vector<64x64xf32>
    %cst_36 = arith.constant dense<0xFF800000> : vector<64xf32>
    %74 = vector.multi_reduction <maximumf>, %73, %cst_36 [1] : vector<64x64xf32> to vector<64xf32>
    %75 = vector.shape_cast %74 : vector<64xf32> to vector<64x1xf32>
    %76 = vector.broadcast %75 : vector<64x1xf32> to vector<64x64xf32>
    %77 = arith.subf %73, %76 : vector<64x64xf32>
    %78 = math.exp %77 : vector<64x64xf32>
    %cst_37 = arith.constant dense<0.000000e+00> : vector<64xf32>
    %79 = vector.multi_reduction <add>, %78, %cst_37 [1] : vector<64x64xf32> to vector<64xf32>
    %80 = vector.shape_cast %79 : vector<64xf32> to vector<64x1xf32>
    %81 = tpu.reciprocal %80 {approx = true} : vector<64x1xf32> -> vector<64x1xf32>
    %82 = vector.broadcast %81 : vector<64x1xf32> to vector<64x64xf32>
    %83 = arith.mulf %78, %82 : vector<64x64xf32>
    %84 = vector.extract_strided_slice %22 {offsets = [0, 16], sizes = [64, 8], strides = [1, 1]} : vector<64x32xf32> to vector<64x8xf32>
    %cst_38 = arith.constant dense<0.000000e+00> : vector<64x8xf32>
    %85 = tpu.matmul %83, %84, %cst_38 {dimension_numbers = #tpu.dot_dimension_numbers<[1], [0], [0], [1], [0, 0, 1, 1], [], []>} : vector<64x64xf32>, vector<64x8xf32>, vector<64x8xf32> -> vector<64x8xf32>
    %86 = vector.extract_strided_slice %24 {offsets = [16, 0], sizes = [8, 32], strides = [1, 1]} : vector<32x32xf32> to vector<8x32xf32>
    %cst_39 = arith.constant dense<0.000000e+00> : vector<64x32xf32>
    %87 = tpu.matmul %85, %86, %cst_39 {dimension_numbers = #tpu.dot_dimension_numbers<[1], [0], [0], [1], [0, 0, 1, 1], [], []>} : vector<64x8xf32>, vector<8x32xf32>, vector<64x32xf32> -> vector<64x32xf32>
    %88 = arith.addf %67, %87 : vector<64x32xf32>
    %89 = vector.extract_strided_slice %14 {offsets = [0, 24], sizes = [64, 8], strides = [1, 1]} : vector<64x32xf32> to vector<64x8xf32>
    %90 = vector.extract_strided_slice %15 {offsets = [0, 24], sizes = [64, 8], strides = [1, 1]} : vector<64x32xf32> to vector<64x8xf32>
    %91 = tpu.transpose %90, [1, 0] : vector<64x8xf32> -> vector<8x64xf32>
    %cst_40 = arith.constant dense<0.000000e+00> : vector<64x64xf32>
    %92 = tpu.matmul %89, %91, %cst_40 {dimension_numbers = #tpu.dot_dimension_numbers<[1], [0], [0], [1], [0, 0, 1, 1], [], []>} : vector<64x8xf32>, vector<8x64xf32>, vector<64x64xf32> -> vector<64x64xf32>
    %93 = vector.broadcast %1 : vector<1x64xf32> to vector<64x64xf32>
    %94 = arith.addf %92, %93 : vector<64x64xf32>
    %cst_41 = arith.constant dense<0xFF800000> : vector<64xf32>
    %95 = vector.multi_reduction <maximumf>, %94, %cst_41 [1] : vector<64x64xf32> to vector<64xf32>
    %96 = vector.shape_cast %95 : vector<64xf32> to vector<64x1xf32>
    %97 = vector.broadcast %96 : vector<64x1xf32> to vector<64x64xf32>
    %98 = arith.subf %94, %97 : vector<64x64xf32>
    %99 = math.exp %98 : vector<64x64xf32>
    %cst_42 = arith.constant dense<0.000000e+00> : vector<64xf32>
    %100 = vector.multi_reduction <add>, %99, %cst_42 [1] : vector<64x64xf32> to vector<64xf32>
    %101 = vector.shape_cast %100 : vector<64xf32> to vector<64x1xf32>
    %102 = tpu.reciprocal %101 {approx = true} : vector<64x1xf32> -> vector<64x1xf32>
    %103 = vector.broadcast %102 : vector<64x1xf32> to vector<64x64xf32>
    %104 = arith.mulf %99, %103 : vector<64x64xf32>
    %105 = vector.extract_strided_slice %22 {offsets = [0, 24], sizes = [64, 8], strides = [1, 1]} : vector<64x32xf32> to vector<64x8xf32>
    %cst_43 = arith.constant dense<0.000000e+00> : vector<64x8xf32>
    %106 = tpu.matmul %104, %105, %cst_43 {dimension_numbers = #tpu.dot_dimension_numbers<[1], [0], [0], [1], [0, 0, 1, 1], [], []>} : vector<64x64xf32>, vector<64x8xf32>, vector<64x8xf32> -> vector<64x8xf32>
    %107 = vector.extract_strided_slice %24 {offsets = [24, 0], sizes = [8, 32], strides = [1, 1]} : vector<32x32xf32> to vector<8x32xf32>
    %cst_44 = arith.constant dense<0.000000e+00> : vector<64x32xf32>
    %108 = tpu.matmul %106, %107, %cst_44 {dimension_numbers = #tpu.dot_dimension_numbers<[1], [0], [0], [1], [0, 0, 1, 1], [], []>} : vector<64x8xf32>, vector<8x32xf32>, vector<64x32xf32> -> vector<64x32xf32>
    %109 = arith.addf %88, %108 : vector<64x32xf32>
    %110 = arith.addf %3, %109 : vector<64x32xf32>
    %c0_45 = arith.constant 0 : index
    %c0_46 = arith.constant 0 : index
    %c0_47 = arith.constant 0 : index
    %111 = vector.load %arg11[%c0_45, %c0_46, %c0_47] : memref<4x1x32xf32, #tpu.memory_space<vmem>>, vector<1x1x32xf32>
    %112 = vector.shape_cast %111 : vector<1x1x32xf32> to vector<1x32xf32>
    %113 = vector.broadcast %112 : vector<1x32xf32> to vector<64x32xf32>
    %114 = arith.addf %110, %113 : vector<64x32xf32>
    %c0_48 = arith.constant 0 : index
    %c0_49 = arith.constant 0 : index
    %c0_50 = arith.constant 0 : index
    %115 = vector.load %arg16[%c0_48, %c0_49, %c0_50] : memref<4x1x32xf32, #tpu.memory_space<vmem>>, vector<1x1x32xf32>
    %116 = vector.shape_cast %115 : vector<1x1x32xf32> to vector<1x32xf32>
    %c0_51 = arith.constant 0 : index
    %c0_52 = arith.constant 0 : index
    %c0_53 = arith.constant 0 : index
    %117 = vector.load %arg17[%c0_51, %c0_52, %c0_53] : memref<4x1x32xf32, #tpu.memory_space<vmem>>, vector<1x1x32xf32>
    %118 = vector.shape_cast %117 : vector<1x1x32xf32> to vector<1x32xf32>
    %cst_54 = arith.constant dense<0.000000e+00> : vector<64xf32>
    %119 = vector.multi_reduction <add>, %114, %cst_54 [1] : vector<64x32xf32> to vector<64xf32>
    %120 = vector.shape_cast %119 : vector<64xf32> to vector<64x1xf32>
    %cst_55 = arith.constant 3.200000e+01 : f32
    %121 = vector.broadcast %cst_55 : f32 to vector<64x1xf32>
    %122 = arith.divf %120, %121 : vector<64x1xf32>
    %123 = vector.broadcast %122 : vector<64x1xf32> to vector<64x32xf32>
    %124 = arith.subf %114, %123 : vector<64x32xf32>
    %125 = arith.mulf %124, %124 : vector<64x32xf32>
    %cst_56 = arith.constant dense<0.000000e+00> : vector<64xf32>
    %126 = vector.multi_reduction <add>, %125, %cst_56 [1] : vector<64x32xf32> to vector<64xf32>
    %127 = vector.shape_cast %126 : vector<64xf32> to vector<64x1xf32>
    %cst_57 = arith.constant 3.200000e+01 : f32
    %128 = vector.broadcast %cst_57 : f32 to vector<64x1xf32>
    %129 = arith.divf %127, %128 : vector<64x1xf32>
    %130 = vector.broadcast %122 : vector<64x1xf32> to vector<64x32xf32>
    %131 = arith.subf %114, %130 : vector<64x32xf32>
    %cst_58 = arith.constant 9.99999974E-6 : f32
    %132 = vector.broadcast %cst_58 : f32 to vector<64x1xf32>
    %133 = arith.addf %129, %132 : vector<64x1xf32>
    %134 = math.rsqrt %133 : vector<64x1xf32>
    %135 = vector.broadcast %134 : vector<64x1xf32> to vector<64x32xf32>
    %136 = arith.mulf %131, %135 : vector<64x32xf32>
    %137 = vector.broadcast %116 : vector<1x32xf32> to vector<64x32xf32>
    %138 = arith.mulf %136, %137 : vector<64x32xf32>
    %139 = vector.broadcast %118 : vector<1x32xf32> to vector<64x32xf32>
    %140 = arith.addf %138, %139 : vector<64x32xf32>
    %c0_59 = arith.constant 0 : index
    %c0_60 = arith.constant 0 : index
    %c0_61 = arith.constant 0 : index
    %141 = vector.load %arg12[%c0_59, %c0_60, %c0_61] : memref<4x32x64xf32, #tpu.memory_space<vmem>>, vector<1x32x64xf32>
    %142 = vector.shape_cast %141 : vector<1x32x64xf32> to vector<32x64xf32>
    %cst_62 = arith.constant dense<0.000000e+00> : vector<64x64xf32>
    %143 = tpu.matmul %140, %142, %cst_62 {dimension_numbers = #tpu.dot_dimension_numbers<[1], [0], [0], [1], [0, 0, 1, 1], [], []>} : vector<64x32xf32>, vector<32x64xf32>, vector<64x64xf32> -> vector<64x64xf32>
    %c0_63 = arith.constant 0 : index
    %c0_64 = arith.constant 0 : index
    %c0_65 = arith.constant 0 : index
    %144 = vector.load %arg13[%c0_63, %c0_64, %c0_65] : memref<4x1x64xf32, #tpu.memory_space<vmem>>, vector<1x1x64xf32>
    %145 = vector.shape_cast %144 : vector<1x1x64xf32> to vector<1x64xf32>
    %146 = vector.broadcast %145 : vector<1x64xf32> to vector<64x64xf32>
    %147 = arith.addf %143, %146 : vector<64x64xf32>
    %cst_66 = arith.constant 0.000000e+00 : f32
    %148 = vector.broadcast %cst_66 : f32 to vector<64x64xf32>
    %149 = arith.maximumf %147, %148 : vector<64x64xf32>
    %c0_67 = arith.constant 0 : index
    %c0_68 = arith.constant 0 : index
    %c0_69 = arith.constant 0 : index
    %150 = vector.load %arg14[%c0_67, %c0_68, %c0_69] : memref<4x64x32xf32, #tpu.memory_space<vmem>>, vector<1x64x32xf32>
    %151 = vector.shape_cast %150 : vector<1x64x32xf32> to vector<64x32xf32>
    %cst_70 = arith.constant dense<0.000000e+00> : vector<64x32xf32>
    %152 = tpu.matmul %149, %151, %cst_70 {dimension_numbers = #tpu.dot_dimension_numbers<[1], [0], [0], [1], [0, 0, 1, 1], [], []>} : vector<64x64xf32>, vector<64x32xf32>, vector<64x32xf32> -> vector<64x32xf32>
    %c0_71 = arith.constant 0 : index
    %c0_72 = arith.constant 0 : index
    %c0_73 = arith.constant 0 : index
    %153 = vector.load %arg15[%c0_71, %c0_72, %c0_73] : memref<4x1x32xf32, #tpu.memory_space<vmem>>, vector<1x1x32xf32>
    %154 = vector.shape_cast %153 : vector<1x1x32xf32> to vector<1x32xf32>
    %155 = vector.broadcast %154 : vector<1x32xf32> to vector<64x32xf32>
    %156 = arith.addf %152, %155 : vector<64x32xf32>
    %157 = arith.addf %140, %156 : vector<64x32xf32>
    %c0_74 = arith.constant 0 : index
    %c0_75 = arith.constant 0 : index
    %c0_76 = arith.constant 0 : index
    %158 = vector.load %arg18[%c0_74, %c0_75, %c0_76] : memref<4x1x32xf32, #tpu.memory_space<vmem>>, vector<1x1x32xf32>
    %159 = vector.shape_cast %158 : vector<1x1x32xf32> to vector<1x32xf32>
    %c0_77 = arith.constant 0 : index
    %c0_78 = arith.constant 0 : index
    %c0_79 = arith.constant 0 : index
    %160 = vector.load %arg19[%c0_77, %c0_78, %c0_79] : memref<4x1x32xf32, #tpu.memory_space<vmem>>, vector<1x1x32xf32>
    %161 = vector.shape_cast %160 : vector<1x1x32xf32> to vector<1x32xf32>
    %cst_80 = arith.constant dense<0.000000e+00> : vector<64xf32>
    %162 = vector.multi_reduction <add>, %157, %cst_80 [1] : vector<64x32xf32> to vector<64xf32>
    %163 = vector.shape_cast %162 : vector<64xf32> to vector<64x1xf32>
    %cst_81 = arith.constant 3.200000e+01 : f32
    %164 = vector.broadcast %cst_81 : f32 to vector<64x1xf32>
    %165 = arith.divf %163, %164 : vector<64x1xf32>
    %166 = vector.broadcast %165 : vector<64x1xf32> to vector<64x32xf32>
    %167 = arith.subf %157, %166 : vector<64x32xf32>
    %168 = arith.mulf %167, %167 : vector<64x32xf32>
    %cst_82 = arith.constant dense<0.000000e+00> : vector<64xf32>
    %169 = vector.multi_reduction <add>, %168, %cst_82 [1] : vector<64x32xf32> to vector<64xf32>
    %170 = vector.shape_cast %169 : vector<64xf32> to vector<64x1xf32>
    %cst_83 = arith.constant 3.200000e+01 : f32
    %171 = vector.broadcast %cst_83 : f32 to vector<64x1xf32>
    %172 = arith.divf %170, %171 : vector<64x1xf32>
    %173 = vector.broadcast %165 : vector<64x1xf32> to vector<64x32xf32>
    %174 = arith.subf %157, %173 : vector<64x32xf32>
    %cst_84 = arith.constant 9.99999974E-6 : f32
    %175 = vector.broadcast %cst_84 : f32 to vector<64x1xf32>
    %176 = arith.addf %172, %175 : vector<64x1xf32>
    %177 = math.rsqrt %176 : vector<64x1xf32>
    %178 = vector.broadcast %177 : vector<64x1xf32> to vector<64x32xf32>
    %179 = arith.mulf %174, %178 : vector<64x32xf32>
    %180 = vector.broadcast %159 : vector<1x32xf32> to vector<64x32xf32>
    %181 = arith.mulf %179, %180 : vector<64x32xf32>
    %182 = vector.broadcast %161 : vector<1x32xf32> to vector<64x32xf32>
    %183 = arith.addf %181, %182 : vector<64x32xf32>
    %184 = arith.addf %183, %5 : vector<64x32xf32>
    %c1 = arith.constant 1 : index
    %c0_85 = arith.constant 0 : index
    %c0_86 = arith.constant 0 : index
    %185 = vector.load %arg6[%c1, %c0_85, %c0_86] : memref<4x32x64xf32, #tpu.memory_space<vmem>>, vector<1x32x64xf32>
    %186 = vector.shape_cast %185 : vector<1x32x64xf32> to vector<32x64xf32>
    %c1_87 = arith.constant 1 : index
    %c0_88 = arith.constant 0 : index
    %c0_89 = arith.constant 0 : index
    %187 = vector.load %arg7[%c1_87, %c0_88, %c0_89] : memref<4x1x64xf32, #tpu.memory_space<vmem>>, vector<1x1x64xf32>
    %188 = vector.shape_cast %187 : vector<1x1x64xf32> to vector<1x64xf32>
    %cst_90 = arith.constant dense<0.000000e+00> : vector<64x64xf32>
    %189 = tpu.matmul %184, %186, %cst_90 {dimension_numbers = #tpu.dot_dimension_numbers<[1], [0], [0], [1], [0, 0, 1, 1], [], []>} : vector<64x32xf32>, vector<32x64xf32>, vector<64x64xf32> -> vector<64x64xf32>
    %190 = vector.broadcast %188 : vector<1x64xf32> to vector<64x64xf32>
    %191 = arith.addf %189, %190 : vector<64x64xf32>
    %192 = vector.extract_strided_slice %191 {offsets = [0, 0], sizes = [64, 32], strides = [1, 1]} : vector<64x64xf32> to vector<64x32xf32>
    %193 = vector.extract_strided_slice %191 {offsets = [0, 32], sizes = [64, 32], strides = [1, 1]} : vector<64x64xf32> to vector<64x32xf32>
    %c1_91 = arith.constant 1 : index
    %c0_92 = arith.constant 0 : index
    %c0_93 = arith.constant 0 : index
    %194 = vector.load %arg8[%c1_91, %c0_92, %c0_93] : memref<4x32x32xf32, #tpu.memory_space<vmem>>, vector<1x32x32xf32>
    %195 = vector.shape_cast %194 : vector<1x32x32xf32> to vector<32x32xf32>
    %cst_94 = arith.constant dense<0.000000e+00> : vector<64x32xf32>
    %196 = tpu.matmul %183, %195, %cst_94 {dimension_numbers = #tpu.dot_dimension_numbers<[1], [0], [0], [1], [0, 0, 1, 1], [], []>} : vector<64x32xf32>, vector<32x32xf32>, vector<64x32xf32> -> vector<64x32xf32>
    %c1_95 = arith.constant 1 : index
    %c0_96 = arith.constant 0 : index
    %c0_97 = arith.constant 0 : index
    %197 = vector.load %arg9[%c1_95, %c0_96, %c0_97] : memref<4x1x32xf32, #tpu.memory_space<vmem>>, vector<1x1x32xf32>
    %198 = vector.shape_cast %197 : vector<1x1x32xf32> to vector<1x32xf32>
    %199 = vector.broadcast %198 : vector<1x32xf32> to vector<64x32xf32>
    %200 = arith.addf %196, %199 : vector<64x32xf32>
    %c1_98 = arith.constant 1 : index
    %c0_99 = arith.constant 0 : index
    %c0_100 = arith.constant 0 : index
    %201 = vector.load %arg10[%c1_98, %c0_99, %c0_100] : memref<4x32x32xf32, #tpu.memory_space<vmem>>, vector<1x32x32xf32>
    %202 = vector.shape_cast %201 : vector<1x32x32xf32> to vector<32x32xf32>
    %cst_101 = arith.constant 0.000000e+00 : f32
    %203 = vector.broadcast %cst_101 : f32 to vector<64x32xf32>
    %204 = vector.extract_strided_slice %192 {offsets = [0, 0], sizes = [64, 8], strides = [1, 1]} : vector<64x32xf32> to vector<64x8xf32>
    %205 = vector.extract_strided_slice %193 {offsets = [0, 0], sizes = [64, 8], strides = [1, 1]} : vector<64x32xf32> to vector<64x8xf32>
    %206 = tpu.transpose %205, [1, 0] : vector<64x8xf32> -> vector<8x64xf32>
    %cst_102 = arith.constant dense<0.000000e+00> : vector<64x64xf32>
    %207 = tpu.matmul %204, %206, %cst_102 {dimension_numbers = #tpu.dot_dimension_numbers<[1], [0], [0], [1], [0, 0, 1, 1], [], []>} : vector<64x8xf32>, vector<8x64xf32>, vector<64x64xf32> -> vector<64x64xf32>
    %208 = vector.broadcast %1 : vector<1x64xf32> to vector<64x64xf32>
    %209 = arith.addf %207, %208 : vector<64x64xf32>
    %cst_103 = arith.constant dense<0xFF800000> : vector<64xf32>
    %210 = vector.multi_reduction <maximumf>, %209, %cst_103 [1] : vector<64x64xf32> to vector<64xf32>
    %211 = vector.shape_cast %210 : vector<64xf32> to vector<64x1xf32>
    %212 = vector.broadcast %211 : vector<64x1xf32> to vector<64x64xf32>
    %213 = arith.subf %209, %212 : vector<64x64xf32>
    %214 = math.exp %213 : vector<64x64xf32>
    %cst_104 = arith.constant dense<0.000000e+00> : vector<64xf32>
    %215 = vector.multi_reduction <add>, %214, %cst_104 [1] : vector<64x64xf32> to vector<64xf32>
    %216 = vector.shape_cast %215 : vector<64xf32> to vector<64x1xf32>
    %217 = tpu.reciprocal %216 {approx = true} : vector<64x1xf32> -> vector<64x1xf32>
    %218 = vector.broadcast %217 : vector<64x1xf32> to vector<64x64xf32>
    %219 = arith.mulf %214, %218 : vector<64x64xf32>
    %220 = vector.extract_strided_slice %200 {offsets = [0, 0], sizes = [64, 8], strides = [1, 1]} : vector<64x32xf32> to vector<64x8xf32>
    %cst_105 = arith.constant dense<0.000000e+00> : vector<64x8xf32>
    %221 = tpu.matmul %219, %220, %cst_105 {dimension_numbers = #tpu.dot_dimension_numbers<[1], [0], [0], [1], [0, 0, 1, 1], [], []>} : vector<64x64xf32>, vector<64x8xf32>, vector<64x8xf32> -> vector<64x8xf32>
    %222 = vector.extract_strided_slice %202 {offsets = [0, 0], sizes = [8, 32], strides = [1, 1]} : vector<32x32xf32> to vector<8x32xf32>
    %cst_106 = arith.constant dense<0.000000e+00> : vector<64x32xf32>
    %223 = tpu.matmul %221, %222, %cst_106 {dimension_numbers = #tpu.dot_dimension_numbers<[1], [0], [0], [1], [0, 0, 1, 1], [], []>} : vector<64x8xf32>, vector<8x32xf32>, vector<64x32xf32> -> vector<64x32xf32>
    %224 = arith.addf %203, %223 : vector<64x32xf32>
    %225 = vector.extract_strided_slice %192 {offsets = [0, 8], sizes = [64, 8], strides = [1, 1]} : vector<64x32xf32> to vector<64x8xf32>
    %226 = vector.extract_strided_slice %193 {offsets = [0, 8], sizes = [64, 8], strides = [1, 1]} : vector<64x32xf32> to vector<64x8xf32>
    %227 = tpu.transpose %226, [1, 0] : vector<64x8xf32> -> vector<8x64xf32>
    %cst_107 = arith.constant dense<0.000000e+00> : vector<64x64xf32>
    %228 = tpu.matmul %225, %227, %cst_107 {dimension_numbers = #tpu.dot_dimension_numbers<[1], [0], [0], [1], [0, 0, 1, 1], [], []>} : vector<64x8xf32>, vector<8x64xf32>, vector<64x64xf32> -> vector<64x64xf32>
    %229 = vector.broadcast %1 : vector<1x64xf32> to vector<64x64xf32>
    %230 = arith.addf %228, %229 : vector<64x64xf32>
    %cst_108 = arith.constant dense<0xFF800000> : vector<64xf32>
    %231 = vector.multi_reduction <maximumf>, %230, %cst_108 [1] : vector<64x64xf32> to vector<64xf32>
    %232 = vector.shape_cast %231 : vector<64xf32> to vector<64x1xf32>
    %233 = vector.broadcast %232 : vector<64x1xf32> to vector<64x64xf32>
    %234 = arith.subf %230, %233 : vector<64x64xf32>
    %235 = math.exp %234 : vector<64x64xf32>
    %cst_109 = arith.constant dense<0.000000e+00> : vector<64xf32>
    %236 = vector.multi_reduction <add>, %235, %cst_109 [1] : vector<64x64xf32> to vector<64xf32>
    %237 = vector.shape_cast %236 : vector<64xf32> to vector<64x1xf32>
    %238 = tpu.reciprocal %237 {approx = true} : vector<64x1xf32> -> vector<64x1xf32>
    %239 = vector.broadcast %238 : vector<64x1xf32> to vector<64x64xf32>
    %240 = arith.mulf %235, %239 : vector<64x64xf32>
    %241 = vector.extract_strided_slice %200 {offsets = [0, 8], sizes = [64, 8], strides = [1, 1]} : vector<64x32xf32> to vector<64x8xf32>
    %cst_110 = arith.constant dense<0.000000e+00> : vector<64x8xf32>
    %242 = tpu.matmul %240, %241, %cst_110 {dimension_numbers = #tpu.dot_dimension_numbers<[1], [0], [0], [1], [0, 0, 1, 1], [], []>} : vector<64x64xf32>, vector<64x8xf32>, vector<64x8xf32> -> vector<64x8xf32>
    %243 = vector.extract_strided_slice %202 {offsets = [8, 0], sizes = [8, 32], strides = [1, 1]} : vector<32x32xf32> to vector<8x32xf32>
    %cst_111 = arith.constant dense<0.000000e+00> : vector<64x32xf32>
    %244 = tpu.matmul %242, %243, %cst_111 {dimension_numbers = #tpu.dot_dimension_numbers<[1], [0], [0], [1], [0, 0, 1, 1], [], []>} : vector<64x8xf32>, vector<8x32xf32>, vector<64x32xf32> -> vector<64x32xf32>
    %245 = arith.addf %224, %244 : vector<64x32xf32>
    %246 = vector.extract_strided_slice %192 {offsets = [0, 16], sizes = [64, 8], strides = [1, 1]} : vector<64x32xf32> to vector<64x8xf32>
    %247 = vector.extract_strided_slice %193 {offsets = [0, 16], sizes = [64, 8], strides = [1, 1]} : vector<64x32xf32> to vector<64x8xf32>
    %248 = tpu.transpose %247, [1, 0] : vector<64x8xf32> -> vector<8x64xf32>
    %cst_112 = arith.constant dense<0.000000e+00> : vector<64x64xf32>
    %249 = tpu.matmul %246, %248, %cst_112 {dimension_numbers = #tpu.dot_dimension_numbers<[1], [0], [0], [1], [0, 0, 1, 1], [], []>} : vector<64x8xf32>, vector<8x64xf32>, vector<64x64xf32> -> vector<64x64xf32>
    %250 = vector.broadcast %1 : vector<1x64xf32> to vector<64x64xf32>
    %251 = arith.addf %249, %250 : vector<64x64xf32>
    %cst_113 = arith.constant dense<0xFF800000> : vector<64xf32>
    %252 = vector.multi_reduction <maximumf>, %251, %cst_113 [1] : vector<64x64xf32> to vector<64xf32>
    %253 = vector.shape_cast %252 : vector<64xf32> to vector<64x1xf32>
    %254 = vector.broadcast %253 : vector<64x1xf32> to vector<64x64xf32>
    %255 = arith.subf %251, %254 : vector<64x64xf32>
    %256 = math.exp %255 : vector<64x64xf32>
    %cst_114 = arith.constant dense<0.000000e+00> : vector<64xf32>
    %257 = vector.multi_reduction <add>, %256, %cst_114 [1] : vector<64x64xf32> to vector<64xf32>
    %258 = vector.shape_cast %257 : vector<64xf32> to vector<64x1xf32>
    %259 = tpu.reciprocal %258 {approx = true} : vector<64x1xf32> -> vector<64x1xf32>
    %260 = vector.broadcast %259 : vector<64x1xf32> to vector<64x64xf32>
    %261 = arith.mulf %256, %260 : vector<64x64xf32>
    %262 = vector.extract_strided_slice %200 {offsets = [0, 16], sizes = [64, 8], strides = [1, 1]} : vector<64x32xf32> to vector<64x8xf32>
    %cst_115 = arith.constant dense<0.000000e+00> : vector<64x8xf32>
    %263 = tpu.matmul %261, %262, %cst_115 {dimension_numbers = #tpu.dot_dimension_numbers<[1], [0], [0], [1], [0, 0, 1, 1], [], []>} : vector<64x64xf32>, vector<64x8xf32>, vector<64x8xf32> -> vector<64x8xf32>
    %264 = vector.extract_strided_slice %202 {offsets = [16, 0], sizes = [8, 32], strides = [1, 1]} : vector<32x32xf32> to vector<8x32xf32>
    %cst_116 = arith.constant dense<0.000000e+00> : vector<64x32xf32>
    %265 = tpu.matmul %263, %264, %cst_116 {dimension_numbers = #tpu.dot_dimension_numbers<[1], [0], [0], [1], [0, 0, 1, 1], [], []>} : vector<64x8xf32>, vector<8x32xf32>, vector<64x32xf32> -> vector<64x32xf32>
    %266 = arith.addf %245, %265 : vector<64x32xf32>
    %267 = vector.extract_strided_slice %192 {offsets = [0, 24], sizes = [64, 8], strides = [1, 1]} : vector<64x32xf32> to vector<64x8xf32>
    %268 = vector.extract_strided_slice %193 {offsets = [0, 24], sizes = [64, 8], strides = [1, 1]} : vector<64x32xf32> to vector<64x8xf32>
    %269 = tpu.transpose %268, [1, 0] : vector<64x8xf32> -> vector<8x64xf32>
    %cst_117 = arith.constant dense<0.000000e+00> : vector<64x64xf32>
    %270 = tpu.matmul %267, %269, %cst_117 {dimension_numbers = #tpu.dot_dimension_numbers<[1], [0], [0], [1], [0, 0, 1, 1], [], []>} : vector<64x8xf32>, vector<8x64xf32>, vector<64x64xf32> -> vector<64x64xf32>
    %271 = vector.broadcast %1 : vector<1x64xf32> to vector<64x64xf32>
    %272 = arith.addf %270, %271 : vector<64x64xf32>
    %cst_118 = arith.constant dense<0xFF800000> : vector<64xf32>
    %273 = vector.multi_reduction <maximumf>, %272, %cst_118 [1] : vector<64x64xf32> to vector<64xf32>
    %274 = vector.shape_cast %273 : vector<64xf32> to vector<64x1xf32>
    %275 = vector.broadcast %274 : vector<64x1xf32> to vector<64x64xf32>
    %276 = arith.subf %272, %275 : vector<64x64xf32>
    %277 = math.exp %276 : vector<64x64xf32>
    %cst_119 = arith.constant dense<0.000000e+00> : vector<64xf32>
    %278 = vector.multi_reduction <add>, %277, %cst_119 [1] : vector<64x64xf32> to vector<64xf32>
    %279 = vector.shape_cast %278 : vector<64xf32> to vector<64x1xf32>
    %280 = tpu.reciprocal %279 {approx = true} : vector<64x1xf32> -> vector<64x1xf32>
    %281 = vector.broadcast %280 : vector<64x1xf32> to vector<64x64xf32>
    %282 = arith.mulf %277, %281 : vector<64x64xf32>
    %283 = vector.extract_strided_slice %200 {offsets = [0, 24], sizes = [64, 8], strides = [1, 1]} : vector<64x32xf32> to vector<64x8xf32>
    %cst_120 = arith.constant dense<0.000000e+00> : vector<64x8xf32>
    %284 = tpu.matmul %282, %283, %cst_120 {dimension_numbers = #tpu.dot_dimension_numbers<[1], [0], [0], [1], [0, 0, 1, 1], [], []>} : vector<64x64xf32>, vector<64x8xf32>, vector<64x8xf32> -> vector<64x8xf32>
    %285 = vector.extract_strided_slice %202 {offsets = [24, 0], sizes = [8, 32], strides = [1, 1]} : vector<32x32xf32> to vector<8x32xf32>
    %cst_121 = arith.constant dense<0.000000e+00> : vector<64x32xf32>
    %286 = tpu.matmul %284, %285, %cst_121 {dimension_numbers = #tpu.dot_dimension_numbers<[1], [0], [0], [1], [0, 0, 1, 1], [], []>} : vector<64x8xf32>, vector<8x32xf32>, vector<64x32xf32> -> vector<64x32xf32>
    %287 = arith.addf %266, %286 : vector<64x32xf32>
    %288 = arith.addf %183, %287 : vector<64x32xf32>
    %c1_122 = arith.constant 1 : index
    %c0_123 = arith.constant 0 : index
    %c0_124 = arith.constant 0 : index
    %289 = vector.load %arg11[%c1_122, %c0_123, %c0_124] : memref<4x1x32xf32, #tpu.memory_space<vmem>>, vector<1x1x32xf32>
    %290 = vector.shape_cast %289 : vector<1x1x32xf32> to vector<1x32xf32>
    %291 = vector.broadcast %290 : vector<1x32xf32> to vector<64x32xf32>
    %292 = arith.addf %288, %291 : vector<64x32xf32>
    %c1_125 = arith.constant 1 : index
    %c0_126 = arith.constant 0 : index
    %c0_127 = arith.constant 0 : index
    %293 = vector.load %arg16[%c1_125, %c0_126, %c0_127] : memref<4x1x32xf32, #tpu.memory_space<vmem>>, vector<1x1x32xf32>
    %294 = vector.shape_cast %293 : vector<1x1x32xf32> to vector<1x32xf32>
    %c1_128 = arith.constant 1 : index
    %c0_129 = arith.constant 0 : index
    %c0_130 = arith.constant 0 : index
    %295 = vector.load %arg17[%c1_128, %c0_129, %c0_130] : memref<4x1x32xf32, #tpu.memory_space<vmem>>, vector<1x1x32xf32>
    %296 = vector.shape_cast %295 : vector<1x1x32xf32> to vector<1x32xf32>
    %cst_131 = arith.constant dense<0.000000e+00> : vector<64xf32>
    %297 = vector.multi_reduction <add>, %292, %cst_131 [1] : vector<64x32xf32> to vector<64xf32>
    %298 = vector.shape_cast %297 : vector<64xf32> to vector<64x1xf32>
    %cst_132 = arith.constant 3.200000e+01 : f32
    %299 = vector.broadcast %cst_132 : f32 to vector<64x1xf32>
    %300 = arith.divf %298, %299 : vector<64x1xf32>
    %301 = vector.broadcast %300 : vector<64x1xf32> to vector<64x32xf32>
    %302 = arith.subf %292, %301 : vector<64x32xf32>
    %303 = arith.mulf %302, %302 : vector<64x32xf32>
    %cst_133 = arith.constant dense<0.000000e+00> : vector<64xf32>
    %304 = vector.multi_reduction <add>, %303, %cst_133 [1] : vector<64x32xf32> to vector<64xf32>
    %305 = vector.shape_cast %304 : vector<64xf32> to vector<64x1xf32>
    %cst_134 = arith.constant 3.200000e+01 : f32
    %306 = vector.broadcast %cst_134 : f32 to vector<64x1xf32>
    %307 = arith.divf %305, %306 : vector<64x1xf32>
    %308 = vector.broadcast %300 : vector<64x1xf32> to vector<64x32xf32>
    %309 = arith.subf %292, %308 : vector<64x32xf32>
    %cst_135 = arith.constant 9.99999974E-6 : f32
    %310 = vector.broadcast %cst_135 : f32 to vector<64x1xf32>
    %311 = arith.addf %307, %310 : vector<64x1xf32>
    %312 = math.rsqrt %311 : vector<64x1xf32>
    %313 = vector.broadcast %312 : vector<64x1xf32> to vector<64x32xf32>
    %314 = arith.mulf %309, %313 : vector<64x32xf32>
    %315 = vector.broadcast %294 : vector<1x32xf32> to vector<64x32xf32>
    %316 = arith.mulf %314, %315 : vector<64x32xf32>
    %317 = vector.broadcast %296 : vector<1x32xf32> to vector<64x32xf32>
    %318 = arith.addf %316, %317 : vector<64x32xf32>
    %c1_136 = arith.constant 1 : index
    %c0_137 = arith.constant 0 : index
    %c0_138 = arith.constant 0 : index
    %319 = vector.load %arg12[%c1_136, %c0_137, %c0_138] : memref<4x32x64xf32, #tpu.memory_space<vmem>>, vector<1x32x64xf32>
    %320 = vector.shape_cast %319 : vector<1x32x64xf32> to vector<32x64xf32>
    %cst_139 = arith.constant dense<0.000000e+00> : vector<64x64xf32>
    %321 = tpu.matmul %318, %320, %cst_139 {dimension_numbers = #tpu.dot_dimension_numbers<[1], [0], [0], [1], [0, 0, 1, 1], [], []>} : vector<64x32xf32>, vector<32x64xf32>, vector<64x64xf32> -> vector<64x64xf32>
    %c1_140 = arith.constant 1 : index
    %c0_141 = arith.constant 0 : index
    %c0_142 = arith.constant 0 : index
    %322 = vector.load %arg13[%c1_140, %c0_141, %c0_142] : memref<4x1x64xf32, #tpu.memory_space<vmem>>, vector<1x1x64xf32>
    %323 = vector.shape_cast %322 : vector<1x1x64xf32> to vector<1x64xf32>
    %324 = vector.broadcast %323 : vector<1x64xf32> to vector<64x64xf32>
    %325 = arith.addf %321, %324 : vector<64x64xf32>
    %cst_143 = arith.constant 0.000000e+00 : f32
    %326 = vector.broadcast %cst_143 : f32 to vector<64x64xf32>
    %327 = arith.maximumf %325, %326 : vector<64x64xf32>
    %c1_144 = arith.constant 1 : index
    %c0_145 = arith.constant 0 : index
    %c0_146 = arith.constant 0 : index
    %328 = vector.load %arg14[%c1_144, %c0_145, %c0_146] : memref<4x64x32xf32, #tpu.memory_space<vmem>>, vector<1x64x32xf32>
    %329 = vector.shape_cast %328 : vector<1x64x32xf32> to vector<64x32xf32>
    %cst_147 = arith.constant dense<0.000000e+00> : vector<64x32xf32>
    %330 = tpu.matmul %327, %329, %cst_147 {dimension_numbers = #tpu.dot_dimension_numbers<[1], [0], [0], [1], [0, 0, 1, 1], [], []>} : vector<64x64xf32>, vector<64x32xf32>, vector<64x32xf32> -> vector<64x32xf32>
    %c1_148 = arith.constant 1 : index
    %c0_149 = arith.constant 0 : index
    %c0_150 = arith.constant 0 : index
    %331 = vector.load %arg15[%c1_148, %c0_149, %c0_150] : memref<4x1x32xf32, #tpu.memory_space<vmem>>, vector<1x1x32xf32>
    %332 = vector.shape_cast %331 : vector<1x1x32xf32> to vector<1x32xf32>
    %333 = vector.broadcast %332 : vector<1x32xf32> to vector<64x32xf32>
    %334 = arith.addf %330, %333 : vector<64x32xf32>
    %335 = arith.addf %318, %334 : vector<64x32xf32>
    %c1_151 = arith.constant 1 : index
    %c0_152 = arith.constant 0 : index
    %c0_153 = arith.constant 0 : index
    %336 = vector.load %arg18[%c1_151, %c0_152, %c0_153] : memref<4x1x32xf32, #tpu.memory_space<vmem>>, vector<1x1x32xf32>
    %337 = vector.shape_cast %336 : vector<1x1x32xf32> to vector<1x32xf32>
    %c1_154 = arith.constant 1 : index
    %c0_155 = arith.constant 0 : index
    %c0_156 = arith.constant 0 : index
    %338 = vector.load %arg19[%c1_154, %c0_155, %c0_156] : memref<4x1x32xf32, #tpu.memory_space<vmem>>, vector<1x1x32xf32>
    %339 = vector.shape_cast %338 : vector<1x1x32xf32> to vector<1x32xf32>
    %cst_157 = arith.constant dense<0.000000e+00> : vector<64xf32>
    %340 = vector.multi_reduction <add>, %335, %cst_157 [1] : vector<64x32xf32> to vector<64xf32>
    %341 = vector.shape_cast %340 : vector<64xf32> to vector<64x1xf32>
    %cst_158 = arith.constant 3.200000e+01 : f32
    %342 = vector.broadcast %cst_158 : f32 to vector<64x1xf32>
    %343 = arith.divf %341, %342 : vector<64x1xf32>
    %344 = vector.broadcast %343 : vector<64x1xf32> to vector<64x32xf32>
    %345 = arith.subf %335, %344 : vector<64x32xf32>
    %346 = arith.mulf %345, %345 : vector<64x32xf32>
    %cst_159 = arith.constant dense<0.000000e+00> : vector<64xf32>
    %347 = vector.multi_reduction <add>, %346, %cst_159 [1] : vector<64x32xf32> to vector<64xf32>
    %348 = vector.shape_cast %347 : vector<64xf32> to vector<64x1xf32>
    %cst_160 = arith.constant 3.200000e+01 : f32
    %349 = vector.broadcast %cst_160 : f32 to vector<64x1xf32>
    %350 = arith.divf %348, %349 : vector<64x1xf32>
    %351 = vector.broadcast %343 : vector<64x1xf32> to vector<64x32xf32>
    %352 = arith.subf %335, %351 : vector<64x32xf32>
    %cst_161 = arith.constant 9.99999974E-6 : f32
    %353 = vector.broadcast %cst_161 : f32 to vector<64x1xf32>
    %354 = arith.addf %350, %353 : vector<64x1xf32>
    %355 = math.rsqrt %354 : vector<64x1xf32>
    %356 = vector.broadcast %355 : vector<64x1xf32> to vector<64x32xf32>
    %357 = arith.mulf %352, %356 : vector<64x32xf32>
    %358 = vector.broadcast %337 : vector<1x32xf32> to vector<64x32xf32>
    %359 = arith.mulf %357, %358 : vector<64x32xf32>
    %360 = vector.broadcast %339 : vector<1x32xf32> to vector<64x32xf32>
    %361 = arith.addf %359, %360 : vector<64x32xf32>
    %c0_162 = arith.constant 0 : index
    %c0_163 = arith.constant 0 : index
    %c0_164 = arith.constant 0 : index
    %362 = vector.load %arg1[%c0_162, %c0_163, %c0_164] : memref<1x16x32xf32, #tpu.memory_space<vmem>>, vector<1x16x32xf32>
    %363 = vector.shape_cast %362 : vector<1x16x32xf32> to vector<16x32xf32>
    %c0_165 = arith.constant 0 : index
    %c0_166 = arith.constant 0 : index
    %c0_167 = arith.constant 0 : index
    %364 = vector.load %arg2[%c0_165, %c0_166, %c0_167] : memref<1x16x32xf32, #tpu.memory_space<vmem>>, vector<1x16x32xf32>
    %365 = vector.shape_cast %364 : vector<1x16x32xf32> to vector<16x32xf32>
    %366 = arith.addf %361, %5 : vector<64x32xf32>
    %367 = arith.addf %363, %365 : vector<16x32xf32>
    %c2 = arith.constant 2 : index
    %c0_168 = arith.constant 0 : index
    %c0_169 = arith.constant 0 : index
    %368 = vector.load %arg6[%c2, %c0_168, %c0_169] : memref<4x32x64xf32, #tpu.memory_space<vmem>>, vector<1x32x64xf32>
    %369 = vector.shape_cast %368 : vector<1x32x64xf32> to vector<32x64xf32>
    %c2_170 = arith.constant 2 : index
    %c0_171 = arith.constant 0 : index
    %c0_172 = arith.constant 0 : index
    %370 = vector.load %arg7[%c2_170, %c0_171, %c0_172] : memref<4x1x64xf32, #tpu.memory_space<vmem>>, vector<1x1x64xf32>
    %371 = vector.shape_cast %370 : vector<1x1x64xf32> to vector<1x64xf32>
    %372 = vector.extract_strided_slice %369 {offsets = [0, 0], sizes = [32, 32], strides = [1, 1]} : vector<32x64xf32> to vector<32x32xf32>
    %cst_173 = arith.constant dense<0.000000e+00> : vector<16x32xf32>
    %373 = tpu.matmul %367, %372, %cst_173 {dimension_numbers = #tpu.dot_dimension_numbers<[1], [0], [0], [1], [0, 0, 1, 1], [], []>} : vector<16x32xf32>, vector<32x32xf32>, vector<16x32xf32> -> vector<16x32xf32>
    %374 = vector.extract_strided_slice %371 {offsets = [0, 0], sizes = [1, 32], strides = [1, 1]} : vector<1x64xf32> to vector<1x32xf32>
    %375 = vector.broadcast %374 : vector<1x32xf32> to vector<16x32xf32>
    %376 = arith.addf %373, %375 : vector<16x32xf32>
    %377 = vector.extract_strided_slice %369 {offsets = [0, 32], sizes = [32, 32], strides = [1, 1]} : vector<32x64xf32> to vector<32x32xf32>
    %cst_174 = arith.constant dense<0.000000e+00> : vector<64x32xf32>
    %378 = tpu.matmul %366, %377, %cst_174 {dimension_numbers = #tpu.dot_dimension_numbers<[1], [0], [0], [1], [0, 0, 1, 1], [], []>} : vector<64x32xf32>, vector<32x32xf32>, vector<64x32xf32> -> vector<64x32xf32>
    %379 = vector.extract_strided_slice %371 {offsets = [0, 32], sizes = [1, 32], strides = [1, 1]} : vector<1x64xf32> to vector<1x32xf32>
    %380 = vector.broadcast %379 : vector<1x32xf32> to vector<64x32xf32>
    %381 = arith.addf %378, %380 : vector<64x32xf32>
    %c2_175 = arith.constant 2 : index
    %c0_176 = arith.constant 0 : index
    %c0_177 = arith.constant 0 : index
    %382 = vector.load %arg8[%c2_175, %c0_176, %c0_177] : memref<4x32x32xf32, #tpu.memory_space<vmem>>, vector<1x32x32xf32>
    %383 = vector.shape_cast %382 : vector<1x32x32xf32> to vector<32x32xf32>
    %cst_178 = arith.constant dense<0.000000e+00> : vector<64x32xf32>
    %384 = tpu.matmul %361, %383, %cst_178 {dimension_numbers = #tpu.dot_dimension_numbers<[1], [0], [0], [1], [0, 0, 1, 1], [], []>} : vector<64x32xf32>, vector<32x32xf32>, vector<64x32xf32> -> vector<64x32xf32>
    %c2_179 = arith.constant 2 : index
    %c0_180 = arith.constant 0 : index
    %c0_181 = arith.constant 0 : index
    %385 = vector.load %arg9[%c2_179, %c0_180, %c0_181] : memref<4x1x32xf32, #tpu.memory_space<vmem>>, vector<1x1x32xf32>
    %386 = vector.shape_cast %385 : vector<1x1x32xf32> to vector<1x32xf32>
    %387 = vector.broadcast %386 : vector<1x32xf32> to vector<64x32xf32>
    %388 = arith.addf %384, %387 : vector<64x32xf32>
    %c2_182 = arith.constant 2 : index
    %c0_183 = arith.constant 0 : index
    %c0_184 = arith.constant 0 : index
    %389 = vector.load %arg10[%c2_182, %c0_183, %c0_184] : memref<4x32x32xf32, #tpu.memory_space<vmem>>, vector<1x32x32xf32>
    %390 = vector.shape_cast %389 : vector<1x32x32xf32> to vector<32x32xf32>
    %cst_185 = arith.constant 0.000000e+00 : f32
    %391 = vector.broadcast %cst_185 : f32 to vector<16x32xf32>
    %392 = vector.extract_strided_slice %376 {offsets = [0, 0], sizes = [16, 8], strides = [1, 1]} : vector<16x32xf32> to vector<16x8xf32>
    %393 = vector.extract_strided_slice %381 {offsets = [0, 0], sizes = [64, 8], strides = [1, 1]} : vector<64x32xf32> to vector<64x8xf32>
    %394 = tpu.transpose %393, [1, 0] : vector<64x8xf32> -> vector<8x64xf32>
    %cst_186 = arith.constant dense<0.000000e+00> : vector<16x64xf32>
    %395 = tpu.matmul %392, %394, %cst_186 {dimension_numbers = #tpu.dot_dimension_numbers<[1], [0], [0], [1], [0, 0, 1, 1], [], []>} : vector<16x8xf32>, vector<8x64xf32>, vector<16x64xf32> -> vector<16x64xf32>
    %396 = vector.broadcast %1 : vector<1x64xf32> to vector<16x64xf32>
    %397 = arith.addf %395, %396 : vector<16x64xf32>
    %cst_187 = arith.constant dense<0xFF800000> : vector<16xf32>
    %398 = vector.multi_reduction <maximumf>, %397, %cst_187 [1] : vector<16x64xf32> to vector<16xf32>
    %399 = vector.shape_cast %398 : vector<16xf32> to vector<16x1xf32>
    %400 = vector.broadcast %399 : vector<16x1xf32> to vector<16x64xf32>
    %401 = arith.subf %397, %400 : vector<16x64xf32>
    %402 = math.exp %401 : vector<16x64xf32>
    %cst_188 = arith.constant dense<0.000000e+00> : vector<16xf32>
    %403 = vector.multi_reduction <add>, %402, %cst_188 [1] : vector<16x64xf32> to vector<16xf32>
    %404 = vector.shape_cast %403 : vector<16xf32> to vector<16x1xf32>
    %405 = tpu.reciprocal %404 {approx = true} : vector<16x1xf32> -> vector<16x1xf32>
    %406 = vector.broadcast %405 : vector<16x1xf32> to vector<16x64xf32>
    %407 = arith.mulf %402, %406 : vector<16x64xf32>
    %408 = vector.extract_strided_slice %388 {offsets = [0, 0], sizes = [64, 8], strides = [1, 1]} : vector<64x32xf32> to vector<64x8xf32>
    %cst_189 = arith.constant dense<0.000000e+00> : vector<16x8xf32>
    %409 = tpu.matmul %407, %408, %cst_189 {dimension_numbers = #tpu.dot_dimension_numbers<[1], [0], [0], [1], [0, 0, 1, 1], [], []>} : vector<16x64xf32>, vector<64x8xf32>, vector<16x8xf32> -> vector<16x8xf32>
    %410 = vector.extract_strided_slice %390 {offsets = [0, 0], sizes = [8, 32], strides = [1, 1]} : vector<32x32xf32> to vector<8x32xf32>
    %cst_190 = arith.constant dense<0.000000e+00> : vector<16x32xf32>
    %411 = tpu.matmul %409, %410, %cst_190 {dimension_numbers = #tpu.dot_dimension_numbers<[1], [0], [0], [1], [0, 0, 1, 1], [], []>} : vector<16x8xf32>, vector<8x32xf32>, vector<16x32xf32> -> vector<16x32xf32>
    %412 = arith.addf %391, %411 : vector<16x32xf32>
    %413 = vector.extract_strided_slice %376 {offsets = [0, 8], sizes = [16, 8], strides = [1, 1]} : vector<16x32xf32> to vector<16x8xf32>
    %414 = vector.extract_strided_slice %381 {offsets = [0, 8], sizes = [64, 8], strides = [1, 1]} : vector<64x32xf32> to vector<64x8xf32>
    %415 = tpu.transpose %414, [1, 0] : vector<64x8xf32> -> vector<8x64xf32>
    %cst_191 = arith.constant dense<0.000000e+00> : vector<16x64xf32>
    %416 = tpu.matmul %413, %415, %cst_191 {dimension_numbers = #tpu.dot_dimension_numbers<[1], [0], [0], [1], [0, 0, 1, 1], [], []>} : vector<16x8xf32>, vector<8x64xf32>, vector<16x64xf32> -> vector<16x64xf32>
    %417 = vector.broadcast %1 : vector<1x64xf32> to vector<16x64xf32>
    %418 = arith.addf %416, %417 : vector<16x64xf32>
    %cst_192 = arith.constant dense<0xFF800000> : vector<16xf32>
    %419 = vector.multi_reduction <maximumf>, %418, %cst_192 [1] : vector<16x64xf32> to vector<16xf32>
    %420 = vector.shape_cast %419 : vector<16xf32> to vector<16x1xf32>
    %421 = vector.broadcast %420 : vector<16x1xf32> to vector<16x64xf32>
    %422 = arith.subf %418, %421 : vector<16x64xf32>
    %423 = math.exp %422 : vector<16x64xf32>
    %cst_193 = arith.constant dense<0.000000e+00> : vector<16xf32>
    %424 = vector.multi_reduction <add>, %423, %cst_193 [1] : vector<16x64xf32> to vector<16xf32>
    %425 = vector.shape_cast %424 : vector<16xf32> to vector<16x1xf32>
    %426 = tpu.reciprocal %425 {approx = true} : vector<16x1xf32> -> vector<16x1xf32>
    %427 = vector.broadcast %426 : vector<16x1xf32> to vector<16x64xf32>
    %428 = arith.mulf %423, %427 : vector<16x64xf32>
    %429 = vector.extract_strided_slice %388 {offsets = [0, 8], sizes = [64, 8], strides = [1, 1]} : vector<64x32xf32> to vector<64x8xf32>
    %cst_194 = arith.constant dense<0.000000e+00> : vector<16x8xf32>
    %430 = tpu.matmul %428, %429, %cst_194 {dimension_numbers = #tpu.dot_dimension_numbers<[1], [0], [0], [1], [0, 0, 1, 1], [], []>} : vector<16x64xf32>, vector<64x8xf32>, vector<16x8xf32> -> vector<16x8xf32>
    %431 = vector.extract_strided_slice %390 {offsets = [8, 0], sizes = [8, 32], strides = [1, 1]} : vector<32x32xf32> to vector<8x32xf32>
    %cst_195 = arith.constant dense<0.000000e+00> : vector<16x32xf32>
    %432 = tpu.matmul %430, %431, %cst_195 {dimension_numbers = #tpu.dot_dimension_numbers<[1], [0], [0], [1], [0, 0, 1, 1], [], []>} : vector<16x8xf32>, vector<8x32xf32>, vector<16x32xf32> -> vector<16x32xf32>
    %433 = arith.addf %412, %432 : vector<16x32xf32>
    %434 = vector.extract_strided_slice %376 {offsets = [0, 16], sizes = [16, 8], strides = [1, 1]} : vector<16x32xf32> to vector<16x8xf32>
    %435 = vector.extract_strided_slice %381 {offsets = [0, 16], sizes = [64, 8], strides = [1, 1]} : vector<64x32xf32> to vector<64x8xf32>
    %436 = tpu.transpose %435, [1, 0] : vector<64x8xf32> -> vector<8x64xf32>
    %cst_196 = arith.constant dense<0.000000e+00> : vector<16x64xf32>
    %437 = tpu.matmul %434, %436, %cst_196 {dimension_numbers = #tpu.dot_dimension_numbers<[1], [0], [0], [1], [0, 0, 1, 1], [], []>} : vector<16x8xf32>, vector<8x64xf32>, vector<16x64xf32> -> vector<16x64xf32>
    %438 = vector.broadcast %1 : vector<1x64xf32> to vector<16x64xf32>
    %439 = arith.addf %437, %438 : vector<16x64xf32>
    %cst_197 = arith.constant dense<0xFF800000> : vector<16xf32>
    %440 = vector.multi_reduction <maximumf>, %439, %cst_197 [1] : vector<16x64xf32> to vector<16xf32>
    %441 = vector.shape_cast %440 : vector<16xf32> to vector<16x1xf32>
    %442 = vector.broadcast %441 : vector<16x1xf32> to vector<16x64xf32>
    %443 = arith.subf %439, %442 : vector<16x64xf32>
    %444 = math.exp %443 : vector<16x64xf32>
    %cst_198 = arith.constant dense<0.000000e+00> : vector<16xf32>
    %445 = vector.multi_reduction <add>, %444, %cst_198 [1] : vector<16x64xf32> to vector<16xf32>
    %446 = vector.shape_cast %445 : vector<16xf32> to vector<16x1xf32>
    %447 = tpu.reciprocal %446 {approx = true} : vector<16x1xf32> -> vector<16x1xf32>
    %448 = vector.broadcast %447 : vector<16x1xf32> to vector<16x64xf32>
    %449 = arith.mulf %444, %448 : vector<16x64xf32>
    %450 = vector.extract_strided_slice %388 {offsets = [0, 16], sizes = [64, 8], strides = [1, 1]} : vector<64x32xf32> to vector<64x8xf32>
    %cst_199 = arith.constant dense<0.000000e+00> : vector<16x8xf32>
    %451 = tpu.matmul %449, %450, %cst_199 {dimension_numbers = #tpu.dot_dimension_numbers<[1], [0], [0], [1], [0, 0, 1, 1], [], []>} : vector<16x64xf32>, vector<64x8xf32>, vector<16x8xf32> -> vector<16x8xf32>
    %452 = vector.extract_strided_slice %390 {offsets = [16, 0], sizes = [8, 32], strides = [1, 1]} : vector<32x32xf32> to vector<8x32xf32>
    %cst_200 = arith.constant dense<0.000000e+00> : vector<16x32xf32>
    %453 = tpu.matmul %451, %452, %cst_200 {dimension_numbers = #tpu.dot_dimension_numbers<[1], [0], [0], [1], [0, 0, 1, 1], [], []>} : vector<16x8xf32>, vector<8x32xf32>, vector<16x32xf32> -> vector<16x32xf32>
    %454 = arith.addf %433, %453 : vector<16x32xf32>
    %455 = vector.extract_strided_slice %376 {offsets = [0, 24], sizes = [16, 8], strides = [1, 1]} : vector<16x32xf32> to vector<16x8xf32>
    %456 = vector.extract_strided_slice %381 {offsets = [0, 24], sizes = [64, 8], strides = [1, 1]} : vector<64x32xf32> to vector<64x8xf32>
    %457 = tpu.transpose %456, [1, 0] : vector<64x8xf32> -> vector<8x64xf32>
    %cst_201 = arith.constant dense<0.000000e+00> : vector<16x64xf32>
    %458 = tpu.matmul %455, %457, %cst_201 {dimension_numbers = #tpu.dot_dimension_numbers<[1], [0], [0], [1], [0, 0, 1, 1], [], []>} : vector<16x8xf32>, vector<8x64xf32>, vector<16x64xf32> -> vector<16x64xf32>
    %459 = vector.broadcast %1 : vector<1x64xf32> to vector<16x64xf32>
    %460 = arith.addf %458, %459 : vector<16x64xf32>
    %cst_202 = arith.constant dense<0xFF800000> : vector<16xf32>
    %461 = vector.multi_reduction <maximumf>, %460, %cst_202 [1] : vector<16x64xf32> to vector<16xf32>
    %462 = vector.shape_cast %461 : vector<16xf32> to vector<16x1xf32>
    %463 = vector.broadcast %462 : vector<16x1xf32> to vector<16x64xf32>
    %464 = arith.subf %460, %463 : vector<16x64xf32>
    %465 = math.exp %464 : vector<16x64xf32>
    %cst_203 = arith.constant dense<0.000000e+00> : vector<16xf32>
    %466 = vector.multi_reduction <add>, %465, %cst_203 [1] : vector<16x64xf32> to vector<16xf32>
    %467 = vector.shape_cast %466 : vector<16xf32> to vector<16x1xf32>
    %468 = tpu.reciprocal %467 {approx = true} : vector<16x1xf32> -> vector<16x1xf32>
    %469 = vector.broadcast %468 : vector<16x1xf32> to vector<16x64xf32>
    %470 = arith.mulf %465, %469 : vector<16x64xf32>
    %471 = vector.extract_strided_slice %388 {offsets = [0, 24], sizes = [64, 8], strides = [1, 1]} : vector<64x32xf32> to vector<64x8xf32>
    %cst_204 = arith.constant dense<0.000000e+00> : vector<16x8xf32>
    %472 = tpu.matmul %470, %471, %cst_204 {dimension_numbers = #tpu.dot_dimension_numbers<[1], [0], [0], [1], [0, 0, 1, 1], [], []>} : vector<16x64xf32>, vector<64x8xf32>, vector<16x8xf32> -> vector<16x8xf32>
    %473 = vector.extract_strided_slice %390 {offsets = [24, 0], sizes = [8, 32], strides = [1, 1]} : vector<32x32xf32> to vector<8x32xf32>
    %cst_205 = arith.constant dense<0.000000e+00> : vector<16x32xf32>
    %474 = tpu.matmul %472, %473, %cst_205 {dimension_numbers = #tpu.dot_dimension_numbers<[1], [0], [0], [1], [0, 0, 1, 1], [], []>} : vector<16x8xf32>, vector<8x32xf32>, vector<16x32xf32> -> vector<16x32xf32>
    %475 = arith.addf %454, %474 : vector<16x32xf32>
    %476 = arith.addf %363, %475 : vector<16x32xf32>
    %c2_206 = arith.constant 2 : index
    %c0_207 = arith.constant 0 : index
    %c0_208 = arith.constant 0 : index
    %477 = vector.load %arg11[%c2_206, %c0_207, %c0_208] : memref<4x1x32xf32, #tpu.memory_space<vmem>>, vector<1x1x32xf32>
    %478 = vector.shape_cast %477 : vector<1x1x32xf32> to vector<1x32xf32>
    %479 = vector.broadcast %478 : vector<1x32xf32> to vector<16x32xf32>
    %480 = arith.addf %476, %479 : vector<16x32xf32>
    %c2_209 = arith.constant 2 : index
    %c0_210 = arith.constant 0 : index
    %c0_211 = arith.constant 0 : index
    %481 = vector.load %arg16[%c2_209, %c0_210, %c0_211] : memref<4x1x32xf32, #tpu.memory_space<vmem>>, vector<1x1x32xf32>
    %482 = vector.shape_cast %481 : vector<1x1x32xf32> to vector<1x32xf32>
    %c2_212 = arith.constant 2 : index
    %c0_213 = arith.constant 0 : index
    %c0_214 = arith.constant 0 : index
    %483 = vector.load %arg17[%c2_212, %c0_213, %c0_214] : memref<4x1x32xf32, #tpu.memory_space<vmem>>, vector<1x1x32xf32>
    %484 = vector.shape_cast %483 : vector<1x1x32xf32> to vector<1x32xf32>
    %cst_215 = arith.constant dense<0.000000e+00> : vector<16xf32>
    %485 = vector.multi_reduction <add>, %480, %cst_215 [1] : vector<16x32xf32> to vector<16xf32>
    %486 = vector.shape_cast %485 : vector<16xf32> to vector<16x1xf32>
    %cst_216 = arith.constant 3.200000e+01 : f32
    %487 = vector.broadcast %cst_216 : f32 to vector<16x1xf32>
    %488 = arith.divf %486, %487 : vector<16x1xf32>
    %489 = vector.broadcast %488 : vector<16x1xf32> to vector<16x32xf32>
    %490 = arith.subf %480, %489 : vector<16x32xf32>
    %491 = arith.mulf %490, %490 : vector<16x32xf32>
    %cst_217 = arith.constant dense<0.000000e+00> : vector<16xf32>
    %492 = vector.multi_reduction <add>, %491, %cst_217 [1] : vector<16x32xf32> to vector<16xf32>
    %493 = vector.shape_cast %492 : vector<16xf32> to vector<16x1xf32>
    %cst_218 = arith.constant 3.200000e+01 : f32
    %494 = vector.broadcast %cst_218 : f32 to vector<16x1xf32>
    %495 = arith.divf %493, %494 : vector<16x1xf32>
    %496 = vector.broadcast %488 : vector<16x1xf32> to vector<16x32xf32>
    %497 = arith.subf %480, %496 : vector<16x32xf32>
    %cst_219 = arith.constant 9.99999974E-6 : f32
    %498 = vector.broadcast %cst_219 : f32 to vector<16x1xf32>
    %499 = arith.addf %495, %498 : vector<16x1xf32>
    %500 = math.rsqrt %499 : vector<16x1xf32>
    %501 = vector.broadcast %500 : vector<16x1xf32> to vector<16x32xf32>
    %502 = arith.mulf %497, %501 : vector<16x32xf32>
    %503 = vector.broadcast %482 : vector<1x32xf32> to vector<16x32xf32>
    %504 = arith.mulf %502, %503 : vector<16x32xf32>
    %505 = vector.broadcast %484 : vector<1x32xf32> to vector<16x32xf32>
    %506 = arith.addf %504, %505 : vector<16x32xf32>
    %c2_220 = arith.constant 2 : index
    %c0_221 = arith.constant 0 : index
    %c0_222 = arith.constant 0 : index
    %507 = vector.load %arg12[%c2_220, %c0_221, %c0_222] : memref<4x32x64xf32, #tpu.memory_space<vmem>>, vector<1x32x64xf32>
    %508 = vector.shape_cast %507 : vector<1x32x64xf32> to vector<32x64xf32>
    %cst_223 = arith.constant dense<0.000000e+00> : vector<16x64xf32>
    %509 = tpu.matmul %506, %508, %cst_223 {dimension_numbers = #tpu.dot_dimension_numbers<[1], [0], [0], [1], [0, 0, 1, 1], [], []>} : vector<16x32xf32>, vector<32x64xf32>, vector<16x64xf32> -> vector<16x64xf32>
    %c2_224 = arith.constant 2 : index
    %c0_225 = arith.constant 0 : index
    %c0_226 = arith.constant 0 : index
    %510 = vector.load %arg13[%c2_224, %c0_225, %c0_226] : memref<4x1x64xf32, #tpu.memory_space<vmem>>, vector<1x1x64xf32>
    %511 = vector.shape_cast %510 : vector<1x1x64xf32> to vector<1x64xf32>
    %512 = vector.broadcast %511 : vector<1x64xf32> to vector<16x64xf32>
    %513 = arith.addf %509, %512 : vector<16x64xf32>
    %cst_227 = arith.constant 0.000000e+00 : f32
    %514 = vector.broadcast %cst_227 : f32 to vector<16x64xf32>
    %515 = arith.maximumf %513, %514 : vector<16x64xf32>
    %c2_228 = arith.constant 2 : index
    %c0_229 = arith.constant 0 : index
    %c0_230 = arith.constant 0 : index
    %516 = vector.load %arg14[%c2_228, %c0_229, %c0_230] : memref<4x64x32xf32, #tpu.memory_space<vmem>>, vector<1x64x32xf32>
    %517 = vector.shape_cast %516 : vector<1x64x32xf32> to vector<64x32xf32>
    %cst_231 = arith.constant dense<0.000000e+00> : vector<16x32xf32>
    %518 = tpu.matmul %515, %517, %cst_231 {dimension_numbers = #tpu.dot_dimension_numbers<[1], [0], [0], [1], [0, 0, 1, 1], [], []>} : vector<16x64xf32>, vector<64x32xf32>, vector<16x32xf32> -> vector<16x32xf32>
    %c2_232 = arith.constant 2 : index
    %c0_233 = arith.constant 0 : index
    %c0_234 = arith.constant 0 : index
    %519 = vector.load %arg15[%c2_232, %c0_233, %c0_234] : memref<4x1x32xf32, #tpu.memory_space<vmem>>, vector<1x1x32xf32>
    %520 = vector.shape_cast %519 : vector<1x1x32xf32> to vector<1x32xf32>
    %521 = vector.broadcast %520 : vector<1x32xf32> to vector<16x32xf32>
    %522 = arith.addf %518, %521 : vector<16x32xf32>
    %523 = arith.addf %506, %522 : vector<16x32xf32>
    %c2_235 = arith.constant 2 : index
    %c0_236 = arith.constant 0 : index
    %c0_237 = arith.constant 0 : index
    %524 = vector.load %arg18[%c2_235, %c0_236, %c0_237] : memref<4x1x32xf32, #tpu.memory_space<vmem>>, vector<1x1x32xf32>
    %525 = vector.shape_cast %524 : vector<1x1x32xf32> to vector<1x32xf32>
    %c2_238 = arith.constant 2 : index
    %c0_239 = arith.constant 0 : index
    %c0_240 = arith.constant 0 : index
    %526 = vector.load %arg19[%c2_238, %c0_239, %c0_240] : memref<4x1x32xf32, #tpu.memory_space<vmem>>, vector<1x1x32xf32>
    %527 = vector.shape_cast %526 : vector<1x1x32xf32> to vector<1x32xf32>
    %cst_241 = arith.constant dense<0.000000e+00> : vector<16xf32>
    %528 = vector.multi_reduction <add>, %523, %cst_241 [1] : vector<16x32xf32> to vector<16xf32>
    %529 = vector.shape_cast %528 : vector<16xf32> to vector<16x1xf32>
    %cst_242 = arith.constant 3.200000e+01 : f32
    %530 = vector.broadcast %cst_242 : f32 to vector<16x1xf32>
    %531 = arith.divf %529, %530 : vector<16x1xf32>
    %532 = vector.broadcast %531 : vector<16x1xf32> to vector<16x32xf32>
    %533 = arith.subf %523, %532 : vector<16x32xf32>
    %534 = arith.mulf %533, %533 : vector<16x32xf32>
    %cst_243 = arith.constant dense<0.000000e+00> : vector<16xf32>
    %535 = vector.multi_reduction <add>, %534, %cst_243 [1] : vector<16x32xf32> to vector<16xf32>
    %536 = vector.shape_cast %535 : vector<16xf32> to vector<16x1xf32>
    %cst_244 = arith.constant 3.200000e+01 : f32
    %537 = vector.broadcast %cst_244 : f32 to vector<16x1xf32>
    %538 = arith.divf %536, %537 : vector<16x1xf32>
    %539 = vector.broadcast %531 : vector<16x1xf32> to vector<16x32xf32>
    %540 = arith.subf %523, %539 : vector<16x32xf32>
    %cst_245 = arith.constant 9.99999974E-6 : f32
    %541 = vector.broadcast %cst_245 : f32 to vector<16x1xf32>
    %542 = arith.addf %538, %541 : vector<16x1xf32>
    %543 = math.rsqrt %542 : vector<16x1xf32>
    %544 = vector.broadcast %543 : vector<16x1xf32> to vector<16x32xf32>
    %545 = arith.mulf %540, %544 : vector<16x32xf32>
    %546 = vector.broadcast %525 : vector<1x32xf32> to vector<16x32xf32>
    %547 = arith.mulf %545, %546 : vector<16x32xf32>
    %548 = vector.broadcast %527 : vector<1x32xf32> to vector<16x32xf32>
    %549 = arith.addf %547, %548 : vector<16x32xf32>
    %550 = arith.addf %549, %365 : vector<16x32xf32>
    %c3 = arith.constant 3 : index
    %c0_246 = arith.constant 0 : index
    %c0_247 = arith.constant 0 : index
    %551 = vector.load %arg6[%c3, %c0_246, %c0_247] : memref<4x32x64xf32, #tpu.memory_space<vmem>>, vector<1x32x64xf32>
    %552 = vector.shape_cast %551 : vector<1x32x64xf32> to vector<32x64xf32>
    %c3_248 = arith.constant 3 : index
    %c0_249 = arith.constant 0 : index
    %c0_250 = arith.constant 0 : index
    %553 = vector.load %arg7[%c3_248, %c0_249, %c0_250] : memref<4x1x64xf32, #tpu.memory_space<vmem>>, vector<1x1x64xf32>
    %554 = vector.shape_cast %553 : vector<1x1x64xf32> to vector<1x64xf32>
    %555 = vector.extract_strided_slice %552 {offsets = [0, 0], sizes = [32, 32], strides = [1, 1]} : vector<32x64xf32> to vector<32x32xf32>
    %cst_251 = arith.constant dense<0.000000e+00> : vector<16x32xf32>
    %556 = tpu.matmul %550, %555, %cst_251 {dimension_numbers = #tpu.dot_dimension_numbers<[1], [0], [0], [1], [0, 0, 1, 1], [], []>} : vector<16x32xf32>, vector<32x32xf32>, vector<16x32xf32> -> vector<16x32xf32>
    %557 = vector.extract_strided_slice %554 {offsets = [0, 0], sizes = [1, 32], strides = [1, 1]} : vector<1x64xf32> to vector<1x32xf32>
    %558 = vector.broadcast %557 : vector<1x32xf32> to vector<16x32xf32>
    %559 = arith.addf %556, %558 : vector<16x32xf32>
    %560 = vector.extract_strided_slice %552 {offsets = [0, 32], sizes = [32, 32], strides = [1, 1]} : vector<32x64xf32> to vector<32x32xf32>
    %cst_252 = arith.constant dense<0.000000e+00> : vector<64x32xf32>
    %561 = tpu.matmul %366, %560, %cst_252 {dimension_numbers = #tpu.dot_dimension_numbers<[1], [0], [0], [1], [0, 0, 1, 1], [], []>} : vector<64x32xf32>, vector<32x32xf32>, vector<64x32xf32> -> vector<64x32xf32>
    %562 = vector.extract_strided_slice %554 {offsets = [0, 32], sizes = [1, 32], strides = [1, 1]} : vector<1x64xf32> to vector<1x32xf32>
    %563 = vector.broadcast %562 : vector<1x32xf32> to vector<64x32xf32>
    %564 = arith.addf %561, %563 : vector<64x32xf32>
    %c3_253 = arith.constant 3 : index
    %c0_254 = arith.constant 0 : index
    %c0_255 = arith.constant 0 : index
    %565 = vector.load %arg8[%c3_253, %c0_254, %c0_255] : memref<4x32x32xf32, #tpu.memory_space<vmem>>, vector<1x32x32xf32>
    %566 = vector.shape_cast %565 : vector<1x32x32xf32> to vector<32x32xf32>
    %cst_256 = arith.constant dense<0.000000e+00> : vector<64x32xf32>
    %567 = tpu.matmul %361, %566, %cst_256 {dimension_numbers = #tpu.dot_dimension_numbers<[1], [0], [0], [1], [0, 0, 1, 1], [], []>} : vector<64x32xf32>, vector<32x32xf32>, vector<64x32xf32> -> vector<64x32xf32>
    %c3_257 = arith.constant 3 : index
    %c0_258 = arith.constant 0 : index
    %c0_259 = arith.constant 0 : index
    %568 = vector.load %arg9[%c3_257, %c0_258, %c0_259] : memref<4x1x32xf32, #tpu.memory_space<vmem>>, vector<1x1x32xf32>
    %569 = vector.shape_cast %568 : vector<1x1x32xf32> to vector<1x32xf32>
    %570 = vector.broadcast %569 : vector<1x32xf32> to vector<64x32xf32>
    %571 = arith.addf %567, %570 : vector<64x32xf32>
    %c3_260 = arith.constant 3 : index
    %c0_261 = arith.constant 0 : index
    %c0_262 = arith.constant 0 : index
    %572 = vector.load %arg10[%c3_260, %c0_261, %c0_262] : memref<4x32x32xf32, #tpu.memory_space<vmem>>, vector<1x32x32xf32>
    %573 = vector.shape_cast %572 : vector<1x32x32xf32> to vector<32x32xf32>
    %cst_263 = arith.constant 0.000000e+00 : f32
    %574 = vector.broadcast %cst_263 : f32 to vector<16x32xf32>
    %575 = vector.extract_strided_slice %559 {offsets = [0, 0], sizes = [16, 8], strides = [1, 1]} : vector<16x32xf32> to vector<16x8xf32>
    %576 = vector.extract_strided_slice %564 {offsets = [0, 0], sizes = [64, 8], strides = [1, 1]} : vector<64x32xf32> to vector<64x8xf32>
    %577 = tpu.transpose %576, [1, 0] : vector<64x8xf32> -> vector<8x64xf32>
    %cst_264 = arith.constant dense<0.000000e+00> : vector<16x64xf32>
    %578 = tpu.matmul %575, %577, %cst_264 {dimension_numbers = #tpu.dot_dimension_numbers<[1], [0], [0], [1], [0, 0, 1, 1], [], []>} : vector<16x8xf32>, vector<8x64xf32>, vector<16x64xf32> -> vector<16x64xf32>
    %579 = vector.broadcast %1 : vector<1x64xf32> to vector<16x64xf32>
    %580 = arith.addf %578, %579 : vector<16x64xf32>
    %cst_265 = arith.constant dense<0xFF800000> : vector<16xf32>
    %581 = vector.multi_reduction <maximumf>, %580, %cst_265 [1] : vector<16x64xf32> to vector<16xf32>
    %582 = vector.shape_cast %581 : vector<16xf32> to vector<16x1xf32>
    %583 = vector.broadcast %582 : vector<16x1xf32> to vector<16x64xf32>
    %584 = arith.subf %580, %583 : vector<16x64xf32>
    %585 = math.exp %584 : vector<16x64xf32>
    %cst_266 = arith.constant dense<0.000000e+00> : vector<16xf32>
    %586 = vector.multi_reduction <add>, %585, %cst_266 [1] : vector<16x64xf32> to vector<16xf32>
    %587 = vector.shape_cast %586 : vector<16xf32> to vector<16x1xf32>
    %588 = tpu.reciprocal %587 {approx = true} : vector<16x1xf32> -> vector<16x1xf32>
    %589 = vector.broadcast %588 : vector<16x1xf32> to vector<16x64xf32>
    %590 = arith.mulf %585, %589 : vector<16x64xf32>
    %591 = vector.extract_strided_slice %571 {offsets = [0, 0], sizes = [64, 8], strides = [1, 1]} : vector<64x32xf32> to vector<64x8xf32>
    %cst_267 = arith.constant dense<0.000000e+00> : vector<16x8xf32>
    %592 = tpu.matmul %590, %591, %cst_267 {dimension_numbers = #tpu.dot_dimension_numbers<[1], [0], [0], [1], [0, 0, 1, 1], [], []>} : vector<16x64xf32>, vector<64x8xf32>, vector<16x8xf32> -> vector<16x8xf32>
    %593 = vector.extract_strided_slice %573 {offsets = [0, 0], sizes = [8, 32], strides = [1, 1]} : vector<32x32xf32> to vector<8x32xf32>
    %cst_268 = arith.constant dense<0.000000e+00> : vector<16x32xf32>
    %594 = tpu.matmul %592, %593, %cst_268 {dimension_numbers = #tpu.dot_dimension_numbers<[1], [0], [0], [1], [0, 0, 1, 1], [], []>} : vector<16x8xf32>, vector<8x32xf32>, vector<16x32xf32> -> vector<16x32xf32>
    %595 = arith.addf %574, %594 : vector<16x32xf32>
    %596 = vector.extract_strided_slice %559 {offsets = [0, 8], sizes = [16, 8], strides = [1, 1]} : vector<16x32xf32> to vector<16x8xf32>
    %597 = vector.extract_strided_slice %564 {offsets = [0, 8], sizes = [64, 8], strides = [1, 1]} : vector<64x32xf32> to vector<64x8xf32>
    %598 = tpu.transpose %597, [1, 0] : vector<64x8xf32> -> vector<8x64xf32>
    %cst_269 = arith.constant dense<0.000000e+00> : vector<16x64xf32>
    %599 = tpu.matmul %596, %598, %cst_269 {dimension_numbers = #tpu.dot_dimension_numbers<[1], [0], [0], [1], [0, 0, 1, 1], [], []>} : vector<16x8xf32>, vector<8x64xf32>, vector<16x64xf32> -> vector<16x64xf32>
    %600 = vector.broadcast %1 : vector<1x64xf32> to vector<16x64xf32>
    %601 = arith.addf %599, %600 : vector<16x64xf32>
    %cst_270 = arith.constant dense<0xFF800000> : vector<16xf32>
    %602 = vector.multi_reduction <maximumf>, %601, %cst_270 [1] : vector<16x64xf32> to vector<16xf32>
    %603 = vector.shape_cast %602 : vector<16xf32> to vector<16x1xf32>
    %604 = vector.broadcast %603 : vector<16x1xf32> to vector<16x64xf32>
    %605 = arith.subf %601, %604 : vector<16x64xf32>
    %606 = math.exp %605 : vector<16x64xf32>
    %cst_271 = arith.constant dense<0.000000e+00> : vector<16xf32>
    %607 = vector.multi_reduction <add>, %606, %cst_271 [1] : vector<16x64xf32> to vector<16xf32>
    %608 = vector.shape_cast %607 : vector<16xf32> to vector<16x1xf32>
    %609 = tpu.reciprocal %608 {approx = true} : vector<16x1xf32> -> vector<16x1xf32>
    %610 = vector.broadcast %609 : vector<16x1xf32> to vector<16x64xf32>
    %611 = arith.mulf %606, %610 : vector<16x64xf32>
    %612 = vector.extract_strided_slice %571 {offsets = [0, 8], sizes = [64, 8], strides = [1, 1]} : vector<64x32xf32> to vector<64x8xf32>
    %cst_272 = arith.constant dense<0.000000e+00> : vector<16x8xf32>
    %613 = tpu.matmul %611, %612, %cst_272 {dimension_numbers = #tpu.dot_dimension_numbers<[1], [0], [0], [1], [0, 0, 1, 1], [], []>} : vector<16x64xf32>, vector<64x8xf32>, vector<16x8xf32> -> vector<16x8xf32>
    %614 = vector.extract_strided_slice %573 {offsets = [8, 0], sizes = [8, 32], strides = [1, 1]} : vector<32x32xf32> to vector<8x32xf32>
    %cst_273 = arith.constant dense<0.000000e+00> : vector<16x32xf32>
    %615 = tpu.matmul %613, %614, %cst_273 {dimension_numbers = #tpu.dot_dimension_numbers<[1], [0], [0], [1], [0, 0, 1, 1], [], []>} : vector<16x8xf32>, vector<8x32xf32>, vector<16x32xf32> -> vector<16x32xf32>
    %616 = arith.addf %595, %615 : vector<16x32xf32>
    %617 = vector.extract_strided_slice %559 {offsets = [0, 16], sizes = [16, 8], strides = [1, 1]} : vector<16x32xf32> to vector<16x8xf32>
    %618 = vector.extract_strided_slice %564 {offsets = [0, 16], sizes = [64, 8], strides = [1, 1]} : vector<64x32xf32> to vector<64x8xf32>
    %619 = tpu.transpose %618, [1, 0] : vector<64x8xf32> -> vector<8x64xf32>
    %cst_274 = arith.constant dense<0.000000e+00> : vector<16x64xf32>
    %620 = tpu.matmul %617, %619, %cst_274 {dimension_numbers = #tpu.dot_dimension_numbers<[1], [0], [0], [1], [0, 0, 1, 1], [], []>} : vector<16x8xf32>, vector<8x64xf32>, vector<16x64xf32> -> vector<16x64xf32>
    %621 = vector.broadcast %1 : vector<1x64xf32> to vector<16x64xf32>
    %622 = arith.addf %620, %621 : vector<16x64xf32>
    %cst_275 = arith.constant dense<0xFF800000> : vector<16xf32>
    %623 = vector.multi_reduction <maximumf>, %622, %cst_275 [1] : vector<16x64xf32> to vector<16xf32>
    %624 = vector.shape_cast %623 : vector<16xf32> to vector<16x1xf32>
    %625 = vector.broadcast %624 : vector<16x1xf32> to vector<16x64xf32>
    %626 = arith.subf %622, %625 : vector<16x64xf32>
    %627 = math.exp %626 : vector<16x64xf32>
    %cst_276 = arith.constant dense<0.000000e+00> : vector<16xf32>
    %628 = vector.multi_reduction <add>, %627, %cst_276 [1] : vector<16x64xf32> to vector<16xf32>
    %629 = vector.shape_cast %628 : vector<16xf32> to vector<16x1xf32>
    %630 = tpu.reciprocal %629 {approx = true} : vector<16x1xf32> -> vector<16x1xf32>
    %631 = vector.broadcast %630 : vector<16x1xf32> to vector<16x64xf32>
    %632 = arith.mulf %627, %631 : vector<16x64xf32>
    %633 = vector.extract_strided_slice %571 {offsets = [0, 16], sizes = [64, 8], strides = [1, 1]} : vector<64x32xf32> to vector<64x8xf32>
    %cst_277 = arith.constant dense<0.000000e+00> : vector<16x8xf32>
    %634 = tpu.matmul %632, %633, %cst_277 {dimension_numbers = #tpu.dot_dimension_numbers<[1], [0], [0], [1], [0, 0, 1, 1], [], []>} : vector<16x64xf32>, vector<64x8xf32>, vector<16x8xf32> -> vector<16x8xf32>
    %635 = vector.extract_strided_slice %573 {offsets = [16, 0], sizes = [8, 32], strides = [1, 1]} : vector<32x32xf32> to vector<8x32xf32>
    %cst_278 = arith.constant dense<0.000000e+00> : vector<16x32xf32>
    %636 = tpu.matmul %634, %635, %cst_278 {dimension_numbers = #tpu.dot_dimension_numbers<[1], [0], [0], [1], [0, 0, 1, 1], [], []>} : vector<16x8xf32>, vector<8x32xf32>, vector<16x32xf32> -> vector<16x32xf32>
    %637 = arith.addf %616, %636 : vector<16x32xf32>
    %638 = vector.extract_strided_slice %559 {offsets = [0, 24], sizes = [16, 8], strides = [1, 1]} : vector<16x32xf32> to vector<16x8xf32>
    %639 = vector.extract_strided_slice %564 {offsets = [0, 24], sizes = [64, 8], strides = [1, 1]} : vector<64x32xf32> to vector<64x8xf32>
    %640 = tpu.transpose %639, [1, 0] : vector<64x8xf32> -> vector<8x64xf32>
    %cst_279 = arith.constant dense<0.000000e+00> : vector<16x64xf32>
    %641 = tpu.matmul %638, %640, %cst_279 {dimension_numbers = #tpu.dot_dimension_numbers<[1], [0], [0], [1], [0, 0, 1, 1], [], []>} : vector<16x8xf32>, vector<8x64xf32>, vector<16x64xf32> -> vector<16x64xf32>
    %642 = vector.broadcast %1 : vector<1x64xf32> to vector<16x64xf32>
    %643 = arith.addf %641, %642 : vector<16x64xf32>
    %cst_280 = arith.constant dense<0xFF800000> : vector<16xf32>
    %644 = vector.multi_reduction <maximumf>, %643, %cst_280 [1] : vector<16x64xf32> to vector<16xf32>
    %645 = vector.shape_cast %644 : vector<16xf32> to vector<16x1xf32>
    %646 = vector.broadcast %645 : vector<16x1xf32> to vector<16x64xf32>
    %647 = arith.subf %643, %646 : vector<16x64xf32>
    %648 = math.exp %647 : vector<16x64xf32>
    %cst_281 = arith.constant dense<0.000000e+00> : vector<16xf32>
    %649 = vector.multi_reduction <add>, %648, %cst_281 [1] : vector<16x64xf32> to vector<16xf32>
    %650 = vector.shape_cast %649 : vector<16xf32> to vector<16x1xf32>
    %651 = tpu.reciprocal %650 {approx = true} : vector<16x1xf32> -> vector<16x1xf32>
    %652 = vector.broadcast %651 : vector<16x1xf32> to vector<16x64xf32>
    %653 = arith.mulf %648, %652 : vector<16x64xf32>
    %654 = vector.extract_strided_slice %571 {offsets = [0, 24], sizes = [64, 8], strides = [1, 1]} : vector<64x32xf32> to vector<64x8xf32>
    %cst_282 = arith.constant dense<0.000000e+00> : vector<16x8xf32>
    %655 = tpu.matmul %653, %654, %cst_282 {dimension_numbers = #tpu.dot_dimension_numbers<[1], [0], [0], [1], [0, 0, 1, 1], [], []>} : vector<16x64xf32>, vector<64x8xf32>, vector<16x8xf32> -> vector<16x8xf32>
    %656 = vector.extract_strided_slice %573 {offsets = [24, 0], sizes = [8, 32], strides = [1, 1]} : vector<32x32xf32> to vector<8x32xf32>
    %cst_283 = arith.constant dense<0.000000e+00> : vector<16x32xf32>
    %657 = tpu.matmul %655, %656, %cst_283 {dimension_numbers = #tpu.dot_dimension_numbers<[1], [0], [0], [1], [0, 0, 1, 1], [], []>} : vector<16x8xf32>, vector<8x32xf32>, vector<16x32xf32> -> vector<16x32xf32>
    %658 = arith.addf %637, %657 : vector<16x32xf32>
    %659 = arith.addf %549, %658 : vector<16x32xf32>
    %c3_284 = arith.constant 3 : index
    %c0_285 = arith.constant 0 : index
    %c0_286 = arith.constant 0 : index
    %660 = vector.load %arg11[%c3_284, %c0_285, %c0_286] : memref<4x1x32xf32, #tpu.memory_space<vmem>>, vector<1x1x32xf32>
    %661 = vector.shape_cast %660 : vector<1x1x32xf32> to vector<1x32xf32>
    %662 = vector.broadcast %661 : vector<1x32xf32> to vector<16x32xf32>
    %663 = arith.addf %659, %662 : vector<16x32xf32>
    %c3_287 = arith.constant 3 : index
    %c0_288 = arith.constant 0 : index
    %c0_289 = arith.constant 0 : index
    %664 = vector.load %arg16[%c3_287, %c0_288, %c0_289] : memref<4x1x32xf32, #tpu.memory_space<vmem>>, vector<1x1x32xf32>
    %665 = vector.shape_cast %664 : vector<1x1x32xf32> to vector<1x32xf32>
    %c3_290 = arith.constant 3 : index
    %c0_291 = arith.constant 0 : index
    %c0_292 = arith.constant 0 : index
    %666 = vector.load %arg17[%c3_290, %c0_291, %c0_292] : memref<4x1x32xf32, #tpu.memory_space<vmem>>, vector<1x1x32xf32>
    %667 = vector.shape_cast %666 : vector<1x1x32xf32> to vector<1x32xf32>
    %cst_293 = arith.constant dense<0.000000e+00> : vector<16xf32>
    %668 = vector.multi_reduction <add>, %663, %cst_293 [1] : vector<16x32xf32> to vector<16xf32>
    %669 = vector.shape_cast %668 : vector<16xf32> to vector<16x1xf32>
    %cst_294 = arith.constant 3.200000e+01 : f32
    %670 = vector.broadcast %cst_294 : f32 to vector<16x1xf32>
    %671 = arith.divf %669, %670 : vector<16x1xf32>
    %672 = vector.broadcast %671 : vector<16x1xf32> to vector<16x32xf32>
    %673 = arith.subf %663, %672 : vector<16x32xf32>
    %674 = arith.mulf %673, %673 : vector<16x32xf32>
    %cst_295 = arith.constant dense<0.000000e+00> : vector<16xf32>
    %675 = vector.multi_reduction <add>, %674, %cst_295 [1] : vector<16x32xf32> to vector<16xf32>
    %676 = vector.shape_cast %675 : vector<16xf32> to vector<16x1xf32>
    %cst_296 = arith.constant 3.200000e+01 : f32
    %677 = vector.broadcast %cst_296 : f32 to vector<16x1xf32>
    %678 = arith.divf %676, %677 : vector<16x1xf32>
    %679 = vector.broadcast %671 : vector<16x1xf32> to vector<16x32xf32>
    %680 = arith.subf %663, %679 : vector<16x32xf32>
    %cst_297 = arith.constant 9.99999974E-6 : f32
    %681 = vector.broadcast %cst_297 : f32 to vector<16x1xf32>
    %682 = arith.addf %678, %681 : vector<16x1xf32>
    %683 = math.rsqrt %682 : vector<16x1xf32>
    %684 = vector.broadcast %683 : vector<16x1xf32> to vector<16x32xf32>
    %685 = arith.mulf %680, %684 : vector<16x32xf32>
    %686 = vector.broadcast %665 : vector<1x32xf32> to vector<16x32xf32>
    %687 = arith.mulf %685, %686 : vector<16x32xf32>
    %688 = vector.broadcast %667 : vector<1x32xf32> to vector<16x32xf32>
    %689 = arith.addf %687, %688 : vector<16x32xf32>
    %c3_298 = arith.constant 3 : index
    %c0_299 = arith.constant 0 : index
    %c0_300 = arith.constant 0 : index
    %690 = vector.load %arg12[%c3_298, %c0_299, %c0_300] : memref<4x32x64xf32, #tpu.memory_space<vmem>>, vector<1x32x64xf32>
    %691 = vector.shape_cast %690 : vector<1x32x64xf32> to vector<32x64xf32>
    %cst_301 = arith.constant dense<0.000000e+00> : vector<16x64xf32>
    %692 = tpu.matmul %689, %691, %cst_301 {dimension_numbers = #tpu.dot_dimension_numbers<[1], [0], [0], [1], [0, 0, 1, 1], [], []>} : vector<16x32xf32>, vector<32x64xf32>, vector<16x64xf32> -> vector<16x64xf32>
    %c3_302 = arith.constant 3 : index
    %c0_303 = arith.constant 0 : index
    %c0_304 = arith.constant 0 : index
    %693 = vector.load %arg13[%c3_302, %c0_303, %c0_304] : memref<4x1x64xf32, #tpu.memory_space<vmem>>, vector<1x1x64xf32>
    %694 = vector.shape_cast %693 : vector<1x1x64xf32> to vector<1x64xf32>
    %695 = vector.broadcast %694 : vector<1x64xf32> to vector<16x64xf32>
    %696 = arith.addf %692, %695 : vector<16x64xf32>
    %cst_305 = arith.constant 0.000000e+00 : f32
    %697 = vector.broadcast %cst_305 : f32 to vector<16x64xf32>
    %698 = arith.maximumf %696, %697 : vector<16x64xf32>
    %c3_306 = arith.constant 3 : index
    %c0_307 = arith.constant 0 : index
    %c0_308 = arith.constant 0 : index
    %699 = vector.load %arg14[%c3_306, %c0_307, %c0_308] : memref<4x64x32xf32, #tpu.memory_space<vmem>>, vector<1x64x32xf32>
    %700 = vector.shape_cast %699 : vector<1x64x32xf32> to vector<64x32xf32>
    %cst_309 = arith.constant dense<0.000000e+00> : vector<16x32xf32>
    %701 = tpu.matmul %698, %700, %cst_309 {dimension_numbers = #tpu.dot_dimension_numbers<[1], [0], [0], [1], [0, 0, 1, 1], [], []>} : vector<16x64xf32>, vector<64x32xf32>, vector<16x32xf32> -> vector<16x32xf32>
    %c3_310 = arith.constant 3 : index
    %c0_311 = arith.constant 0 : index
    %c0_312 = arith.constant 0 : index
    %702 = vector.load %arg15[%c3_310, %c0_311, %c0_312] : memref<4x1x32xf32, #tpu.memory_space<vmem>>, vector<1x1x32xf32>
    %703 = vector.shape_cast %702 : vector<1x1x32xf32> to vector<1x32xf32>
    %704 = vector.broadcast %703 : vector<1x32xf32> to vector<16x32xf32>
    %705 = arith.addf %701, %704 : vector<16x32xf32>
    %706 = arith.addf %689, %705 : vector<16x32xf32>
    %c3_313 = arith.constant 3 : index
    %c0_314 = arith.constant 0 : index
    %c0_315 = arith.constant 0 : index
    %707 = vector.load %arg18[%c3_313, %c0_314, %c0_315] : memref<4x1x32xf32, #tpu.memory_space<vmem>>, vector<1x1x32xf32>
    %708 = vector.shape_cast %707 : vector<1x1x32xf32> to vector<1x32xf32>
    %c3_316 = arith.constant 3 : index
    %c0_317 = arith.constant 0 : index
    %c0_318 = arith.constant 0 : index
    %709 = vector.load %arg19[%c3_316, %c0_317, %c0_318] : memref<4x1x32xf32, #tpu.memory_space<vmem>>, vector<1x1x32xf32>
    %710 = vector.shape_cast %709 : vector<1x1x32xf32> to vector<1x32xf32>
    %cst_319 = arith.constant dense<0.000000e+00> : vector<16xf32>
    %711 = vector.multi_reduction <add>, %706, %cst_319 [1] : vector<16x32xf32> to vector<16xf32>
    %712 = vector.shape_cast %711 : vector<16xf32> to vector<16x1xf32>
    %cst_320 = arith.constant 3.200000e+01 : f32
    %713 = vector.broadcast %cst_320 : f32 to vector<16x1xf32>
    %714 = arith.divf %712, %713 : vector<16x1xf32>
    %715 = vector.broadcast %714 : vector<16x1xf32> to vector<16x32xf32>
    %716 = arith.subf %706, %715 : vector<16x32xf32>
    %717 = arith.mulf %716, %716 : vector<16x32xf32>
    %cst_321 = arith.constant dense<0.000000e+00> : vector<16xf32>
    %718 = vector.multi_reduction <add>, %717, %cst_321 [1] : vector<16x32xf32> to vector<16xf32>
    %719 = vector.shape_cast %718 : vector<16xf32> to vector<16x1xf32>
    %cst_322 = arith.constant 3.200000e+01 : f32
    %720 = vector.broadcast %cst_322 : f32 to vector<16x1xf32>
    %721 = arith.divf %719, %720 : vector<16x1xf32>
    %722 = vector.broadcast %714 : vector<16x1xf32> to vector<16x32xf32>
    %723 = arith.subf %706, %722 : vector<16x32xf32>
    %cst_323 = arith.constant 9.99999974E-6 : f32
    %724 = vector.broadcast %cst_323 : f32 to vector<16x1xf32>
    %725 = arith.addf %721, %724 : vector<16x1xf32>
    %726 = math.rsqrt %725 : vector<16x1xf32>
    %727 = vector.broadcast %726 : vector<16x1xf32> to vector<16x32xf32>
    %728 = arith.mulf %723, %727 : vector<16x32xf32>
    %729 = vector.broadcast %708 : vector<1x32xf32> to vector<16x32xf32>
    %730 = arith.mulf %728, %729 : vector<16x32xf32>
    %731 = vector.broadcast %710 : vector<1x32xf32> to vector<16x32xf32>
    %732 = arith.addf %730, %731 : vector<16x32xf32>
    %c0_324 = arith.constant 0 : index
    %c0_325 = arith.constant 0 : index
    %c0_326 = arith.constant 0 : index
    %733 = vector.load %arg20[%c0_324, %c0_325, %c0_326] : memref<1x16x32xf32, #tpu.memory_space<vmem>>, vector<1x16x32xf32>
    %734 = vector.shape_cast %733 : vector<1x16x32xf32> to vector<16x32xf32>
    %735 = vector.shape_cast %732 : vector<16x32xf32> to vector<1x16x32xf32>
    tpu.vector_store %arg20[%c0_324, %c0_325, %c0_326], %735 {strides = array<i32>} : memref<1x16x32xf32, #tpu.memory_space<vmem>>, vector<1x16x32xf32>,
    return
  }
  func.func @transform_0(%arg0: i32) -> (i32, i32, i32) {
    %c0_i32 = arith.constant 0 : i32
    %c0_i32_0 = arith.constant 0 : i32
    %c0_i32_1 = arith.constant 0 : i32
    return %arg0, %c0_i32, %c0_i32_0 : i32, i32, i32
  }
  func.func @transform_1(%arg0: i32) -> (i32, i32, i32) {
    %c0_i32 = arith.constant 0 : i32
    %c0_i32_0 = arith.constant 0 : i32
    %c0_i32_1 = arith.constant 0 : i32
    return %arg0, %c0_i32, %c0_i32_0 : i32, i32, i32
  }
  func.func @transform_2(%arg0: i32) -> (i32, i32, i32) {
    %c0_i32 = arith.constant 0 : i32
    %c0_i32_0 = arith.constant 0 : i32
    %c0_i32_1 = arith.constant 0 : i32
    return %arg0, %c0_i32, %c0_i32_0 : i32, i32, i32
  }
  func.func @transform_3(%arg0: i32) -> (i32, i32, i32) {
    %c0_i32 = arith.constant 0 : i32
    %c0_i32_0 = arith.constant 0 : i32
    %c0_i32_1 = arith.constant 0 : i32
    return %arg0, %c0_i32, %c0_i32_0 : i32, i32, i32
  }
  func.func @transform_4(%arg0: i32) -> (i32, i32, i32) {
    %c0_i32 = arith.constant 0 : i32
    %c0_i32_0 = arith.constant 0 : i32
    %c0_i32_1 = arith.constant 0 : i32
    return %arg0, %c0_i32, %c0_i32_0 : i32, i32, i32
  }
  func.func @transform_5(%arg0: i32) -> (i32, i32, i32) {
    %c0_i32 = arith.constant 0 : i32
    %c0_i32_0 = arith.constant 0 : i32
    %c0_i32_1 = arith.constant 0 : i32
    %c0_i32_2 = arith.constant 0 : i32
    return %c0_i32, %c0_i32_0, %c0_i32_1 : i32, i32, i32
  }
  func.func @transform_6(%arg0: i32) -> (i32, i32, i32) {
    %c0_i32 = arith.constant 0 : i32
    %c0_i32_0 = arith.constant 0 : i32
    %c0_i32_1 = arith.constant 0 : i32
    %c0_i32_2 = arith.constant 0 : i32
    return %c0_i32, %c0_i32_0, %c0_i32_1 : i32, i32, i32
  }
  func.func @transform_7(%arg0: i32) -> (i32, i32, i32) {
    %c0_i32 = arith.constant 0 : i32
    %c0_i32_0 = arith.constant 0 : i32
    %c0_i32_1 = arith.constant 0 : i32
    %c0_i32_2 = arith.constant 0 : i32
    return %c0_i32, %c0_i32_0, %c0_i32_1 : i32, i32, i32
  }
  func.func @transform_8(%arg0: i32) -> (i32, i32, i32) {
    %c0_i32 = arith.constant 0 : i32
    %c0_i32_0 = arith.constant 0 : i32
    %c0_i32_1 = arith.constant 0 : i32
    %c0_i32_2 = arith.constant 0 : i32
    return %c0_i32, %c0_i32_0, %c0_i32_1 : i32, i32, i32
  }
  func.func @transform_9(%arg0: i32) -> (i32, i32, i32) {
    %c0_i32 = arith.constant 0 : i32
    %c0_i32_0 = arith.constant 0 : i32
    %c0_i32_1 = arith.constant 0 : i32
    %c0_i32_2 = arith.constant 0 : i32
    return %c0_i32, %c0_i32_0, %c0_i32_1 : i32, i32, i32
  }
  func.func @transform_10(%arg0: i32) -> (i32, i32, i32) {
    %c0_i32 = arith.constant 0 : i32
    %c0_i32_0 = arith.constant 0 : i32
    %c0_i32_1 = arith.constant 0 : i32
    %c0_i32_2 = arith.constant 0 : i32
    return %c0_i32, %c0_i32_0, %c0_i32_1 : i32, i32, i32
  }
  func.func @transform_11(%arg0: i32) -> (i32, i32, i32) {
    %c0_i32 = arith.constant 0 : i32
    %c0_i32_0 = arith.constant 0 : i32
    %c0_i32_1 = arith.constant 0 : i32
    %c0_i32_2 = arith.constant 0 : i32
    return %c0_i32, %c0_i32_0, %c0_i32_1 : i32, i32, i32
  }
  func.func @transform_12(%arg0: i32) -> (i32, i32, i32) {
    %c0_i32 = arith.constant 0 : i32
    %c0_i32_0 = arith.constant 0 : i32
    %c0_i32_1 = arith.constant 0 : i32
    %c0_i32_2 = arith.constant 0 : i32
    return %c0_i32, %c0_i32_0, %c0_i32_1 : i32, i32, i32
  }
  func.func @transform_13(%arg0: i32) -> (i32, i32, i32) {
    %c0_i32 = arith.constant 0 : i32
    %c0_i32_0 = arith.constant 0 : i32
    %c0_i32_1 = arith.constant 0 : i32
    %c0_i32_2 = arith.constant 0 : i32
    return %c0_i32, %c0_i32_0, %c0_i32_1 : i32, i32, i32
  }
  func.func @transform_14(%arg0: i32) -> (i32, i32, i32) {
    %c0_i32 = arith.constant 0 : i32
    %c0_i32_0 = arith.constant 0 : i32
    %c0_i32_1 = arith.constant 0 : i32
    %c0_i32_2 = arith.constant 0 : i32
    return %c0_i32, %c0_i32_0, %c0_i32_1 : i32, i32, i32
  }
  func.func @transform_15(%arg0: i32) -> (i32, i32, i32) {
    %c0_i32 = arith.constant 0 : i32
    %c0_i32_0 = arith.constant 0 : i32
    %c0_i32_1 = arith.constant 0 : i32
    %c0_i32_2 = arith.constant 0 : i32
    return %c0_i32, %c0_i32_0, %c0_i32_1 : i32, i32, i32
  }
  func.func @transform_16(%arg0: i32) -> (i32, i32, i32) {
    %c0_i32 = arith.constant 0 : i32
    %c0_i32_0 = arith.constant 0 : i32
    %c0_i32_1 = arith.constant 0 : i32
    %c0_i32_2 = arith.constant 0 : i32
    return %c0_i32, %c0_i32_0, %c0_i32_1 : i32, i32, i32
  }
  func.func @transform_17(%arg0: i32) -> (i32, i32, i32) {
    %c0_i32 = arith.constant 0 : i32
    %c0_i32_0 = arith.constant 0 : i32
    %c0_i32_1 = arith.constant 0 : i32
    %c0_i32_2 = arith.constant 0 : i32
    return %c0_i32, %c0_i32_0, %c0_i32_1 : i32, i32, i32
  }
  func.func @transform_18(%arg0: i32) -> (i32, i32, i32) {
    %c0_i32 = arith.constant 0 : i32
    %c0_i32_0 = arith.constant 0 : i32
    %c0_i32_1 = arith.constant 0 : i32
    %c0_i32_2 = arith.constant 0 : i32
    return %c0_i32, %c0_i32_0, %c0_i32_1 : i32, i32, i32
  }
  func.func @transform_19(%arg0: i32) -> (i32, i32, i32) {
    %c0_i32 = arith.constant 0 : i32
    %c0_i32_0 = arith.constant 0 : i32
    %c0_i32_1 = arith.constant 0 : i32
    return %arg0, %c0_i32, %c0_i32_0 : i32, i32, i32
  }
}

</mosaic_0001>

<bundles_post_ra>
// kernel: pallas_forward.1
= control target key start
LH: loop header
LB: loop body
LE: loop exit
PB: predicated region body
PF: predicated region fallthrough
CT: control target
= control target key end

     0   :  { %s17223_s0 = inlined_call_operand.vmem [shape: f32[2,16,32], index: 0, kind: input, shape index: {}]   ;;  %s17224_s1 = inlined_call_operand.vmem [shape: f32[2,16,32], index: 1, kind: input, shape index: {}]   ;;  %s17225_s2 = inlined_call_operand.vmem [shape: f32[2,64,32], index: 2, kind: input, shape index: {}]   ;;  %s17226_s3 = inlined_call_operand.vmem [shape: f32[2,64,32], index: 3, kind: input, shape index: {}]   ;;  %s17227_s4 = inlined_call_operand.vmem [shape: f32[2,1,64], index: 4, kind: input, shape index: {}]   ;;  %s17228_s5 = inlined_call_operand.vmem [shape: f32[4,32,64], index: 5, kind: input, shape index: {}]   ;;  %s17229_s6 = inlined_call_operand.vmem [shape: f32[4,1,64], index: 6, kind: input, shape index: {}]   ;;  %s17230_s7 = inlined_call_operand.vmem [shape: f32[4,32,32], index: 7, kind: input, shape index: {}]   ;;  %s17231_s8 = inlined_call_operand.vmem [shape: f32[4,1,32], index: 8, kind: input, shape index: {}]   ;;  %s17232_s9 = inlined_call_operand.vmem [shape: f32[4,32,32], index: 9, kind: input, shape index: {}]   ;;  %s17233_s10 = inlined_call_operand.vmem [shape: f32[4,1,32], index: 10, kind: input, shape index: {}]   ;;  %s17234_s11 = inlined_call_operand.vmem [shape: f32[4,32,64], index: 11, kind: input, shape index: {}]   ;;  %s17235_s12 = inlined_call_operand.vmem [shape: f32[4,1,64], index: 12, kind: input, shape index: {}]   ;;  %s17236_s13 = inlined_call_operand.vmem [shape: f32[4,64,32], index: 13, kind: input, shape index: {}]   ;;  %s17237_s14 = inlined_call_operand.vmem [shape: f32[4,1,32], index: 14, kind: input, shape index: {}]   ;;  %s17238_s15 = inlined_call_operand.vmem [shape: f32[4,1,32], index: 15, kind: input, shape index: {}]   ;;  %s17239_s16 = inlined_call_operand.vmem [shape: f32[4,1,32], index: 16, kind: input, shape index: {}]   ;;  %s17240_s17 = inlined_call_operand.vmem [shape: f32[4,1,32], index: 17, kind: input, shape index: {}]   ;;  %s17241_s18 = inlined_call_operand.vmem [shape: f32[4,1,32], index: 18, kind: input, shape index: {}]   ;;  %s17242_s19 = inlined_call_operand.hbm [shape: f32[2,16,32], index: 19, kind: output, shape index: {}]  }
   0x1   :  { %17268 = sst [smem:[#allocation14_spill]] %s17223_s0 }
   0x2   :  { %17269 = sst [smem:[#allocation15_spill]] %s17224_s1 }
   0x3   :  { %17270 = sst [smem:[#allocation16_spill]] %s17225_s2 }
   0x4   :  { %17271 = sst [smem:[#allocation17_spill]] %s17226_s3 }
   0x5   :  { %17272 = sst [smem:[#allocation18_spill]] %s17227_s4 }
   0x6   :  { %17273 = sst [smem:[#allocation19_spill]] %s17242_s19 }
   0x7   :  { %24 = vsyncpa [#allocation3], 0 }
   0x8   :  { %26 = vsyncpa [#allocation3 + $0x1], 0  ;;  %s14025_s0 = smov 0   ;;  %s14027_s30 = smov 0  }
   0x9   :  { %s14029_s20 = smov 0   ;;  %s14031_s21 = smov 0  }
   0xa LB: > { %17274 = sst [smem:[#allocation5_spill]] %s13901_s0  ;;  %s14046_s1 = sadd.s32 4294967295, %s13913_s21   ;;  %s13913_s21 = sphi %s14031_s21, %s17305_s21   ;;  %s13909_s20 = sphi %s14029_s20, %s17308_s20   ;;  %s13905_s30 = sphi %s14027_s30, %s17307_s30   ;;  %s13901_s0 = sphi %s14025_s0, %s17306_s0  }
   0xb   : > { %17275 = sst [smem:[#allocation6_spill]] %s13905_s30  ;;  %s10787_s22 = sadd.s32 4294967294, %s13913_s21  }
   0xc   : > { %17276 = sst [smem:[#allocation7_spill]] %s13909_s20  ;;  %s14050_s2 = sadd.s32 1, %s13913_s21  }
   0xd   : > { %17277 = sst [smem:[#allocation8_spill]] %s13913_s21  ;;  %s463_s23 = sadd.s32 1, %s13909_s20 }
   0xe   : > { %17278 = sst [smem:[#allocation9_spill]] %s14046_s1  ;;  %s460_s24 = ssub.s32 %s13913_s21, %s14050_s2 }
   0xf   : > { %17279 = sst [smem:[#allocation10_spill]] %s14050_s2  ;;  %p473_p0 = scmp.ne.s32.totalorder %s13909_s20, %s13905_s30 }
  0x10   : > { %p461_p1 = scmp.eq.s32.totalorder %s460_s24, 0  ;;  %p474_p2 = scmp.eq.s32.totalorder %s14046_s1, 1 }
  0x11   : > { %p479_p3 = scmp.ne.s32.totalorder %s13905_s30, %s13901_s0  ;;  %p480_p4 = scmp.eq.s32.totalorder %s10787_s22, 1 }
  0x12   : > { %s14061_s25 = scalar_select %p461_p1, %s13909_s20, %s463_s23  }
  0x13   : > { %p14063_p5 = por %p474_p2, %p473_p0  ;;  %p14067_p6 = por %p480_p4, %p479_p3 }
  0x14   : > { %17280 = sst [smem:[#allocation11_spill]] %s14061_s25  ;;  %p10790_p7 = scmp.ge.s32.totalorder %s13913_s21, 1 }
  0x15   : > { %s17281_s3 = scalar_select %p14063_p5, 1, 0 }
  0x16   : > { %s17283_s26 = scalar_select %p14067_p6, 1, 0 }
  0x17   : > { %17282 = sst [smem:[#allocation12_spill]] %s17281_s3  ;;  %p578_p8 = scmp.lt.s32.totalorder %s13913_s21, 3 }
  0x18   : > { %17284 = sst [smem:[#allocation13_spill]] %s17283_s26 }
  0x19   : > { %p579_p9 = pnand %p10790_p7, %p578_p8 }
  0x1a   : > { %p652_p10 = scmp.lt.s32.totalorder (!%p579_p9), %s14046_s1, 1  ;;  %s17285_s27 = sld [smem:[#allocation16_spill]] (!%p579_p9) }
  0x1b   : > { %582 = sbr.rel (%p579_p9) target bundleno = 16304 (0x3fb0), region = 96  ;;  %s17286_s19 = sld [smem:[#allocation17_spill]] (!%p579_p9) }
  0x1c   : > { %s17262_s21 = smov (!%p579_p9), 96   ;;  %s17260_s2 = smov (!%p579_p9), 88  }
  0x1d   : > { %s17287_s4 = sld [smem:[#allocation18_spill]] (!%p579_p9)  ;;  %s17258_s23 = smov (!%p579_p9), 120  }
  0x1e   : > { %s17256_s24 = smov (!%p579_p9), 80   ;;  %s17252_s25 = smov (!%p579_p9), 72  }
  0x1f   : > { %s17296_s3 = sld [smem:[#allocation15_spill]] (!%p579_p9) }
  0x20   : > { %v703_v0 = vld [vmem:[%s17228_s5 + $0x18] sm:$0xff]  ;;  %v702_v1 = vld [vmem:[%s17228_s5 + $0x10] sm:$0xff]  ;;  %v701_v4 = vld [vmem:[%s17228_s5 + $0x8] sm:$0xff]  ;;  %s14090_s28 = scalar_select %p652_p10, %s14046_s1, 1  ;;  %vm711_vm0 = vcmask 261120   ;;  %vm1015_vm1 = vcmask 64512  }
  0x21   : > { %12130 = vmatprep.subr.mxu0 %v703_v0  ;;  %v844_v2 = vld [vmem:[%s17230_s7 + $0x18] sm:$0xff]  ;;  %v843_v3 = vld [vmem:[%s17230_s7 + $0x10] sm:$0xff]  ;;  %v842_v5 = vld [vmem:[%s17230_s7 + $0x8] sm:$0xff]  ;;  %vm1153_vm2 = vcmask 523264   ;;  %s17300_s30 = sld [smem:[#allocation19_spill]] }
  0x22   : > { %12131 = vmatpush3.msra.mxu0 %v703_v0  ;;  %12150 = vmatprep.subr.mxu1 %v844_v2  ;;  %v700_v6 = vld [vmem:[%s17228_s5] sm:$0xff]  ;;  %s11419_s20 = sshll.u32 %s14090_s28, 6 }
  0x23   : > { %12132 = vmatprep.subr.mxu0 %v702_v1  ;;  %12151 = vmatpush3.msra.mxu1 %v844_v2  ;;  %s14102_s26 = scalar_lea.vmem %s17285_s27, %s11419_s20  ;;  %s14107_s29 = scalar_lea.vmem %s17286_s19, %s11419_s20  ;;  %v841_v7 = vld [vmem:[%s17230_s7] sm:$0xff] }
  0x24   : > { %12133 = vmatpush3.msra.mxu0 %v702_v1  ;;  %12152 = vmatprep.subr.mxu1 %v843_v3  ;;  %v676_v8 = vld [vmem:[%s14102_s26] sm:$0xff]  ;;  %v677_v10 = vld [vmem:[%s14102_s26 + $0x8] sm:$0xff]  ;;  %v678_v13 = vld [vmem:[%s14102_s26 + $0x10] sm:$0xff]  ;;  %s14262_s22 = scalar_lea.vmem %s17287_s4, %s14090_s28  ;;  %s17254_s20 = smov 112  }
  0x25   : > { %12134 = vmatprep.subr.mxu0 %v701_v4  ;;  %12153 = vmatpush3.msra.mxu1 %v843_v3  ;;  %v684_v9 = vld [vmem:[%s14107_s29] sm:$0xff]  ;;  %v685_v12 = vld [vmem:[%s14107_s29 + $0x8] sm:$0xff]  ;;  %v686_v14 = vld [vmem:[%s14107_s29 + $0x10] sm:$0xff]  ;;  %s17250_s27 = smov 104   ;;  %s17293_s19 = smov 72  }
  0x26   : > { %12135 = vmatpush3.msra.mxu0 %v701_v4  ;;  %12154 = vmatprep.subr.mxu1 %v842_v5  ;;  %v692_v11 = vadd.f32 %v684_v9, %v676_v8  ;;  %v693_v15 = vadd.f32 %v685_v12, %v677_v10  ;;  %v694_v16 = vadd.f32 %v686_v14, %v678_v13  ;;  %v679_v17 = vld [vmem:[%s14102_s26 + $0x18] sm:$0xff]  ;;  %v680_v19 = vld [vmem:[%s14102_s26 + $0x20] sm:$0xff]  ;;  %v681_v23 = vld [vmem:[%s14102_s26 + $0x28] sm:$0xff]  ;;  %s17297_s4 = sld [smem:[#allocation6_spill]] }
  0x27   : > { %12136 = vmatprep.subr.mxu0 %v700_v6  ;;  %12155 = vmatpush3.msra.mxu1 %v842_v5  ;;  %v687_v18 = vld [vmem:[%s14107_s29 + $0x18] sm:$0xff]  ;;  %v688_v20 = vld [vmem:[%s14107_s29 + $0x20] sm:$0xff]  ;;  %v689_v24 = vld [vmem:[%s14107_s29 + $0x28] sm:$0xff] }
  0x28   : > { %12137 = vmatpush3.msra.mxu0 %v700_v6  ;;  %12156 = vmatprep.subr.mxu1 %v841_v7  ;;  %v695_v21 = vadd.f32 %v687_v18, %v679_v17  ;;  %v696_v22 = vadd.f32 %v688_v20, %v680_v19  ;;  %v682_v25 = vld [vmem:[%s14102_s26 + $0x30] sm:$0xff]  ;;  %v697_v27 = vadd.f32 %v689_v24, %v681_v23  ;;  %v683_v29 = vld [vmem:[%s14102_s26 + $0x38] sm:$0xff]  ;;  %v10800_v34 = vld [vmem:[%s17229_s6] ss:$0 sm:$0xff] }
  0x29   : > { %12138 = vmatprep.mubr.msk.f32.mxu0 %vm711_vm0, %v692_v11  ;;  %12157 = vmatpush3.msra.mxu1 %v841_v7  ;;  %v690_v26 = vld [vmem:[%s14107_s29 + $0x30] sm:$0xff]  ;;  %v691_v30 = vld [vmem:[%s14107_s29 + $0x38] sm:$0xff]  ;;  %v10809_v46 = vld [vmem:[%s17231_s8] ss:$0 sm:$0xff] }
  0x2a   : > { %12139 = vmatmul.mubr.msk.f32.vlgmr.msra.gmra.mxu0 %vm711_vm0, %v693_v15  ;;  %12158 = vmatprep.mubr.msk.f32.mxu1 %vm711_vm0, %v676_v8  ;;  %v698_v28 = vadd.f32 %v690_v26, %v682_v25  ;;  %v699_v31 = vadd.f32 %v691_v30, %v683_v29  ;;  %v14265_v11 = vld [vmem:[%s14262_s22] ss:$0 sm:$0xff] }
  0x2b   : > { %12141 = vmatprep.mubr.msk.f32.mxu0 %vm711_vm0, %v694_v16  ;;  %12159 = vmatmul.mubr.msk.f32.vlgmr.msra.gmra.mxu1 %vm711_vm0, %v677_v10 }
  0x2c   : > { %12161 = vmatprep.mubr.msk.f32.mxu1 %vm711_vm0, %v678_v13 }
  0x2e   : > { %12142 = vmatmul.mubr.msk.f32.gmra.mxu0 %vm711_vm0, %v695_v21 }
  0x2f   : > { %12144 = vmatprep.mubr.msk.f32.mxu0 %vm711_vm0, %v696_v22  ;;  %12162 = vmatmul.mubr.msk.f32.gmra.mxu1 %vm711_vm0, %v679_v17 }
  0x30   : > { %12164 = vmatprep.mubr.msk.f32.mxu1 %vm711_vm0, %v680_v19 }
  0x32   : > { %12145 = vmatmul.mubr.msk.f32.gmra.mxu0 %vm711_vm0, %v697_v27 }
  0x33   : > { %12147 = vmatprep.mubr.msk.f32.mxu0 %vm711_vm0, %v698_v28  ;;  %12165 = vmatmul.mubr.msk.f32.gmra.mxu1 %vm711_vm0, %v681_v23 }
  0x34   : > { %12167 = vmatprep.mubr.msk.f32.mxu1 %vm711_vm0, %v682_v25 }
  0x36   : > { %12148 = vmatmul.mubr.msk.f32.gmra.mxu0 %vm711_vm0, %v699_v31 }
  0x37   : > { %12168 = vmatmul.mubr.msk.f32.gmra.mxu1 %vm711_vm0, %v683_v29 }
  0xea   : > { %v12140_v32 = vpop.f32.mrf.mxu0 }
  0xeb   : > { %v12160_v33 = vpop.f32.mrf.mxu1  ;;  %v14197_v62 = vadd.f32 %v12140_v32, %v10800_v34 }
  0xec   : > { %v802_v35 = vpop.f32.mrf.mxu0  ;;  %v14207_v0 = vadd.f32 %v12160_v33, %v10809_v46 }
  0xed   : > { %v14147_v36 = vadd.f32 %v10800_v34, %v802_v35  ;;  %v942_v37 = vpop.f32.mrf.mxu1 }
  0xee   : > { %v12143_v38 = vpop.f32.mrf.mxu0  ;;  %v14211_v1 = vadd.f32 %v10809_v46, %v942_v37 }
  0xef   : > { %12186 = vmatprep.mubr.msk.f32.mxu0 %vm1015_vm1, %v14147_v36  ;;  %v12163_v39 = vpop.f32.mrf.mxu1  ;;  %v14186_v60 = vadd.f32 %v12143_v38, %v10800_v34 }
  0xf0   : > { %v812_v40 = vpop.f32.mrf.mxu0  ;;  %v14189_v61 = vadd.f32 %v12163_v39, %v10809_v46 }
  0xf1   : > { %v952_v41 = vpop.f32.mrf.mxu1  ;;  %v14171_v56 = vadd.f32 %v10800_v34, %v812_v40 }
  0xf2   : > { %v12146_v42 = vpop.f32.mrf.mxu0  ;;  %v14199_v63 = vadd.f32 %v10809_v46, %v952_v41 }
  0xf3   : > { %v14151_v43 = vadd.f32 %v12146_v42, %v10800_v34  ;;  %v12166_v44 = vpop.f32.mrf.mxu1 }
  0xf4   : > { %v822_v45 = vpop.f32.mrf.mxu0  ;;  %v14175_v58 = vadd.f32 %v12166_v44, %v10809_v46 }
  0xf5   : > { %1009 = vrot.lane.b32.xlu1 %v14151_v43, %s17262_s21  ;;  %v962_v47 = vpop.f32.mrf.mxu1  ;;  %v14158_v49 = vadd.f32 %v10800_v34, %v822_v45 }
  0xf6   : > { %v12149_v48 = vpop.f32.mrf.mxu0  ;;  %v14183_v59 = vadd.f32 %v10809_v46, %v962_v47 }
  0xf7   : > { %v14160_v50 = vadd.f32 %v12149_v48, %v10800_v34  ;;  %v12169_v51 = vpop.f32.mrf.mxu1 }
  0xf8   : > { %v832_v52 = vpop.f32.mrf.mxu0  ;;  %v14162_v53 = vadd.f32 %v12169_v51, %v10809_v46 }
  0xf9   : > { %1013 = vrot.lane.b32.xlu0 %v14160_v50, %s17262_s21  ;;  %1007 = vrot.lane.b32.xlu1 %v14158_v49, %s17262_s21  ;;  %v972_v54 = vpop.f32.mrf.mxu1  ;;  %v14173_v57 = vadd.f32 %v10800_v34, %v832_v52 }
  0xfa   : > { %v14168_v55 = vadd.f32 %v10809_v46, %v972_v54  ;;  %12198 = vmatprep.subr.mxu1 %v14162_v53 }
  0xfb   : > { %12199 = vmatpush3.msra.mxu1 %v14162_v53 }
  0xfc   : > { %12200 = vmatprep.subr.mxu1 %v14168_v55 }
  0xfd   : > { %1011 = vrot.lane.b32.xlu0 %v14173_v57, %s17262_s21  ;;  %1003 = vrot.lane.b32.xlu1 %v14171_v56, %s17262_s21 }
  0xfe   : > { %12201 = vmatpush3.msra.mxu1 %v14168_v55 }
  0xff   : > { %12202 = vmatprep.subr.mxu1 %v14175_v58 }
 0x100   : > { %12203 = vmatpush3.msra.mxu1 %v14175_v58 }
 0x101   : > { %1005 = vrot.lane.b32.xlu0 %v14186_v60, %s17262_s21  ;;  %999 = vrot.lane.b32.xlu1 %v14147_v36, %s17262_s21 }
 0x102   : > { %12204 = vmatprep.subr.mxu1 %v14183_v59 }
 0x103   : > { %12205 = vmatpush3.msra.mxu1 %v14183_v59 }
 0x104   : > { %12206 = vmatprep.subr.mxu1 %v14189_v61 }
 0x105   : > { %1001 = vrot.lane.b32.xlu0 %v14197_v62, %s17262_s21  ;;  %1401 = vrot.lane.b32.xlu1 %v14160_v50, %s17260_s2  ;;  %s17288_s21 = smov 96  }
 0x106   : > { %12207 = vmatpush3.msra.mxu1 %v14189_v61 }
 0x107   : > { %12208 = vmatprep.subr.mxu1 %v14199_v63 }
 0x108   : > { %12209 = vmatpush3.msra.mxu1 %v14199_v63 }
 0x109   : > { %1399 = vrot.lane.b32.xlu0 %v14173_v57, %s17260_s2  ;;  %1397 = vrot.lane.b32.xlu1 %v14151_v43, %s17260_s2 }
 0x10a   : > { %12210 = vmatprep.subr.mxu1 %v14207_v0 }
 0x10b   : > { %12211 = vmatpush3.msra.mxu1 %v14207_v0 }
 0x10c   : > { %12212 = vmatprep.subr.mxu1 %v14211_v1 }
 0x10d   : > { %1395 = vrot.lane.b32.xlu1 %v14158_v49, %s17260_s2  ;;  %12213 = vmatpush3.msra.mxu1 %v14211_v1 }
 0x167   : > { %v1010_v2 = vpop.permute.xlu1 %1009 }
 0x16b   : > { %v1014_v3 = vpop.permute.xlu0 %1013  ;;  %v1008_v4 = vpop.permute.xlu1 %1007 }
 0x16c   : > { %12170 = vmatprep.subr.msk.mxu0 %vm1015_vm1, %v1014_v3 }
 0x16d   : > { %12171 = vmatpush3.xpose.msk.msra.mxu0 %vm1015_vm1, %v1014_v3 }
 0x16f   : > { %v1012_v5 = vpop.permute.xlu0 %1011  ;;  %v1004_v6 = vpop.permute.xlu1 %1003 }
 0x170   : > { %12172 = vmatprep.subr.msk.mxu0 %vm1015_vm1, %v1012_v5 }
 0x171   : > { %12173 = vmatpush3.xpose.msk.msra.mxu0 %vm1015_vm1, %v1012_v5 }
 0x172   : > { %12174 = vmatprep.subr.msk.mxu0 %vm1015_vm1, %v1010_v2 }
 0x173   : > { %v1000_v7 = vpop.permute.xlu1 %999  ;;  %v1006_v9 = vpop.permute.xlu0 %1005 }
 0x175   : > { %12175 = vmatpush3.xpose.msk.msra.mxu0 %vm1015_vm1, %v1010_v2 }
 0x176   : > { %12176 = vmatprep.subr.msk.mxu0 %vm1015_vm1, %v1008_v4 }
 0x177   : > { %v14231_v8 = vpop.permute.xlu1 %1401  ;;  %v1002_v10 = vpop.permute.xlu0 %1001 }
 0x178   : > { %12226 = vmatprep.subr.msk.mxu1 %vm1015_vm1, %v14231_v8 }
 0x179   : > { %12177 = vmatpush3.xpose.msk.msra.mxu0 %vm1015_vm1, %v1008_v4 }
 0x17a   : > { %12178 = vmatprep.subr.msk.mxu0 %vm1015_vm1, %v1006_v9 }
 0x17b   : > { %v14287_v37 = vpop.permute.xlu1 %1397  ;;  %v14291_v39 = vpop.permute.xlu0 %1399 }
 0x17d   : > { %12179 = vmatpush3.xpose.msk.msra.mxu0 %vm1015_vm1, %v1006_v9 }
 0x17e   : > { %12180 = vmatprep.subr.msk.mxu0 %vm1015_vm1, %v1004_v6 }
 0x17f   : > { %v14289_v38 = vpop.permute.xlu1 %1395 }
 0x181   : > { %12181 = vmatpush3.xpose.msk.msra.mxu0 %vm1015_vm1, %v1004_v6 }
 0x182   : > { %12182 = vmatprep.subr.msk.mxu0 %vm1015_vm1, %v1002_v10 }
 0x185   : > { %12183 = vmatpush3.xpose.msk.msra.mxu0 %vm1015_vm1, %v1002_v10 }
 0x186   : > { %12184 = vmatprep.subr.msk.mxu0 %vm1015_vm1, %v1000_v7 }
 0x189   : > { %12185 = vmatpush3.xpose.msk.msra.mxu0 %vm1015_vm1, %v1000_v7 }
 0x18c   : > { %12187 = vmatmul.mubr.msk.f32.vlgmr.msra.gmra.mxu0 %vm1015_vm1, %v14197_v62 }
 0x18d   : > { %12189 = vmatprep.mubr.msk.f32.mxu0 %vm1015_vm1, %v14171_v56 }
 0x190   : > { %12190 = vmatmul.mubr.msk.f32.gmra.mxu0 %vm1015_vm1, %v14186_v60 }
 0x191   : > { %12192 = vmatprep.mubr.msk.f32.mxu0 %vm1015_vm1, %v14158_v49 }
 0x194   : > { %12193 = vmatmul.mubr.msk.f32.gmra.mxu0 %vm1015_vm1, %v14151_v43 }
 0x195   : > { %12195 = vmatprep.mubr.msk.f32.mxu0 %vm1015_vm1, %v14173_v57 }
 0x198   : > { %12196 = vmatmul.mubr.msk.f32.gmra.mxu0 %vm1015_vm1, %v14160_v50 }
 0x24c   : > { %v12188_v12 = vpop.f32.mrf.mxu0 }
 0x24d   : > { %v1120_v13 = vadd.f32 %v12188_v12, %v14265_v11 }
 0x24e   : > { %v1114_v14 = vpop.f32.mrf.mxu0 }
 0x24f   : > { %v1115_v15 = vadd.f32 %v14265_v11, %v1114_v14  ;;  %v1157_v16 = vsel %vm1153_vm2, %v1120_v13, -inf }
 0x250   : > { %1158 = vmax.xlane.f32.xlu1 %v1157_v16  ;;  %v12191_v17 = vpop.f32.mrf.mxu0 }
 0x251   : > { %v1130_v18 = vadd.f32 %v12191_v17, %v14265_v11  ;;  %v1154_v19 = vsel %vm1153_vm2, %v1115_v15, -inf }
 0x252   : > { %v1124_v20 = vpop.f32.mrf.mxu0  ;;  %1155 = vmax.xlane.f32.xlu0 %v1154_v19 }
 0x253   : > { %v1125_v22 = vadd.f32 %v14265_v11, %v1124_v20  ;;  %v1163_v23 = vsel %vm1153_vm2, %v1130_v18, -inf }
 0x254   : > { %v12194_v21 = vpop.f32.mrf.mxu0 }
 0x255   : > { %v1140_v27 = vadd.f32 %v12194_v21, %v14265_v11  ;;  %v1160_v29 = vsel %vm1153_vm2, %v1125_v22, -inf }
 0x256   : > { %v1134_v24 = vpop.f32.mrf.mxu0  ;;  %1164 = vmax.xlane.f32.xlu0 %v1163_v23 }
 0x257   : > { %v1135_v25 = vadd.f32 %v14265_v11, %v1134_v24  ;;  %v1169_v34 = vsel %vm1153_vm2, %v1140_v27, -inf }
 0x258   : > { %v12197_v26 = vpop.f32.mrf.mxu0 }
 0x259   : > { %v1166_v28 = vsel %vm1153_vm2, %v1135_v25, -inf  ;;  %v1150_v32 = vadd.f32 %v12197_v26, %v14265_v11 }
 0x25a   : > { %v1144_v30 = vpop.f32.mrf.mxu0  ;;  %1167 = vmax.xlane.f32.xlu1 %v1166_v28  ;;  %1161 = vmax.xlane.f32.xlu0 %v1160_v29 }
 0x25b   : > { %v1145_v31 = vadd.f32 %v14265_v11, %v1144_v30  ;;  %v1175_v35 = vsel %vm1153_vm2, %v1150_v32, -inf }
 0x25d   : > { %v1172_v33 = vsel %vm1153_vm2, %v1145_v31, -inf }
 0x25e   : > { %1173 = vmax.xlane.f32.xlu1 %v1172_v33  ;;  %1170 = vmax.xlane.f32.xlu0 %v1169_v34 }
 0x262   : > { %1176 = vmax.xlane.f32.xlu0 %v1175_v35 }
 0x26f   : > { %1391 = vrot.lane.b32.xlu1 %v14171_v56, %s17260_s2 }
 0x278   : > { %1393 = vrot.lane.b32.xlu0 %v14186_v60, %s17260_s2 }
 0x2d9   : > { %v1159_v40 = vpop.xlane.xlu1 %1158 }
 0x2da   : > { %v1179_v41 = vsub.f32 %v1120_v13, %v1159_v40 }
 0x2db   : > { %v1156_v42 = vpop.xlane.xlu0 %1155 }
 0x2dc   : > { %v1188_v44 = vmul.f32 1.442695, %v1179_v41  ;;  %v1178_v45 = vsub.f32 %v1115_v15, %v1156_v42 }
 0x2de   : > { %13420 = vpow2.f32 %v1188_v44  ;;  %v1186_v46 = vmul.f32 1.442695, %v1178_v45 }
 0x2df   : > { %v1165_v54 = vpop.xlane.xlu0 %1164 }
 0x2e0   : > { %13422 = vpow2.f32 %v1186_v46  ;;  %v1181_v4 = vsub.f32 %v1130_v18, %v1165_v54 }
 0x2e2   : > { %v1192_v7 = vmul.f32 1.442695, %v1181_v4 }
 0x2e3   : > { %v1162_v2 = vpop.xlane.xlu0 %1161  ;;  %v1168_v5 = vpop.xlane.xlu1 %1167 }
 0x2e4   : > { %v1180_v6 = vsub.f32 %v1125_v22, %v1162_v2  ;;  %v1182_v12 = vsub.f32 %v1135_v25, %v1168_v5  ;;  %13424 = vpow2.f32 %v1192_v7 }
 0x2e6   : > { %v1190_v13 = vmul.f32 1.442695, %v1180_v6  ;;  %v1194_v17 = vmul.f32 1.442695, %v1182_v12 }
 0x2e7   : > { %v1171_v3 = vpop.xlane.xlu0 %1170  ;;  %v1174_v14 = vpop.xlane.xlu1 %1173 }
 0x2e8   : > { %v1183_v9 = vsub.f32 %v1140_v27, %v1171_v3  ;;  %13426 = vpow2.f32 %v1190_v13  ;;  %v1184_v19 = vsub.f32 %v1145_v31, %v1174_v14 }
 0x2ea   : > { %v1196_v15 = vmul.f32 1.442695, %v1183_v9  ;;  %v1198_v21 = vmul.f32 1.442695, %v1184_v19 }
 0x2eb   : > { %v14293_v47 = vpop.eup %13420  ;;  %v1177_v10 = vpop.xlane.xlu0 %1176 }
 0x2ec   : > { %v1205_v48 = vsel %vm1153_vm2, %v14293_v47, 0.0  ;;  %v1185_v16 = vsub.f32 %v1150_v32, %v1177_v10  ;;  %13428 = vpow2.f32 %v1196_v15  ;;  %v1392_v34 = vpop.permute.xlu1 %1391 }
 0x2ed   : > { %v14297_v51 = vpop.eup %13422  ;;  %1206 = vadd.xlane.f32.xlu0 %v1205_v48  ;;  %13430 = vpow2.f32 %v1194_v17 }
 0x2ee   : > { %v1202_v52 = vsel %vm1153_vm2, %v14297_v51, 0.0  ;;  %v1200_v20 = vmul.f32 1.442695, %v1185_v16 }
 0x2ef   : > { %1203 = vadd.xlane.f32.xlu1 %v1202_v52  ;;  %v1394_v33 = vpop.permute.xlu0 %1393 }
 0x2f0   : > { %13432 = vpow2.f32 %v1200_v20 }
 0x2f1   : > { %13434 = vpow2.f32 %v1198_v21  ;;  %v14305_v18 = vpop.eup %13424 }
 0x2f2   : > { %v1211_v23 = vsel %vm1153_vm2, %v14305_v18, 0.0 }
 0x2f5   : > { %v14307_v22 = vpop.eup %13426 }
 0x2f6   : > { %v1208_v25 = vsel %vm1153_vm2, %v14307_v22, 0.0 }
 0x2f9   : > { %v14311_v24 = vpop.eup %13428 }
 0x2fa   : > { %v14315_v26 = vpop.eup %13430  ;;  %v1217_v27 = vsel %vm1153_vm2, %v14311_v24, 0.0 }
 0x2fb   : > { %v1214_v29 = vsel %vm1153_vm2, %v14315_v26, 0.0 }
 0x2fd   : > { %v14319_v28 = vpop.eup %13432 }
 0x2fe   : > { %v14323_v30 = vpop.eup %13434  ;;  %v1223_v31 = vsel %vm1153_vm2, %v14319_v28, 0.0 }
 0x2ff   : > { %v1220_v32 = vsel %vm1153_vm2, %v14323_v30, 0.0 }
 0x300   : > { %1387 = vrot.lane.b32.xlu1 %v14147_v36, %s17260_s2 }
 0x303   : > { %1389 = vrot.lane.b32.xlu0 %v14197_v62, %s17260_s2  ;;  %s17289_s2 = smov 88  }
 0x322   : > { %1212 = vadd.xlane.f32.xlu0 %v1211_v23 }
 0x324   : > { %1209 = vadd.xlane.f32.xlu1 %v1208_v25 }
 0x326   : > { %1218 = vadd.xlane.f32.xlu0 %v1217_v27 }
 0x328   : > { %1215 = vadd.xlane.f32.xlu1 %v1214_v29 }
 0x32a   : > { %1224 = vadd.xlane.f32.xlu0 %v1223_v31 }
 0x32c   : > { %1221 = vadd.xlane.f32.xlu1 %v1220_v32 }
 0x33d   : > { %1373 = vrot.lane.b32.xlu1 %v14197_v62, %s17258_s23 }
 0x340   : > { %1371 = vrot.lane.b32.xlu0 %v14147_v36, %s17258_s23 }
 0x341   : > { %1377 = vrot.lane.b32.xlu1 %v14186_v60, %s17258_s23 }
 0x344   : > { %1375 = vrot.lane.b32.xlu0 %v14171_v56, %s17258_s23 }
 0x345   : > { %1381 = vrot.lane.b32.xlu1 %v14151_v43, %s17258_s23 }
 0x348   : > { %1379 = vrot.lane.b32.xlu0 %v14158_v49, %s17258_s23 }
 0x349   : > { %1385 = vrot.lane.b32.xlu1 %v14160_v50, %s17258_s23 }
 0x34c   : > { %1383 = vrot.lane.b32.xlu0 %v14173_v57, %s17258_s23 }
 0x34d   : > { %1650 = vrot.lane.b32.xlu1 %v14162_v53, %s17258_s23 }
 0x350   : > { %1648 = vrot.lane.b32.xlu0 %v14168_v55, %s17258_s23 }
 0x354   : > { %1644 = vrot.lane.b32.xlu0 %v14183_v59, %s17258_s23 }
 0x376   : > { %v1207_v35 = vpop.xlane.xlu0 %1206 }
 0x377   : > { %13436 = vrcp.f32 %v1207_v35 }
 0x378   : > { %v1204_v40 = vpop.xlane.xlu1 %1203 }
 0x379   : > { %13438 = vrcp.f32 %v1204_v40 }
 0x384   : > { %v13437_v41 = vpop.eup %13436 }
 0x385   : > { %v1235_v45 = vmul.f32 %v13437_v41, %v14293_v47 }
 0x386   : > { %v13439_v42 = vpop.eup %13438 }
 0x387   : > { %v1234_v44 = vmul.f32 %v13439_v42, %v14297_v51 }
 0x389   : > { %12214 = vmatprep.mubr.msk.f32.mxu1 %vm1153_vm2, %v1234_v44 }
 0x38a   : > { %12215 = vmatmul.mubr.msk.f32.vlgmr.msra.gmra.mxu1 %vm1153_vm2, %v1235_v45 }
 0x38b   : > { %12227 = vmatpush3.xpose.msk.msra.mxu1 %vm1015_vm1, %v14231_v8  ;;  %v1390_v8 = vpop.permute.xlu0 %1389 }
 0x38c   : > { %12228 = vmatprep.subr.msk.mxu1 %vm1015_vm1, %v14291_v39 }
 0x38f   : > { %12229 = vmatpush3.xpose.msk.msra.mxu1 %vm1015_vm1, %v14291_v39  ;;  %v1388_v39 = vpop.permute.xlu1 %1387 }
 0x390   : > { %12230 = vmatprep.subr.msk.mxu1 %vm1015_vm1, %v14287_v37 }
 0x393   : > { %12231 = vmatpush3.xpose.msk.msra.mxu1 %vm1015_vm1, %v14287_v37 }
 0x394   : > { %12232 = vmatprep.subr.msk.mxu1 %vm1015_vm1, %v14289_v38 }
 0x397   : > { %12233 = vmatpush3.xpose.msk.msra.mxu1 %vm1015_vm1, %v14289_v38 }
 0x398   : > { %12234 = vmatprep.subr.msk.mxu1 %vm1015_vm1, %v1394_v33 }
 0x39b   : > { %12235 = vmatpush3.xpose.msk.msra.mxu1 %vm1015_vm1, %v1394_v33 }
 0x39c   : > { %12236 = vmatprep.subr.msk.mxu1 %vm1015_vm1, %v1392_v34 }
 0x39f   : > { %12237 = vmatpush3.xpose.msk.msra.mxu1 %vm1015_vm1, %v1392_v34 }
 0x3a0   : > { %12238 = vmatprep.subr.msk.mxu1 %vm1015_vm1, %v1390_v8 }
 0x3a3   : > { %12239 = vmatpush3.xpose.msk.msra.mxu1 %vm1015_vm1, %v1390_v8 }
 0x3a4   : > { %12240 = vmatprep.subr.msk.mxu1 %vm1015_vm1, %v1388_v39 }
 0x3a7   : > { %12241 = vmatpush3.xpose.msk.msra.mxu1 %vm1015_vm1, %v1388_v39 }
 0x3ab   : > { %v1213_v37 = vpop.xlane.xlu0 %1212 }
 0x3ac   : > { %13440 = vrcp.f32 %v1213_v37 }
 0x3ad   : > { %v1210_v38 = vpop.xlane.xlu1 %1209 }
 0x3ae   : > { %13442 = vrcp.f32 %v1210_v38 }
 0x3af   : > { %v1219_v46 = vpop.xlane.xlu0 %1218 }
 0x3b0   : > { %13444 = vrcp.f32 %v1219_v46 }
 0x3b1   : > { %v1216_v47 = vpop.xlane.xlu1 %1215 }
 0x3b2   : > { %13446 = vrcp.f32 %v1216_v47 }
 0x3b3   : > { %v1225_v48 = vpop.xlane.xlu0 %1224 }
 0x3b4   : > { %13448 = vrcp.f32 %v1225_v48 }
 0x3b5   : > { %v1222_v51 = vpop.xlane.xlu1 %1221 }
 0x3b6   : > { %13450 = vrcp.f32 %v1222_v51 }
 0x3b7   : > { %v1372_v52 = vpop.permute.xlu0 %1371 }
 0x3b9   : > { %v1374_v54 = vpop.permute.xlu1 %1373  ;;  %v13441_v2 = vpop.eup %13440 }
 0x3ba   : > { %v1237_v7 = vmul.f32 %v13441_v2, %v14305_v18 }
 0x3bb   : > { %v13443_v3 = vpop.eup %13442  ;;  %v1376_v4 = vpop.permute.xlu0 %1375 }
 0x3bc   : > { %v1236_v5 = vmul.f32 %v13443_v3, %v14307_v22 }
 0x3bd   : > { %v1378_v6 = vpop.permute.xlu1 %1377  ;;  %v13445_v9 = vpop.eup %13444 }
 0x3be   : > { %12217 = vmatprep.mubr.msk.f32.mxu1 %vm1153_vm2, %v1236_v5  ;;  %v1239_v15 = vmul.f32 %v13445_v9, %v14311_v24  ;;  %v981_v24 = vld [vmem:[%s17232_s9] sm:$0xff] }
 0x3bf   : > { %v13447_v10 = vpop.eup %13446  ;;  %12218 = vmatmul.mubr.msk.f32.gmra.mxu1 %vm1153_vm2, %v1237_v7  ;;  %v1380_v13 = vpop.permute.xlu0 %1379  ;;  %12296 = vmatprep.subr.mxu1 %v981_v24 }
 0x3c0   : > { %v1238_v12 = vmul.f32 %v13447_v10, %v14315_v26 }
 0x3c1   : > { %v1382_v14 = vpop.permute.xlu1 %1381  ;;  %v13449_v16 = vpop.eup %13448 }
 0x3c2   : > { %12220 = vmatprep.mubr.msk.f32.mxu1 %vm1153_vm2, %v1238_v12  ;;  %v1241_v21 = vmul.f32 %v13449_v16, %v14319_v28 }
 0x3c3   : > { %v13451_v17 = vpop.eup %13450  ;;  %12221 = vmatmul.mubr.msk.f32.gmra.mxu1 %vm1153_vm2, %v1239_v15  ;;  %v1384_v18 = vpop.permute.xlu0 %1383 }
 0x3c4   : > { %v1240_v19 = vmul.f32 %v13451_v17, %v14323_v30 }
 0x3c5   : > { %v1386_v20 = vpop.permute.xlu1 %1385 }
 0x3c6   : > { %12223 = vmatprep.mubr.msk.f32.mxu1 %vm1153_vm2, %v1240_v19 }
 0x3c7   : > { %12224 = vmatmul.mubr.msk.f32.gmra.mxu1 %vm1153_vm2, %v1241_v21  ;;  %v1649_v23 = vpop.permute.xlu0 %1648 }
 0x3c8   : > { %12242 = vmatprep.mubr.msk.f32.mxu1 %vm1015_vm1, %v1372_v52 }
 0x3c9   : > { %v1651_v22 = vpop.permute.xlu1 %1650 }
 0x3ca   : > { %12254 = vmatprep.subr.mxu0 %v1651_v22 }
 0x3cb   : > { %12243 = vmatmul.mubr.msk.f32.vlgmr.msra.gmra.mxu1 %vm1015_vm1, %v1374_v54  ;;  %12255 = vmatpush3.msra.mxu0 %v1651_v22  ;;  %v1645_v9 = vpop.permute.xlu0 %1644 }
 0x3cc   : > { %12245 = vmatprep.mubr.msk.f32.mxu1 %vm1015_vm1, %v1376_v4  ;;  %12256 = vmatprep.subr.mxu0 %v1649_v23 }
 0x3cd   : > { %12257 = vmatpush3.msra.mxu0 %v1649_v23  ;;  %12297 = vmatpush3.msra.mxu1 %v981_v24 }
 0x3cf   : > { %12246 = vmatmul.mubr.msk.f32.gmra.mxu1 %vm1015_vm1, %v1378_v6 }
 0x3d0   : > { %12248 = vmatprep.mubr.msk.f32.mxu1 %vm1015_vm1, %v1380_v13 }
 0x3d3   : > { %12249 = vmatmul.mubr.msk.f32.gmra.mxu1 %vm1015_vm1, %v1382_v14 }
 0x3d4   : > { %12251 = vmatprep.mubr.msk.f32.mxu1 %vm1015_vm1, %v1384_v18 }
 0x3d7   : > { %12252 = vmatmul.mubr.msk.f32.gmra.mxu1 %vm1015_vm1, %v1386_v20 }
 0x44a   : > { %v12216_v25 = vpop.f32.mrf.mxu1 }
 0x44c   : > { %v1332_v26 = vpop.f32.mrf.mxu1 }
 0x44d   : > { %12298 = vmatprep.mubr.msk.f32.mxu1 %vm1015_vm1, %v1332_v26 }
 0x44e   : > { %12299 = vmatmul.mubr.msk.f32.vlgmr.msra.gmra.mxu1 %vm1015_vm1, %v12216_v25 }
 0x47f   : > { %v12219_v27 = vpop.f32.mrf.mxu1 }
 0x481   : > { %v1342_v28 = vpop.f32.mrf.mxu1 }
 0x482   : > { %12301 = vmatprep.mubr.msk.f32.mxu1 %vm1015_vm1, %v1342_v28 }
 0x483   : > { %v12222_v29 = vpop.f32.mrf.mxu1  ;;  %12302 = vmatmul.mubr.msk.f32.gmra.mxu1 %vm1015_vm1, %v12219_v27 }
 0x485   : > { %v1352_v30 = vpop.f32.mrf.mxu1 }
 0x486   : > { %12304 = vmatprep.mubr.msk.f32.mxu1 %vm1015_vm1, %v1352_v30 }
 0x487   : > { %v12225_v31 = vpop.f32.mrf.mxu1  ;;  %12305 = vmatmul.mubr.msk.f32.gmra.mxu1 %vm1015_vm1, %v12222_v29 }
 0x489   : > { %v1362_v32 = vpop.f32.mrf.mxu1 }
 0x48a   : > { %12307 = vmatprep.mubr.msk.f32.mxu1 %vm1015_vm1, %v1362_v32 }
 0x48b   : > { %v12244_v33 = vpop.f32.mrf.mxu1  ;;  %12308 = vmatmul.mubr.msk.f32.gmra.mxu1 %vm1015_vm1, %v12225_v31 }
 0x48c   : > { %v1507_v34 = vadd.f32 %v12244_v33, %v14265_v11 }
 0x48d   : > { %v1501_v35 = vpop.f32.mrf.mxu1 }
 0x48e   : > { %v1502_v40 = vadd.f32 %v14265_v11, %v1501_v35  ;;  %v1543_v41 = vsel %vm1153_vm2, %v1507_v34, -inf }
 0x48f   : > { %1544 = vmax.xlane.f32.xlu1 %v1543_v41  ;;  %v12247_v42 = vpop.f32.mrf.mxu1 }
 0x490   : > { %v14412_v44 = vadd.f32 %v12247_v42, %v14265_v11  ;;  %v1540_v45 = vsel %vm1153_vm2, %v1502_v40, -inf }
 0x491   : > { %1541 = vmax.xlane.f32.xlu0 %v1540_v45  ;;  %v1511_v8 = vpop.f32.mrf.mxu1 }
 0x492   : > { %v1512_v37 = vadd.f32 %v14265_v11, %v1511_v8  ;;  %v1549_v38 = vsel %vm1153_vm2, %v14412_v44, -inf }
 0x493   : > { %v12250_v39 = vpop.f32.mrf.mxu1 }
 0x494   : > { %v1527_v47 = vadd.f32 %v12250_v39, %v14265_v11  ;;  %v1546_v48 = vsel %vm1153_vm2, %v1512_v37, -inf }
 0x495   : > { %1550 = vmax.xlane.f32.xlu0 %v1549_v38  ;;  %v1521_v46 = vpop.f32.mrf.mxu1 }
 0x496   : > { %v1555_v54 = vsel %vm1153_vm2, %v1527_v47, -inf  ;;  %v1522_v3 = vadd.f32 %v14265_v11, %v1521_v46 }
 0x497   : > { %v12253_v51 = vpop.f32.mrf.mxu1 }
 0x498   : > { %v14421_v52 = vadd.f32 %v12253_v51, %v14265_v11  ;;  %v1552_v6 = vsel %vm1153_vm2, %v1522_v3, -inf }
 0x499   : > { %1547 = vmax.xlane.f32.xlu0 %v1546_v48  ;;  %v1531_v4 = vpop.f32.mrf.mxu1 }
 0x49a   : > { %v1561_v2 = vsel %vm1153_vm2, %v14421_v52, -inf  ;;  %v1532_v5 = vadd.f32 %v14265_v11, %v1531_v4 }
 0x49c   : > { %v1558_v7 = vsel %vm1153_vm2, %v1532_v5, -inf }
 0x49d   : > { %1556 = vmax.xlane.f32.xlu0 %v1555_v54 }
 0x4a0   : > { %1646 = vrot.lane.b32.xlu1 %v14175_v58, %s17258_s23 }
 0x4a1   : > { %1562 = vmax.xlane.f32.xlu0 %v1561_v2 }
 0x4b7   : > { %1640 = vrot.lane.b32.xlu0 %v14199_v63, %s17258_s23 }
 0x4c4   : > { %1553 = vmax.xlane.f32.xlu1 %v1552_v6 }
 0x4c8   : > { %1559 = vmax.xlane.f32.xlu1 %v1558_v7 }
 0x4d9   : > { %1642 = vrot.lane.b32.xlu1 %v14189_v61, %s17258_s23 }
 0x518   : > { %v1545_v10 = vpop.xlane.xlu1 %1544 }
 0x519   : > { %v1565_v12 = vsub.f32 %v1507_v34, %v1545_v10 }
 0x51a   : > { %v1542_v13 = vpop.xlane.xlu0 %1541 }
 0x51b   : > { %v1574_v14 = vmul.f32 1.442695, %v1565_v12  ;;  %v1564_v15 = vsub.f32 %v1502_v40, %v1542_v13 }
 0x51c   : > { %v1647_v16 = vpop.permute.xlu1 %1646 }
 0x51d   : > { %13452 = vpow2.f32 %v1574_v14  ;;  %v1572_v17 = vmul.f32 1.442695, %v1564_v15  ;;  %12258 = vmatprep.subr.mxu0 %v1647_v16 }
 0x51e   : > { %12259 = vmatpush3.msra.mxu0 %v1647_v16  ;;  %v1551_v19 = vpop.xlane.xlu0 %1550 }
 0x51f   : > { %13454 = vpow2.f32 %v1572_v17  ;;  %12260 = vmatprep.subr.mxu0 %v1645_v9  ;;  %v1567_v33 = vsub.f32 %v14412_v44, %v1551_v19 }
 0x520   : > { %12261 = vmatpush3.msra.mxu0 %v1645_v9 }
 0x521   : > { %v1578_v34 = vmul.f32 1.442695, %v1567_v33 }
 0x522   : > { %v1548_v20 = vpop.xlane.xlu0 %1547 }
 0x523   : > { %v1566_v21 = vsub.f32 %v1512_v37, %v1548_v20 }
 0x525   : > { %v1576_v18 = vmul.f32 1.442695, %v1566_v21 }
 0x526   : > { %v1557_v22 = vpop.xlane.xlu0 %1556 }
 0x527   : > { %13456 = vpow2.f32 %v1576_v18  ;;  %v1569_v23 = vsub.f32 %v1527_v47, %v1557_v22 }
 0x529   : > { %v1582_v24 = vmul.f32 1.442695, %v1569_v23 }
 0x52a   : > { %v14436_v25 = vpop.eup %13452  ;;  %v1563_v42 = vpop.xlane.xlu0 %1562 }
 0x52b   : > { %13458 = vpow2.f32 %v1582_v24  ;;  %v1591_v26 = vsel %vm1153_vm2, %v14436_v25, 0.0  ;;  %v1571_v44 = vsub.f32 %v14421_v52, %v1563_v42 }
 0x52c   : > { %v14440_v27 = vpop.eup %13454  ;;  %1592 = vadd.xlane.f32.xlu0 %v1591_v26  ;;  %13460 = vpow2.f32 %v1578_v34 }
 0x52d   : > { %v1588_v28 = vsel %vm1153_vm2, %v14440_v27, 0.0  ;;  %v1586_v46 = vmul.f32 1.442695, %v1571_v44 }
 0x52e   : > { %1589 = vadd.xlane.f32.xlu1 %v1588_v28  ;;  %v1641_v38 = vpop.permute.xlu0 %1640 }
 0x534   : > { %v14444_v29 = vpop.eup %13456 }
 0x535   : > { %v1594_v30 = vsel %vm1153_vm2, %v14444_v29, 0.0 }
 0x536   : > { %1595 = vadd.xlane.f32.xlu1 %v1594_v30 }
 0x538   : > { %v14448_v31 = vpop.eup %13458 }
 0x539   : > { %v1603_v32 = vsel %vm1153_vm2, %v14448_v31, 0.0  ;;  %v14466_v47 = vpop.eup %13460 }
 0x53a   : > { %1604 = vadd.xlane.f32.xlu1 %v1603_v32  ;;  %v1597_v48 = vsel %vm1153_vm2, %v14466_v47, 0.0 }
 0x542   : > { %1638 = vrot.lane.b32.xlu0 %v14207_v0, %s17258_s23 }
 0x54b   : > { %1636 = vrot.lane.b32.xlu1 %v14211_v1, %s17258_s23 }
 0x54d   : > { %v1554_v35 = vpop.xlane.xlu1 %1553 }
 0x54e   : > { %v1568_v40 = vsub.f32 %v1522_v3, %v1554_v35 }
 0x54f   : > { %2075 = vrot.lane.b32.xlu1 %v14173_v57, %s17256_s24 }
 0x550   : > { %v1580_v41 = vmul.f32 1.442695, %v1568_v40 }
 0x551   : > { %v1560_v45 = vpop.xlane.xlu1 %1559 }
 0x552   : > { %v1570_v8 = vsub.f32 %v1532_v5, %v1560_v45  ;;  %13462 = vpow2.f32 %v1580_v41 }
 0x553   : > { %2073 = vrot.lane.b32.xlu1 %v14151_v43, %s17256_s24 }
 0x554   : > { %v1584_v39 = vmul.f32 1.442695, %v1570_v8 }
 0x555   : > { %v1643_v37 = vpop.permute.xlu1 %1642 }
 0x556   : > { %12262 = vmatprep.subr.mxu0 %v1643_v37  ;;  %13464 = vpow2.f32 %v1584_v39 }
 0x557   : > { %12263 = vmatpush3.msra.mxu0 %v1643_v37  ;;  %2071 = vrot.lane.b32.xlu1 %v14158_v49, %s17256_s24  ;;  %13466 = vpow2.f32 %v1586_v46 }
 0x558   : > { %12264 = vmatprep.subr.mxu0 %v1641_v38 }
 0x559   : > { %12265 = vmatpush3.msra.mxu0 %v1641_v38 }
 0x55b   : > { %2069 = vrot.lane.b32.xlu1 %v14186_v60, %s17256_s24 }
 0x55f   : > { %2067 = vrot.lane.b32.xlu1 %v14171_v56, %s17256_s24  ;;  %v14472_v51 = vpop.eup %13462 }
 0x560   : > { %v1600_v52 = vsel %vm1153_vm2, %v14472_v51, 0.0 }
 0x561   : > { %1598 = vadd.xlane.f32.xlu0 %v1597_v48 }
 0x563   : > { %2063 = vrot.lane.b32.xlu1 %v14147_v36, %s17256_s24  ;;  %v14478_v54 = vpop.eup %13464 }
 0x564   : > { %v1606_v2 = vsel %vm1153_vm2, %v14478_v54, 0.0  ;;  %v14484_v3 = vpop.eup %13466 }
 0x565   : > { %1601 = vadd.xlane.f32.xlu0 %v1600_v52  ;;  %v1609_v4 = vsel %vm1153_vm2, %v14484_v3, 0.0 }
 0x567   : > { %2049 = vrot.lane.b32.xlu1 %v14197_v62, %s17254_s20 }
 0x569   : > { %1607 = vadd.xlane.f32.xlu0 %v1606_v2 }
 0x56b   : > { %2053 = vrot.lane.b32.xlu1 %v14186_v60, %s17254_s20 }
 0x56d   : > { %1610 = vadd.xlane.f32.xlu0 %v1609_v4 }
 0x56f   : > { %2057 = vrot.lane.b32.xlu1 %v14151_v43, %s17254_s20 }
 0x573   : > { %2061 = vrot.lane.b32.xlu1 %v14160_v50, %s17254_s20 }
 0x577   : > { %2622 = vrot.lane.b32.xlu1 %v14173_v57, %s17252_s25 }
 0x57b   : > { %2618 = vrot.lane.b32.xlu1 %v14158_v49, %s17252_s25 }
 0x57f   : > { %2614 = vrot.lane.b32.xlu1 %v14171_v56, %s17252_s25 }
 0x583   : > { %2610 = vrot.lane.b32.xlu1 %v14147_v36, %s17252_s25  ;;  %2077 = vrot.lane.b32.xlu0 %v14160_v50, %s17256_s24 }
 0x587   : > { %2596 = vrot.lane.b32.xlu1 %v14197_v62, %s17250_s27  ;;  %2065 = vrot.lane.b32.xlu0 %v14197_v62, %s17256_s24  ;;  %s17291_s24 = smov 80  }
 0x58b   : > { %2600 = vrot.lane.b32.xlu1 %v14186_v60, %s17250_s27  ;;  %2047 = vrot.lane.b32.xlu0 %v14147_v36, %s17254_s20 }
 0x58f   : > { %2604 = vrot.lane.b32.xlu1 %v14151_v43, %s17250_s27  ;;  %2051 = vrot.lane.b32.xlu0 %v14171_v56, %s17254_s20 }
 0x593   : > { %2608 = vrot.lane.b32.xlu1 %v14160_v50, %s17250_s27  ;;  %2055 = vrot.lane.b32.xlu0 %v14158_v49, %s17254_s20 }
 0x597   : > { %2059 = vrot.lane.b32.xlu0 %v14173_v57, %s17254_s20 }
 0x59b   : > { %2624 = vrot.lane.b32.xlu0 %v14160_v50, %s17252_s25 }
 0x59f   : > { %2620 = vrot.lane.b32.xlu0 %v14151_v43, %s17252_s25 }
 0x5a3   : > { %2616 = vrot.lane.b32.xlu0 %v14186_v60, %s17252_s25 }
 0x5a7   : > { %2612 = vrot.lane.b32.xlu0 %v14197_v62, %s17252_s25  ;;  %s11417_s25 = sshll.u32 %s14090_s28, 4  ;;  %s649_s28 = sand.u32 1, %s17297_s4  }
 0x5a8   : > { %s16158_s1 = scalar_lea.vmem %s17296_s3, %s11417_s25  ;;  %s17298_s3 = sld [smem:[#allocation9_spill]] }
 0x5a9   : > { %s17183_s4 = scalar_lea.sflag [#allocation3], %s649_s28 }
 0x5ab   : > { %2594 = vrot.lane.b32.xlu0 %v14147_v36, %s17250_s27 }
 0x5af   : > { %2598 = vrot.lane.b32.xlu0 %v14171_v56, %s17250_s27 }
 0x5b3   : > { %2602 = vrot.lane.b32.xlu0 %v14158_v49, %s17250_s27  ;;  %v982_v49 = vld [vmem:[%s17232_s9 + $0x8] sm:$0xff] }
 0x5b5   : > { %v1593_v5 = vpop.xlane.xlu0 %1592 }
 0x5b6   : > { %13468 = vrcp.f32 %v1593_v5 }
 0x5b7   : > { %v1590_v50 = vpop.xlane.xlu1 %1589  ;;  %2606 = vrot.lane.b32.xlu0 %v14173_v57, %s17250_s27 }
 0x5b8   : > { %13470 = vrcp.f32 %v1590_v50 }
 0x5b9   : > { %v1639_v43 = vpop.permute.xlu0 %1638 }
 0x5ba   : > { %12266 = vmatprep.subr.mxu0 %v1639_v43 }
 0x5bb   : > { %12267 = vmatpush3.msra.mxu0 %v1639_v43 }
 0x5bf   : > { %v1596_v60 = vpop.xlane.xlu1 %1595 }
 0x5c0   : > { %13472 = vrcp.f32 %v1596_v60 }
 0x5c3   : > { %v1605_v62 = vpop.xlane.xlu1 %1604  ;;  %v13469_v36 = vpop.eup %13468 }
 0x5c4   : > { %v1621_v9 = vmul.f32 %v13469_v36, %v14436_v25 }
 0x5c5   : > { %v13471_v6 = vpop.eup %13470 }
 0x5c6   : > { %v1620_v56 = vmul.f32 %v13471_v6, %v14440_v27 }
 0x5c7   : > { %v1637_v7 = vpop.permute.xlu1 %1636 }
 0x5c8   : > { %12268 = vmatprep.subr.mxu0 %v1637_v7  ;;  %12270 = vmatprep.mubr.msk.f32.mxu0 %vm1153_vm2, %v1620_v56 }
 0x5c9   : > { %12269 = vmatpush3.msra.mxu0 %v1637_v7 }
 0x5ca   : > { %12271 = vmatmul.mubr.msk.f32.vlgmr.msra.gmra.mxu0 %vm1153_vm2, %v1621_v9  ;;  %12282 = vmatprep.subr.mxu0 %v982_v49 }
 0x5cb   : > { %12283 = vmatpush3.msra.mxu0 %v982_v49  ;;  %v2076_v27 = vpop.permute.xlu1 %2075 }
 0x5cd   : > { %v13473_v57 = vpop.eup %13472 }
 0x5ce   : > { %v1622_v10 = vmul.f32 %v13473_v57, %v14444_v29 }
 0x5cf   : > { %v2074_v30 = vpop.permute.xlu1 %2073 }
 0x5d0   : > { %12273 = vmatprep.mubr.msk.f32.mxu0 %vm1153_vm2, %v1622_v10 }
 0x5ea   : > { %v1599_v12 = vpop.xlane.xlu0 %1598 }
 0x5eb   : > { %13474 = vrcp.f32 %v1599_v12 }
 0x5ec   : > { %13476 = vrcp.f32 %v1605_v62 }
 0x5ee   : > { %v1602_v13 = vpop.xlane.xlu0 %1601 }
 0x5ef   : > { %13478 = vrcp.f32 %v1602_v13 }
 0x5f2   : > { %v1608_v14 = vpop.xlane.xlu0 %1607 }
 0x5f3   : > { %13480 = vrcp.f32 %v1608_v14 }
 0x5f6   : > { %v1611_v15 = vpop.xlane.xlu0 %1610 }
 0x5f7   : > { %13482 = vrcp.f32 %v1611_v15 }
 0x5f8   : > { %v13475_v16 = vpop.eup %13474 }
 0x5f9   : > { %v1623_v17 = vmul.f32 %v13475_v16, %v14466_v47  ;;  %v13477_v20 = vpop.eup %13476 }
 0x5fa   : > { %v2078_v19 = vpop.permute.xlu0 %2077  ;;  %v1625_v22 = vmul.f32 %v13477_v20, %v14448_v31  ;;  %v2072_v31 = vpop.permute.xlu1 %2071 }
 0x5fb   : > { %12274 = vmatmul.mubr.msk.f32.gmra.mxu0 %vm1153_vm2, %v1623_v17  ;;  %12310 = vmatprep.subr.msk.mxu0 %vm1015_vm1, %v2078_v19 }
 0x5fc   : > { %v13479_v21 = vpop.eup %13478 }
 0x5fd   : > { %v1624_v18 = vmul.f32 %v13479_v21, %v14472_v51 }
 0x5fe   : > { %v2066_v32 = vpop.permute.xlu0 %2065  ;;  %v2070_v34 = vpop.permute.xlu1 %2069 }
 0x5ff   : > { %12276 = vmatprep.mubr.msk.f32.mxu0 %vm1153_vm2, %v1624_v18 }
 0x600   : > { %v13481_v23 = vpop.eup %13480  ;;  %12277 = vmatmul.mubr.msk.f32.gmra.mxu0 %vm1153_vm2, %v1625_v22 }
 0x601   : > { %v1626_v24 = vmul.f32 %v13481_v23, %v14478_v54 }
 0x602   : > { %v2048_v33 = vpop.permute.xlu0 %2047  ;;  %v2068_v40 = vpop.permute.xlu1 %2067 }
 0x603   : > { %12279 = vmatprep.mubr.msk.f32.mxu0 %vm1153_vm2, %v1626_v24 }
 0x604   : > { %v13483_v25 = vpop.eup %13482 }
 0x605   : > { %v1627_v26 = vmul.f32 %v13483_v25, %v14484_v3 }
 0x606   : > { %v2052_v35 = vpop.permute.xlu0 %2051  ;;  %v2064_v45 = vpop.permute.xlu1 %2063 }
 0x607   : > { %12280 = vmatmul.mubr.msk.f32.gmra.mxu0 %vm1153_vm2, %v1627_v26 }
 0x60a   : > { %v2056_v41 = vpop.permute.xlu0 %2055  ;;  %v2050_v44 = vpop.permute.xlu1 %2049 }
 0x60e   : > { %v2060_v42 = vpop.permute.xlu0 %2059  ;;  %v2054_v38 = vpop.permute.xlu1 %2053 }
 0x612   : > { %v2625_v8 = vpop.permute.xlu0 %2624  ;;  %v2058_v48 = vpop.permute.xlu1 %2057 }
 0x616   : > { %v2621_v52 = vpop.permute.xlu0 %2620  ;;  %v2062_v2 = vpop.permute.xlu1 %2061 }
 0x61a   : > { %v2617_v3 = vpop.permute.xlu0 %2616  ;;  %v2623_v4 = vpop.permute.xlu1 %2622 }
 0x61e   : > { %v2613_v5 = vpop.permute.xlu0 %2612  ;;  %v2619_v50 = vpop.permute.xlu1 %2618 }
 0x622   : > { %v2595_v43 = vpop.permute.xlu0 %2594  ;;  %v2615_v60 = vpop.permute.xlu1 %2614 }
 0x626   : > { %v2611_v62 = vpop.permute.xlu1 %2610  ;;  %v2599_v6 = vpop.permute.xlu0 %2598 }
 0x62a   : > { %v2597_v36 = vpop.permute.xlu1 %2596  ;;  %v2603_v7 = vpop.permute.xlu0 %2602 }
 0x62e   : > { %v2601_v56 = vpop.permute.xlu1 %2600  ;;  %v2607_v9 = vpop.permute.xlu0 %2606 }
 0x632   : > { %v2605_v49 = vpop.permute.xlu1 %2604 }
 0x636   : > { %v2609_v57 = vpop.permute.xlu1 %2608 }
 0x68a   : > { %v12272_v28 = vpop.f32.mrf.mxu0 }
 0x68c   : > { %v1750_v29 = vpop.f32.mrf.mxu0 }
 0x68d   : > { %12284 = vmatprep.mubr.msk.f32.mxu0 %vm1015_vm1, %v1750_v29 }
 0x68e   : > { %12285 = vmatmul.mubr.msk.f32.vlgmr.msra.gmra.mxu0 %vm1015_vm1, %v12272_v28 }
 0x68f   : > { %12311 = vmatpush3.xpose.msk.msra.mxu0 %vm1015_vm1, %v2078_v19 }
 0x690   : > { %12312 = vmatprep.subr.msk.mxu0 %vm1015_vm1, %v2076_v27 }
 0x693   : > { %12313 = vmatpush3.xpose.msk.msra.mxu0 %vm1015_vm1, %v2076_v27  ;;  %v14634_v27 = vld [vmem:[%s14262_s22] ss:$0 sm:$0xff] }
 0x694   : > { %12314 = vmatprep.subr.msk.mxu0 %vm1015_vm1, %v2074_v30 }
 0x697   : > { %12315 = vmatpush3.xpose.msk.msra.mxu0 %vm1015_vm1, %v2074_v30 }
 0x698   : > { %12316 = vmatprep.subr.msk.mxu0 %vm1015_vm1, %v2072_v31 }
 0x69b   : > { %12317 = vmatpush3.xpose.msk.msra.mxu0 %vm1015_vm1, %v2072_v31 }
 0x69c   : > { %12318 = vmatprep.subr.msk.mxu0 %vm1015_vm1, %v2070_v34 }
 0x69f   : > { %12319 = vmatpush3.xpose.msk.msra.mxu0 %vm1015_vm1, %v2070_v34 }
 0x6a0   : > { %12320 = vmatprep.subr.msk.mxu0 %vm1015_vm1, %v2068_v40 }
 0x6a3   : > { %12321 = vmatpush3.xpose.msk.msra.mxu0 %vm1015_vm1, %v2068_v40 }
 0x6a4   : > { %12322 = vmatprep.subr.msk.mxu0 %vm1015_vm1, %v2066_v32 }
 0x6a7   : > { %12323 = vmatpush3.xpose.msk.msra.mxu0 %vm1015_vm1, %v2066_v32 }
 0x6a8   : > { %12324 = vmatprep.subr.msk.mxu0 %vm1015_vm1, %v2064_v45 }
 0x6ab   : > { %12325 = vmatpush3.xpose.msk.msra.mxu0 %vm1015_vm1, %v2064_v45 }
 0x6ac   : > { %12380 = vmatprep.subr.msk.mxu0 %vm1015_vm1, %v2625_v8 }
 0x6bb   : > { %v12275_v39 = vpop.f32.mrf.mxu0 }
 0x6bd   : > { %v1760_v37 = vpop.f32.mrf.mxu0 }
 0x6be   : > { %12287 = vmatprep.mubr.msk.f32.mxu0 %vm1015_vm1, %v1760_v37 }
 0x6bf   : > { %12288 = vmatmul.mubr.msk.f32.gmra.mxu0 %vm1015_vm1, %v12275_v39 }
 0x6c0   : > { %v12278_v46 = vpop.f32.mrf.mxu0 }
 0x6c2   : > { %v1770_v47 = vpop.f32.mrf.mxu0 }
 0x6c3   : > { %12290 = vmatprep.mubr.msk.f32.mxu0 %vm1015_vm1, %v1770_v47 }
 0x6c4   : > { %12291 = vmatmul.mubr.msk.f32.gmra.mxu0 %vm1015_vm1, %v12278_v46 }
 0x6c7   : > { %v12281_v51 = vpop.f32.mrf.mxu0 }
 0x6c9   : > { %v1780_v54 = vpop.f32.mrf.mxu0 }
 0x6ca   : > { %12293 = vmatprep.mubr.msk.f32.mxu0 %vm1015_vm1, %v1780_v54 }
 0x6cb   : > { %12294 = vmatmul.mubr.msk.f32.gmra.mxu0 %vm1015_vm1, %v12281_v51 }
 0x6cc   : > { %12326 = vmatprep.mubr.msk.f32.mxu0 %vm1015_vm1, %v2048_v33 }
 0x6cf   : > { %12327 = vmatmul.mubr.msk.f32.vlgmr.msra.gmra.mxu0 %vm1015_vm1, %v2050_v44 }
 0x6d0   : > { %12381 = vmatpush3.xpose.msk.msra.mxu0 %vm1015_vm1, %v2625_v8  ;;  %12329 = vmatprep.mubr.msk.f32.mxu0 %vm1015_vm1, %v2052_v35 }
 0x6d1   : > { %12382 = vmatprep.subr.msk.mxu0 %vm1015_vm1, %v2623_v4 }
 0x6d3   : > { %12330 = vmatmul.mubr.msk.f32.gmra.mxu0 %vm1015_vm1, %v2054_v38 }
 0x6d4   : > { %12383 = vmatpush3.xpose.msk.msra.mxu0 %vm1015_vm1, %v2623_v4  ;;  %12332 = vmatprep.mubr.msk.f32.mxu0 %vm1015_vm1, %v2056_v41 }
 0x6d5   : > { %12384 = vmatprep.subr.msk.mxu0 %vm1015_vm1, %v2621_v52 }
 0x6d7   : > { %12333 = vmatmul.mubr.msk.f32.gmra.mxu0 %vm1015_vm1, %v2058_v48 }
 0x6d8   : > { %12385 = vmatpush3.xpose.msk.msra.mxu0 %vm1015_vm1, %v2621_v52  ;;  %12335 = vmatprep.mubr.msk.f32.mxu0 %vm1015_vm1, %v2060_v42 }
 0x6d9   : > { %12386 = vmatprep.subr.msk.mxu0 %vm1015_vm1, %v2619_v50 }
 0x6db   : > { %12336 = vmatmul.mubr.msk.f32.gmra.mxu0 %vm1015_vm1, %v2062_v2 }
 0x6dc   : > { %12387 = vmatpush3.xpose.msk.msra.mxu0 %vm1015_vm1, %v2619_v50  ;;  %12396 = vmatprep.mubr.msk.f32.mxu0 %vm1015_vm1, %v2595_v43 }
 0x6dd   : > { %12388 = vmatprep.subr.msk.mxu0 %vm1015_vm1, %v2617_v3 }
 0x6e0   : > { %12389 = vmatpush3.xpose.msk.msra.mxu0 %vm1015_vm1, %v2617_v3 }
 0x6e1   : > { %12390 = vmatprep.subr.msk.mxu0 %vm1015_vm1, %v2615_v60 }
 0x6e4   : > { %12391 = vmatpush3.xpose.msk.msra.mxu0 %vm1015_vm1, %v2615_v60 }
 0x6e5   : > { %12392 = vmatprep.subr.msk.mxu0 %vm1015_vm1, %v2613_v5 }
 0x6e8   : > { %12393 = vmatpush3.xpose.msk.msra.mxu0 %vm1015_vm1, %v2613_v5 }
 0x6e9   : > { %12394 = vmatprep.subr.msk.mxu0 %vm1015_vm1, %v2611_v62 }
 0x6ec   : > { %12395 = vmatpush3.xpose.msk.msra.mxu0 %vm1015_vm1, %v2611_v62 }
 0x6ef   : > { %12397 = vmatmul.mubr.msk.f32.vlgmr.msra.gmra.mxu0 %vm1015_vm1, %v2597_v36 }
 0x6f0   : > { %12399 = vmatprep.mubr.msk.f32.mxu0 %vm1015_vm1, %v2599_v6 }
 0x6f3   : > { %12400 = vmatmul.mubr.msk.f32.gmra.mxu0 %vm1015_vm1, %v2601_v56 }
 0x6f4   : > { %12402 = vmatprep.mubr.msk.f32.mxu0 %vm1015_vm1, %v2603_v7 }
 0x6f7   : > { %12403 = vmatmul.mubr.msk.f32.gmra.mxu0 %vm1015_vm1, %v2605_v49 }
 0x6f8   : > { %12405 = vmatprep.mubr.msk.f32.mxu0 %vm1015_vm1, %v2607_v9 }
 0x6fb   : > { %12406 = vmatmul.mubr.msk.f32.gmra.mxu0 %vm1015_vm1, %v2609_v57 }
 0x74e   : > { %v14613_v10 = vpop.f32.mrf.mxu0 }
 0x750   : > { %v14615_v12 = vpop.f32.mrf.mxu0 }
 0x77f   : > { %v14617_v13 = vpop.f32.mrf.mxu0 }
 0x781   : > { %v14619_v14 = vpop.f32.mrf.mxu0 }
 0x784   : > { %v14621_v15 = vpop.f32.mrf.mxu0 }
 0x786   : > { %v14623_v16 = vpop.f32.mrf.mxu0 }
 0x78b   : > { %v14625_v17 = vpop.f32.mrf.mxu0 }
 0x78d   : > { %v14627_v19 = vpop.f32.mrf.mxu0 }
 0x78f   : > { %v12328_v20 = vpop.f32.mrf.mxu0 }
 0x790   : > { %v2183_v21 = vadd.f32 %v12328_v20, %v14265_v11 }
 0x791   : > { %v2177_v18 = vpop.f32.mrf.mxu0 }
 0x792   : > { %v2178_v22 = vadd.f32 %v14265_v11, %v2177_v18  ;;  %v2219_v23 = vsel %vm1153_vm2, %v2183_v21, -inf }
 0x793   : > { %2220 = vmax.xlane.f32.xlu1 %v2219_v23  ;;  %v12331_v24 = vpop.f32.mrf.mxu0 }
 0x794   : > { %v2216_v25 = vsel %vm1153_vm2, %v2178_v22, -inf  ;;  %v2193_v30 = vadd.f32 %v14634_v27, %v12331_v24 }
 0x795   : > { %2217 = vmax.xlane.f32.xlu0 %v2216_v25  ;;  %v2187_v26 = vpop.f32.mrf.mxu0 }
 0x796   : > { %v2188_v28 = vadd.f32 %v14634_v27, %v2187_v26  ;;  %v2225_v34 = vsel %vm1153_vm2, %v2193_v30, -inf }
 0x797   : > { %v12334_v29 = vpop.f32.mrf.mxu0 }
 0x798   : > { %v2222_v32 = vsel %vm1153_vm2, %v2188_v28, -inf  ;;  %v2203_v33 = vadd.f32 %v14634_v27, %v12334_v29 }
 0x799   : > { %2223 = vmax.xlane.f32.xlu0 %v2222_v32  ;;  %v2197_v31 = vpop.f32.mrf.mxu0 }
 0x79a   : > { %v2198_v11 = vadd.f32 %v14634_v27, %v2197_v31  ;;  %v2231_v42 = vsel %vm1153_vm2, %v2203_v33, -inf }
 0x79b   : > { %v12337_v40 = vpop.f32.mrf.mxu0 }
 0x79c   : > { %v2228_v35 = vsel %vm1153_vm2, %v2198_v11, -inf  ;;  %v2213_v41 = vadd.f32 %v14634_v27, %v12337_v40 }
 0x79d   : > { %2226 = vmax.xlane.f32.xlu0 %v2225_v34  ;;  %2229 = vmax.xlane.f32.xlu1 %v2228_v35  ;;  %v2207_v8 = vpop.f32.mrf.mxu0 }
 0x79e   : > { %v2237_v45 = vsel %vm1153_vm2, %v2213_v41, -inf  ;;  %v14655_v44 = vadd.f32 %v14634_v27, %v2207_v8 }
 0x7a0   : > { %v2234_v39 = vsel %vm1153_vm2, %v14655_v44, -inf }
 0x7a1   : > { %2232 = vmax.xlane.f32.xlu0 %v2231_v42 }
 0x7a5   : > { %2238 = vmax.xlane.f32.xlu0 %v2237_v45 }
 0x7ae   : > { %2318 = vrot.lane.b32.xlu1 %v14162_v53, %s17254_s20 }
 0x7af   : > { %v12398_v8 = vpop.f32.mrf.mxu0 }
 0x7b2   : > { %2314 = vrot.lane.b32.xlu1 %v14175_v58, %s17254_s20 }
 0x7bb   : > { %2316 = vrot.lane.b32.xlu0 %v14168_v55, %s17254_s20 }
 0x7bf   : > { %2310 = vrot.lane.b32.xlu0 %v14189_v61, %s17254_s20 }
 0x7d6   : > { %2235 = vmax.xlane.f32.xlu1 %v2234_v39  ;;  %v2724_v39 = vpop.f32.mrf.mxu0 }
 0x7e7   : > { %2312 = vrot.lane.b32.xlu1 %v14183_v59, %s17254_s20 }
 0x7eb   : > { %2308 = vrot.lane.b32.xlu1 %v14199_v63, %s17254_s20 }
 0x81c   : > { %v2221_v37 = vpop.xlane.xlu1 %2220 }
 0x81d   : > { %v2241_v38 = vsub.f32 %v2183_v21, %v2221_v37  ;;  %v12401_v37 = vpop.f32.mrf.mxu0 }
 0x81e   : > { %v2218_v46 = vpop.xlane.xlu0 %2217 }
 0x81f   : > { %v2250_v47 = vmul.f32 1.442695, %v2241_v38  ;;  %v2240_v48 = vsub.f32 %v2178_v22, %v2218_v46 }
 0x821   : > { %13484 = vpow2.f32 %v2250_v47  ;;  %v2248_v51 = vmul.f32 1.442695, %v2240_v48  ;;  %v2734_v47 = vpop.f32.mrf.mxu0 }
 0x822   : > { %v2224_v52 = vpop.xlane.xlu0 %2223  ;;  %v14702_v48 = vadd.f32 %v14634_v27, %v2734_v47 }
 0x823   : > { %13486 = vpow2.f32 %v2248_v51  ;;  %v2242_v54 = vsub.f32 %v2188_v28, %v2224_v52  ;;  %v12404_v52 = vpop.f32.mrf.mxu0 }
 0x825   : > { %v2252_v2 = vmul.f32 1.442695, %v2242_v54  ;;  %v14707_v54 = vadd.f32 %v14634_v27, %v12401_v37 }
 0x826   : > { %v2230_v3 = vpop.xlane.xlu1 %2229  ;;  %v2227_v4 = vpop.xlane.xlu0 %2226 }
 0x827   : > { %13488 = vpow2.f32 %v2252_v2  ;;  %v2244_v5 = vsub.f32 %v2198_v11, %v2230_v3  ;;  %v2243_v50 = vsub.f32 %v2193_v30, %v2227_v4  ;;  %v2769_v2 = vsel %vm1153_vm2, %v14702_v48, -inf  ;;  %v2744_v3 = vpop.f32.mrf.mxu0 }
 0x828   : > { %v14712_v4 = vadd.f32 %v14634_v27, %v12404_v52 }
 0x829   : > { %v2256_v43 = vmul.f32 1.442695, %v2244_v5  ;;  %v2254_v60 = vmul.f32 1.442695, %v2243_v50  ;;  %v2772_v5 = vsel %vm1153_vm2, %v14707_v54, -inf  ;;  %v12407_v50 = vpop.f32.mrf.mxu0 }
 0x82a   : > { %v2319_v62 = vpop.permute.xlu1 %2318  ;;  %v2233_v36 = vpop.xlane.xlu0 %2232 }
 0x82b   : > { %13490 = vpow2.f32 %v2256_v43  ;;  %v2245_v6 = vsub.f32 %v2203_v33, %v2233_v36  ;;  %12338 = vmatprep.subr.mxu1 %v2319_v62  ;;  %v14717_v43 = vadd.f32 %v14634_v27, %v12407_v50  ;;  %v14730_v36 = vadd.f32 %v14634_v27, %v12398_v8 }
 0x82c   : > { %13492 = vpow2.f32 %v2254_v60  ;;  %12339 = vmatpush3.msra.mxu1 %v2319_v62  ;;  %v2778_v60 = vsel %vm1153_vm2, %v14712_v4, -inf }
 0x82d   : > { %v2258_v56 = vmul.f32 1.442695, %v2245_v6  ;;  %v2784_v62 = vsel %vm1153_vm2, %v14717_v43, -inf  ;;  %v14733_v6 = vadd.f32 %v14634_v27, %v2744_v3 }
 0x82e   : > { %v14663_v7 = vpop.eup %13484  ;;  %v2239_v49 = vpop.xlane.xlu0 %2238 }
 0x82f   : > { %13494 = vpow2.f32 %v2258_v56  ;;  %v2247_v9 = vsub.f32 %v2213_v41, %v2239_v49  ;;  %v2267_v57 = vsel %vm1153_vm2, %v14663_v7, 0.0  ;;  %v2315_v24 = vpop.permute.xlu1 %2314  ;;  %v2766_v56 = vsel %vm1153_vm2, %v14730_v36, -inf  ;;  %v2754_v49 = vpop.f32.mrf.mxu0 }
 0x830   : > { %v14667_v20 = vpop.eup %13486  ;;  %2268 = vadd.xlane.f32.xlu0 %v2267_v57 }
 0x831   : > { %v2262_v21 = vmul.f32 1.442695, %v2247_v9  ;;  %v2264_v18 = vsel %vm1153_vm2, %v14667_v20, 0.0  ;;  %v14738_v9 = vadd.f32 %v14634_v27, %v2754_v49 }
 0x832   : > { %2265 = vadd.xlane.f32.xlu1 %v2264_v18  ;;  %v2317_v22 = vpop.permute.xlu0 %2316 }
 0x833   : > { %13496 = vpow2.f32 %v2262_v21  ;;  %12340 = vmatprep.subr.mxu1 %v2317_v22 }
 0x834   : > { %v14671_v23 = vpop.eup %13488  ;;  %12341 = vmatpush3.msra.mxu1 %v2317_v22 }
 0x835   : > { %12342 = vmatprep.subr.mxu1 %v2315_v24  ;;  %v2270_v25 = vsel %vm1153_vm2, %v14671_v23, 0.0 }
 0x836   : > { %2271 = vadd.xlane.f32.xlu1 %v2270_v25  ;;  %12343 = vmatpush3.msra.mxu1 %v2315_v24  ;;  %v2311_v42 = vpop.permute.xlu0 %2310 }
 0x838   : > { %v14675_v26 = vpop.eup %13490 }
 0x839   : > { %v14677_v28 = vpop.eup %13492  ;;  %v2276_v29 = vsel %vm1153_vm2, %v14675_v26, 0.0 }
 0x83a   : > { %2277 = vadd.xlane.f32.xlu1 %v2276_v29  ;;  %v2273_v30 = vsel %vm1153_vm2, %v14677_v28, 0.0 }
 0x83b   : > { %2274 = vadd.xlane.f32.xlu0 %v2273_v30 }
 0x83c   : > { %v14683_v32 = vpop.eup %13494 }
 0x83d   : > { %v2279_v31 = vsel %vm1153_vm2, %v14683_v32, 0.0 }
 0x83f   : > { %2280 = vadd.xlane.f32.xlu0 %v2279_v31 }
 0x840   : > { %v14687_v11 = vpop.eup %13496 }
 0x841   : > { %v2285_v33 = vsel %vm1153_vm2, %v14687_v11, 0.0 }
 0x843   : > { %2286 = vadd.xlane.f32.xlu0 %v2285_v33 }
 0x859   : > { %2306 = vrot.lane.b32.xlu0 %v14207_v0, %s17254_s20 }
 0x85f   : > { %v2236_v34 = vpop.xlane.xlu1 %2235 }
 0x860   : > { %v2246_v35 = vsub.f32 %v14655_v44, %v2236_v34  ;;  %v14699_v44 = vadd.f32 %v14634_v27, %v2724_v39 }
 0x862   : > { %v2260_v40 = vmul.f32 1.442695, %v2246_v35  ;;  %v2763_v51 = vsel %vm1153_vm2, %v14699_v44, -inf }
 0x863   : > { %v2313_v41 = vpop.permute.xlu1 %2312 }
 0x864   : > { %13498 = vpow2.f32 %v2260_v40  ;;  %12344 = vmatprep.subr.mxu1 %v2313_v41 }
 0x865   : > { %12345 = vmatpush3.msra.mxu1 %v2313_v41 }
 0x866   : > { %12346 = vmatprep.subr.mxu1 %v2311_v42 }
 0x867   : > { %v2309_v45 = vpop.permute.xlu1 %2308  ;;  %12347 = vmatpush3.msra.mxu1 %v2311_v42 }
 0x868   : > { %12348 = vmatprep.subr.mxu1 %v2309_v45 }
 0x869   : > { %12349 = vmatpush3.msra.mxu1 %v2309_v45 }
 0x871   : > { %v14694_v38 = vpop.eup %13498 }
 0x872   : > { %v2282_v46 = vsel %vm1153_vm2, %v14694_v38, 0.0 }
 0x873   : > { %2283 = vadd.xlane.f32.xlu1 %v2282_v46 }
 0x878   : > { %2764 = vmax.xlane.f32.xlu0 %v2763_v51 }
 0x87c   : > { %2770 = vmax.xlane.f32.xlu0 %v2769_v2 }
 0x880   : > { %2773 = vmax.xlane.f32.xlu0 %v2772_v5 }
 0x884   : > { %2779 = vmax.xlane.f32.xlu0 %v2778_v60  ;;  %2304 = vrot.lane.b32.xlu1 %v14211_v1, %s17254_s20  ;;  %s17290_s20 = smov 120  }
 0x888   : > { %2785 = vmax.xlane.f32.xlu0 %v2784_v62 }
 0x89e   : > { %2863 = vrot.lane.b32.xlu0 %v14168_v55, %s17250_s27  ;;  %v2775_v55 = vsel %vm1153_vm2, %v14733_v6, -inf }
 0x8a2   : > { %2857 = vrot.lane.b32.xlu0 %v14189_v61, %s17250_s27  ;;  %v2781_v61 = vsel %vm1153_vm2, %v14738_v9, -inf }
 0x8a8   : > { %2767 = vmax.xlane.f32.xlu1 %v2766_v56 }
 0x8ac   : > { %2776 = vmax.xlane.f32.xlu1 %v2775_v55 }
 0x8b0   : > { %2782 = vmax.xlane.f32.xlu1 %v2781_v61 }
 0x8b9   : > { %v2269_v21 = vpop.xlane.xlu0 %2268 }
 0x8bb   : > { %v2266_v57 = vpop.xlane.xlu1 %2265 }
 0x8bc   : > { %13500 = vrcp.f32 %v2266_v57 }
 0x8bd   : > { %13502 = vrcp.f32 %v2269_v21 }
 0x8c1   : > { %2865 = vrot.lane.b32.xlu1 %v14162_v53, %s17250_s27  ;;  %v2272_v53 = vpop.xlane.xlu1 %2271 }
 0x8c2   : > { %13504 = vrcp.f32 %v2272_v53 }
 0x8c4   : > { %v2275_v18 = vpop.xlane.xlu0 %2274 }
 0x8c5   : > { %2861 = vrot.lane.b32.xlu1 %v14175_v58, %s17250_s27  ;;  %v2278_v58 = vpop.xlane.xlu1 %2277  ;;  %13506 = vrcp.f32 %v2275_v18 }
 0x8c6   : > { %13508 = vrcp.f32 %v2278_v58 }
 0x8c8   : > { %v2281_v27 = vpop.xlane.xlu0 %2280 }
 0x8c9   : > { %v13501_v22 = vpop.eup %13500  ;;  %2859 = vrot.lane.b32.xlu1 %v14183_v59, %s17250_s27  ;;  %13510 = vrcp.f32 %v2281_v27 }
 0x8ca   : > { %v2296_v24 = vmul.f32 %v13501_v22, %v14667_v20  ;;  %v13503_v20 = vpop.eup %13502 }
 0x8cb   : > { %v2297_v33 = vmul.f32 %v13503_v20, %v14663_v7 }
 0x8cc   : > { %v2287_v25 = vpop.xlane.xlu0 %2286  ;;  %12354 = vmatprep.mubr.msk.f32.mxu1 %vm1153_vm2, %v2296_v24 }
 0x8cd   : > { %2855 = vrot.lane.b32.xlu1 %v14199_v63, %s17250_s27  ;;  %13512 = vrcp.f32 %v2287_v25  ;;  %v983_v63 = vld [vmem:[%s17232_s9 + $0x10] sm:$0xff] }
 0x8cf   : > { %v13505_v30 = vpop.eup %13504 }
 0x8d0   : > { %v2307_v29 = vpop.permute.xlu0 %2306  ;;  %v2298_v41 = vmul.f32 %v13505_v30, %v14671_v23 }
 0x8d1   : > { %12350 = vmatprep.subr.mxu1 %v2307_v29 }
 0x8d2   : > { %12351 = vmatpush3.msra.mxu1 %v2307_v29  ;;  %v13507_v35 = vpop.eup %13506 }
 0x8d3   : > { %v13509_v42 = vpop.eup %13508  ;;  %v2299_v39 = vmul.f32 %v13507_v35, %v14677_v28 }
 0x8d4   : > { %v2300_v46 = vmul.f32 %v13509_v42, %v14675_v26 }
 0x8d6   : > { %v13511_v7 = vpop.eup %13510 }
 0x8d7   : > { %v2301_v47 = vmul.f32 %v13511_v7, %v14683_v32 }
 0x8fc   : > { %v2284_v59 = vpop.xlane.xlu1 %2283 }
 0x8fd   : > { %13514 = vrcp.f32 %v2284_v59 }
 0x900   : > { %v2305_v31 = vpop.permute.xlu1 %2304 }
 0x901   : > { %v2765_v34 = vpop.xlane.xlu0 %2764  ;;  %12352 = vmatprep.subr.mxu1 %v2305_v31 }
 0x902   : > { %v2787_v40 = vsub.f32 %v14699_v44, %v2765_v34  ;;  %12353 = vmatpush3.msra.mxu1 %v2305_v31  ;;  %v13513_v44 = vpop.eup %13512 }
 0x903   : > { %12355 = vmatmul.mubr.msk.f32.vlgmr.msra.gmra.mxu1 %vm1153_vm2, %v2297_v33  ;;  %12366 = vmatprep.subr.mxu1 %v983_v63 }
 0x904   : > { %v2795_v45 = vmul.f32 1.442695, %v2787_v40  ;;  %12357 = vmatprep.mubr.msk.f32.mxu1 %vm1153_vm2, %v2298_v41  ;;  %12367 = vmatpush3.msra.mxu1 %v983_v63  ;;  %v14815_v63 = vpop.f32.mrf.mxu1 }
 0x905   : > { %v2771_v8 = vpop.xlane.xlu0 %2770 }
 0x906   : > { %13516 = vpow2.f32 %v2795_v45  ;;  %v2789_v37 = vsub.f32 %v14702_v48, %v2771_v8  ;;  %v2303_v48 = vmul.f32 %v13513_v44, %v14687_v11  ;;  %v14817_v33 = vpop.f32.mrf.mxu1 }
 0x907   : > { %12358 = vmatmul.mubr.msk.f32.gmra.mxu1 %vm1153_vm2, %v2299_v39 }
 0x908   : > { %v2799_v23 = vmul.f32 1.442695, %v2789_v37  ;;  %12360 = vmatprep.mubr.msk.f32.mxu1 %vm1153_vm2, %v2300_v46  ;;  %v14819_v34 = vpop.f32.mrf.mxu1 }
 0x909   : > { %v2774_v3 = vpop.xlane.xlu0 %2773 }
 0x90a   : > { %v13515_v51 = vpop.eup %13514  ;;  %13518 = vpow2.f32 %v2799_v23  ;;  %v2790_v5 = vsub.f32 %v14707_v54, %v2774_v3  ;;  %v14821_v40 = vpop.f32.mrf.mxu1 }
 0x90b   : > { %12361 = vmatmul.mubr.msk.f32.gmra.mxu1 %vm1153_vm2, %v2301_v47  ;;  %v2302_v28 = vmul.f32 %v13515_v51, %v14694_v38 }
 0x90c   : > { %v2801_v60 = vmul.f32 1.442695, %v2790_v5  ;;  %v14823_v41 = vpop.f32.mrf.mxu1 }
 0x90d   : > { %12363 = vmatprep.mubr.msk.f32.mxu1 %vm1153_vm2, %v2302_v28  ;;  %v2780_v38 = vpop.xlane.xlu0 %2779 }
 0x90e   : > { %v2792_v62 = vsub.f32 %v14712_v4, %v2780_v38  ;;  %v14825_v45 = vpop.f32.mrf.mxu1 }
 0x90f   : > { %12364 = vmatmul.mubr.msk.f32.gmra.mxu1 %vm1153_vm2, %v2303_v48 }
 0x910   : > { %v2805_v57 = vmul.f32 1.442695, %v2792_v62  ;;  %v14827_v39 = vpop.f32.mrf.mxu1 }
 0x911   : > { %v2786_v49 = vpop.xlane.xlu0 %2785 }
 0x912   : > { %v2794_v21 = vsub.f32 %v14717_v43, %v2786_v49  ;;  %v14829_v7 = vpop.f32.mrf.mxu1 }
 0x913   : > { %v14773_v26 = vpop.eup %13516 }
 0x914   : > { %v2811_v52 = vsel %vm1153_vm2, %v14773_v26, 0.0 }
 0x915   : > { %2812 = vadd.xlane.f32.xlu1 %v2811_v52  ;;  %v2864_v37 = vpop.permute.xlu0 %2863 }
 0x917   : > { %v14777_v2 = vpop.eup %13518 }
 0x918   : > { %v2817_v32 = vsel %vm1153_vm2, %v14777_v2, 0.0 }
 0x919   : > { %2818 = vadd.xlane.f32.xlu1 %v2817_v32  ;;  %v2858_v47 = vpop.permute.xlu0 %2857 }
 0x931   : > { %v2768_v50 = vpop.xlane.xlu1 %2767 }
 0x932   : > { %v2788_v11 = vsub.f32 %v14730_v36, %v2768_v50  ;;  %v2809_v36 = vmul.f32 1.442695, %v2794_v21 }
 0x934   : > { %v2797_v56 = vmul.f32 1.442695, %v2788_v11 }
 0x935   : > { %v2777_v55 = vpop.xlane.xlu1 %2776 }
 0x936   : > { %13520 = vpow2.f32 %v2797_v56  ;;  %v2791_v61 = vsub.f32 %v14733_v6, %v2777_v55 }
 0x937   : > { %13522 = vpow2.f32 %v2801_v60 }
 0x938   : > { %v2803_v18 = vmul.f32 1.442695, %v2791_v61 }
 0x939   : > { %v2783_v27 = vpop.xlane.xlu1 %2782 }
 0x93a   : > { %13524 = vpow2.f32 %v2803_v18  ;;  %v2793_v54 = vsub.f32 %v14738_v9, %v2783_v27 }
 0x93b   : > { %13526 = vpow2.f32 %v2805_v57 }
 0x93c   : > { %v2807_v22 = vmul.f32 1.442695, %v2793_v54 }
 0x93d   : > { %v2866_v24 = vpop.permute.xlu1 %2865 }
 0x93e   : > { %13528 = vpow2.f32 %v2807_v22  ;;  %12408 = vmatprep.subr.mxu1 %v2866_v24 }
 0x93f   : > { %13530 = vpow2.f32 %v2809_v36 }
 0x941   : > { %v2862_v35 = vpop.permute.xlu1 %2861 }
 0x943   : > { %v14787_v4 = vpop.eup %13520 }
 0x944   : > { %v2814_v6 = vsel %vm1153_vm2, %v14787_v4, 0.0  ;;  %v14791_v25 = vpop.eup %13522 }
 0x945   : > { %2815 = vadd.xlane.f32.xlu0 %v2814_v6  ;;  %v2820_v29 = vsel %vm1153_vm2, %v14791_v25, 0.0  ;;  %v2860_v42 = vpop.permute.xlu1 %2859 }
 0x947   : > { %v14793_v43 = vpop.eup %13524 }
 0x948   : > { %v2823_v9 = vsel %vm1153_vm2, %v14793_v43, 0.0  ;;  %v14799_v53 = vpop.eup %13526 }
 0x949   : > { %2824 = vadd.xlane.f32.xlu1 %v2823_v9  ;;  %2821 = vadd.xlane.f32.xlu0 %v2820_v29  ;;  %v2826_v20 = vsel %vm1153_vm2, %v14799_v53, 0.0  ;;  %v2856_v8 = vpop.permute.xlu1 %2855 }
 0x94b   : > { %v14801_v58 = vpop.eup %13528 }
 0x94c   : > { %v2829_v59 = vsel %vm1153_vm2, %v14801_v58, 0.0  ;;  %v14807_v30 = vpop.eup %13530 }
 0x94d   : > { %2830 = vadd.xlane.f32.xlu1 %v2829_v59  ;;  %2827 = vadd.xlane.f32.xlu0 %v2826_v20  ;;  %v2832_v31 = vsel %vm1153_vm2, %v14807_v30, 0.0  ;;  %v2024_v59 = vadd.f32 %v14819_v34, %v14617_v13 }
 0x951   : > { %2833 = vadd.xlane.f32.xlu0 %v2832_v31 }
 0x95e   : > { %2851 = vrot.lane.b32.xlu1 %v14211_v1, %s17250_s27 }
 0x967   : > { %2853 = vrot.lane.b32.xlu0 %v14207_v0, %s17250_s27  ;;  %s17294_s27 = smov 104  }
 0x99e   : > { %v2813_v1 = vpop.xlane.xlu1 %2812 }
 0x99f   : > { %13532 = vrcp.f32 %v2813_v1 }
 0x9a2   : > { %v2819_v48 = vpop.xlane.xlu1 %2818 }
 0x9ac   : > { %v13533_v32 = vpop.eup %13532 }
 0x9ad   : > { %v2843_v11 = vmul.f32 %v13533_v32, %v14773_v26  ;;  %v2019_v32 = vadd.f32 %v14821_v40, %v14619_v14 }
 0x9c3   : > { %v12356_v0 = vpop.f32.mrf.mxu1 }
 0x9c5   : > { %v2418_v46 = vpop.f32.mrf.mxu1 }
 0x9c6   : > { %12368 = vmatprep.mubr.msk.f32.mxu1 %vm1015_vm1, %v2418_v46 }
 0x9c7   : > { %v12359_v23 = vpop.f32.mrf.mxu1  ;;  %12369 = vmatmul.mubr.msk.f32.vlgmr.msra.gmra.mxu1 %vm1015_vm1, %v12356_v0  ;;  %v2044_v0 = vadd.f32 %v14827_v39, %v14625_v17 }
 0x9c8   : > { %12409 = vmatpush3.msra.mxu1 %v2866_v24 }
 0x9c9   : > { %12410 = vmatprep.subr.mxu1 %v2864_v37  ;;  %v2428_v44 = vpop.f32.mrf.mxu1 }
 0x9ca   : > { %12411 = vmatpush3.msra.mxu1 %v2864_v37  ;;  %12371 = vmatprep.mubr.msk.f32.mxu1 %vm1015_vm1, %v2428_v44  ;;  %v2009_v44 = vadd.f32 %v14817_v33, %v14615_v12 }
 0x9cb   : > { %12412 = vmatprep.subr.mxu1 %v2862_v35  ;;  %v12362_v51 = vpop.f32.mrf.mxu1  ;;  %12372 = vmatmul.mubr.msk.f32.gmra.mxu1 %vm1015_vm1, %v12359_v23 }
 0x9cc   : > { %12413 = vmatpush3.msra.mxu1 %v2862_v35  ;;  %v2034_v35 = vadd.f32 %v14823_v41, %v14621_v15 }
 0x9cd   : > { %12414 = vmatprep.subr.mxu1 %v2860_v42  ;;  %v2438_v28 = vpop.f32.mrf.mxu1 }
 0x9ce   : > { %12415 = vmatpush3.msra.mxu1 %v2860_v42  ;;  %12374 = vmatprep.mubr.msk.f32.mxu1 %vm1015_vm1, %v2438_v28  ;;  %v2816_v52 = vpop.xlane.xlu0 %2815 }
 0x9cf   : > { %12416 = vmatprep.subr.mxu1 %v2858_v47  ;;  %v12365_v3 = vpop.f32.mrf.mxu1  ;;  %12375 = vmatmul.mubr.msk.f32.gmra.mxu1 %vm1015_vm1, %v12362_v51  ;;  %13534 = vrcp.f32 %v2816_v52  ;;  %v10947_v52 = vld [vmem:[%s17233_s10] ss:$0 sm:$0xff] }
 0x9d0   : > { %12417 = vmatpush3.msra.mxu1 %v2858_v47  ;;  %13536 = vrcp.f32 %v2819_v48 }
 0x9d1   : > { %12418 = vmatprep.subr.mxu1 %v2856_v8  ;;  %v2448_v38 = vpop.f32.mrf.mxu1 }
 0x9d2   : > { %12419 = vmatpush3.msra.mxu1 %v2856_v8  ;;  %12377 = vmatprep.mubr.msk.f32.mxu1 %vm1015_vm1, %v2448_v38  ;;  %v2825_v5 = vpop.xlane.xlu1 %2824  ;;  %v2822_v50 = vpop.xlane.xlu0 %2821 }
 0x9d3   : > { %12378 = vmatmul.mubr.msk.f32.gmra.mxu1 %vm1015_vm1, %v12365_v3  ;;  %13538 = vrcp.f32 %v2822_v50  ;;  %v13821_v3 = vld [vmem:[%s14102_s26 + $0x8] sm:$0xff] }
 0x9d4   : > { %12424 = vmatprep.mubr.msk.f32.mxu1 %vm1153_vm2, %v2843_v11  ;;  %13540 = vrcp.f32 %v2825_v5 }
 0x9d6   : > { %v2828_v60 = vpop.xlane.xlu0 %2827  ;;  %v2831_v62 = vpop.xlane.xlu1 %2830 }
 0x9d7   : > { %13542 = vrcp.f32 %v2828_v60  ;;  %v13822_v60 = vld [vmem:[%s14102_s26] sm:$0xff] }
 0x9d8   : > { %13544 = vrcp.f32 %v2831_v62 }
 0x9da   : > { %v2834_v56 = vpop.xlane.xlu0 %2833  ;;  %v2852_v57 = vpop.permute.xlu1 %2851 }
 0x9db   : > { %13546 = vrcp.f32 %v2834_v56 }
 0x9dc   : > { %v13535_v49 = vpop.eup %13534 }
 0x9dd   : > { %v13537_v61 = vpop.eup %13536  ;;  %v2844_v26 = vmul.f32 %v13535_v49, %v14787_v4  ;;  %v2029_v49 = vadd.f32 %v14825_v45, %v14623_v16 }
 0x9de   : > { %v2854_v55 = vpop.permute.xlu0 %2853  ;;  %v2845_v18 = vmul.f32 %v13537_v61, %v14777_v2 }
 0x9df   : > { %12420 = vmatprep.subr.mxu1 %v2854_v55 }
 0x9e0   : > { %12421 = vmatpush3.msra.mxu1 %v2854_v55  ;;  %v13539_v21 = vpop.eup %13538 }
 0x9e1   : > { %12422 = vmatprep.subr.mxu1 %v2852_v57  ;;  %v13541_v27 = vpop.eup %13540  ;;  %v2846_v54 = vmul.f32 %v13539_v21, %v14791_v25  ;;  %v984_v25 = vld [vmem:[%s17232_s9 + $0x18] sm:$0xff] }
 0x9e2   : > { %12423 = vmatpush3.msra.mxu1 %v2852_v57  ;;  %v2847_v22 = vmul.f32 %v13541_v27, %v14793_v43  ;;  %v2014_v43 = vadd.f32 %v14815_v63, %v14613_v10 }
 0x9e3   : > { %12425 = vmatmul.mubr.msk.f32.vlgmr.msra.gmra.mxu1 %vm1153_vm2, %v2844_v26  ;;  %12436 = vmatprep.subr.mxu1 %v984_v25  ;;  %v13823_v26 = vld [vmem:[%s14102_s26 + $0x18] sm:$0xff] }
 0x9e4   : > { %12427 = vmatprep.mubr.msk.f32.mxu1 %vm1153_vm2, %v2845_v18  ;;  %v13543_v36 = vpop.eup %13542  ;;  %12437 = vmatpush3.msra.mxu1 %v984_v25  ;;  %v13824_v18 = vld [vmem:[%s14102_s26 + $0x10] sm:$0xff] }
 0x9e5   : > { %v13545_v24 = vpop.eup %13544  ;;  %v2848_v4 = vmul.f32 %v13543_v36, %v14799_v53 }
 0x9e6   : > { %v2849_v2 = vmul.f32 %v13545_v24, %v14801_v58 }
 0x9e7   : > { %12428 = vmatmul.mubr.msk.f32.gmra.mxu1 %vm1153_vm2, %v2846_v54 }
 0x9e8   : > { %12430 = vmatprep.mubr.msk.f32.mxu1 %vm1153_vm2, %v2847_v22  ;;  %v13547_v6 = vpop.eup %13546  ;;  %v2039_v22 = vadd.f32 %v14829_v7, %v14627_v19 }
 0x9e9   : > { %v2850_v9 = vmul.f32 %v13547_v6, %v14807_v30 }
 0x9eb   : > { %12431 = vmatmul.mubr.msk.f32.gmra.mxu1 %vm1153_vm2, %v2848_v4 }
 0x9ec   : > { %12433 = vmatprep.mubr.msk.f32.mxu1 %vm1153_vm2, %v2849_v2 }
 0x9ef   : > { %12434 = vmatmul.mubr.msk.f32.gmra.mxu1 %vm1153_vm2, %v2850_v9  ;;  %v13825_v9 = vld [vmem:[%s14102_s26 + $0x28] sm:$0xff] }
 0xa87   : > { %v12370_v29 = vpop.f32.mrf.mxu1 }
 0xa88   : > { %v2587_v53 = vadd.f32 %v12370_v29, %v2014_v43  ;;  %v13826_v43 = vld [vmem:[%s14102_s26 + $0x20] sm:$0xff] }
 0xa89   : > { %v2547_v58 = vpop.f32.mrf.mxu1 }
 0xa8a   : > { %v2586_v51 = vadd.f32 %v2547_v58, %v2009_v44 }
 0xa8b   : > { %v12373_v20 = vpop.f32.mrf.mxu1 }
 0xa8c   : > { %v2589_v31 = vadd.f32 %v12373_v20, %v2024_v59 }
 0xa8d   : > { %v2557_v30 = vpop.f32.mrf.mxu1 }
 0xa8e   : > { %v2588_v11 = vadd.f32 %v2557_v30, %v2019_v32 }
 0xa8f   : > { %v12376_v42 = vpop.f32.mrf.mxu1 }
 0xa90   : > { %v2591_v8 = vadd.f32 %v12376_v42, %v2034_v35  ;;  %v13828_v35 = vld [vmem:[%s14102_s26 + $0x30] sm:$0xff] }
 0xa91   : > { %v2567_v1 = vpop.f32.mrf.mxu1 }
 0xa92   : > { %v2590_v21 = vadd.f32 %v2567_v1, %v2029_v49 }
 0xa93   : > { %v12379_v37 = vpop.f32.mrf.mxu1 }
 0xa94   : > { %v2593_v10 = vadd.f32 %v12379_v37, %v2044_v0 }
 0xa95   : > { %v2577_v63 = vpop.f32.mrf.mxu1 }
 0xa96   : > { %v2592_v4 = vadd.f32 %v2577_v63, %v2039_v22 }
 0xaa3   : > { %v12426_v46 = vpop.f32.mrf.mxu1 }
 0xaa5   : > { %v2965_v23 = vpop.f32.mrf.mxu1 }
 0xaa6   : > { %12438 = vmatprep.mubr.msk.f32.mxu1 %vm1015_vm1, %v2965_v23 }
 0xaa7   : > { %v12429_v13 = vpop.f32.mrf.mxu1  ;;  %12439 = vmatmul.mubr.msk.f32.vlgmr.msra.gmra.mxu1 %vm1015_vm1, %v12426_v46 }
 0xaa9   : > { %v2975_v34 = vpop.f32.mrf.mxu1 }
 0xaaa   : > { %12441 = vmatprep.mubr.msk.f32.mxu1 %vm1015_vm1, %v2975_v34 }
 0xaab   : > { %v12432_v15 = vpop.f32.mrf.mxu1  ;;  %12442 = vmatmul.mubr.msk.f32.gmra.mxu1 %vm1015_vm1, %v12429_v13 }
 0xaad   : > { %v2985_v41 = vpop.f32.mrf.mxu1 }
 0xaae   : > { %12444 = vmatprep.mubr.msk.f32.mxu1 %vm1015_vm1, %v2985_v41 }
 0xaaf   : > { %v12435_v17 = vpop.f32.mrf.mxu1  ;;  %12445 = vmatmul.mubr.msk.f32.gmra.mxu1 %vm1015_vm1, %v12432_v15 }
 0xab1   : > { %v2995_v39 = vpop.f32.mrf.mxu1 }
 0xab2   : > { %12447 = vmatprep.mubr.msk.f32.mxu1 %vm1015_vm1, %v2995_v39 }
 0xab3   : > { %12448 = vmatmul.mubr.msk.f32.gmra.mxu1 %vm1015_vm1, %v12435_v17 }
 0xb67   : > { %v12440_v47 = vpop.f32.mrf.mxu1 }
 0xb68   : > { %v3134_v28 = vadd.f32 %v12440_v47, %v2587_v53 }
 0xb69   : > { %v3094_v48 = vpop.f32.mrf.mxu1 }
 0xb6a   : > { %v3142_v38 = vadd.f32 %v13821_v3, %v3134_v28  ;;  %v3133_v5 = vadd.f32 %v3094_v48, %v2586_v51 }
 0xb6b   : > { %v12443_v50 = vpop.f32.mrf.mxu1 }
 0xb6c   : > { %v3141_v12 = vadd.f32 %v13822_v60, %v3133_v5  ;;  %v3136_v33 = vadd.f32 %v12443_v50, %v2589_v31  ;;  %v3157_v62 = vadd.f32 %v10947_v52, %v3142_v38  ;;  %v13827_v31 = vld [vmem:[%s14102_s26 + $0x38] sm:$0xff]  ;;  %s17292_s26 = smov 112  }
 0xb6d   : > { %v3104_v56 = vpop.f32.mrf.mxu1 }
 0xb6e   : > { %v3135_v55 = vadd.f32 %v3104_v56, %v2588_v11  ;;  %v3169_v61 = vsel %vm711_vm0, %v3157_v62, 0.0  ;;  %v3156_v57 = vadd.f32 %v10947_v52, %v3141_v12  ;;  %v3144_v14 = vadd.f32 %v13823_v26, %v3136_v33 }
 0xb6f   : > { %3170 = vadd.xlane.f32.xlu1 %v3169_v61  ;;  %v12446_v40 = vpop.f32.mrf.mxu1 }
 0xb70   : > { %v3143_v27 = vadd.f32 %v13824_v18, %v3135_v55  ;;  %v3138_v54 = vadd.f32 %v12446_v40, %v2591_v8  ;;  %v3166_v36 = vsel %vm711_vm0, %v3156_v57, 0.0  ;;  %v3159_v2 = vadd.f32 %v10947_v52, %v3144_v14 }
 0xb71   : > { %3167 = vadd.xlane.f32.xlu0 %v3166_v36  ;;  %v3114_v16 = vpop.f32.mrf.mxu1 }
 0xb72   : > { %v3137_v45 = vadd.f32 %v3114_v16, %v2590_v21  ;;  %v3158_v24 = vadd.f32 %v10947_v52, %v3143_v27  ;;  %v3146_v25 = vadd.f32 %v13825_v9, %v3138_v54  ;;  %v3175_v7 = vsel %vm711_vm0, %v3159_v2, 0.0  ;;  %v3299_v9 = vld [vmem:[%s17234_s11] sm:$0xff] }
 0xb73   : > { %v12449_v6 = vpop.f32.mrf.mxu1 }
 0xb74   : > { %v3145_v29 = vadd.f32 %v13826_v43, %v3137_v45  ;;  %v3140_v53 = vadd.f32 %v12449_v6, %v2593_v10  ;;  %v3172_v58 = vsel %vm711_vm0, %v3158_v24, 0.0  ;;  %v3161_v1 = vadd.f32 %v10947_v52, %v3146_v25  ;;  %v3301_v6 = vld [vmem:[%s17234_s11 + $0x10] sm:$0xff]  ;;  %v3454_v25 = vld [vmem:[%s17236_s13 + $0x38] sm:$0xff] }
 0xb75   : > { %3173 = vadd.xlane.f32.xlu0 %v3172_v58  ;;  %v3124_v59 = vpop.f32.mrf.mxu1  ;;  %v3453_v43 = vld [vmem:[%s17236_s13 + $0x30] sm:$0xff]  ;;  %12470 = vmatprep.subr.mxu1 %v3454_v25 }
 0xb76   : > { %v3139_v20 = vadd.f32 %v3124_v59, %v2592_v4  ;;  %v3160_v19 = vadd.f32 %v10947_v52, %v3145_v29  ;;  %v3148_v30 = vadd.f32 %v13827_v31, %v3140_v53  ;;  %v3181_v37 = vsel %vm711_vm0, %v3161_v1, 0.0  ;;  %v3302_v4 = vld [vmem:[%s17234_s11 + $0x18] sm:$0xff]  ;;  %12471 = vmatpush3.msra.mxu1 %v3454_v25  ;;  %v3452_v29 = vld [vmem:[%s17236_s13 + $0x28] sm:$0xff]  ;;  %v3451_v53 = vld [vmem:[%s17236_s13 + $0x20] sm:$0xff] }
 0xb77   : > { %12450 = vmatprep.subr.mxu0 %v3302_v4  ;;  %12472 = vmatprep.subr.mxu1 %v3453_v43  ;;  %v3448_v25 = vld [vmem:[%s17236_s13 + $0x8] sm:$0xff] }
 0xb78   : > { %v3147_v42 = vadd.f32 %v13828_v35, %v3139_v20  ;;  %v3178_v8 = vsel %vm711_vm0, %v3160_v19, 0.0  ;;  %v3163_v63 = vadd.f32 %v10947_v52, %v3148_v30  ;;  %12451 = vmatpush3.msra.mxu0 %v3302_v4  ;;  %12473 = vmatpush3.msra.mxu1 %v3453_v43  ;;  %v3447_v43 = vld [vmem:[%s17236_s13] sm:$0xff] }
 0xb79   : > { %3176 = vadd.xlane.f32.xlu0 %v3175_v7  ;;  %3179 = vadd.xlane.f32.xlu1 %v3178_v8 }
 0xb7a   : > { %v3162_v0 = vadd.f32 %v10947_v52, %v3147_v42  ;;  %v3187_v46 = vsel %vm711_vm0, %v3163_v63, 0.0  ;;  %12452 = vmatprep.subr.mxu0 %v3301_v6  ;;  %12474 = vmatprep.subr.mxu1 %v3452_v29 }
 0xb7b   : > { %12453 = vmatpush3.msra.mxu0 %v3301_v6  ;;  %12475 = vmatpush3.msra.mxu1 %v3452_v29  ;;  %v10950_v29 = vld [vmem:[%s17235_s12] ss:$0 sm:$0xff] }
 0xb7c   : > { %v3184_v10 = vsel %vm711_vm0, %v3162_v0, 0.0  ;;  %12476 = vmatprep.subr.mxu1 %v3451_v53 }
 0xb7d   : > { %3182 = vadd.xlane.f32.xlu0 %v3181_v37  ;;  %3185 = vadd.xlane.f32.xlu1 %v3184_v10 }
 0xb7e   : > { %12477 = vmatpush3.msra.mxu1 %v3451_v53 }
 0xb81   : > { %3188 = vadd.xlane.f32.xlu0 %v3187_v46 }
 0xbf8   : > { %v3171_v23 = vpop.xlane.xlu1 %3170 }
 0xbf9   : > { %v3192_v13 = vmul.f32 0.03125, %v3171_v23 }
 0xbfa   : > { %v3168_v34 = vpop.xlane.xlu0 %3167 }
 0xbfb   : > { %v14901_v15 = vsub.f32 %v3157_v62, %v3192_v13  ;;  %v3191_v41 = vmul.f32 0.03125, %v3168_v34 }
 0xbfd   : > { %v14903_v17 = vsub.f32 %v3156_v57, %v3191_v41  ;;  %v3208_v39 = vmul.f32 %v14901_v15, %v14901_v15 }
 0xbfe   : > { %v3174_v44 = vpop.xlane.xlu0 %3173 }
 0xbff   : > { %v3193_v47 = vmul.f32 0.03125, %v3174_v44  ;;  %v3218_v51 = vsel %vm711_vm0, %v3208_v39, 0.0  ;;  %v3207_v28 = vmul.f32 %v14903_v17, %v14903_v17 }
 0xc00   : > { %3219 = vadd.xlane.f32.xlu0 %v3218_v51  ;;  %v10948_v51 = vld [vmem:[%s17238_s15] ss:$0 sm:$0xff] }
 0xc01   : > { %v14910_v48 = vsub.f32 %v3158_v24, %v3193_v47  ;;  %v3215_v52 = vsel %vm711_vm0, %v3207_v28, 0.0 }
 0xc02   : > { %v3177_v32 = vpop.xlane.xlu0 %3176  ;;  %v3180_v3 = vpop.xlane.xlu1 %3179  ;;  %3216 = vadd.xlane.f32.xlu1 %v3215_v52 }
 0xc03   : > { %v3194_v38 = vmul.f32 0.03125, %v3177_v32  ;;  %v3195_v5 = vmul.f32 0.03125, %v3180_v3  ;;  %v3209_v50 = vmul.f32 %v14910_v48, %v14910_v48 }
 0xc05   : > { %v14915_v11 = vsub.f32 %v3159_v2, %v3194_v38  ;;  %v14917_v60 = vsub.f32 %v3160_v19, %v3195_v5  ;;  %v3221_v12 = vsel %vm711_vm0, %v3209_v50, 0.0  ;;  %v3300_v2 = vld [vmem:[%s17234_s11 + $0x8] sm:$0xff]  ;;  %v10949_v50 = vld [vmem:[%s17239_s16] ss:$0 sm:$0xff] }
 0xc06   : > { %v3183_v33 = vpop.xlane.xlu0 %3182  ;;  %3222 = vadd.xlane.f32.xlu1 %v3221_v12  ;;  %v3186_v62 = vpop.xlane.xlu1 %3185  ;;  %12454 = vmatprep.subr.mxu0 %v3300_v2 }
 0xc07   : > { %v3196_v56 = vmul.f32 0.03125, %v3183_v33  ;;  %v3197_v49 = vmul.f32 0.03125, %v3186_v62  ;;  %v3210_v55 = vmul.f32 %v14915_v11, %v14915_v11  ;;  %v3211_v61 = vmul.f32 %v14917_v60, %v14917_v60  ;;  %12455 = vmatpush3.msra.mxu0 %v3300_v2 }
 0xc08   : > { %12456 = vmatprep.subr.mxu0 %v3299_v9 }
 0xc09   : > { %v14924_v57 = vsub.f32 %v3161_v1, %v3196_v56  ;;  %v14926_v26 = vsub.f32 %v3162_v0, %v3197_v49  ;;  %v3224_v14 = vsel %vm711_vm0, %v3210_v55, 0.0  ;;  %v3227_v40 = vsel %vm711_vm0, %v3211_v61, 0.0  ;;  %12457 = vmatpush3.msra.mxu0 %v3299_v9  ;;  %v3450_v9 = vld [vmem:[%s17236_s13 + $0x18] sm:$0xff] }
 0xc0a   : > { %3225 = vadd.xlane.f32.xlu0 %v3224_v14  ;;  %v3189_v21 = vpop.xlane.xlu0 %3188  ;;  %3228 = vadd.xlane.f32.xlu1 %v3227_v40 }
 0xc0b   : > { %v3198_v18 = vmul.f32 0.03125, %v3189_v21  ;;  %v3212_v27 = vmul.f32 %v14924_v57, %v14924_v57  ;;  %v3213_v54 = vmul.f32 %v14926_v26, %v14926_v26  ;;  %12478 = vmatprep.subr.mxu1 %v3450_v9 }
 0xc0c   : > { %12479 = vmatpush3.msra.mxu1 %v3450_v9 }
 0xc0d   : > { %v14934_v36 = vsub.f32 %v3163_v63, %v3198_v18  ;;  %v3230_v22 = vsel %vm711_vm0, %v3212_v27, 0.0  ;;  %v3233_v16 = vsel %vm711_vm0, %v3213_v54, 0.0 }
 0xc0e   : > { %3231 = vadd.xlane.f32.xlu0 %v3230_v22  ;;  %3234 = vadd.xlane.f32.xlu1 %v3233_v16 }
 0xc0f   : > { %v3214_v45 = vmul.f32 %v14934_v36, %v14934_v36 }
 0xc11   : > { %v3236_v24 = vsel %vm711_vm0, %v3214_v45, 0.0 }
 0xc12   : > { %3237 = vadd.xlane.f32.xlu0 %v3236_v24 }
 0xc89   : > { %v3220_v58 = vpop.xlane.xlu0 %3219 }
 0xc8a   : > { %v3240_v59 = vmul.f32 0.03125, %v3220_v58 }
 0xc8b   : > { %v3217_v20 = vpop.xlane.xlu1 %3216 }
 0xc8c   : > { %v3248_v19 = vadd.f32 1e-05, %v3240_v59  ;;  %v3239_v7 = vmul.f32 0.03125, %v3217_v20 }
 0xc8e   : > { %13548 = vrsqrt.f32 %v3248_v19  ;;  %v3247_v31 = vadd.f32 1e-05, %v3239_v7 }
 0xc8f   : > { %v3223_v30 = vpop.xlane.xlu1 %3222 }
 0xc90   : > { %13550 = vrsqrt.f32 %v3247_v31  ;;  %v3241_v35 = vmul.f32 0.03125, %v3223_v30 }
 0xc92   : > { %v3249_v42 = vadd.f32 1e-05, %v3241_v35 }
 0xc93   : > { %v3226_v8 = vpop.xlane.xlu0 %3225  ;;  %v3229_v1 = vpop.xlane.xlu1 %3228 }
 0xc94   : > { %13552 = vrsqrt.f32 %v3249_v42  ;;  %v3242_v0 = vmul.f32 0.03125, %v3226_v8  ;;  %v3243_v37 = vmul.f32 0.03125, %v3229_v1 }
 0xc96   : > { %v3250_v10 = vadd.f32 1e-05, %v3242_v0  ;;  %v3251_v63 = vadd.f32 1e-05, %v3243_v37 }
 0xc97   : > { %v3232_v46 = vpop.xlane.xlu0 %3231  ;;  %v3235_v23 = vpop.xlane.xlu1 %3234 }
 0xc98   : > { %13554 = vrsqrt.f32 %v3250_v10  ;;  %v3244_v13 = vmul.f32 0.03125, %v3232_v46  ;;  %v3245_v34 = vmul.f32 0.03125, %v3235_v23 }
 0xc99   : > { %13556 = vrsqrt.f32 %v3251_v63 }
 0xc9a   : > { %v3252_v41 = vadd.f32 1e-05, %v3244_v13  ;;  %v3253_v39 = vadd.f32 1e-05, %v3245_v34 }
 0xc9b   : > { %v13549_v44 = vpop.eup %13548  ;;  %v3238_v47 = vpop.xlane.xlu0 %3237 }
 0xc9c   : > { %v3264_v28 = vmul.f32 %v13549_v44, %v14901_v15  ;;  %13558 = vrsqrt.f32 %v3252_v41  ;;  %v3246_v52 = vmul.f32 0.03125, %v3238_v47 }
 0xc9d   : > { %v13551_v32 = vpop.eup %13550  ;;  %13560 = vrsqrt.f32 %v3253_v39 }
 0xc9e   : > { %v3254_v3 = vadd.f32 1e-05, %v3246_v52  ;;  %v3263_v38 = vmul.f32 %v13551_v32, %v14903_v17  ;;  %v3278_v5 = vmul.f32 %v10948_v51, %v3264_v28 }
 0xca0   : > { %13562 = vrsqrt.f32 %v3254_v3  ;;  %v3277_v12 = vmul.f32 %v10948_v51, %v3263_v38  ;;  %v14976_v15 = vadd.f32 %v10949_v50, %v3278_v5 }
 0xca1   : > { %v13553_v33 = vpop.eup %13552 }
 0xca2   : > { %v14973_v62 = vadd.f32 %v10949_v50, %v3277_v12  ;;  %v3265_v56 = vmul.f32 %v13553_v33, %v14910_v48 }
 0xca4   : > { %12458 = vmatprep.mubr.msk.f32.mxu0 %vm711_vm0, %v14973_v62  ;;  %v3279_v49 = vmul.f32 %v10948_v51, %v3265_v56 }
 0xca5   : > { %v13555_v55 = vpop.eup %13554  ;;  %12459 = vmatmul.mubr.msk.f32.vlgmr.msra.gmra.mxu0 %vm711_vm0, %v14976_v15 }
 0xca6   : > { %v13557_v17 = vpop.eup %13556  ;;  %v14982_v61 = vadd.f32 %v10949_v50, %v3279_v49  ;;  %v3266_v14 = vmul.f32 %v13555_v55, %v14915_v11 }
 0xca7   : > { %v3267_v40 = vmul.f32 %v13557_v17, %v14917_v60 }
 0xca8   : > { %12461 = vmatprep.mubr.msk.f32.mxu0 %vm711_vm0, %v14982_v61  ;;  %v3280_v48 = vmul.f32 %v10948_v51, %v3266_v14 }
 0xca9   : > { %v13559_v21 = vpop.eup %13558  ;;  %v3281_v18 = vmul.f32 %v10948_v51, %v3267_v40 }
 0xcaa   : > { %v13561_v27 = vpop.eup %13560  ;;  %v14988_v54 = vadd.f32 %v10949_v50, %v3280_v48  ;;  %v3268_v22 = vmul.f32 %v13559_v21, %v14924_v57 }
 0xcab   : > { %v14991_v16 = vadd.f32 %v10949_v50, %v3281_v18  ;;  %v3269_v45 = vmul.f32 %v13561_v27, %v14926_v26 }
 0xcac   : > { %12462 = vmatmul.mubr.msk.f32.gmra.mxu0 %vm711_vm0, %v14988_v54  ;;  %v3282_v11 = vmul.f32 %v10948_v51, %v3268_v22 }
 0xcad   : > { %v13563_v60 = vpop.eup %13562  ;;  %12464 = vmatprep.mubr.msk.f32.mxu0 %vm711_vm0, %v14991_v16  ;;  %v3283_v24 = vmul.f32 %v10948_v51, %v3269_v45 }
 0xcae   : > { %v14998_v4 = vadd.f32 %v10949_v50, %v3282_v11  ;;  %v3270_v6 = vmul.f32 %v13563_v60, %v14934_v36  ;;  %v3449_v36 = vld [vmem:[%s17236_s13 + $0x10] sm:$0xff] }
 0xcaf   : > { %v15001_v2 = vadd.f32 %v10949_v50, %v3283_v24  ;;  %12480 = vmatprep.subr.mxu1 %v3449_v36 }
 0xcb0   : > { %12465 = vmatmul.mubr.msk.f32.gmra.mxu0 %vm711_vm0, %v14998_v4  ;;  %v3284_v57 = vmul.f32 %v10948_v51, %v3270_v6  ;;  %12481 = vmatpush3.msra.mxu1 %v3449_v36  ;;  %v10959_v51 = vld [vmem:[%s17237_s14] ss:$0 sm:$0xff] }
 0xcb1   : > { %12467 = vmatprep.mubr.msk.f32.mxu0 %vm711_vm0, %v15001_v2  ;;  %12482 = vmatprep.subr.mxu1 %v3448_v25 }
 0xcb2   : > { %v15007_v26 = vadd.f32 %v10949_v50, %v3284_v57  ;;  %12483 = vmatpush3.msra.mxu1 %v3448_v25 }
 0xcb3   : > { %12484 = vmatprep.subr.mxu1 %v3447_v43 }
 0xcb4   : > { %12468 = vmatmul.mubr.msk.f32.gmra.mxu0 %vm711_vm0, %v15007_v26  ;;  %12485 = vmatpush3.msra.mxu1 %v3447_v43 }
 0xd65   : > { %v12460_v53 = vpop.f32.mrf.mxu0 }
 0xd66   : > { %v3406_v58 = vadd.f32 %v12460_v53, %v10950_v29 }
 0xd67   : > { %v3400_v59 = vpop.f32.mrf.mxu0 }
 0xd68   : > { %v3401_v20 = vadd.f32 %v10950_v29, %v3400_v59  ;;  %v3440_v7 = vmax.f32 %v3406_v58, 0.0 }
 0xd6a   : > { %v3439_v19 = vmax.f32 %v3401_v20, 0.0 }
 0xd6c   : > { %v12463_v31 = vpop.f32.mrf.mxu0  ;;  %12486 = vmatprep.mubr.msk.f32.mxu1 %vm1153_vm2, %v3439_v19 }
 0xd6d   : > { %12487 = vmatmul.mubr.msk.f32.vlgmr.msra.gmra.mxu1 %vm1153_vm2, %v3440_v7  ;;  %v3416_v30 = vadd.f32 %v12463_v31, %v10950_v29 }
 0xd6e   : > { %v3410_v35 = vpop.f32.mrf.mxu0 }
 0xd6f   : > { %v3411_v42 = vadd.f32 %v10950_v29, %v3410_v35  ;;  %v3442_v0 = vmax.f32 %v3416_v30, 0.0 }
 0xd70   : > { %v12466_v8 = vpop.f32.mrf.mxu0 }
 0xd71   : > { %v3441_v1 = vmax.f32 %v3411_v42, 0.0  ;;  %v3426_v37 = vadd.f32 %v12466_v8, %v10950_v29 }
 0xd72   : > { %v3420_v10 = vpop.f32.mrf.mxu0 }
 0xd73   : > { %v3421_v63 = vadd.f32 %v10950_v29, %v3420_v10  ;;  %12489 = vmatprep.mubr.msk.f32.mxu1 %vm1153_vm2, %v3441_v1  ;;  %v3444_v13 = vmax.f32 %v3426_v37, 0.0 }
 0xd74   : > { %v12469_v46 = vpop.f32.mrf.mxu0  ;;  %12490 = vmatmul.mubr.msk.f32.gmra.mxu1 %vm1153_vm2, %v3442_v0 }
 0xd75   : > { %v3443_v23 = vmax.f32 %v3421_v63, 0.0  ;;  %v3436_v34 = vadd.f32 %v12469_v46, %v10950_v29 }
 0xd76   : > { %v3430_v41 = vpop.f32.mrf.mxu0 }
 0xd77   : > { %v3431_v39 = vadd.f32 %v10950_v29, %v3430_v41  ;;  %12492 = vmatprep.mubr.msk.f32.mxu1 %vm1153_vm2, %v3443_v23  ;;  %v3446_v47 = vmax.f32 %v3436_v34, 0.0 }
 0xd78   : > { %12493 = vmatmul.mubr.msk.f32.gmra.mxu1 %vm1153_vm2, %v3444_v13 }
 0xd79   : > { %v3445_v44 = vmax.f32 %v3431_v39, 0.0 }
 0xd7b   : > { %12495 = vmatprep.mubr.msk.f32.mxu1 %vm1153_vm2, %v3445_v44 }
 0xd7c   : > { %12496 = vmatmul.mubr.msk.f32.gmra.mxu1 %vm1153_vm2, %v3446_v47 }
 0xe2d   : > { %v12488_v28 = vpop.f32.mrf.mxu1 }
 0xe2e   : > { %v3558_v52 = vadd.f32 %v12488_v28, %v10959_v51 }
 0xe2f   : > { %v3552_v32 = vpop.f32.mrf.mxu1 }
 0xe30   : > { %v3592_v3 = vadd.f32 %v3558_v52, %v14976_v15  ;;  %v3553_v38 = vadd.f32 %v10959_v51, %v3552_v32 }
 0xe32   : > { %v3604_v5 = vsel %vm711_vm0, %v3592_v3, 0.0  ;;  %v3591_v50 = vadd.f32 %v3553_v38, %v14973_v62 }
 0xe33   : > { %3605 = vadd.xlane.f32.xlu0 %v3604_v5 }
 0xe34   : > { %v12491_v12 = vpop.f32.mrf.mxu1  ;;  %v3601_v33 = vsel %vm711_vm0, %v3591_v50, 0.0 }
 0xe35   : > { %v3568_v56 = vadd.f32 %v12491_v12, %v10959_v51  ;;  %3602 = vadd.xlane.f32.xlu1 %v3601_v33  ;;  %v10987_v33 = vld [vmem:[%s17230_s7 + $0x38] sm:$0xff] }
 0xe36   : > { %v3562_v49 = vpop.f32.mrf.mxu1  ;;  %12518 = vmatprep.subr.mxu1 %v10987_v33 }
 0xe37   : > { %v3594_v55 = vadd.f32 %v3568_v56, %v14988_v54  ;;  %v3563_v17 = vadd.f32 %v10959_v51, %v3562_v49  ;;  %v10973_v56 = vld [vmem:[%s17228_s5 + $0x38] sm:$0xff]  ;;  %v10972_v49 = vld [vmem:[%s17228_s5 + $0x30] sm:$0xff]  ;;  %12519 = vmatpush3.msra.mxu1 %v10987_v33 }
 0xe38   : > { %v12494_v14 = vpop.f32.mrf.mxu1  ;;  %12498 = vmatprep.subr.mxu0 %v10973_v56 }
 0xe39   : > { %v3578_v40 = vadd.f32 %v12494_v14, %v10959_v51  ;;  %v3610_v48 = vsel %vm711_vm0, %v3594_v55, 0.0  ;;  %v3593_v15 = vadd.f32 %v3563_v17, %v14982_v61  ;;  %v10985_v17 = vld [vmem:[%s17230_s7 + $0x28] sm:$0xff]  ;;  %12499 = vmatpush3.msra.mxu0 %v10973_v56 }
 0xe3a   : > { %3611 = vadd.xlane.f32.xlu0 %v3610_v48  ;;  %v3572_v21 = vpop.f32.mrf.mxu1  ;;  %v10971_v14 = vld [vmem:[%s17228_s5 + $0x28] sm:$0xff]  ;;  %12500 = vmatprep.subr.mxu0 %v10972_v49  ;;  %v10970_v48 = vld [vmem:[%s17228_s5 + $0x20] sm:$0xff] }
 0xe3b   : > { %v3596_v62 = vadd.f32 %v3578_v40, %v14998_v4  ;;  %v3573_v18 = vadd.f32 %v10959_v51, %v3572_v21  ;;  %v3607_v27 = vsel %vm711_vm0, %v3593_v15, 0.0  ;;  %v10984_v40 = vld [vmem:[%s17230_s7 + $0x20] sm:$0xff]  ;;  %12501 = vmatpush3.msra.mxu0 %v10972_v49 }
 0xe3c   : > { %3608 = vadd.xlane.f32.xlu1 %v3607_v27  ;;  %v12497_v22 = vpop.f32.mrf.mxu1  ;;  %12502 = vmatprep.subr.mxu0 %v10971_v14 }
 0xe3d   : > { %v3588_v45 = vadd.f32 %v12497_v22, %v10959_v51  ;;  %v3616_v11 = vsel %vm711_vm0, %v3596_v62, 0.0  ;;  %v3595_v54 = vadd.f32 %v3573_v18, %v14991_v16  ;;  %12503 = vmatpush3.msra.mxu0 %v10971_v14 }
 0xe3e   : > { %3617 = vadd.xlane.f32.xlu0 %v3616_v11  ;;  %v3582_v60 = vpop.f32.mrf.mxu1  ;;  %12504 = vmatprep.subr.mxu0 %v10970_v48 }
 0xe3f   : > { %v3598_v24 = vadd.f32 %v3588_v45, %v15007_v26  ;;  %v3583_v6 = vadd.f32 %v10959_v51, %v3582_v60  ;;  %v3613_v61 = vsel %vm711_vm0, %v3595_v54, 0.0  ;;  %12505 = vmatpush3.msra.mxu0 %v10970_v48 }
 0xe40   : > { %3614 = vadd.xlane.f32.xlu1 %v3613_v61 }
 0xe41   : > { %v3622_v4 = vsel %vm711_vm0, %v3598_v24, 0.0  ;;  %v3597_v57 = vadd.f32 %v3583_v6, %v15001_v2 }
 0xe42   : > { %3623 = vadd.xlane.f32.xlu0 %v3622_v4 }
 0xe43   : > { %v3619_v9 = vsel %vm711_vm0, %v3597_v57, 0.0 }
 0xe44   : > { %3620 = vadd.xlane.f32.xlu1 %v3619_v9 }
 0xebc   : > { %v3606_v36 = vpop.xlane.xlu0 %3605 }
 0xebd   : > { %v3626_v25 = vmul.f32 0.03125, %v3606_v36 }
 0xebe   : > { %v3603_v43 = vpop.xlane.xlu1 %3602 }
 0xebf   : > { %v15053_v16 = vsub.f32 %v3592_v3, %v3626_v25  ;;  %v3625_v29 = vmul.f32 0.03125, %v3603_v43 }
 0xec1   : > { %v15055_v53 = vsub.f32 %v3591_v50, %v3625_v29  ;;  %v3642_v26 = vmul.f32 %v15053_v16, %v15053_v16 }
 0xec3   : > { %v3612_v58 = vpop.xlane.xlu0 %3611  ;;  %v3652_v59 = vsel %vm711_vm0, %v3642_v26, 0.0  ;;  %v3641_v2 = vmul.f32 %v15055_v53, %v15055_v53 }
 0xec4   : > { %v3628_v20 = vmul.f32 0.03125, %v3612_v58  ;;  %3653 = vadd.xlane.f32.xlu0 %v3652_v59  ;;  %v10968_v59 = vld [vmem:[%s17240_s17] ss:$0 sm:$0xff] }
 0xec5   : > { %v3609_v19 = vpop.xlane.xlu1 %3608  ;;  %v3649_v7 = vsel %vm711_vm0, %v3641_v2, 0.0 }
 0xec6   : > { %v15063_v31 = vsub.f32 %v3594_v55, %v3628_v20  ;;  %v3627_v30 = vmul.f32 0.03125, %v3609_v19  ;;  %3650 = vadd.xlane.f32.xlu1 %v3649_v7  ;;  %v10986_v55 = vld [vmem:[%s17230_s7 + $0x30] sm:$0xff] }
 0xec7   : > { %v3618_v35 = vpop.xlane.xlu0 %3617  ;;  %12520 = vmatprep.subr.mxu1 %v10986_v55 }
 0xec8   : > { %v15065_v42 = vsub.f32 %v3593_v15, %v3627_v30  ;;  %v3630_v8 = vmul.f32 0.03125, %v3618_v35  ;;  %v3644_v1 = vmul.f32 %v15063_v31, %v15063_v31  ;;  %12521 = vmatpush3.msra.mxu1 %v10986_v55 }
 0xec9   : > { %v3615_v0 = vpop.xlane.xlu1 %3614  ;;  %12522 = vmatprep.subr.mxu1 %v10985_v17 }
 0xeca   : > { %v15069_v37 = vsub.f32 %v3596_v62, %v3630_v8  ;;  %v3629_v10 = vmul.f32 0.03125, %v3615_v0  ;;  %v3658_v63 = vsel %vm711_vm0, %v3644_v1, 0.0  ;;  %v3643_v46 = vmul.f32 %v15065_v42, %v15065_v42  ;;  %12523 = vmatpush3.msra.mxu1 %v10985_v17  ;;  %v10969_v8 = vld [vmem:[%s17241_s18] ss:$0 sm:$0xff]  ;;  %v13832_v17 = vld [vmem:[%s14107_s29 + $0x18] sm:$0xff] }
 0xecb   : > { %3659 = vadd.xlane.f32.xlu0 %v3658_v63  ;;  %v3624_v23 = vpop.xlane.xlu0 %3623  ;;  %12524 = vmatprep.subr.mxu1 %v10984_v40 }
 0xecc   : > { %v15074_v13 = vsub.f32 %v3595_v54, %v3629_v10  ;;  %v3632_v34 = vmul.f32 0.03125, %v3624_v23  ;;  %v3655_v41 = vsel %vm711_vm0, %v3643_v46, 0.0  ;;  %v3646_v39 = vmul.f32 %v15069_v37, %v15069_v37  ;;  %12525 = vmatpush3.msra.mxu1 %v10984_v40 }
 0xecd   : > { %3656 = vadd.xlane.f32.xlu1 %v3655_v41  ;;  %v3621_v44 = vpop.xlane.xlu1 %3620 }
 0xece   : > { %v15079_v47 = vsub.f32 %v3598_v24, %v3632_v34  ;;  %v3631_v51 = vmul.f32 0.03125, %v3621_v44  ;;  %v3664_v28 = vsel %vm711_vm0, %v3646_v39, 0.0  ;;  %v3645_v52 = vmul.f32 %v15074_v13, %v15074_v13  ;;  %v13829_v34 = vld [vmem:[%s14107_s29] sm:$0xff] }
 0xecf   : > { %3665 = vadd.xlane.f32.xlu0 %v3664_v28 }
 0xed0   : > { %v15084_v32 = vsub.f32 %v3597_v57, %v3631_v51  ;;  %v3661_v3 = vsel %vm711_vm0, %v3645_v52, 0.0  ;;  %v3648_v38 = vmul.f32 %v15079_v47, %v15079_v47 }
 0xed1   : > { %3662 = vadd.xlane.f32.xlu1 %v3661_v3 }
 0xed2   : > { %v3670_v5 = vsel %vm711_vm0, %v3648_v38, 0.0  ;;  %v3647_v50 = vmul.f32 %v15084_v32, %v15084_v32 }
 0xed3   : > { %3671 = vadd.xlane.f32.xlu0 %v3670_v5 }
 0xed4   : > { %v3667_v12 = vsel %vm711_vm0, %v3647_v50, 0.0 }
 0xed5   : > { %3668 = vadd.xlane.f32.xlu1 %v3667_v12 }
 0xf4d   : > { %v3654_v15 = vpop.xlane.xlu0 %3653 }
 0xf4e   : > { %v3674_v21 = vmul.f32 0.03125, %v3654_v15 }
 0xf4f   : > { %v3651_v62 = vpop.xlane.xlu1 %3650 }
 0xf50   : > { %v3682_v18 = vadd.f32 1e-05, %v3674_v21  ;;  %v3673_v27 = vmul.f32 0.03125, %v3651_v62 }
 0xf52   : > { %13564 = vrsqrt.f32 %v3682_v18  ;;  %v3681_v22 = vadd.f32 1e-05, %v3673_v27  ;;  %v13834_v18 = vld [vmem:[%s14107_s29 + $0x28] sm:$0xff] }
 0xf54   : > { %13566 = vrsqrt.f32 %v3681_v22  ;;  %v3660_v45 = vpop.xlane.xlu0 %3659 }
 0xf55   : > { %v3676_v11 = vmul.f32 0.03125, %v3660_v45  ;;  %v13835_v45 = vld [vmem:[%s14107_s29 + $0x30] sm:$0xff] }
 0xf56   : > { %v3657_v54 = vpop.xlane.xlu1 %3656 }
 0xf57   : > { %v3684_v60 = vadd.f32 1e-05, %v3676_v11  ;;  %v3675_v24 = vmul.f32 0.03125, %v3657_v54  ;;  %v13836_v54 = vld [vmem:[%s14107_s29 + $0x38] sm:$0xff] }
 0xf58   : > { %v3666_v6 = vpop.xlane.xlu0 %3665 }
 0xf59   : > { %13568 = vrsqrt.f32 %v3684_v60  ;;  %v3683_v61 = vadd.f32 1e-05, %v3675_v24  ;;  %v3678_v4 = vmul.f32 0.03125, %v3666_v6 }
 0xf5a   : > { %v3663_v57 = vpop.xlane.xlu1 %3662 }
 0xf5b   : > { %13570 = vrsqrt.f32 %v3683_v61  ;;  %v3686_v9 = vadd.f32 1e-05, %v3678_v4  ;;  %v3677_v36 = vmul.f32 0.03125, %v3663_v57  ;;  %v10975_v61 = vld [vmem:[%s17229_s6 + $0x1] ss:$0 sm:$0xff] }
 0xf5c   : > { %v3672_v25 = vpop.xlane.xlu0 %3671 }
 0xf5d   : > { %13572 = vrsqrt.f32 %v3686_v9  ;;  %v3685_v43 = vadd.f32 1e-05, %v3677_v36  ;;  %v3680_v29 = vmul.f32 0.03125, %v3672_v25 }
 0xf5e   : > { %v3669_v26 = vpop.xlane.xlu1 %3668 }
 0xf5f   : > { %v13565_v58 = vpop.eup %13564  ;;  %13574 = vrsqrt.f32 %v3685_v43  ;;  %v3688_v2 = vadd.f32 1e-05, %v3680_v29  ;;  %v3679_v20 = vmul.f32 0.03125, %v3669_v26 }
 0xf60   : > { %v3698_v19 = vmul.f32 %v13565_v58, %v15053_v16 }
 0xf61   : > { %v13567_v7 = vpop.eup %13566  ;;  %13576 = vrsqrt.f32 %v3688_v2  ;;  %v3687_v30 = vadd.f32 1e-05, %v3679_v20  ;;  %v10989_v2 = vld [vmem:[%s17231_s8 + $0x1] ss:$0 sm:$0xff] }
 0xf62   : > { %v3712_v35 = vmul.f32 %v10968_v59, %v3698_v19  ;;  %v3697_v1 = vmul.f32 %v13567_v7, %v15055_v53  ;;  %v13830_v53 = vld [vmem:[%s14107_s29 + $0x8] sm:$0xff] }
 0xf63   : > { %13578 = vrsqrt.f32 %v3687_v30 }
 0xf64   : > { %v3711_v0 = vmul.f32 %v10968_v59, %v3697_v1  ;;  %v15125_v10 = vadd.f32 %v10969_v8, %v3712_v35 }
 0xf66   : > { %v13569_v63 = vpop.eup %13568  ;;  %v15127_v46 = vadd.f32 %v10969_v8, %v3711_v0  ;;  %v3734_v39 = vadd.f32 %v13830_v53, %v15125_v10 }
 0xf67   : > { %v3700_v16 = vmul.f32 %v13569_v63, %v15063_v31 }
 0xf68   : > { %v13571_v23 = vpop.eup %13570  ;;  %12526 = vmatprep.mubr.msk.f32.mxu1 %vm711_vm0, %v15127_v46  ;;  %v3733_v41 = vadd.f32 %v13829_v34, %v15127_v46 }
 0xf69   : > { %12527 = vmatmul.mubr.msk.f32.vlgmr.msra.gmra.mxu1 %vm711_vm0, %v15125_v10  ;;  %v3699_v44 = vmul.f32 %v13571_v23, %v15065_v42  ;;  %v3714_v51 = vmul.f32 %v10968_v59, %v3700_v16  ;;  %v13831_v42 = vld [vmem:[%s14107_s29 + $0x10] sm:$0xff] }
 0xf6a   : > { %v13573_v28 = vpop.eup %13572  ;;  %12506 = vmatprep.mubr.msk.f32.mxu0 %vm711_vm0, %v3733_v41 }
 0xf6b   : > { %12507 = vmatmul.mubr.msk.f32.vlgmr.msra.gmra.mxu0 %vm711_vm0, %v3734_v39  ;;  %v3713_v31 = vmul.f32 %v10968_v59, %v3699_v44  ;;  %v3702_v52 = vmul.f32 %v13573_v28, %v15069_v37  ;;  %v15142_v38 = vadd.f32 %v10969_v8, %v3714_v51 }
 0xf6c   : > { %v13575_v3 = vpop.eup %13574 }
 0xf6d   : > { %v15144_v5 = vadd.f32 %v10969_v8, %v3713_v31  ;;  %v3701_v50 = vmul.f32 %v13575_v3, %v15074_v13  ;;  %v3716_v12 = vmul.f32 %v10968_v59, %v3702_v52  ;;  %v3736_v13 = vadd.f32 %v13832_v17, %v15142_v38 }
 0xf6e   : > { %v13577_v33 = vpop.eup %13576 }
 0xf6f   : > { %12529 = vmatprep.mubr.msk.f32.mxu1 %vm711_vm0, %v15144_v5  ;;  %v3735_v56 = vadd.f32 %v13831_v42, %v15144_v5  ;;  %v3715_v49 = vmul.f32 %v10968_v59, %v3701_v50  ;;  %v3704_v55 = vmul.f32 %v13577_v33, %v15079_v47  ;;  %v15156_v14 = vadd.f32 %v10969_v8, %v3716_v12  ;;  %v13833_v47 = vld [vmem:[%s14107_s29 + $0x20] sm:$0xff] }
 0xf70   : > { %v13579_v37 = vpop.eup %13578  ;;  %12530 = vmatmul.mubr.msk.f32.gmra.mxu1 %vm711_vm0, %v15142_v38 }
 0xf71   : > { %12509 = vmatprep.mubr.msk.f32.mxu0 %vm711_vm0, %v3735_v56  ;;  %v15159_v40 = vadd.f32 %v10969_v8, %v3715_v49  ;;  %v3703_v48 = vmul.f32 %v13579_v37, %v15084_v32  ;;  %v3718_v15 = vmul.f32 %v10968_v59, %v3704_v55  ;;  %v3738_v27 = vadd.f32 %v13834_v18, %v15156_v14 }
 0xf72   : > { %12510 = vmatmul.mubr.msk.f32.gmra.mxu0 %vm711_vm0, %v3736_v13  ;;  %v15302_v13 = vld [vmem:[%s14262_s22] ss:$0 sm:$0xff] }
 0xf73   : > { %12532 = vmatprep.mubr.msk.f32.mxu1 %vm711_vm0, %v15159_v40  ;;  %v3737_v21 = vadd.f32 %v13833_v47, %v15159_v40  ;;  %v3717_v62 = vmul.f32 %v10968_v59, %v3703_v48  ;;  %v15171_v22 = vadd.f32 %v10969_v8, %v3718_v15 }
 0xf74   : > { %12533 = vmatmul.mubr.msk.f32.gmra.mxu1 %vm711_vm0, %v15156_v14 }
 0xf75   : > { %12512 = vmatprep.mubr.msk.f32.mxu0 %vm711_vm0, %v3737_v21  ;;  %v15174_v32 = vadd.f32 %v10969_v8, %v3717_v62  ;;  %v3740_v60 = vadd.f32 %v13836_v54, %v15171_v22 }
 0xf76   : > { %12513 = vmatmul.mubr.msk.f32.gmra.mxu0 %vm711_vm0, %v3738_v27 }
 0xf77   : > { %12535 = vmatprep.mubr.msk.f32.mxu1 %vm711_vm0, %v15174_v32  ;;  %v3739_v11 = vadd.f32 %v13835_v45, %v15174_v32 }
 0xf78   : > { %12536 = vmatmul.mubr.msk.f32.gmra.mxu1 %vm711_vm0, %v15171_v22 }
 0xf79   : > { %12515 = vmatprep.mubr.msk.f32.mxu0 %vm711_vm0, %v3739_v11 }
 0xf7a   : > { %12516 = vmatmul.mubr.msk.f32.gmra.mxu0 %vm711_vm0, %v3740_v60 }
0x1029   : > { %v12528_v24 = vpop.f32.mrf.mxu1 }
0x102a   : > { %v15237_v51 = vadd.f32 %v12528_v24, %v10989_v2 }
0x102b   : > { %v12508_v6 = vpop.f32.mrf.mxu0  ;;  %v3986_v57 = vpop.f32.mrf.mxu1 }
0x102c   : > { %v15239_v28 = vadd.f32 %v12508_v6, %v10975_v61  ;;  %v15245_v31 = vadd.f32 %v10989_v2, %v3986_v57 }
0x102d   : > { %v3844_v4 = vpop.f32.mrf.mxu0 }
0x102e   : > { %v15190_v9 = vadd.f32 %v10975_v61, %v3844_v4 }
0x1030   : > { %v12531_v36 = vpop.f32.mrf.mxu1  ;;  %12554 = vmatprep.mubr.msk.f32.mxu0 %vm1015_vm1, %v15190_v9 }
0x1031   : > { %v15221_v41 = vadd.f32 %v12531_v36, %v10989_v2 }
0x1032   : > { %v12511_v25 = vpop.f32.mrf.mxu0  ;;  %v3996_v43 = vpop.f32.mrf.mxu1 }
0x1033   : > { %v15223_v53 = vadd.f32 %v12511_v25, %v10975_v61  ;;  %v15229_v39 = vadd.f32 %v10989_v2, %v3996_v43 }
0x1034   : > { %v3854_v29 = vpop.f32.mrf.mxu0  ;;  %v12534_v26 = vpop.f32.mrf.mxu1 }
0x1035   : > { %v15205_v63 = vadd.f32 %v12534_v26, %v10989_v2  ;;  %v15247_v52 = vadd.f32 %v10975_v61, %v3854_v29 }
0x1036   : > { %v12514_v58 = vpop.f32.mrf.mxu0  ;;  %v4006_v59 = vpop.f32.mrf.mxu1 }
0x1037   : > { %v15213_v23 = vadd.f32 %v12514_v58, %v10975_v61  ;;  %v15215_v34 = vadd.f32 %v10989_v2, %v4006_v59 }
0x1038   : > { %v3864_v20 = vpop.f32.mrf.mxu0  ;;  %v12537_v19 = vpop.f32.mrf.mxu1 }
0x1039   : > { %v15197_v7 = vadd.f32 %v12537_v19, %v10989_v2  ;;  %v15231_v44 = vadd.f32 %v10975_v61, %v3864_v20 }
0x103a   : > { %v12517_v30 = vpop.f32.mrf.mxu0  ;;  %v4016_v35 = vpop.f32.mrf.mxu1 }
0x103b   : > { %v15199_v8 = vadd.f32 %v12517_v30, %v10975_v61  ;;  %v15201_v1 = vadd.f32 %v10989_v2, %v4016_v35  ;;  %12566 = vmatprep.subr.mxu1 %v15197_v7 }
0x103c   : > { %v3874_v0 = vpop.f32.mrf.mxu0  ;;  %12567 = vmatpush3.msra.mxu1 %v15197_v7 }
0x103d   : > { %v15207_v16 = vadd.f32 %v10975_v61, %v3874_v0  ;;  %12568 = vmatprep.subr.mxu1 %v15201_v1  ;;  %4052 = vrot.lane.b32.xlu1 %v15199_v8, %s17288_s21 }
0x103e   : > { %12569 = vmatpush3.msra.mxu1 %v15201_v1 }
0x103f   : > { %12570 = vmatprep.subr.mxu1 %v15205_v63  ;;  %4050 = vrot.lane.b32.xlu0 %v15207_v16, %s17288_s21 }
0x1040   : > { %12571 = vmatpush3.msra.mxu1 %v15205_v63 }
0x1041   : > { %12572 = vmatprep.subr.mxu1 %v15215_v34  ;;  %4048 = vrot.lane.b32.xlu1 %v15213_v23, %s17288_s21 }
0x1042   : > { %12573 = vmatpush3.msra.mxu1 %v15215_v34 }
0x1043   : > { %12574 = vmatprep.subr.mxu1 %v15221_v41  ;;  %4044 = vrot.lane.b32.xlu0 %v15223_v53, %s17288_s21 }
0x1044   : > { %12575 = vmatpush3.msra.mxu1 %v15221_v41 }
0x1045   : > { %12576 = vmatprep.subr.mxu1 %v15229_v39  ;;  %4046 = vrot.lane.b32.xlu1 %v15231_v44, %s17288_s21 }
0x1046   : > { %12577 = vmatpush3.msra.mxu1 %v15229_v39 }
0x1047   : > { %12578 = vmatprep.subr.mxu1 %v15237_v51  ;;  %4040 = vrot.lane.b32.xlu0 %v15239_v28, %s17288_s21 }
0x1048   : > { %12579 = vmatpush3.msra.mxu1 %v15237_v51 }
0x1049   : > { %12580 = vmatprep.subr.mxu1 %v15245_v31  ;;  %4042 = vrot.lane.b32.xlu1 %v15247_v52, %s17288_s21 }
0x104a   : > { %12581 = vmatpush3.msra.mxu1 %v15245_v31 }
0x104b   : > { %4436 = vrot.lane.b32.xlu0 %v15207_v16, %s17289_s2 }
0x104d   : > { %4038 = vrot.lane.b32.xlu1 %v15190_v9, %s17288_s21 }
0x1051   : > { %4438 = vrot.lane.b32.xlu1 %v15199_v8, %s17289_s2 }
0x1055   : > { %4434 = vrot.lane.b32.xlu1 %v15213_v23, %s17289_s2 }
0x1059   : > { %4432 = vrot.lane.b32.xlu1 %v15231_v44, %s17289_s2 }
0x10af   : > { %v4053_v3 = vpop.permute.xlu1 %4052 }
0x10b0   : > { %12538 = vmatprep.subr.msk.mxu0 %vm1015_vm1, %v4053_v3 }
0x10b1   : > { %12539 = vmatpush3.xpose.msk.msra.mxu0 %vm1015_vm1, %v4053_v3  ;;  %v4051_v50 = vpop.permute.xlu0 %4050 }
0x10b2   : > { %12540 = vmatprep.subr.msk.mxu0 %vm1015_vm1, %v4051_v50 }
0x10b3   : > { %v4049_v12 = vpop.permute.xlu1 %4048 }
0x10b5   : > { %12541 = vmatpush3.xpose.msk.msra.mxu0 %vm1015_vm1, %v4051_v50  ;;  %v4045_v56 = vpop.permute.xlu0 %4044 }
0x10b6   : > { %12542 = vmatprep.subr.msk.mxu0 %vm1015_vm1, %v4049_v12 }
0x10b7   : > { %v4047_v33 = vpop.permute.xlu1 %4046 }
0x10b9   : > { %12543 = vmatpush3.xpose.msk.msra.mxu0 %vm1015_vm1, %v4049_v12  ;;  %v4041_v37 = vpop.permute.xlu0 %4040 }
0x10ba   : > { %12544 = vmatprep.subr.msk.mxu0 %vm1015_vm1, %v4047_v33 }
0x10bb   : > { %v4043_v42 = vpop.permute.xlu1 %4042 }
0x10bd   : > { %12545 = vmatpush3.xpose.msk.msra.mxu0 %vm1015_vm1, %v4047_v33  ;;  %v15328_v19 = vpop.permute.xlu0 %4436 }
0x10be   : > { %12546 = vmatprep.subr.msk.mxu0 %vm1015_vm1, %v4045_v56 }
0x10bf   : > { %v4039_v49 = vpop.permute.xlu1 %4038 }
0x10c1   : > { %12547 = vmatpush3.xpose.msk.msra.mxu0 %vm1015_vm1, %v4045_v56 }
0x10c2   : > { %12548 = vmatprep.subr.msk.mxu0 %vm1015_vm1, %v4043_v42 }
0x10c3   : > { %v15278_v55 = vpop.permute.xlu1 %4438 }
0x10c4   : > { %12594 = vmatprep.subr.msk.mxu1 %vm1015_vm1, %v15278_v55 }
0x10c5   : > { %12549 = vmatpush3.xpose.msk.msra.mxu0 %vm1015_vm1, %v4043_v42 }
0x10c6   : > { %12550 = vmatprep.subr.msk.mxu0 %vm1015_vm1, %v4041_v37 }
0x10c7   : > { %v15324_v2 = vpop.permute.xlu1 %4434 }
0x10c9   : > { %12551 = vmatpush3.xpose.msk.msra.mxu0 %vm1015_vm1, %v4041_v37 }
0x10ca   : > { %12552 = vmatprep.subr.msk.mxu0 %vm1015_vm1, %v4039_v49 }
0x10cb   : > { %v15326_v20 = vpop.permute.xlu1 %4432 }
0x10cd   : > { %12553 = vmatpush3.xpose.msk.msra.mxu0 %vm1015_vm1, %v4039_v49 }
0x10d0   : > { %12555 = vmatmul.mubr.msk.f32.vlgmr.msra.gmra.mxu0 %vm1015_vm1, %v15239_v28 }
0x10d1   : > { %12557 = vmatprep.mubr.msk.f32.mxu0 %vm1015_vm1, %v15247_v52 }
0x10d4   : > { %12558 = vmatmul.mubr.msk.f32.gmra.mxu0 %vm1015_vm1, %v15223_v53 }
0x10d5   : > { %12560 = vmatprep.mubr.msk.f32.mxu0 %vm1015_vm1, %v15231_v44 }
0x10d8   : > { %12561 = vmatmul.mubr.msk.f32.gmra.mxu0 %vm1015_vm1, %v15213_v23 }
0x10d9   : > { %12563 = vmatprep.mubr.msk.f32.mxu0 %vm1015_vm1, %v15207_v16 }
0x10dc   : > { %12564 = vmatmul.mubr.msk.f32.gmra.mxu0 %vm1015_vm1, %v15199_v8 }
0x1190   : > { %v12556_v17 = vpop.f32.mrf.mxu0 }
0x1191   : > { %v4158_v48 = vadd.f32 %v15302_v13, %v12556_v17 }
0x1192   : > { %v4152_v15 = vpop.f32.mrf.mxu0 }
0x1193   : > { %v4153_v47 = vadd.f32 %v15302_v13, %v4152_v15  ;;  %v4194_v21 = vsel %vm1153_vm2, %v4158_v48, -inf }
0x1194   : > { %4195 = vmax.xlane.f32.xlu1 %v4194_v21  ;;  %v12559_v62 = vpop.f32.mrf.mxu0 }
0x1195   : > { %v4168_v18 = vadd.f32 %v15302_v13, %v12559_v62  ;;  %v4191_v27 = vsel %vm1153_vm2, %v4153_v47, -inf }
0x1196   : > { %v4162_v45 = vpop.f32.mrf.mxu0  ;;  %4192 = vmax.xlane.f32.xlu0 %v4191_v27 }
0x1197   : > { %v4163_v54 = vadd.f32 %v15302_v13, %v4162_v45  ;;  %v4200_v60 = vsel %vm1153_vm2, %v4168_v18, -inf }
0x1198   : > { %v12562_v11 = vpop.f32.mrf.mxu0 }
0x1199   : > { %v4178_v4 = vadd.f32 %v15302_v13, %v12562_v11  ;;  %v4197_v36 = vsel %vm1153_vm2, %v4163_v54, -inf }
0x119a   : > { %v4172_v24 = vpop.f32.mrf.mxu0  ;;  %4201 = vmax.xlane.f32.xlu0 %v4200_v60 }
0x119b   : > { %v4173_v6 = vadd.f32 %v15302_v13, %v4172_v24  ;;  %v4206_v58 = vsel %vm1153_vm2, %v4178_v4, -inf }
0x119c   : > { %v12565_v61 = vpop.f32.mrf.mxu0 }
0x119d   : > { %v4203_v57 = vsel %vm1153_vm2, %v4173_v6, -inf  ;;  %v4188_v29 = vadd.f32 %v15302_v13, %v12565_v61 }
0x119e   : > { %v4182_v25 = vpop.f32.mrf.mxu0  ;;  %4204 = vmax.xlane.f32.xlu1 %v4203_v57  ;;  %4198 = vmax.xlane.f32.xlu0 %v4197_v36 }
0x119f   : > { %v4183_v43 = vadd.f32 %v15302_v13, %v4182_v25  ;;  %v4212_v59 = vsel %vm1153_vm2, %v4188_v29, -inf }
0x11a1   : > { %v4209_v26 = vsel %vm1153_vm2, %v4183_v43, -inf }
0x11a2   : > { %4210 = vmax.xlane.f32.xlu1 %v4209_v26  ;;  %4207 = vmax.xlane.f32.xlu0 %v4206_v58 }
0x11a6   : > { %4213 = vmax.xlane.f32.xlu0 %v4212_v59 }
0x11b3   : > { %4428 = vrot.lane.b32.xlu1 %v15247_v52, %s17289_s2 }
0x11bc   : > { %4430 = vrot.lane.b32.xlu0 %v15223_v53, %s17289_s2 }
0x121d   : > { %v4196_v30 = vpop.xlane.xlu1 %4195 }
0x121e   : > { %v4216_v35 = vsub.f32 %v4158_v48, %v4196_v30 }
0x121f   : > { %v4193_v0 = vpop.xlane.xlu0 %4192 }
0x1220   : > { %v4225_v3 = vmul.f32 1.442695, %v4216_v35  ;;  %v4215_v50 = vsub.f32 %v4153_v47, %v4193_v0 }
0x1222   : > { %13580 = vpow2.f32 %v4225_v3  ;;  %v4223_v12 = vmul.f32 1.442695, %v4215_v50 }
0x1223   : > { %v4202_v37 = vpop.xlane.xlu0 %4201 }
0x1224   : > { %13582 = vpow2.f32 %v4223_v12  ;;  %v4218_v15 = vsub.f32 %v4168_v18, %v4202_v37 }
0x1226   : > { %v4229_v62 = vmul.f32 1.442695, %v4218_v15 }
0x1227   : > { %v4199_v17 = vpop.xlane.xlu0 %4198  ;;  %v4205_v47 = vpop.xlane.xlu1 %4204 }
0x1228   : > { %v4217_v21 = vsub.f32 %v4163_v54, %v4199_v17  ;;  %v4219_v11 = vsub.f32 %v4173_v6, %v4205_v47  ;;  %13584 = vpow2.f32 %v4229_v62 }
0x122a   : > { %v4227_v60 = vmul.f32 1.442695, %v4217_v21  ;;  %v4231_v36 = vmul.f32 1.442695, %v4219_v11 }
0x122b   : > { %v4208_v48 = vpop.xlane.xlu0 %4207  ;;  %v4211_v24 = vpop.xlane.xlu1 %4210 }
0x122c   : > { %v4220_v27 = vsub.f32 %v4178_v4, %v4208_v48  ;;  %13586 = vpow2.f32 %v4227_v60  ;;  %v4221_v25 = vsub.f32 %v4183_v43, %v4211_v24 }
0x122e   : > { %v4233_v61 = vmul.f32 1.442695, %v4220_v27  ;;  %v4235_v58 = vmul.f32 1.442695, %v4221_v25 }
0x122f   : > { %v15330_v33 = vpop.eup %13580  ;;  %v4214_v45 = vpop.xlane.xlu0 %4213 }
0x1230   : > { %v4242_v42 = vsel %vm1153_vm2, %v15330_v33, 0.0  ;;  %v4222_v57 = vsub.f32 %v4188_v29, %v4214_v45  ;;  %13588 = vpow2.f32 %v4233_v61 }
0x1231   : > { %v15334_v56 = vpop.eup %13582  ;;  %4243 = vadd.xlane.f32.xlu0 %v4242_v42  ;;  %13590 = vpow2.f32 %v4231_v36  ;;  %v4429_v42 = vpop.permute.xlu1 %4428 }
0x1232   : > { %v4239_v49 = vsel %vm1153_vm2, %v15334_v56, 0.0  ;;  %v4237_v26 = vmul.f32 1.442695, %v4222_v57 }
0x1233   : > { %4240 = vadd.xlane.f32.xlu1 %v4239_v49  ;;  %v4431_v12 = vpop.permute.xlu0 %4430 }
0x1234   : > { %13592 = vpow2.f32 %v4237_v26 }
0x1235   : > { %13594 = vpow2.f32 %v4235_v58  ;;  %v15342_v18 = vpop.eup %13584 }
0x1236   : > { %v4248_v6 = vsel %vm1153_vm2, %v15342_v18, 0.0 }
0x1239   : > { %v15344_v54 = vpop.eup %13586 }
0x123a   : > { %v4245_v29 = vsel %vm1153_vm2, %v15344_v54, 0.0 }
0x123d   : > { %v15348_v4 = vpop.eup %13588 }
0x123e   : > { %v15352_v43 = vpop.eup %13590  ;;  %v4254_v59 = vsel %vm1153_vm2, %v15348_v4, 0.0 }
0x123f   : > { %v4251_v35 = vsel %vm1153_vm2, %v15352_v43, 0.0 }
0x1241   : > { %v15356_v30 = vpop.eup %13592 }
0x1242   : > { %v15360_v0 = vpop.eup %13594  ;;  %v4260_v3 = vsel %vm1153_vm2, %v15356_v30, 0.0 }
0x1243   : > { %v4257_v50 = vsel %vm1153_vm2, %v15360_v0, 0.0 }
0x1244   : > { %4424 = vrot.lane.b32.xlu1 %v15190_v9, %s17289_s2 }
0x1247   : > { %4426 = vrot.lane.b32.xlu0 %v15239_v28, %s17289_s2  ;;  %s17301_s2 = smov %s17300_s30 }
0x1266   : > { %4249 = vadd.xlane.f32.xlu0 %v4248_v6 }
0x1268   : > { %4246 = vadd.xlane.f32.xlu1 %v4245_v29 }
0x126a   : > { %4255 = vadd.xlane.f32.xlu0 %v4254_v59 }
0x126c   : > { %4252 = vadd.xlane.f32.xlu1 %v4251_v35 }
0x126e   : > { %4261 = vadd.xlane.f32.xlu0 %v4260_v3 }
0x1270   : > { %4258 = vadd.xlane.f32.xlu1 %v4257_v50 }
0x1281   : > { %4410 = vrot.lane.b32.xlu1 %v15239_v28, %s17290_s20 }
0x1284   : > { %4408 = vrot.lane.b32.xlu0 %v15190_v9, %s17290_s20 }
0x1285   : > { %4414 = vrot.lane.b32.xlu1 %v15223_v53, %s17290_s20 }
0x1288   : > { %4412 = vrot.lane.b32.xlu0 %v15247_v52, %s17290_s20 }
0x1289   : > { %4418 = vrot.lane.b32.xlu1 %v15213_v23, %s17290_s20 }
0x128c   : > { %4416 = vrot.lane.b32.xlu0 %v15231_v44, %s17290_s20 }
0x128d   : > { %4422 = vrot.lane.b32.xlu1 %v15199_v8, %s17290_s20 }
0x1290   : > { %4420 = vrot.lane.b32.xlu0 %v15207_v16, %s17290_s20 }
0x1291   : > { %4687 = vrot.lane.b32.xlu1 %v15197_v7, %s17290_s20 }
0x1294   : > { %4685 = vrot.lane.b32.xlu0 %v15201_v1, %s17290_s20 }
0x1298   : > { %4681 = vrot.lane.b32.xlu0 %v15215_v34, %s17290_s20 }
0x12ba   : > { %v4244_v49 = vpop.xlane.xlu0 %4243 }
0x12bb   : > { %13596 = vrcp.f32 %v4244_v49 }
0x12bc   : > { %v4241_v37 = vpop.xlane.xlu1 %4240 }
0x12bd   : > { %13598 = vrcp.f32 %v4241_v37 }
0x12c8   : > { %v13597_v17 = vpop.eup %13596 }
0x12c9   : > { %v4272_v47 = vmul.f32 %v13597_v17, %v15330_v33 }
0x12ca   : > { %v13599_v48 = vpop.eup %13598 }
0x12cb   : > { %v4271_v15 = vmul.f32 %v13599_v48, %v15334_v56 }
0x12cd   : > { %12582 = vmatprep.mubr.msk.f32.mxu1 %vm1153_vm2, %v4271_v15 }
0x12ce   : > { %12583 = vmatmul.mubr.msk.f32.vlgmr.msra.gmra.mxu1 %vm1153_vm2, %v4272_v47 }
0x12cf   : > { %12595 = vmatpush3.xpose.msk.msra.mxu1 %vm1015_vm1, %v15278_v55  ;;  %v4427_v55 = vpop.permute.xlu0 %4426 }
0x12d0   : > { %12596 = vmatprep.subr.msk.mxu1 %vm1015_vm1, %v15328_v19 }
0x12d3   : > { %12597 = vmatpush3.xpose.msk.msra.mxu1 %vm1015_vm1, %v15328_v19  ;;  %v4425_v19 = vpop.permute.xlu1 %4424 }
0x12d4   : > { %12598 = vmatprep.subr.msk.mxu1 %vm1015_vm1, %v15324_v2 }
0x12d7   : > { %12599 = vmatpush3.xpose.msk.msra.mxu1 %vm1015_vm1, %v15324_v2 }
0x12d8   : > { %12600 = vmatprep.subr.msk.mxu1 %vm1015_vm1, %v15326_v20 }
0x12db   : > { %12601 = vmatpush3.xpose.msk.msra.mxu1 %vm1015_vm1, %v15326_v20 }
0x12dc   : > { %12602 = vmatprep.subr.msk.mxu1 %vm1015_vm1, %v4431_v12 }
0x12df   : > { %12603 = vmatpush3.xpose.msk.msra.mxu1 %vm1015_vm1, %v4431_v12 }
0x12e0   : > { %12604 = vmatprep.subr.msk.mxu1 %vm1015_vm1, %v4429_v42 }
0x12e3   : > { %12605 = vmatpush3.xpose.msk.msra.mxu1 %vm1015_vm1, %v4429_v42 }
0x12e4   : > { %12606 = vmatprep.subr.msk.mxu1 %vm1015_vm1, %v4427_v55 }
0x12e7   : > { %12607 = vmatpush3.xpose.msk.msra.mxu1 %vm1015_vm1, %v4427_v55 }
0x12e8   : > { %12608 = vmatprep.subr.msk.mxu1 %vm1015_vm1, %v4425_v19 }
0x12eb   : > { %12609 = vmatpush3.xpose.msk.msra.mxu1 %vm1015_vm1, %v4425_v19 }
0x12ef   : > { %v4250_v2 = vpop.xlane.xlu0 %4249 }
0x12f0   : > { %13600 = vrcp.f32 %v4250_v2 }
0x12f1   : > { %v4247_v20 = vpop.xlane.xlu1 %4246 }
0x12f2   : > { %13602 = vrcp.f32 %v4247_v20 }
0x12f3   : > { %v4256_v33 = vpop.xlane.xlu0 %4255 }
0x12f4   : > { %13604 = vrcp.f32 %v4256_v33 }
0x12f5   : > { %v4253_v56 = vpop.xlane.xlu1 %4252 }
0x12f6   : > { %13606 = vrcp.f32 %v4253_v56 }
0x12f7   : > { %v4262_v21 = vpop.xlane.xlu0 %4261 }
0x12f8   : > { %13608 = vrcp.f32 %v4262_v21 }
0x12f9   : > { %v4259_v62 = vpop.xlane.xlu1 %4258 }
0x12fa   : > { %13610 = vrcp.f32 %v4259_v62 }
0x12fb   : > { %v4409_v27 = vpop.permute.xlu0 %4408 }
0x12fd   : > { %v4411_v45 = vpop.permute.xlu1 %4410  ;;  %v13601_v11 = vpop.eup %13600 }
0x12fe   : > { %v4274_v36 = vmul.f32 %v13601_v11, %v15342_v18 }
0x12ff   : > { %v13603_v60 = vpop.eup %13602  ;;  %v4413_v24 = vpop.permute.xlu0 %4412 }
0x1300   : > { %v4273_v61 = vmul.f32 %v13603_v60, %v15344_v54 }
0x1301   : > { %v4415_v57 = vpop.permute.xlu1 %4414  ;;  %v13605_v25 = vpop.eup %13604 }
0x1302   : > { %12585 = vmatprep.mubr.msk.f32.mxu1 %vm1153_vm2, %v4273_v61  ;;  %v4276_v59 = vmul.f32 %v13605_v25, %v15348_v4 }
0x1303   : > { %v13607_v26 = vpop.eup %13606  ;;  %12586 = vmatmul.mubr.msk.f32.gmra.mxu1 %vm1153_vm2, %v4274_v36  ;;  %v4417_v58 = vpop.permute.xlu0 %4416 }
0x1304   : > { %v4275_v6 = vmul.f32 %v13607_v26, %v15352_v43 }
0x1305   : > { %v4419_v29 = vpop.permute.xlu1 %4418  ;;  %v13609_v35 = vpop.eup %13608 }
0x1306   : > { %12588 = vmatprep.mubr.msk.f32.mxu1 %vm1153_vm2, %v4275_v6  ;;  %v4278_v12 = vmul.f32 %v13609_v35, %v15356_v30 }
0x1307   : > { %v13611_v3 = vpop.eup %13610  ;;  %12589 = vmatmul.mubr.msk.f32.gmra.mxu1 %vm1153_vm2, %v4276_v59  ;;  %v4421_v54 = vpop.permute.xlu0 %4420 }
0x1308   : > { %v4277_v18 = vmul.f32 %v13611_v3, %v15360_v0  ;;  %v10998_v0 = vld [vmem:[%s17232_s9 + $0x20] sm:$0xff] }
0x1309   : > { %v4423_v50 = vpop.permute.xlu1 %4422  ;;  %12664 = vmatprep.subr.mxu1 %v10998_v0 }
0x130a   : > { %12591 = vmatprep.mubr.msk.f32.mxu1 %vm1153_vm2, %v4277_v18 }
0x130b   : > { %12592 = vmatmul.mubr.msk.f32.gmra.mxu1 %vm1153_vm2, %v4278_v12  ;;  %v4686_v4 = vpop.permute.xlu0 %4685 }
0x130c   : > { %12610 = vmatprep.mubr.msk.f32.mxu1 %vm1015_vm1, %v4409_v27 }
0x130d   : > { %v4688_v43 = vpop.permute.xlu1 %4687 }
0x130e   : > { %12622 = vmatprep.subr.mxu0 %v4688_v43 }
0x130f   : > { %12611 = vmatmul.mubr.msk.f32.vlgmr.msra.gmra.mxu1 %vm1015_vm1, %v4411_v45  ;;  %12623 = vmatpush3.msra.mxu0 %v4688_v43  ;;  %v4682_v18 = vpop.permute.xlu0 %4681 }
0x1310   : > { %12613 = vmatprep.mubr.msk.f32.mxu1 %vm1015_vm1, %v4413_v24  ;;  %12624 = vmatprep.subr.mxu0 %v4686_v4 }
0x1311   : > { %12625 = vmatpush3.msra.mxu0 %v4686_v4  ;;  %12665 = vmatpush3.msra.mxu1 %v10998_v0 }
0x1313   : > { %12614 = vmatmul.mubr.msk.f32.gmra.mxu1 %vm1015_vm1, %v4415_v57 }
0x1314   : > { %12616 = vmatprep.mubr.msk.f32.mxu1 %vm1015_vm1, %v4417_v58 }
0x1317   : > { %12617 = vmatmul.mubr.msk.f32.gmra.mxu1 %vm1015_vm1, %v4419_v29 }
0x1318   : > { %12619 = vmatprep.mubr.msk.f32.mxu1 %vm1015_vm1, %v4421_v54 }
0x131b   : > { %12620 = vmatmul.mubr.msk.f32.gmra.mxu1 %vm1015_vm1, %v4423_v50 }
0x138e   : > { %v12584_v30 = vpop.f32.mrf.mxu1 }
0x1390   : > { %v4369_v42 = vpop.f32.mrf.mxu1 }
0x1391   : > { %12666 = vmatprep.mubr.msk.f32.mxu1 %vm1015_vm1, %v4369_v42 }
0x1392   : > { %12667 = vmatmul.mubr.msk.f32.vlgmr.msra.gmra.mxu1 %vm1015_vm1, %v12584_v30 }
0x13c3   : > { %v12587_v49 = vpop.f32.mrf.mxu1 }
0x13c5   : > { %v4379_v37 = vpop.f32.mrf.mxu1 }
0x13c6   : > { %12669 = vmatprep.mubr.msk.f32.mxu1 %vm1015_vm1, %v4379_v37 }
0x13c7   : > { %v12590_v17 = vpop.f32.mrf.mxu1  ;;  %12670 = vmatmul.mubr.msk.f32.gmra.mxu1 %vm1015_vm1, %v12587_v49 }
0x13c9   : > { %v4389_v48 = vpop.f32.mrf.mxu1 }
0x13ca   : > { %12672 = vmatprep.mubr.msk.f32.mxu1 %vm1015_vm1, %v4389_v48 }
0x13cb   : > { %v12593_v15 = vpop.f32.mrf.mxu1  ;;  %12673 = vmatmul.mubr.msk.f32.gmra.mxu1 %vm1015_vm1, %v12590_v17 }
0x13cd   : > { %v4399_v47 = vpop.f32.mrf.mxu1 }
0x13ce   : > { %12675 = vmatprep.mubr.msk.f32.mxu1 %vm1015_vm1, %v4399_v47 }
0x13cf   : > { %v12612_v55 = vpop.f32.mrf.mxu1  ;;  %12676 = vmatmul.mubr.msk.f32.gmra.mxu1 %vm1015_vm1, %v12593_v15 }
0x13d0   : > { %v4544_v19 = vadd.f32 %v15302_v13, %v12612_v55 }
0x13d1   : > { %v4538_v2 = vpop.f32.mrf.mxu1 }
0x13d2   : > { %v4539_v20 = vadd.f32 %v15302_v13, %v4538_v2  ;;  %v4580_v33 = vsel %vm1153_vm2, %v4544_v19, -inf }
0x13d3   : > { %4581 = vmax.xlane.f32.xlu1 %v4580_v33  ;;  %v12615_v56 = vpop.f32.mrf.mxu1 }
0x13d4   : > { %v15449_v21 = vadd.f32 %v15302_v13, %v12615_v56  ;;  %v4577_v62 = vsel %vm1153_vm2, %v4539_v20, -inf }
0x13d5   : > { %4578 = vmax.xlane.f32.xlu0 %v4577_v62  ;;  %v4548_v27 = vpop.f32.mrf.mxu1 }
0x13d6   : > { %v4549_v11 = vadd.f32 %v15302_v13, %v4548_v27  ;;  %v4586_v60 = vsel %vm1153_vm2, %v15449_v21, -inf }
0x13d7   : > { %v12618_v45 = vpop.f32.mrf.mxu1 }
0x13d8   : > { %v4564_v61 = vadd.f32 %v15302_v13, %v12618_v45  ;;  %v4583_v57 = vsel %vm1153_vm2, %v4549_v11, -inf }
0x13d9   : > { %4587 = vmax.xlane.f32.xlu0 %v4586_v60  ;;  %v4558_v24 = vpop.f32.mrf.mxu1 }
0x13da   : > { %v4592_v26 = vsel %vm1153_vm2, %v4564_v61, -inf  ;;  %v4559_v6 = vadd.f32 %v15302_v13, %v4558_v24 }
0x13db   : > { %v12621_v36 = vpop.f32.mrf.mxu1 }
0x13dc   : > { %v15458_v25 = vadd.f32 %v15302_v13, %v12621_v36  ;;  %v4589_v35 = vsel %vm1153_vm2, %v4559_v6, -inf }
0x13dd   : > { %4584 = vmax.xlane.f32.xlu0 %v4583_v57  ;;  %v4568_v29 = vpop.f32.mrf.mxu1 }
0x13de   : > { %v4598_v58 = vsel %vm1153_vm2, %v15458_v25, -inf  ;;  %v4569_v59 = vadd.f32 %v15302_v13, %v4568_v29 }
0x13e0   : > { %v4595_v3 = vsel %vm1153_vm2, %v4569_v59, -inf }
0x13e1   : > { %4593 = vmax.xlane.f32.xlu0 %v4592_v26 }
0x13e4   : > { %4683 = vrot.lane.b32.xlu1 %v15205_v63, %s17290_s20 }
0x13e5   : > { %4599 = vmax.xlane.f32.xlu0 %v4598_v58 }
0x13fb   : > { %4677 = vrot.lane.b32.xlu0 %v15229_v39, %s17290_s20 }
0x1408   : > { %4590 = vmax.xlane.f32.xlu1 %v4589_v35 }
0x140c   : > { %4596 = vmax.xlane.f32.xlu1 %v4595_v3 }
0x141d   : > { %4679 = vrot.lane.b32.xlu1 %v15221_v41, %s17290_s20 }
0x145c   : > { %v4582_v54 = vpop.xlane.xlu1 %4581 }
0x145d   : > { %v4602_v50 = vsub.f32 %v4544_v19, %v4582_v54 }
0x145e   : > { %v4579_v12 = vpop.xlane.xlu0 %4578 }
0x145f   : > { %v4611_v43 = vmul.f32 1.442695, %v4602_v50  ;;  %v4601_v4 = vsub.f32 %v4539_v20, %v4579_v12 }
0x1460   : > { %v4684_v0 = vpop.permute.xlu1 %4683 }
0x1461   : > { %13612 = vpow2.f32 %v4611_v43  ;;  %v4609_v30 = vmul.f32 1.442695, %v4601_v4  ;;  %12626 = vmatprep.subr.mxu0 %v4684_v0 }
0x1462   : > { %12627 = vmatpush3.msra.mxu0 %v4684_v0  ;;  %v4588_v42 = vpop.xlane.xlu0 %4587 }
0x1463   : > { %13614 = vpow2.f32 %v4609_v30  ;;  %12628 = vmatprep.subr.mxu0 %v4682_v18  ;;  %v4604_v45 = vsub.f32 %v15449_v21, %v4588_v42 }
0x1464   : > { %12629 = vmatpush3.msra.mxu0 %v4682_v18 }
0x1466   : > { %v4585_v49 = vpop.xlane.xlu0 %4584 }
0x1467   : > { %v4603_v37 = vsub.f32 %v4549_v11, %v4585_v49  ;;  %v4615_v11 = vmul.f32 1.442695, %v4604_v45 }
0x1469   : > { %v4613_v17 = vmul.f32 1.442695, %v4603_v37 }
0x146a   : > { %v4594_v48 = vpop.xlane.xlu0 %4593 }
0x146b   : > { %13616 = vpow2.f32 %v4613_v17  ;;  %v4606_v15 = vsub.f32 %v4564_v61, %v4594_v48 }
0x146d   : > { %v4619_v47 = vmul.f32 1.442695, %v4606_v15 }
0x146e   : > { %v15473_v55 = vpop.eup %13612  ;;  %v4600_v57 = vpop.xlane.xlu0 %4599 }
0x146f   : > { %13618 = vpow2.f32 %v4619_v47  ;;  %v4628_v19 = vsel %vm1153_vm2, %v15473_v55, 0.0  ;;  %v4608_v58 = vsub.f32 %v15458_v25, %v4600_v57 }
0x1470   : > { %v15477_v2 = vpop.eup %13614  ;;  %4629 = vadd.xlane.f32.xlu0 %v4628_v19  ;;  %13620 = vpow2.f32 %v4615_v11 }
0x1471   : > { %v4625_v20 = vsel %vm1153_vm2, %v15477_v2, 0.0 }
0x1472   : > { %4626 = vadd.xlane.f32.xlu1 %v4625_v20  ;;  %v4678_v35 = vpop.permute.xlu0 %4677 }
0x1478   : > { %v15481_v33 = vpop.eup %13616 }
0x1479   : > { %v4631_v56 = vsel %vm1153_vm2, %v15481_v33, 0.0 }
0x147a   : > { %4632 = vadd.xlane.f32.xlu1 %v4631_v56 }
0x147c   : > { %v15485_v62 = vpop.eup %13618 }
0x147d   : > { %v4640_v27 = vsel %vm1153_vm2, %v15485_v62, 0.0 }
0x147e   : > { %4641 = vadd.xlane.f32.xlu1 %v4640_v27 }
0x1486   : > { %4675 = vrot.lane.b32.xlu0 %v15237_v51, %s17290_s20 }
0x148f   : > { %4673 = vrot.lane.b32.xlu1 %v15245_v31, %s17290_s20 }
0x1491   : > { %v4591_v60 = vpop.xlane.xlu1 %4590 }
0x1492   : > { %v4605_v24 = vsub.f32 %v4559_v6, %v4591_v60  ;;  %v4623_v6 = vmul.f32 1.442695, %v4608_v58 }
0x1493   : > { %5112 = vrot.lane.b32.xlu1 %v15207_v16, %s17291_s24 }
0x1494   : > { %v4617_v61 = vmul.f32 1.442695, %v4605_v24 }
0x1495   : > { %v4597_v36 = vpop.xlane.xlu1 %4596 }
0x1496   : > { %v4607_v26 = vsub.f32 %v4569_v59, %v4597_v36  ;;  %13622 = vpow2.f32 %v4617_v61  ;;  %v15503_v59 = vpop.eup %13620 }
0x1497   : > { %5110 = vrot.lane.b32.xlu1 %v15213_v23, %s17291_s24  ;;  %v4634_v25 = vsel %vm1153_vm2, %v15503_v59, 0.0 }
0x1498   : > { %v4621_v21 = vmul.f32 1.442695, %v4607_v26 }
0x1499   : > { %v4680_v29 = vpop.permute.xlu1 %4679 }
0x149a   : > { %12630 = vmatprep.subr.mxu0 %v4680_v29  ;;  %13624 = vpow2.f32 %v4621_v21 }
0x149b   : > { %12631 = vmatpush3.msra.mxu0 %v4680_v29  ;;  %5108 = vrot.lane.b32.xlu1 %v15231_v44, %s17291_s24  ;;  %13626 = vpow2.f32 %v4623_v6 }
0x149c   : > { %12632 = vmatprep.subr.mxu0 %v4678_v35 }
0x149d   : > { %12633 = vmatpush3.msra.mxu0 %v4678_v35 }
0x149f   : > { %5106 = vrot.lane.b32.xlu1 %v15223_v53, %s17291_s24 }
0x14a3   : > { %5104 = vrot.lane.b32.xlu1 %v15247_v52, %s17291_s24  ;;  %v15509_v3 = vpop.eup %13622 }
0x14a4   : > { %v4637_v18 = vsel %vm1153_vm2, %v15509_v3, 0.0 }
0x14a5   : > { %4635 = vadd.xlane.f32.xlu0 %v4634_v25 }
0x14a7   : > { %5100 = vrot.lane.b32.xlu1 %v15190_v9, %s17291_s24  ;;  %v15515_v54 = vpop.eup %13624 }
0x14a8   : > { %v4643_v50 = vsel %vm1153_vm2, %v15515_v54, 0.0  ;;  %v15521_v12 = vpop.eup %13626 }
0x14a9   : > { %4638 = vadd.xlane.f32.xlu0 %v4637_v18  ;;  %v4646_v43 = vsel %vm1153_vm2, %v15521_v12, 0.0 }
0x14ab   : > { %5086 = vrot.lane.b32.xlu1 %v15239_v28, %s17292_s26 }
0x14ad   : > { %4644 = vadd.xlane.f32.xlu0 %v4643_v50 }
0x14af   : > { %5090 = vrot.lane.b32.xlu1 %v15223_v53, %s17292_s26 }
0x14b1   : > { %4647 = vadd.xlane.f32.xlu0 %v4646_v43 }
0x14b3   : > { %5094 = vrot.lane.b32.xlu1 %v15213_v23, %s17292_s26 }
0x14b7   : > { %5098 = vrot.lane.b32.xlu1 %v15199_v8, %s17292_s26 }
0x14bb   : > { %5659 = vrot.lane.b32.xlu1 %v15207_v16, %s17293_s19 }
0x14bf   : > { %5655 = vrot.lane.b32.xlu1 %v15231_v44, %s17293_s19 }
0x14c3   : > { %5651 = vrot.lane.b32.xlu1 %v15247_v52, %s17293_s19 }
0x14c7   : > { %5647 = vrot.lane.b32.xlu1 %v15190_v9, %s17293_s19  ;;  %5114 = vrot.lane.b32.xlu0 %v15199_v8, %s17291_s24 }
0x14cb   : > { %5633 = vrot.lane.b32.xlu1 %v15239_v28, %s17294_s27  ;;  %5102 = vrot.lane.b32.xlu0 %v15239_v28, %s17291_s24 }
0x14cf   : > { %5637 = vrot.lane.b32.xlu1 %v15223_v53, %s17294_s27  ;;  %5084 = vrot.lane.b32.xlu0 %v15190_v9, %s17292_s26 }
0x14d3   : > { %5641 = vrot.lane.b32.xlu1 %v15213_v23, %s17294_s27  ;;  %5088 = vrot.lane.b32.xlu0 %v15247_v52, %s17292_s26 }
0x14d7   : > { %5645 = vrot.lane.b32.xlu1 %v15199_v8, %s17294_s27  ;;  %5092 = vrot.lane.b32.xlu0 %v15231_v44, %s17292_s26 }
0x14db   : > { %5096 = vrot.lane.b32.xlu0 %v15207_v16, %s17292_s26 }
0x14df   : > { %5661 = vrot.lane.b32.xlu0 %v15199_v8, %s17293_s19 }
0x14e3   : > { %5657 = vrot.lane.b32.xlu0 %v15213_v23, %s17293_s19 }
0x14e7   : > { %5653 = vrot.lane.b32.xlu0 %v15223_v53, %s17293_s19 }
0x14eb   : > { %5649 = vrot.lane.b32.xlu0 %v15239_v28, %s17293_s19  ;;  %s17295_s19 = sld [smem:[#allocation14_spill]] }
0x14ef   : > { %5631 = vrot.lane.b32.xlu0 %v15190_v9, %s17294_s27 }
0x14f1   : > { %s16153_s0 = scalar_lea.vmem %s17295_s19, %s11417_s25  ;;  %s10791_s25 = sshll.u32 %s649_s28, 4 }
0x14f3   : > { %5635 = vrot.lane.b32.xlu0 %v15247_v52, %s17294_s27 }
0x14f7   : > { %5639 = vrot.lane.b32.xlu0 %v15231_v44, %s17294_s27  ;;  %v10999_v44 = vld [vmem:[%s17232_s9 + $0x28] sm:$0xff] }
0x14f9   : > { %v4630_v4 = vpop.xlane.xlu0 %4629 }
0x14fa   : > { %13628 = vrcp.f32 %v4630_v4 }
0x14fb   : > { %v4627_v8 = vpop.xlane.xlu1 %4626  ;;  %5643 = vrot.lane.b32.xlu0 %v15207_v16, %s17294_s27 }
0x14fc   : > { %13630 = vrcp.f32 %v4627_v8 }
0x14fd   : > { %v4676_v23 = vpop.permute.xlu0 %4675 }
0x14fe   : > { %12634 = vmatprep.subr.mxu0 %v4676_v23 }
0x14ff   : > { %12635 = vmatpush3.msra.mxu0 %v4676_v23 }
0x1503   : > { %v4633_v53 = vpop.xlane.xlu1 %4632 }
0x1504   : > { %13632 = vrcp.f32 %v4633_v53 }
0x1507   : > { %v4642_v28 = vpop.xlane.xlu1 %4641  ;;  %v13629_v9 = vpop.eup %13628 }
0x1508   : > { %v4658_v42 = vmul.f32 %v13629_v9, %v15473_v55 }
0x1509   : > { %v13631_v0 = vpop.eup %13630 }
0x150a   : > { %v4657_v52 = vmul.f32 %v13631_v0, %v15477_v2 }
0x150b   : > { %v4674_v30 = vpop.permute.xlu1 %4673 }
0x150c   : > { %12636 = vmatprep.subr.mxu0 %v4674_v30  ;;  %12638 = vmatprep.mubr.msk.f32.mxu0 %vm1153_vm2, %v4657_v52 }
0x150d   : > { %12637 = vmatpush3.msra.mxu0 %v4674_v30 }
0x150e   : > { %12639 = vmatmul.mubr.msk.f32.vlgmr.msra.gmra.mxu0 %vm1153_vm2, %v4658_v42  ;;  %12650 = vmatprep.subr.mxu0 %v10999_v44 }
0x150f   : > { %12651 = vmatpush3.msra.mxu0 %v10999_v44  ;;  %v5113_v24 = vpop.permute.xlu1 %5112 }
0x1511   : > { %v13633_v16 = vpop.eup %13632 }
0x1512   : > { %v4659_v49 = vmul.f32 %v13633_v16, %v15481_v33 }
0x1513   : > { %v5111_v36 = vpop.permute.xlu1 %5110 }
0x1514   : > { %12641 = vmatprep.mubr.msk.f32.mxu0 %vm1153_vm2, %v4659_v49 }
0x152e   : > { %v4636_v37 = vpop.xlane.xlu0 %4635 }
0x152f   : > { %13634 = vrcp.f32 %v4636_v37 }
0x1530   : > { %13636 = vrcp.f32 %v4642_v28 }
0x1532   : > { %v4639_v17 = vpop.xlane.xlu0 %4638 }
0x1533   : > { %13638 = vrcp.f32 %v4639_v17 }
0x1536   : > { %v4645_v48 = vpop.xlane.xlu0 %4644 }
0x1537   : > { %13640 = vrcp.f32 %v4645_v48 }
0x153a   : > { %v4648_v15 = vpop.xlane.xlu0 %4647 }
0x153b   : > { %13642 = vrcp.f32 %v4648_v15 }
0x153c   : > { %v13635_v47 = vpop.eup %13634 }
0x153d   : > { %v4660_v55 = vmul.f32 %v13635_v47, %v15503_v59  ;;  %v13637_v2 = vpop.eup %13636 }
0x153e   : > { %v5115_v19 = vpop.permute.xlu0 %5114  ;;  %v4662_v56 = vmul.f32 %v13637_v2, %v15485_v62  ;;  %v5109_v62 = vpop.permute.xlu1 %5108 }
0x153f   : > { %12642 = vmatmul.mubr.msk.f32.gmra.mxu0 %vm1153_vm2, %v4660_v55  ;;  %12678 = vmatprep.subr.msk.mxu0 %vm1015_vm1, %v5115_v19 }
0x1540   : > { %v13639_v20 = vpop.eup %13638 }
0x1541   : > { %v4661_v33 = vmul.f32 %v13639_v20, %v15509_v3 }
0x1542   : > { %v5103_v26 = vpop.permute.xlu0 %5102  ;;  %v5107_v21 = vpop.permute.xlu1 %5106 }
0x1543   : > { %12644 = vmatprep.mubr.msk.f32.mxu0 %vm1153_vm2, %v4661_v33 }
0x1544   : > { %v13641_v27 = vpop.eup %13640  ;;  %12645 = vmatmul.mubr.msk.f32.gmra.mxu0 %vm1153_vm2, %v4662_v56 }
0x1545   : > { %v4663_v45 = vmul.f32 %v13641_v27, %v15515_v54 }
0x1546   : > { %v5085_v58 = vpop.permute.xlu0 %5084  ;;  %v5105_v35 = vpop.permute.xlu1 %5104 }
0x1547   : > { %12647 = vmatprep.mubr.msk.f32.mxu0 %vm1153_vm2, %v4663_v45 }
0x1548   : > { %v13643_v11 = vpop.eup %13642 }
0x1549   : > { %v4664_v60 = vmul.f32 %v13643_v11, %v15521_v12 }
0x154a   : > { %v5089_v29 = vpop.permute.xlu0 %5088  ;;  %v5101_v25 = vpop.permute.xlu1 %5100 }
0x154b   : > { %12648 = vmatmul.mubr.msk.f32.gmra.mxu0 %vm1153_vm2, %v4664_v60 }
0x154e   : > { %v5093_v6 = vpop.permute.xlu0 %5092  ;;  %v5087_v18 = vpop.permute.xlu1 %5086 }
0x1552   : > { %v5097_v59 = vpop.permute.xlu0 %5096  ;;  %v5091_v12 = vpop.permute.xlu1 %5090 }
0x1556   : > { %v5662_v3 = vpop.permute.xlu0 %5661  ;;  %v5095_v8 = vpop.permute.xlu1 %5094 }
0x155a   : > { %v5658_v53 = vpop.permute.xlu0 %5657  ;;  %v5099_v9 = vpop.permute.xlu1 %5098 }
0x155e   : > { %v5654_v0 = vpop.permute.xlu0 %5653  ;;  %v5660_v52 = vpop.permute.xlu1 %5659 }
0x1562   : > { %v5650_v30 = vpop.permute.xlu0 %5649  ;;  %v5656_v44 = vpop.permute.xlu1 %5655 }
0x1566   : > { %v5632_v42 = vpop.permute.xlu0 %5631  ;;  %v5652_v16 = vpop.permute.xlu1 %5651 }
0x156a   : > { %v5648_v49 = vpop.permute.xlu1 %5647  ;;  %v5636_v17 = vpop.permute.xlu0 %5635 }
0x156e   : > { %v5634_v37 = vpop.permute.xlu1 %5633  ;;  %v5640_v15 = vpop.permute.xlu0 %5639 }
0x1572   : > { %v5638_v48 = vpop.permute.xlu1 %5637  ;;  %v5644_v55 = vpop.permute.xlu0 %5643 }
0x1576   : > { %v5642_v47 = vpop.permute.xlu1 %5641 }
0x15ce   : > { %v12640_v61 = vpop.f32.mrf.mxu0 }
0x15d0   : > { %v4787_v57 = vpop.f32.mrf.mxu0 }
0x15d1   : > { %12652 = vmatprep.mubr.msk.f32.mxu0 %vm1015_vm1, %v4787_v57 }
0x15d2   : > { %12653 = vmatmul.mubr.msk.f32.vlgmr.msra.gmra.mxu0 %vm1015_vm1, %v12640_v61 }
0x15d3   : > { %12679 = vmatpush3.xpose.msk.msra.mxu0 %vm1015_vm1, %v5115_v19  ;;  %v5646_v19 = vpop.permute.xlu1 %5645 }
0x15d4   : > { %12680 = vmatprep.subr.msk.mxu0 %vm1015_vm1, %v5113_v24 }
0x15d7   : > { %12681 = vmatpush3.xpose.msk.msra.mxu0 %vm1015_vm1, %v5113_v24 }
0x15d8   : > { %12682 = vmatprep.subr.msk.mxu0 %vm1015_vm1, %v5111_v36 }
0x15db   : > { %12683 = vmatpush3.xpose.msk.msra.mxu0 %vm1015_vm1, %v5111_v36 }
0x15dc   : > { %12684 = vmatprep.subr.msk.mxu0 %vm1015_vm1, %v5109_v62 }
0x15df   : > { %12685 = vmatpush3.xpose.msk.msra.mxu0 %vm1015_vm1, %v5109_v62 }
0x15e0   : > { %12686 = vmatprep.subr.msk.mxu0 %vm1015_vm1, %v5107_v21 }
0x15e3   : > { %12687 = vmatpush3.xpose.msk.msra.mxu0 %vm1015_vm1, %v5107_v21 }
0x15e4   : > { %12688 = vmatprep.subr.msk.mxu0 %vm1015_vm1, %v5105_v35 }
0x15e7   : > { %12689 = vmatpush3.xpose.msk.msra.mxu0 %vm1015_vm1, %v5105_v35 }
0x15e8   : > { %12690 = vmatprep.subr.msk.mxu0 %vm1015_vm1, %v5103_v26 }
0x15eb   : > { %12691 = vmatpush3.xpose.msk.msra.mxu0 %vm1015_vm1, %v5103_v26 }
0x15ec   : > { %12692 = vmatprep.subr.msk.mxu0 %vm1015_vm1, %v5101_v25 }
0x15ef   : > { %12693 = vmatpush3.xpose.msk.msra.mxu0 %vm1015_vm1, %v5101_v25 }
0x15f0   : > { %12748 = vmatprep.subr.msk.mxu0 %vm1015_vm1, %v5662_v3 }
0x15ff   : > { %v12643_v54 = vpop.f32.mrf.mxu0 }
0x1601   : > { %v4797_v50 = vpop.f32.mrf.mxu0 }
0x1602   : > { %12655 = vmatprep.mubr.msk.f32.mxu0 %vm1015_vm1, %v4797_v50 }
0x1603   : > { %12656 = vmatmul.mubr.msk.f32.gmra.mxu0 %vm1015_vm1, %v12643_v54 }
0x1604   : > { %v12646_v43 = vpop.f32.mrf.mxu0 }
0x1606   : > { %v4807_v4 = vpop.f32.mrf.mxu0 }
0x1607   : > { %12658 = vmatprep.mubr.msk.f32.mxu0 %vm1015_vm1, %v4807_v4 }
0x1608   : > { %12659 = vmatmul.mubr.msk.f32.gmra.mxu0 %vm1015_vm1, %v12646_v43 }
0x160b   : > { %v12649_v23 = vpop.f32.mrf.mxu0 }
0x160d   : > { %v4817_v28 = vpop.f32.mrf.mxu0 }
0x160e   : > { %12661 = vmatprep.mubr.msk.f32.mxu0 %vm1015_vm1, %v4817_v28 }
0x160f   : > { %12662 = vmatmul.mubr.msk.f32.gmra.mxu0 %vm1015_vm1, %v12649_v23 }
0x1610   : > { %12694 = vmatprep.mubr.msk.f32.mxu0 %vm1015_vm1, %v5085_v58 }
0x1613   : > { %12695 = vmatmul.mubr.msk.f32.vlgmr.msra.gmra.mxu0 %vm1015_vm1, %v5087_v18  ;;  %v15675_v18 = vld [vmem:[%s14262_s22] ss:$0 sm:$0xff] }
0x1614   : > { %12749 = vmatpush3.xpose.msk.msra.mxu0 %vm1015_vm1, %v5662_v3  ;;  %12697 = vmatprep.mubr.msk.f32.mxu0 %vm1015_vm1, %v5089_v29 }
0x1615   : > { %12750 = vmatprep.subr.msk.mxu0 %vm1015_vm1, %v5660_v52 }
0x1617   : > { %12698 = vmatmul.mubr.msk.f32.gmra.mxu0 %vm1015_vm1, %v5091_v12 }
0x1618   : > { %12751 = vmatpush3.xpose.msk.msra.mxu0 %vm1015_vm1, %v5660_v52  ;;  %12700 = vmatprep.mubr.msk.f32.mxu0 %vm1015_vm1, %v5093_v6 }
0x1619   : > { %12752 = vmatprep.subr.msk.mxu0 %vm1015_vm1, %v5658_v53 }
0x161b   : > { %12701 = vmatmul.mubr.msk.f32.gmra.mxu0 %vm1015_vm1, %v5095_v8 }
0x161c   : > { %12753 = vmatpush3.xpose.msk.msra.mxu0 %vm1015_vm1, %v5658_v53  ;;  %12703 = vmatprep.mubr.msk.f32.mxu0 %vm1015_vm1, %v5097_v59 }
0x161d   : > { %12754 = vmatprep.subr.msk.mxu0 %vm1015_vm1, %v5656_v44 }
0x161f   : > { %12704 = vmatmul.mubr.msk.f32.gmra.mxu0 %vm1015_vm1, %v5099_v9 }
0x1620   : > { %12755 = vmatpush3.xpose.msk.msra.mxu0 %vm1015_vm1, %v5656_v44  ;;  %12764 = vmatprep.mubr.msk.f32.mxu0 %vm1015_vm1, %v5632_v42 }
0x1621   : > { %12756 = vmatprep.subr.msk.mxu0 %vm1015_vm1, %v5654_v0 }
0x1624   : > { %12757 = vmatpush3.xpose.msk.msra.mxu0 %vm1015_vm1, %v5654_v0 }
0x1625   : > { %12758 = vmatprep.subr.msk.mxu0 %vm1015_vm1, %v5652_v16 }
0x1628   : > { %12759 = vmatpush3.xpose.msk.msra.mxu0 %vm1015_vm1, %v5652_v16 }
0x1629   : > { %12760 = vmatprep.subr.msk.mxu0 %vm1015_vm1, %v5650_v30 }
0x162c   : > { %12761 = vmatpush3.xpose.msk.msra.mxu0 %vm1015_vm1, %v5650_v30 }
0x162d   : > { %12762 = vmatprep.subr.msk.mxu0 %vm1015_vm1, %v5648_v49 }
0x1630   : > { %12763 = vmatpush3.xpose.msk.msra.mxu0 %vm1015_vm1, %v5648_v49 }
0x1633   : > { %12765 = vmatmul.mubr.msk.f32.vlgmr.msra.gmra.mxu0 %vm1015_vm1, %v5634_v37 }
0x1634   : > { %12767 = vmatprep.mubr.msk.f32.mxu0 %vm1015_vm1, %v5636_v17 }
0x1637   : > { %12768 = vmatmul.mubr.msk.f32.gmra.mxu0 %vm1015_vm1, %v5638_v48 }
0x1638   : > { %12770 = vmatprep.mubr.msk.f32.mxu0 %vm1015_vm1, %v5640_v15 }
0x163b   : > { %12771 = vmatmul.mubr.msk.f32.gmra.mxu0 %vm1015_vm1, %v5642_v47 }
0x163c   : > { %12773 = vmatprep.mubr.msk.f32.mxu0 %vm1015_vm1, %v5644_v55 }
0x163f   : > { %12774 = vmatmul.mubr.msk.f32.gmra.mxu0 %vm1015_vm1, %v5646_v19 }
0x1692   : > { %v15650_v2 = vpop.f32.mrf.mxu0 }
0x1694   : > { %v15652_v20 = vpop.f32.mrf.mxu0 }
0x16c3   : > { %v15654_v33 = vpop.f32.mrf.mxu0 }
0x16c5   : > { %v15656_v56 = vpop.f32.mrf.mxu0 }
0x16c8   : > { %v15658_v27 = vpop.f32.mrf.mxu0 }
0x16ca   : > { %v15660_v45 = vpop.f32.mrf.mxu0 }
0x16cf   : > { %v15662_v11 = vpop.f32.mrf.mxu0 }
0x16d1   : > { %v15664_v60 = vpop.f32.mrf.mxu0 }
0x16d3   : > { %v12696_v24 = vpop.f32.mrf.mxu0 }
0x16d4   : > { %v5220_v61 = vadd.f32 %v15302_v13, %v12696_v24 }
0x16d5   : > { %v5214_v57 = vpop.f32.mrf.mxu0 }
0x16d6   : > { %v5215_v36 = vadd.f32 %v15302_v13, %v5214_v57  ;;  %v5256_v26 = vsel %vm1153_vm2, %v5220_v61, -inf }
0x16d7   : > { %5257 = vmax.xlane.f32.xlu1 %v5256_v26  ;;  %v12699_v62 = vpop.f32.mrf.mxu0 }
0x16d8   : > { %v5253_v58 = vsel %vm1153_vm2, %v5215_v36, -inf  ;;  %v5230_v6 = vadd.f32 %v15302_v13, %v12699_v62 }
0x16d9   : > { %5254 = vmax.xlane.f32.xlu0 %v5253_v58  ;;  %v5224_v21 = vpop.f32.mrf.mxu0 }
0x16da   : > { %v5225_v29 = vadd.f32 %v15302_v13, %v5224_v21  ;;  %v5262_v50 = vsel %vm1153_vm2, %v5230_v6, -inf }
0x16db   : > { %v12702_v35 = vpop.f32.mrf.mxu0 }
0x16dc   : > { %v5259_v59 = vsel %vm1153_vm2, %v5225_v29, -inf  ;;  %v5240_v54 = vadd.f32 %v15675_v18, %v12702_v35 }
0x16dd   : > { %5260 = vmax.xlane.f32.xlu0 %v5259_v59  ;;  %v5234_v25 = vpop.f32.mrf.mxu0 }
0x16de   : > { %v5235_v3 = vadd.f32 %v15302_v13, %v5234_v25  ;;  %v5268_v8 = vsel %vm1153_vm2, %v5240_v54, -inf }
0x16df   : > { %v12705_v43 = vpop.f32.mrf.mxu0 }
0x16e0   : > { %v5265_v12 = vsel %vm1153_vm2, %v5235_v3, -inf  ;;  %v5250_v4 = vadd.f32 %v15675_v18, %v12705_v43 }
0x16e1   : > { %5263 = vmax.xlane.f32.xlu0 %v5262_v50  ;;  %5266 = vmax.xlane.f32.xlu1 %v5265_v12  ;;  %v5244_v13 = vpop.f32.mrf.mxu0 }
0x16e2   : > { %v5274_v23 = vsel %vm1153_vm2, %v5250_v4, -inf  ;;  %v15692_v53 = vadd.f32 %v15675_v18, %v5244_v13 }
0x16e4   : > { %v5271_v28 = vsel %vm1153_vm2, %v15692_v53, -inf }
0x16e5   : > { %5269 = vmax.xlane.f32.xlu0 %v5268_v8 }
0x16e9   : > { %5275 = vmax.xlane.f32.xlu0 %v5274_v23 }
0x16f2   : > { %5355 = vrot.lane.b32.xlu1 %v15197_v7, %s17292_s26 }
0x16f6   : > { %5351 = vrot.lane.b32.xlu1 %v15205_v63, %s17292_s26 }
0x16ff   : > { %5353 = vrot.lane.b32.xlu0 %v15201_v1, %s17292_s26 }
0x1703   : > { %5347 = vrot.lane.b32.xlu0 %v15221_v41, %s17292_s26 }
0x171a   : > { %5272 = vmax.xlane.f32.xlu1 %v5271_v28 }
0x172b   : > { %5349 = vrot.lane.b32.xlu1 %v15215_v34, %s17292_s26 }
0x172f   : > { %5345 = vrot.lane.b32.xlu1 %v15229_v39, %s17292_s26 }
0x1760   : > { %v5258_v9 = vpop.xlane.xlu1 %5257 }
0x1761   : > { %v5278_v0 = vsub.f32 %v5220_v61, %v5258_v9 }
0x1762   : > { %v5255_v52 = vpop.xlane.xlu0 %5254 }
0x1763   : > { %v5287_v30 = vmul.f32 1.442695, %v5278_v0  ;;  %v5277_v44 = vsub.f32 %v5215_v36, %v5255_v52 }
0x1765   : > { %13644 = vpow2.f32 %v5287_v30  ;;  %v5285_v42 = vmul.f32 1.442695, %v5277_v44 }
0x1766   : > { %v5261_v16 = vpop.xlane.xlu0 %5260 }
0x1767   : > { %13646 = vpow2.f32 %v5285_v42  ;;  %v5279_v49 = vsub.f32 %v5225_v29, %v5261_v16  ;;  %v12766_v16 = vpop.f32.mrf.mxu0 }
0x1769   : > { %v5289_v37 = vmul.f32 1.442695, %v5279_v49  ;;  %v5761_v49 = vpop.f32.mrf.mxu0 }
0x176a   : > { %v5267_v17 = vpop.xlane.xlu1 %5266  ;;  %v5264_v48 = vpop.xlane.xlu0 %5263 }
0x176b   : > { %13648 = vpow2.f32 %v5289_v37  ;;  %v5281_v15 = vsub.f32 %v5235_v3, %v5267_v17  ;;  %v5280_v47 = vsub.f32 %v5230_v6, %v5264_v48  ;;  %v12769_v37 = vpop.f32.mrf.mxu0 }
0x176d   : > { %v5293_v55 = vmul.f32 1.442695, %v5281_v15  ;;  %v5291_v19 = vmul.f32 1.442695, %v5280_v47  ;;  %v5771_v15 = vpop.f32.mrf.mxu0 }
0x176e   : > { %v5356_v24 = vpop.permute.xlu1 %5355  ;;  %v5270_v57 = vpop.xlane.xlu0 %5269  ;;  %v15739_v47 = vadd.f32 %v15675_v18, %v5771_v15 }
0x176f   : > { %13650 = vpow2.f32 %v5293_v55  ;;  %v5282_v61 = vsub.f32 %v5240_v54, %v5270_v57  ;;  %12706 = vmatprep.subr.mxu1 %v5356_v24 }
0x1770   : > { %13652 = vpow2.f32 %v5291_v19  ;;  %12707 = vmatpush3.msra.mxu1 %v5356_v24  ;;  %v12772_v19 = vpop.f32.mrf.mxu0  ;;  %v15744_v24 = vadd.f32 %v15675_v18, %v12769_v37  ;;  %v5806_v57 = vsel %vm1153_vm2, %v15739_v47, -inf }
0x1771   : > { %v5295_v36 = vmul.f32 1.442695, %v5282_v61 }
0x1772   : > { %v15700_v26 = vpop.eup %13644  ;;  %v5276_v62 = vpop.xlane.xlu0 %5275 }
0x1773   : > { %13654 = vpow2.f32 %v5295_v36  ;;  %v5284_v58 = vsub.f32 %v5250_v4, %v5276_v62  ;;  %v5304_v21 = vsel %vm1153_vm2, %v15700_v26, 0.0  ;;  %v5352_v3 = vpop.permute.xlu1 %5351  ;;  %v5781_v61 = vpop.f32.mrf.mxu0  ;;  %v15749_v36 = vadd.f32 %v15675_v18, %v12772_v19 }
0x1774   : > { %v15704_v29 = vpop.eup %13646  ;;  %5305 = vadd.xlane.f32.xlu0 %v5304_v21  ;;  %v5809_v62 = vsel %vm1153_vm2, %v15744_v24, -inf }
0x1775   : > { %v5299_v35 = vmul.f32 1.442695, %v5284_v58  ;;  %v5301_v6 = vsel %vm1153_vm2, %v15704_v29, 0.0  ;;  %v12775_v58 = vpop.f32.mrf.mxu0 }
0x1776   : > { %5302 = vadd.xlane.f32.xlu1 %v5301_v6  ;;  %v5354_v59 = vpop.permute.xlu0 %5353  ;;  %v15754_v21 = vadd.f32 %v15675_v18, %v12775_v58 }
0x1777   : > { %13656 = vpow2.f32 %v5299_v35  ;;  %12708 = vmatprep.subr.mxu1 %v5354_v59  ;;  %v5815_v35 = vsel %vm1153_vm2, %v15749_v36, -inf }
0x1778   : > { %v15708_v25 = vpop.eup %13648  ;;  %12709 = vmatpush3.msra.mxu1 %v5354_v59  ;;  %v5821_v6 = vsel %vm1153_vm2, %v15754_v21, -inf  ;;  %v15767_v59 = vadd.f32 %v15675_v18, %v12766_v16 }
0x1779   : > { %12710 = vmatprep.subr.mxu1 %v5352_v3  ;;  %v5307_v54 = vsel %vm1153_vm2, %v15708_v25, 0.0 }
0x177a   : > { %5308 = vadd.xlane.f32.xlu1 %v5307_v54  ;;  %12711 = vmatpush3.msra.mxu1 %v5352_v3  ;;  %v5348_v44 = vpop.permute.xlu0 %5347  ;;  %v15770_v3 = vadd.f32 %v15675_v18, %v5781_v61  ;;  %v5803_v54 = vsel %vm1153_vm2, %v15767_v59, -inf }
0x177c   : > { %v15712_v50 = vpop.eup %13650 }
0x177d   : > { %v15714_v12 = vpop.eup %13652  ;;  %v5313_v43 = vsel %vm1153_vm2, %v15712_v50, 0.0 }
0x177e   : > { %5314 = vadd.xlane.f32.xlu1 %v5313_v43  ;;  %v5310_v4 = vsel %vm1153_vm2, %v15714_v12, 0.0  ;;  %v5791_v43 = vpop.f32.mrf.mxu0 }
0x177f   : > { %5311 = vadd.xlane.f32.xlu0 %v5310_v4  ;;  %v15775_v4 = vadd.f32 %v15675_v18, %v5791_v43 }
0x1780   : > { %v15720_v8 = vpop.eup %13654 }
0x1781   : > { %v5316_v23 = vsel %vm1153_vm2, %v15720_v8, 0.0 }
0x1783   : > { %5317 = vadd.xlane.f32.xlu0 %v5316_v23 }
0x1784   : > { %v15724_v13 = vpop.eup %13656 }
0x1785   : > { %v5322_v28 = vsel %vm1153_vm2, %v15724_v13, 0.0 }
0x1787   : > { %5323 = vadd.xlane.f32.xlu0 %v5322_v28 }
0x179d   : > { %5343 = vrot.lane.b32.xlu0 %v15237_v51, %s17292_s26 }
0x17a3   : > { %v5273_v9 = vpop.xlane.xlu1 %5272 }
0x17a4   : > { %v5283_v0 = vsub.f32 %v15692_v53, %v5273_v9  ;;  %v15736_v53 = vadd.f32 %v15675_v18, %v5761_v49 }
0x17a6   : > { %v5297_v52 = vmul.f32 1.442695, %v5283_v0  ;;  %v5800_v55 = vsel %vm1153_vm2, %v15736_v53, -inf }
0x17a7   : > { %v5350_v30 = vpop.permute.xlu1 %5349 }
0x17a8   : > { %13658 = vpow2.f32 %v5297_v52  ;;  %12712 = vmatprep.subr.mxu1 %v5350_v30 }
0x17a9   : > { %12713 = vmatpush3.msra.mxu1 %v5350_v30 }
0x17aa   : > { %12714 = vmatprep.subr.mxu1 %v5348_v44 }
0x17ab   : > { %v5346_v42 = vpop.permute.xlu1 %5345  ;;  %12715 = vmatpush3.msra.mxu1 %v5348_v44 }
0x17ac   : > { %12716 = vmatprep.subr.mxu1 %v5346_v42 }
0x17ad   : > { %12717 = vmatpush3.msra.mxu1 %v5346_v42 }
0x17b5   : > { %v15731_v17 = vpop.eup %13658 }
0x17b6   : > { %v5319_v48 = vsel %vm1153_vm2, %v15731_v17, 0.0 }
0x17b7   : > { %5320 = vadd.xlane.f32.xlu1 %v5319_v48 }
0x17bc   : > { %5801 = vmax.xlane.f32.xlu0 %v5800_v55 }
0x17c0   : > { %5807 = vmax.xlane.f32.xlu0 %v5806_v57 }
0x17c4   : > { %5810 = vmax.xlane.f32.xlu0 %v5809_v62 }
0x17c8   : > { %5816 = vmax.xlane.f32.xlu0 %v5815_v35  ;;  %5341 = vrot.lane.b32.xlu1 %v15245_v31, %s17292_s26 }
0x17cc   : > { %5822 = vmax.xlane.f32.xlu0 %v5821_v6 }
0x17e2   : > { %5900 = vrot.lane.b32.xlu0 %v15201_v1, %s17294_s27  ;;  %v5812_v1 = vsel %vm1153_vm2, %v15770_v3, -inf }
0x17e6   : > { %5894 = vrot.lane.b32.xlu0 %v15221_v41, %s17294_s27  ;;  %v5818_v41 = vsel %vm1153_vm2, %v15775_v4, -inf }
0x17ec   : > { %5804 = vmax.xlane.f32.xlu1 %v5803_v54 }
0x17f0   : > { %5813 = vmax.xlane.f32.xlu1 %v5812_v1 }
0x17f4   : > { %5819 = vmax.xlane.f32.xlu1 %v5818_v41 }
0x17fd   : > { %v5306_v28 = vpop.xlane.xlu0 %5305 }
0x17ff   : > { %v5303_v23 = vpop.xlane.xlu1 %5302 }
0x1800   : > { %13660 = vrcp.f32 %v5303_v23 }
0x1801   : > { %13662 = vrcp.f32 %v5306_v28 }
0x1805   : > { %5902 = vrot.lane.b32.xlu1 %v15197_v7, %s17294_s27  ;;  %v5309_v7 = vpop.xlane.xlu1 %5308 }
0x1806   : > { %13664 = vrcp.f32 %v5309_v7 }
0x1808   : > { %v5312_v9 = vpop.xlane.xlu0 %5311 }
0x1809   : > { %5898 = vrot.lane.b32.xlu1 %v15205_v63, %s17294_s27  ;;  %v5315_v63 = vpop.xlane.xlu1 %5314  ;;  %13666 = vrcp.f32 %v5312_v9 }
0x180a   : > { %13668 = vrcp.f32 %v5315_v63 }
0x180c   : > { %v5318_v18 = vpop.xlane.xlu0 %5317 }
0x180d   : > { %v13661_v0 = vpop.eup %13660  ;;  %5896 = vrot.lane.b32.xlu1 %v15215_v34, %s17294_s27  ;;  %13670 = vrcp.f32 %v5318_v18 }
0x180e   : > { %v5333_v52 = vmul.f32 %v13661_v0, %v15704_v29  ;;  %v13663_v29 = vpop.eup %13662 }
0x180f   : > { %v5334_v49 = vmul.f32 %v13663_v29, %v15700_v26 }
0x1810   : > { %v5324_v30 = vpop.xlane.xlu0 %5323  ;;  %12722 = vmatprep.mubr.msk.f32.mxu1 %vm1153_vm2, %v5333_v52 }
0x1811   : > { %5892 = vrot.lane.b32.xlu1 %v15229_v39, %s17294_s27  ;;  %13672 = vrcp.f32 %v5324_v30  ;;  %v11000_v39 = vld [vmem:[%s17232_s9 + $0x30] sm:$0xff] }
0x1813   : > { %v13665_v42 = vpop.eup %13664 }
0x1814   : > { %v5344_v44 = vpop.permute.xlu0 %5343  ;;  %v5335_v55 = vmul.f32 %v13665_v42, %v15708_v25 }
0x1815   : > { %12718 = vmatprep.subr.mxu1 %v5344_v44 }
0x1816   : > { %12719 = vmatpush3.msra.mxu1 %v5344_v44  ;;  %v13667_v48 = vpop.eup %13666 }
0x1817   : > { %v13669_v19 = vpop.eup %13668  ;;  %v5336_v62 = vmul.f32 %v13667_v48, %v15714_v12 }
0x181a   : > { %v13671_v26 = vpop.eup %13670 }
0x181b   : > { %v5338_v6 = vmul.f32 %v13671_v26, %v15720_v8 }
0x181e   : > { %v13673_v35 = vpop.eup %13672 }
0x1840   : > { %v5321_v34 = vpop.xlane.xlu1 %5320 }
0x1841   : > { %13674 = vrcp.f32 %v5321_v34 }
0x1844   : > { %v5342_v16 = vpop.permute.xlu1 %5341 }
0x1845   : > { %v5802_v37 = vpop.xlane.xlu0 %5801  ;;  %12720 = vmatprep.subr.mxu1 %v5342_v16 }
0x1846   : > { %v5824_v15 = vsub.f32 %v15736_v53, %v5802_v37  ;;  %12721 = vmatpush3.msra.mxu1 %v5342_v16  ;;  %v5337_v53 = vmul.f32 %v13669_v19, %v15712_v50 }
0x1847   : > { %12723 = vmatmul.mubr.msk.f32.vlgmr.msra.gmra.mxu1 %vm1153_vm2, %v5334_v49  ;;  %12734 = vmatprep.subr.mxu1 %v11000_v39 }
0x1848   : > { %v5832_v57 = vmul.f32 1.442695, %v5824_v15  ;;  %12725 = vmatprep.mubr.msk.f32.mxu1 %vm1153_vm2, %v5335_v55  ;;  %12735 = vmatpush3.msra.mxu1 %v11000_v39 }
0x1849   : > { %v5808_v61 = vpop.xlane.xlu0 %5807 }
0x184a   : > { %13676 = vpow2.f32 %v5832_v57  ;;  %v5826_v58 = vsub.f32 %v15739_v47, %v5808_v61  ;;  %v5340_v47 = vmul.f32 %v13673_v35, %v15724_v13  ;;  %v15852_v61 = vpop.f32.mrf.mxu1 }
0x184b   : > { %12726 = vmatmul.mubr.msk.f32.gmra.mxu1 %vm1153_vm2, %v5336_v62 }
0x184c   : > { %v5836_v25 = vmul.f32 1.442695, %v5826_v58  ;;  %12728 = vmatprep.mubr.msk.f32.mxu1 %vm1153_vm2, %v5337_v53  ;;  %v15854_v62 = vpop.f32.mrf.mxu1 }
0x184d   : > { %v5811_v41 = vpop.xlane.xlu0 %5810 }
0x184e   : > { %v13675_v54 = vpop.eup %13674  ;;  %13678 = vpow2.f32 %v5836_v25  ;;  %v5827_v23 = vsub.f32 %v15744_v24, %v5811_v41  ;;  %v15856_v26 = vpop.f32.mrf.mxu1 }
0x184f   : > { %12729 = vmatmul.mubr.msk.f32.gmra.mxu1 %vm1153_vm2, %v5338_v6  ;;  %v5339_v12 = vmul.f32 %v13675_v54, %v15731_v17 }
0x1850   : > { %v5838_v9 = vmul.f32 1.442695, %v5827_v23  ;;  %v15858_v53 = vpop.f32.mrf.mxu1 }
0x1851   : > { %12731 = vmatprep.mubr.msk.f32.mxu1 %vm1153_vm2, %v5339_v12  ;;  %v5817_v17 = vpop.xlane.xlu0 %5816 }
0x1852   : > { %v5829_v18 = vsub.f32 %v15749_v36, %v5817_v17  ;;  %v15860_v25 = vpop.f32.mrf.mxu1 }
0x1853   : > { %12732 = vmatmul.mubr.msk.f32.gmra.mxu1 %vm1153_vm2, %v5340_v47 }
0x1854   : > { %v5842_v7 = vmul.f32 1.442695, %v5829_v18  ;;  %v15862_v6 = vpop.f32.mrf.mxu1 }
0x1855   : > { %v5823_v52 = vpop.xlane.xlu0 %5822 }
0x1856   : > { %v5831_v63 = vsub.f32 %v15754_v21, %v5823_v52  ;;  %v15864_v12 = vpop.f32.mrf.mxu1 }
0x1857   : > { %v15810_v50 = vpop.eup %13676 }
0x1858   : > { %v5848_v43 = vsel %vm1153_vm2, %v15810_v50, 0.0  ;;  %v15866_v47 = vpop.f32.mrf.mxu1 }
0x1859   : > { %5849 = vadd.xlane.f32.xlu1 %v5848_v43  ;;  %v5901_v43 = vpop.permute.xlu0 %5900 }
0x185b   : > { %v15814_v1 = vpop.eup %13678 }
0x185c   : > { %v5854_v8 = vsel %vm1153_vm2, %v15814_v1, 0.0 }
0x185d   : > { %5855 = vadd.xlane.f32.xlu1 %v5854_v8  ;;  %v5895_v23 = vpop.permute.xlu0 %5894 }
0x1875   : > { %v5805_v28 = vpop.xlane.xlu1 %5804 }
0x1876   : > { %v5825_v13 = vsub.f32 %v15767_v59, %v5805_v28  ;;  %v5846_v59 = vmul.f32 1.442695, %v5831_v63 }
0x1878   : > { %v5834_v0 = vmul.f32 1.442695, %v5825_v13 }
0x1879   : > { %v5814_v30 = vpop.xlane.xlu1 %5813 }
0x187a   : > { %13680 = vpow2.f32 %v5834_v0  ;;  %v5828_v44 = vsub.f32 %v15770_v3, %v5814_v30 }
0x187b   : > { %13682 = vpow2.f32 %v5838_v9 }
0x187c   : > { %v5840_v34 = vmul.f32 1.442695, %v5828_v44 }
0x187d   : > { %v5820_v29 = vpop.xlane.xlu1 %5819 }
0x187e   : > { %13684 = vpow2.f32 %v5840_v34  ;;  %v5830_v24 = vsub.f32 %v15775_v4, %v5820_v29 }
0x187f   : > { %13686 = vpow2.f32 %v5842_v7 }
0x1880   : > { %v5844_v42 = vmul.f32 1.442695, %v5830_v24 }
0x1881   : > { %v5903_v16 = vpop.permute.xlu1 %5902 }
0x1882   : > { %13688 = vpow2.f32 %v5844_v42  ;;  %12776 = vmatprep.subr.mxu1 %v5903_v16 }
0x1883   : > { %13690 = vpow2.f32 %v5846_v59 }
0x1885   : > { %v5899_v58 = vpop.permute.xlu1 %5898 }
0x1887   : > { %v15824_v36 = vpop.eup %13680 }
0x1888   : > { %v5851_v3 = vsel %vm1153_vm2, %v15824_v36, 0.0  ;;  %v15828_v39 = vpop.eup %13682 }
0x1889   : > { %5852 = vadd.xlane.f32.xlu0 %v5851_v3  ;;  %v5857_v49 = vsel %vm1153_vm2, %v15828_v39, 0.0  ;;  %v5897_v35 = vpop.permute.xlu1 %5896 }
0x188b   : > { %v15830_v21 = vpop.eup %13684 }
0x188c   : > { %v5860_v4 = vsel %vm1153_vm2, %v15830_v21, 0.0  ;;  %v15836_v37 = vpop.eup %13686 }
0x188d   : > { %5861 = vadd.xlane.f32.xlu1 %v5860_v4  ;;  %5858 = vadd.xlane.f32.xlu0 %v5857_v49  ;;  %v5863_v55 = vsel %vm1153_vm2, %v15836_v37, 0.0  ;;  %v5893_v54 = vpop.permute.xlu1 %5892 }
0x188f   : > { %v15838_v48 = vpop.eup %13688 }
0x1890   : > { %v5866_v15 = vsel %vm1153_vm2, %v15838_v48, 0.0  ;;  %v15844_v19 = vpop.eup %13690 }
0x1891   : > { %5867 = vadd.xlane.f32.xlu1 %v5866_v15  ;;  %5864 = vadd.xlane.f32.xlu0 %v5863_v55  ;;  %v5869_v57 = vsel %vm1153_vm2, %v15844_v19, 0.0 }
0x1895   : > { %5870 = vadd.xlane.f32.xlu0 %v5869_v57 }
0x18a2   : > { %5888 = vrot.lane.b32.xlu1 %v15245_v31, %s17294_s27 }
0x18ab   : > { %5890 = vrot.lane.b32.xlu0 %v15237_v51, %s17294_s27 }
0x18e2   : > { %v5850_v31 = vpop.xlane.xlu1 %5849 }
0x18e3   : > { %13692 = vrcp.f32 %v5850_v31 }
0x18e6   : > { %v5856_v9 = vpop.xlane.xlu1 %5855 }
0x18f0   : > { %v13693_v0 = vpop.eup %13692 }
0x18f1   : > { %v5880_v63 = vmul.f32 %v13693_v0, %v15810_v50 }
0x1907   : > { %v12724_v51 = vpop.f32.mrf.mxu1 }
0x1909   : > { %v5455_v8 = vpop.f32.mrf.mxu1 }
0x190a   : > { %12736 = vmatprep.mubr.msk.f32.mxu1 %vm1015_vm1, %v5455_v8 }
0x190b   : > { %v12727_v41 = vpop.f32.mrf.mxu1  ;;  %12737 = vmatmul.mubr.msk.f32.vlgmr.msra.gmra.mxu1 %vm1015_vm1, %v12724_v51 }
0x190c   : > { %12777 = vmatpush3.msra.mxu1 %v5903_v16 }
0x190d   : > { %12778 = vmatprep.subr.mxu1 %v5901_v43  ;;  %v5465_v17 = vpop.f32.mrf.mxu1 }
0x190e   : > { %12779 = vmatpush3.msra.mxu1 %v5901_v43  ;;  %12739 = vmatprep.mubr.msk.f32.mxu1 %vm1015_vm1, %v5465_v17  ;;  %v5056_v17 = vadd.f32 %v15858_v53, %v15656_v56  ;;  %v5076_v56 = vadd.f32 %v15866_v47, %v15664_v60 }
0x190f   : > { %12780 = vmatprep.subr.mxu1 %v5899_v58  ;;  %v12730_v28 = vpop.f32.mrf.mxu1  ;;  %12740 = vmatmul.mubr.msk.f32.gmra.mxu1 %vm1015_vm1, %v12727_v41 }
0x1910   : > { %12781 = vmatpush3.msra.mxu1 %v5899_v58 }
0x1911   : > { %12782 = vmatprep.subr.mxu1 %v5897_v35  ;;  %v5475_v13 = vpop.f32.mrf.mxu1 }
0x1912   : > { %12783 = vmatpush3.msra.mxu1 %v5897_v35  ;;  %12742 = vmatprep.mubr.msk.f32.mxu1 %vm1015_vm1, %v5475_v13  ;;  %v5853_v18 = vpop.xlane.xlu0 %5852  ;;  %v5071_v13 = vadd.f32 %v15860_v25, %v15658_v27 }
0x1913   : > { %12784 = vmatprep.subr.mxu1 %v5895_v23  ;;  %v12733_v52 = vpop.f32.mrf.mxu1  ;;  %12743 = vmatmul.mubr.msk.f32.gmra.mxu1 %vm1015_vm1, %v12730_v28  ;;  %13694 = vrcp.f32 %v5853_v18 }
0x1914   : > { %12785 = vmatpush3.msra.mxu1 %v5895_v23  ;;  %13696 = vrcp.f32 %v5856_v9 }
0x1915   : > { %12786 = vmatprep.subr.mxu1 %v5893_v54  ;;  %v5485_v30 = vpop.f32.mrf.mxu1 }
0x1916   : > { %12787 = vmatpush3.msra.mxu1 %v5893_v54  ;;  %12745 = vmatprep.mubr.msk.f32.mxu1 %vm1015_vm1, %v5485_v30  ;;  %v5862_v44 = vpop.xlane.xlu1 %5861  ;;  %v5859_v7 = vpop.xlane.xlu0 %5858 }
0x1917   : > { %12746 = vmatmul.mubr.msk.f32.gmra.mxu1 %vm1015_vm1, %v12733_v52  ;;  %13698 = vrcp.f32 %v5859_v7 }
0x1918   : > { %12792 = vmatprep.mubr.msk.f32.mxu1 %vm1153_vm2, %v5880_v63  ;;  %13700 = vrcp.f32 %v5862_v44  ;;  %v11131_v63 = vld [vmem:[%s17233_s10 + $0x1] ss:$0 sm:$0xff] }
0x191a   : > { %v5865_v34 = vpop.xlane.xlu0 %5864  ;;  %v5868_v29 = vpop.xlane.xlu1 %5867 }
0x191b   : > { %13702 = vrcp.f32 %v5865_v34 }
0x191c   : > { %13704 = vrcp.f32 %v5868_v29 }
0x191e   : > { %v5871_v24 = vpop.xlane.xlu0 %5870  ;;  %v5889_v3 = vpop.permute.xlu1 %5888 }
0x191f   : > { %13706 = vrcp.f32 %v5871_v24 }
0x1920   : > { %v13695_v59 = vpop.eup %13694 }
0x1921   : > { %v13697_v16 = vpop.eup %13696  ;;  %v5881_v50 = vmul.f32 %v13695_v59, %v15824_v36 }
0x1922   : > { %v5891_v42 = vpop.permute.xlu0 %5890  ;;  %v5882_v49 = vmul.f32 %v13697_v16, %v15814_v1 }
0x1923   : > { %12788 = vmatprep.subr.mxu1 %v5891_v42 }
0x1924   : > { %12789 = vmatpush3.msra.mxu1 %v5891_v42  ;;  %v13699_v4 = vpop.eup %13698 }
0x1925   : > { %12790 = vmatprep.subr.mxu1 %v5889_v3  ;;  %v13701_v15 = vpop.eup %13700  ;;  %v5883_v55 = vmul.f32 %v13699_v4, %v15828_v39  ;;  %v11001_v39 = vld [vmem:[%s17232_s9 + $0x38] sm:$0xff] }
0x1926   : > { %12791 = vmatpush3.msra.mxu1 %v5889_v3  ;;  %v5884_v58 = vmul.f32 %v13701_v15, %v15830_v21  ;;  %v5051_v21 = vadd.f32 %v15852_v61, %v15650_v2 }
0x1927   : > { %12793 = vmatmul.mubr.msk.f32.vlgmr.msra.gmra.mxu1 %vm1153_vm2, %v5881_v50  ;;  %12804 = vmatprep.subr.mxu1 %v11001_v39 }
0x1928   : > { %12795 = vmatprep.mubr.msk.f32.mxu1 %vm1153_vm2, %v5882_v49  ;;  %v13703_v57 = vpop.eup %13702  ;;  %12805 = vmatpush3.msra.mxu1 %v11001_v39 }
0x1929   : > { %v13705_v35 = vpop.eup %13704  ;;  %v5885_v36 = vmul.f32 %v13703_v57, %v15836_v37 }
0x192a   : > { %v5886_v1 = vmul.f32 %v13705_v35, %v15838_v48  ;;  %v5046_v48 = vadd.f32 %v15854_v62, %v15652_v20  ;;  %v5066_v20 = vadd.f32 %v15862_v6, %v15660_v45 }
0x192b   : > { %12796 = vmatmul.mubr.msk.f32.gmra.mxu1 %vm1153_vm2, %v5883_v55 }
0x192c   : > { %12798 = vmatprep.mubr.msk.f32.mxu1 %vm1153_vm2, %v5884_v58  ;;  %v13707_v54 = vpop.eup %13706 }
0x192d   : > { %v5887_v31 = vmul.f32 %v13707_v54, %v15844_v19  ;;  %v5061_v19 = vadd.f32 %v15856_v26, %v15654_v33  ;;  %v5081_v33 = vadd.f32 %v15864_v12, %v15662_v11 }
0x192f   : > { %12799 = vmatmul.mubr.msk.f32.gmra.mxu1 %vm1153_vm2, %v5885_v36 }
0x1930   : > { %12801 = vmatprep.mubr.msk.f32.mxu1 %vm1153_vm2, %v5886_v1 }
0x1933   : > { %12802 = vmatmul.mubr.msk.f32.gmra.mxu1 %vm1153_vm2, %v5887_v31 }
0x19cb   : > { %v12738_v37 = vpop.f32.mrf.mxu1 }
0x19cc   : > { %v5624_v51 = vadd.f32 %v12738_v37, %v5051_v21 }
0x19cd   : > { %v5584_v43 = vpop.f32.mrf.mxu1 }
0x19ce   : > { %v5623_v8 = vadd.f32 %v5584_v43, %v5046_v48 }
0x19cf   : > { %v12741_v41 = vpop.f32.mrf.mxu1 }
0x19d0   : > { %v5626_v23 = vadd.f32 %v12741_v41, %v5061_v19 }
0x19d1   : > { %v5594_v28 = vpop.f32.mrf.mxu1 }
0x19d2   : > { %v5625_v2 = vadd.f32 %v5594_v28, %v5056_v17 }
0x19d3   : > { %v12744_v61 = vpop.f32.mrf.mxu1 }
0x19d4   : > { %v5628_v62 = vadd.f32 %v12744_v61, %v5071_v13 }
0x19d5   : > { %v5604_v9 = vpop.f32.mrf.mxu1 }
0x19d6   : > { %v5627_v26 = vadd.f32 %v5604_v9, %v5066_v20 }
0x19d7   : > { %v12747_v18 = vpop.f32.mrf.mxu1 }
0x19d8   : > { %v5630_v53 = vadd.f32 %v12747_v18, %v5081_v33 }
0x19d9   : > { %v5614_v0 = vpop.f32.mrf.mxu1 }
0x19da   : > { %v5629_v52 = vadd.f32 %v5614_v0, %v5076_v56 }
0x19e7   : > { %v12794_v30 = vpop.f32.mrf.mxu1 }
0x19e9   : > { %v6002_v27 = vpop.f32.mrf.mxu1 }
0x19ea   : > { %12806 = vmatprep.mubr.msk.f32.mxu1 %vm1015_vm1, %v6002_v27 }
0x19eb   : > { %v12797_v25 = vpop.f32.mrf.mxu1  ;;  %12807 = vmatmul.mubr.msk.f32.vlgmr.msra.gmra.mxu1 %vm1015_vm1, %v12794_v30 }
0x19ed   : > { %v6012_v45 = vpop.f32.mrf.mxu1 }
0x19ee   : > { %12809 = vmatprep.mubr.msk.f32.mxu1 %vm1015_vm1, %v6012_v45 }
0x19ef   : > { %v12800_v6 = vpop.f32.mrf.mxu1  ;;  %12810 = vmatmul.mubr.msk.f32.gmra.mxu1 %vm1015_vm1, %v12797_v25 }
0x19f1   : > { %v6022_v11 = vpop.f32.mrf.mxu1 }
0x19f2   : > { %12812 = vmatprep.mubr.msk.f32.mxu1 %vm1015_vm1, %v6022_v11 }
0x19f3   : > { %v12803_v60 = vpop.f32.mrf.mxu1  ;;  %12813 = vmatmul.mubr.msk.f32.gmra.mxu1 %vm1015_vm1, %v12800_v6 }
0x19f5   : > { %v6032_v12 = vpop.f32.mrf.mxu1 }
0x19f6   : > { %12815 = vmatprep.mubr.msk.f32.mxu1 %vm1015_vm1, %v6032_v12 }
0x19f7   : > { %12816 = vmatmul.mubr.msk.f32.gmra.mxu1 %vm1015_vm1, %v12803_v60 }
0x1aab   : > { %v12808_v47 = vpop.f32.mrf.mxu1 }
0x1aac   : > { %v6171_v44 = vadd.f32 %v12808_v47, %v5624_v51 }
0x1aad   : > { %v6131_v7 = vpop.f32.mrf.mxu1 }
0x1aae   : > { %v6179_v34 = vadd.f32 %v6171_v44, %v15125_v10  ;;  %v6170_v29 = vadd.f32 %v6131_v7, %v5623_v8 }
0x1aaf   : > { %v12811_v24 = vpop.f32.mrf.mxu1 }
0x1ab0   : > { %v6178_v59 = vadd.f32 %v6170_v29, %v15127_v46  ;;  %v6173_v42 = vadd.f32 %v12811_v24, %v5626_v23  ;;  %v6195_v16 = vadd.f32 %v11131_v63, %v6179_v34 }
0x1ab1   : > { %v6141_v3 = vpop.f32.mrf.mxu1 }
0x1ab2   : > { %v6172_v50 = vadd.f32 %v6141_v3, %v5625_v2  ;;  %v6209_v4 = vsel %vm711_vm0, %v6195_v16, 0.0  ;;  %v6194_v49 = vadd.f32 %v11131_v63, %v6178_v59  ;;  %v6181_v15 = vadd.f32 %v6173_v42, %v15142_v38 }
0x1ab3   : > { %6210 = vadd.xlane.f32.xlu1 %v6209_v4  ;;  %v12814_v55 = vpop.f32.mrf.mxu1 }
0x1ab4   : > { %v6180_v57 = vadd.f32 %v6172_v50, %v15144_v5  ;;  %v6175_v58 = vadd.f32 %v12814_v55, %v5628_v62  ;;  %v6206_v10 = vsel %vm711_vm0, %v6194_v49, 0.0  ;;  %v6197_v1 = vadd.f32 %v11131_v63, %v6181_v15 }
0x1ab5   : > { %6207 = vadd.xlane.f32.xlu0 %v6206_v10  ;;  %v6151_v35 = vpop.f32.mrf.mxu1  ;;  %v11138_v10 = vld [vmem:[%s17234_s11 + $0x30] sm:$0xff] }
0x1ab6   : > { %v6174_v36 = vadd.f32 %v6151_v35, %v5627_v26  ;;  %v6196_v46 = vadd.f32 %v11131_v63, %v6180_v57  ;;  %v6183_v31 = vadd.f32 %v6175_v58, %v15156_v14  ;;  %v6215_v51 = vsel %vm711_vm0, %v6197_v1, 0.0  ;;  %v11139_v58 = vld [vmem:[%s17234_s11 + $0x38] sm:$0xff]  ;;  %v11137_v35 = vld [vmem:[%s17234_s11 + $0x28] sm:$0xff] }
0x1ab7   : > { %v12817_v54 = vpop.f32.mrf.mxu1  ;;  %12818 = vmatprep.subr.mxu0 %v11139_v58 }
0x1ab8   : > { %v6182_v39 = vadd.f32 %v6174_v36, %v15159_v40  ;;  %v6177_v21 = vadd.f32 %v12817_v54, %v5630_v53  ;;  %v6212_v38 = vsel %vm711_vm0, %v6196_v46, 0.0  ;;  %v6199_v41 = vadd.f32 %v11131_v63, %v6183_v31  ;;  %12819 = vmatpush3.msra.mxu0 %v11139_v58  ;;  %v11136_v36 = vld [vmem:[%s17234_s11 + $0x20] sm:$0xff]  ;;  %v11156_v54 = vld [vmem:[%s17236_s13 + $0x70] sm:$0xff] }
0x1ab9   : > { %6213 = vadd.xlane.f32.xlu0 %v6212_v38  ;;  %v6161_v37 = vpop.f32.mrf.mxu1  ;;  %12820 = vmatprep.subr.mxu0 %v11138_v10  ;;  %v11154_v31 = vld [vmem:[%s17236_s13 + $0x60] sm:$0xff] }
0x1aba   : > { %v6176_v48 = vadd.f32 %v6161_v37, %v5629_v52  ;;  %v6198_v5 = vadd.f32 %v11131_v63, %v6182_v39  ;;  %v6185_v43 = vadd.f32 %v6177_v21, %v15171_v22  ;;  %v6221_v40 = vsel %vm711_vm0, %v6199_v41, 0.0  ;;  %12821 = vmatpush3.msra.mxu0 %v11138_v10 }
0x1abb   : > { %12822 = vmatprep.subr.mxu0 %v11137_v35 }
0x1abc   : > { %v6184_v19 = vadd.f32 %v6176_v48, %v15174_v32  ;;  %v6218_v8 = vsel %vm711_vm0, %v6198_v5, 0.0  ;;  %v6201_v23 = vadd.f32 %v11131_v63, %v6185_v43  ;;  %12823 = vmatpush3.msra.mxu0 %v11137_v35 }
0x1abd   : > { %6216 = vadd.xlane.f32.xlu0 %v6215_v51  ;;  %6219 = vadd.xlane.f32.xlu1 %v6218_v8 }
0x1abe   : > { %v6200_v14 = vadd.f32 %v11131_v63, %v6184_v19  ;;  %v6227_v28 = vsel %vm711_vm0, %v6201_v23, 0.0  ;;  %12824 = vmatprep.subr.mxu0 %v11136_v36 }
0x1abf   : > { %12825 = vmatpush3.msra.mxu0 %v11136_v36  ;;  %v11153_v36 = vld [vmem:[%s17236_s13 + $0x58] sm:$0xff] }
0x1ac0   : > { %v6224_v17 = vsel %vm711_vm0, %v6200_v14, 0.0 }
0x1ac1   : > { %6222 = vadd.xlane.f32.xlu0 %v6221_v40  ;;  %6225 = vadd.xlane.f32.xlu1 %v6224_v17 }
0x1ac5   : > { %6228 = vadd.xlane.f32.xlu0 %v6227_v28 }
0x1b3c   : > { %v6211_v13 = vpop.xlane.xlu1 %6210 }
0x1b3d   : > { %v6231_v22 = vmul.f32 0.03125, %v6211_v13 }
0x1b3e   : > { %v6208_v2 = vpop.xlane.xlu0 %6207 }
0x1b3f   : > { %v15938_v32 = vsub.f32 %v6195_v16, %v6231_v22  ;;  %v6230_v61 = vmul.f32 0.03125, %v6208_v2 }
0x1b41   : > { %v15940_v20 = vsub.f32 %v6194_v49, %v6230_v61  ;;  %v6247_v62 = vmul.f32 %v15938_v32, %v15938_v32 }
0x1b42   : > { %v6214_v9 = vpop.xlane.xlu0 %6213 }
0x1b43   : > { %v6232_v33 = vmul.f32 0.03125, %v6214_v9  ;;  %v6257_v26 = vsel %vm711_vm0, %v6247_v62, 0.0  ;;  %v6246_v18 = vmul.f32 %v15940_v20, %v15940_v20 }
0x1b44   : > { %6258 = vadd.xlane.f32.xlu0 %v6257_v26  ;;  %v11134_v26 = vld [vmem:[%s17238_s15 + $0x1] ss:$0 sm:$0xff] }
0x1b45   : > { %v15947_v56 = vsub.f32 %v6196_v46, %v6232_v33  ;;  %v6254_v53 = vsel %vm711_vm0, %v6246_v18, 0.0  ;;  %v11157_v46 = vld [vmem:[%s17236_s13 + $0x78] sm:$0xff] }
0x1b46   : > { %v6217_v0 = vpop.xlane.xlu0 %6216  ;;  %v6220_v52 = vpop.xlane.xlu1 %6219  ;;  %6255 = vadd.xlane.f32.xlu1 %v6254_v53  ;;  %12838 = vmatprep.subr.mxu1 %v11157_v46 }
0x1b47   : > { %v6233_v30 = vmul.f32 0.03125, %v6217_v0  ;;  %v6234_v27 = vmul.f32 0.03125, %v6220_v52  ;;  %v6248_v25 = vmul.f32 %v15947_v56, %v15947_v56  ;;  %12839 = vmatpush3.msra.mxu1 %v11157_v46  ;;  %v11151_v46 = vld [vmem:[%s17236_s13 + $0x48] sm:$0xff] }
0x1b48   : > { %12840 = vmatprep.subr.mxu1 %v11156_v54 }
0x1b49   : > { %v15952_v45 = vsub.f32 %v6197_v1, %v6233_v30  ;;  %v15954_v6 = vsub.f32 %v6198_v5, %v6234_v27  ;;  %v6260_v11 = vsel %vm711_vm0, %v6248_v25, 0.0  ;;  %v11155_v1 = vld [vmem:[%s17236_s13 + $0x68] sm:$0xff]  ;;  %12841 = vmatpush3.msra.mxu1 %v11156_v54  ;;  %v11135_v25 = vld [vmem:[%s17239_s16 + $0x1] ss:$0 sm:$0xff] }
0x1b4a   : > { %v6223_v60 = vpop.xlane.xlu0 %6222  ;;  %6261 = vadd.xlane.f32.xlu1 %v6260_v11  ;;  %v6226_v12 = vpop.xlane.xlu1 %6225  ;;  %12842 = vmatprep.subr.mxu1 %v11155_v1  ;;  %v11150_v54 = vld [vmem:[%s17236_s13 + $0x40] sm:$0xff] }
0x1b4b   : > { %v6235_v47 = vmul.f32 0.03125, %v6223_v60  ;;  %v6236_v44 = vmul.f32 0.03125, %v6226_v12  ;;  %v6249_v7 = vmul.f32 %v15952_v45, %v15952_v45  ;;  %v6250_v63 = vmul.f32 %v15954_v6, %v15954_v6  ;;  %12843 = vmatpush3.msra.mxu1 %v11155_v1  ;;  %v11141_v1 = vld [vmem:[%s17235_s12 + $0x1] ss:$0 sm:$0xff] }
0x1b4c   : > { %12844 = vmatprep.subr.mxu1 %v11154_v31 }
0x1b4d   : > { %v15961_v34 = vsub.f32 %v6199_v41, %v6235_v47  ;;  %v15963_v29 = vsub.f32 %v6200_v14, %v6236_v44  ;;  %v6263_v24 = vsel %vm711_vm0, %v6249_v7, 0.0  ;;  %v6266_v59 = vsel %vm711_vm0, %v6250_v63, 0.0  ;;  %12845 = vmatpush3.msra.mxu1 %v11154_v31 }
0x1b4e   : > { %6264 = vadd.xlane.f32.xlu0 %v6263_v24  ;;  %v6229_v42 = vpop.xlane.xlu0 %6228  ;;  %6267 = vadd.xlane.f32.xlu1 %v6266_v59 }
0x1b4f   : > { %v6237_v16 = vmul.f32 0.03125, %v6229_v42  ;;  %v6251_v3 = vmul.f32 %v15961_v34, %v15961_v34  ;;  %v6252_v50 = vmul.f32 %v15963_v29, %v15963_v29  ;;  %12846 = vmatprep.subr.mxu1 %v11153_v36 }
0x1b50   : > { %12847 = vmatpush3.msra.mxu1 %v11153_v36 }
0x1b51   : > { %v15971_v4 = vsub.f32 %v6201_v23, %v6237_v16  ;;  %v6269_v49 = vsel %vm711_vm0, %v6251_v3, 0.0  ;;  %v6272_v15 = vsel %vm711_vm0, %v6252_v50, 0.0 }
0x1b52   : > { %6270 = vadd.xlane.f32.xlu0 %v6269_v49  ;;  %6273 = vadd.xlane.f32.xlu1 %v6272_v15 }
0x1b53   : > { %v6253_v55 = vmul.f32 %v15971_v4, %v15971_v4 }
0x1b55   : > { %v6275_v57 = vsel %vm711_vm0, %v6253_v55, 0.0 }
0x1b56   : > { %6276 = vadd.xlane.f32.xlu0 %v6275_v57 }
0x1bcd   : > { %v6259_v39 = vpop.xlane.xlu0 %6258 }
0x1bce   : > { %v6279_v21 = vmul.f32 0.03125, %v6259_v39 }
0x1bcf   : > { %v6256_v38 = vpop.xlane.xlu1 %6255 }
0x1bd0   : > { %v6287_v37 = vadd.f32 1e-05, %v6279_v21  ;;  %v6278_v48 = vmul.f32 0.03125, %v6256_v38 }
0x1bd2   : > { %13708 = vrsqrt.f32 %v6287_v37  ;;  %v6286_v5 = vadd.f32 1e-05, %v6278_v48 }
0x1bd3   : > { %v6262_v51 = vpop.xlane.xlu1 %6261 }
0x1bd4   : > { %13710 = vrsqrt.f32 %v6286_v5  ;;  %v6280_v43 = vmul.f32 0.03125, %v6262_v51 }
0x1bd6   : > { %v6288_v19 = vadd.f32 1e-05, %v6280_v43 }
0x1bd7   : > { %v6265_v8 = vpop.xlane.xlu0 %6264  ;;  %v6268_v41 = vpop.xlane.xlu1 %6267 }
0x1bd8   : > { %13712 = vrsqrt.f32 %v6288_v19  ;;  %v6281_v14 = vmul.f32 0.03125, %v6265_v8  ;;  %v6282_v40 = vmul.f32 0.03125, %v6268_v41 }
0x1bda   : > { %v6289_v17 = vadd.f32 1e-05, %v6281_v14  ;;  %v6290_v23 = vadd.f32 1e-05, %v6282_v40 }
0x1bdb   : > { %v6271_v28 = vpop.xlane.xlu0 %6270  ;;  %v6274_v13 = vpop.xlane.xlu1 %6273 }
0x1bdc   : > { %13714 = vrsqrt.f32 %v6289_v17  ;;  %v6283_v22 = vmul.f32 0.03125, %v6271_v28  ;;  %v6284_v2 = vmul.f32 0.03125, %v6274_v13 }
0x1bdd   : > { %13716 = vrsqrt.f32 %v6290_v23 }
0x1bde   : > { %v6291_v61 = vadd.f32 1e-05, %v6283_v22  ;;  %v6292_v62 = vadd.f32 1e-05, %v6284_v2 }
0x1bdf   : > { %v13709_v9 = vpop.eup %13708  ;;  %v6277_v33 = vpop.xlane.xlu0 %6276 }
0x1be0   : > { %v6303_v18 = vmul.f32 %v13709_v9, %v15938_v32  ;;  %13718 = vrsqrt.f32 %v6291_v61  ;;  %v6285_v53 = vmul.f32 0.03125, %v6277_v33 }
0x1be1   : > { %v13711_v0 = vpop.eup %13710  ;;  %13720 = vrsqrt.f32 %v6292_v62 }
0x1be2   : > { %v6293_v52 = vadd.f32 1e-05, %v6285_v53  ;;  %v6302_v30 = vmul.f32 %v13711_v0, %v15940_v20  ;;  %v6317_v27 = vmul.f32 %v11134_v26, %v6303_v18  ;;  %v11159_v18 = vld [vmem:[%s17237_s14 + $0x1] ss:$0 sm:$0xff] }
0x1be4   : > { %13722 = vrsqrt.f32 %v6293_v52  ;;  %v6316_v11 = vmul.f32 %v11134_v26, %v6302_v30  ;;  %v16013_v32 = vadd.f32 %v11135_v25, %v6317_v27 }
0x1be5   : > { %v13713_v60 = vpop.eup %13712 }
0x1be6   : > { %v16010_v12 = vadd.f32 %v11135_v25, %v6316_v11  ;;  %v6304_v47 = vmul.f32 %v13713_v60, %v15947_v56 }
0x1be8   : > { %12826 = vmatprep.mubr.msk.f32.mxu0 %vm711_vm0, %v16010_v12  ;;  %v6318_v44 = vmul.f32 %v11134_v26, %v6304_v47 }
0x1be9   : > { %v13715_v7 = vpop.eup %13714  ;;  %12827 = vmatmul.mubr.msk.f32.vlgmr.msra.gmra.mxu0 %vm711_vm0, %v16013_v32 }
0x1bea   : > { %v13717_v20 = vpop.eup %13716  ;;  %v16019_v63 = vadd.f32 %v11135_v25, %v6318_v44  ;;  %v6305_v24 = vmul.f32 %v13715_v7, %v15952_v45 }
0x1beb   : > { %v6306_v59 = vmul.f32 %v13717_v20, %v15954_v6 }
0x1bec   : > { %12829 = vmatprep.mubr.msk.f32.mxu0 %vm711_vm0, %v16019_v63  ;;  %v6319_v56 = vmul.f32 %v11134_v26, %v6305_v24 }
0x1bed   : > { %v13719_v42 = vpop.eup %13718  ;;  %v6320_v16 = vmul.f32 %v11134_v26, %v6306_v59 }
0x1bee   : > { %v13721_v3 = vpop.eup %13720  ;;  %v16025_v50 = vadd.f32 %v11135_v25, %v6319_v56  ;;  %v6307_v49 = vmul.f32 %v13719_v42, %v15961_v34 }
0x1bef   : > { %v16028_v15 = vadd.f32 %v11135_v25, %v6320_v16  ;;  %v6308_v55 = vmul.f32 %v13721_v3, %v15963_v29 }
0x1bf0   : > { %12830 = vmatmul.mubr.msk.f32.gmra.mxu0 %vm711_vm0, %v16025_v50  ;;  %v6321_v45 = vmul.f32 %v11134_v26, %v6307_v49 }
0x1bf1   : > { %v13723_v6 = vpop.eup %13722  ;;  %12832 = vmatprep.mubr.msk.f32.mxu0 %vm711_vm0, %v16028_v15  ;;  %v6322_v57 = vmul.f32 %v11134_v26, %v6308_v55 }
0x1bf2   : > { %v16035_v58 = vadd.f32 %v11135_v25, %v6321_v45  ;;  %v6309_v10 = vmul.f32 %v13723_v6, %v15971_v4  ;;  %v11152_v4 = vld [vmem:[%s17236_s13 + $0x50] sm:$0xff] }
0x1bf3   : > { %v16038_v35 = vadd.f32 %v11135_v25, %v6322_v57  ;;  %12848 = vmatprep.subr.mxu1 %v11152_v4 }
0x1bf4   : > { %12833 = vmatmul.mubr.msk.f32.gmra.mxu0 %vm711_vm0, %v16035_v58  ;;  %v6323_v34 = vmul.f32 %v11134_v26, %v6309_v10  ;;  %12849 = vmatpush3.msra.mxu1 %v11152_v4  ;;  %v11175_v26 = vld [vmem:[%s17228_s5 + $0x58] sm:$0xff]  ;;  %v16110_v4 = vld [vmem:[%s17228_s5 + $0x40] sm:$0xff] }
0x1bf5   : > { %12835 = vmatprep.mubr.msk.f32.mxu0 %vm711_vm0, %v16038_v35  ;;  %12850 = vmatprep.subr.mxu1 %v11151_v46 }
0x1bf6   : > { %v16044_v29 = vadd.f32 %v11135_v25, %v6323_v34  ;;  %12851 = vmatpush3.msra.mxu1 %v11151_v46  ;;  %12866 = vmatprep.subr.mxu0 %v11175_v26 }
0x1bf7   : > { %12852 = vmatprep.subr.mxu1 %v11150_v54  ;;  %12867 = vmatpush3.msra.mxu0 %v11175_v26 }
0x1bf8   : > { %12836 = vmatmul.mubr.msk.f32.gmra.mxu0 %vm711_vm0, %v16044_v29  ;;  %12853 = vmatpush3.msra.mxu1 %v11150_v54 }
0x1ca9   : > { %v12828_v31 = vpop.f32.mrf.mxu0 }
0x1caa   : > { %v6447_v39 = vadd.f32 %v12828_v31, %v11141_v1 }
0x1cab   : > { %v6441_v21 = vpop.f32.mrf.mxu0 }
0x1cac   : > { %v6442_v38 = vadd.f32 %v11141_v1, %v6441_v21  ;;  %v6481_v48 = vmax.f32 %v6447_v39, 0.0 }
0x1cae   : > { %v6480_v37 = vmax.f32 %v6442_v38, 0.0 }
0x1cb0   : > { %v12831_v5 = vpop.f32.mrf.mxu0  ;;  %12854 = vmatprep.mubr.msk.f32.mxu1 %vm1153_vm2, %v6480_v37 }
0x1cb1   : > { %12855 = vmatmul.mubr.msk.f32.vlgmr.msra.gmra.mxu1 %vm1153_vm2, %v6481_v48  ;;  %v6457_v51 = vadd.f32 %v12831_v5, %v11141_v1 }
0x1cb2   : > { %v6451_v43 = vpop.f32.mrf.mxu0 }
0x1cb3   : > { %v6452_v19 = vadd.f32 %v11141_v1, %v6451_v43  ;;  %v6483_v14 = vmax.f32 %v6457_v51, 0.0 }
0x1cb4   : > { %v12834_v8 = vpop.f32.mrf.mxu0 }
0x1cb5   : > { %v6482_v41 = vmax.f32 %v6452_v19, 0.0  ;;  %v6467_v40 = vadd.f32 %v12834_v8, %v11141_v1 }
0x1cb6   : > { %v6461_v17 = vpop.f32.mrf.mxu0 }
0x1cb7   : > { %v6462_v23 = vadd.f32 %v11141_v1, %v6461_v17  ;;  %12857 = vmatprep.mubr.msk.f32.mxu1 %vm1153_vm2, %v6482_v41  ;;  %v6485_v22 = vmax.f32 %v6467_v40, 0.0 }
0x1cb8   : > { %v12837_v28 = vpop.f32.mrf.mxu0  ;;  %12858 = vmatmul.mubr.msk.f32.gmra.mxu1 %vm1153_vm2, %v6483_v14 }
0x1cb9   : > { %v6484_v13 = vmax.f32 %v6462_v23, 0.0  ;;  %v6477_v2 = vadd.f32 %v12837_v28, %v11141_v1 }
0x1cba   : > { %v6471_v61 = vpop.f32.mrf.mxu0 }
0x1cbb   : > { %v6472_v62 = vadd.f32 %v11141_v1, %v6471_v61  ;;  %12860 = vmatprep.mubr.msk.f32.mxu1 %vm1153_vm2, %v6484_v13  ;;  %v6487_v33 = vmax.f32 %v6477_v2, 0.0 }
0x1cbc   : > { %12861 = vmatmul.mubr.msk.f32.gmra.mxu1 %vm1153_vm2, %v6485_v22 }
0x1cbd   : > { %v6486_v9 = vmax.f32 %v6472_v62, 0.0 }
0x1cbf   : > { %12863 = vmatprep.mubr.msk.f32.mxu1 %vm1153_vm2, %v6486_v9 }
0x1cc0   : > { %12864 = vmatmul.mubr.msk.f32.gmra.mxu1 %vm1153_vm2, %v6487_v33 }
0x1d71   : > { %v12856_v53 = vpop.f32.mrf.mxu1 }
0x1d72   : > { %v6601_v0 = vadd.f32 %v12856_v53, %v11159_v18 }
0x1d73   : > { %v6595_v52 = vpop.f32.mrf.mxu1 }
0x1d74   : > { %v6635_v30 = vadd.f32 %v6601_v0, %v16013_v32  ;;  %v6596_v27 = vadd.f32 %v11159_v18, %v6595_v52 }
0x1d76   : > { %v6634_v25 = vadd.f32 %v6596_v27, %v16010_v12  ;;  %v6649_v11 = vsel %vm711_vm0, %v6635_v30, 0.0 }
0x1d77   : > { %6650 = vadd.xlane.f32.xlu0 %v6649_v11 }
0x1d78   : > { %v12859_v60 = vpop.f32.mrf.mxu1  ;;  %v6646_v47 = vsel %vm711_vm0, %v6634_v25, 0.0 }
0x1d79   : > { %v6611_v44 = vadd.f32 %v12859_v60, %v11159_v18  ;;  %6647 = vadd.xlane.f32.xlu1 %v6646_v47  ;;  %v6778_v47 = vld [vmem:[%s16153_s0] sm:$0xff] }
0x1d7a   : > { %v6605_v7 = vpop.f32.mrf.mxu1 }
0x1d7b   : > { %v6637_v20 = vadd.f32 %v6611_v44, %v16025_v50  ;;  %v6606_v24 = vadd.f32 %v11159_v18, %v6605_v7  ;;  %v6780_v44 = vld [vmem:[%s16158_s1] sm:$0xff]  ;;  %v6779_v7 = vld [vmem:[%s16153_s0 + $0x8] sm:$0xff] }
0x1d7c   : > { %v12862_v59 = vpop.f32.mrf.mxu1 }
0x1d7d   : > { %v6636_v56 = vadd.f32 %v6606_v24, %v16019_v63  ;;  %v6621_v42 = vadd.f32 %v12862_v59, %v11159_v18  ;;  %v6655_v32 = vsel %vm711_vm0, %v6637_v20, 0.0  ;;  %v6790_v24 = vadd.f32 %v6780_v44, %v6778_v47 }
0x1d7e   : > { %6656 = vadd.xlane.f32.xlu0 %v6655_v32  ;;  %v6615_v12 = vpop.f32.mrf.mxu1  ;;  %v11189_v32 = vld [vmem:[%s17230_s7 + $0x48] sm:$0xff] }
0x1d7f   : > { %v6639_v16 = vadd.f32 %v6621_v42, %v16035_v58  ;;  %v6616_v3 = vadd.f32 %v11159_v18, %v6615_v12  ;;  %v6652_v49 = vsel %vm711_vm0, %v6636_v56, 0.0  ;;  %12874 = vmatprep.mubr.msk.f32.mxu0 %vm711_vm0, %v6790_v24  ;;  %v11190_v42 = vld [vmem:[%s17230_s7 + $0x50] sm:$0xff]  ;;  %v11188_v12 = vld [vmem:[%s17230_s7 + $0x40] sm:$0xff] }
0x1d80   : > { %6653 = vadd.xlane.f32.xlu1 %v6652_v49  ;;  %v12865_v55 = vpop.f32.mrf.mxu1 }
0x1d81   : > { %v6638_v45 = vadd.f32 %v6616_v3, %v16028_v15  ;;  %v6631_v6 = vadd.f32 %v12865_v55, %v11159_v18  ;;  %v6661_v50 = vsel %vm711_vm0, %v6639_v16, 0.0 }
0x1d82   : > { %6662 = vadd.xlane.f32.xlu0 %v6661_v50  ;;  %v6625_v57 = vpop.f32.mrf.mxu1 }
0x1d83   : > { %v6641_v63 = vadd.f32 %v6631_v6, %v16044_v29  ;;  %v6626_v10 = vadd.f32 %v11159_v18, %v6625_v57  ;;  %v6658_v34 = vsel %vm711_vm0, %v6638_v45, 0.0  ;;  %v16100_v29 = vld [vmem:[%s17228_s5 + $0x50] sm:$0xff] }
0x1d84   : > { %6659 = vadd.xlane.f32.xlu1 %v6658_v34  ;;  %12868 = vmatprep.subr.mxu0 %v16100_v29 }
0x1d85   : > { %v16091_v58 = vadd.f32 %v6626_v10, %v16038_v35  ;;  %v6667_v36 = vsel %vm711_vm0, %v6641_v63, 0.0  ;;  %v11173_v35 = vld [vmem:[%s17228_s5 + $0x48] sm:$0xff]  ;;  %12869 = vmatpush3.msra.mxu0 %v16100_v29 }
0x1d86   : > { %6668 = vadd.xlane.f32.xlu0 %v6667_v36  ;;  %12870 = vmatprep.subr.mxu0 %v11173_v35 }
0x1d87   : > { %v6664_v15 = vsel %vm711_vm0, %v16091_v58, 0.0  ;;  %12871 = vmatpush3.msra.mxu0 %v11173_v35 }
0x1d88   : > { %6665 = vadd.xlane.f32.xlu1 %v6664_v15  ;;  %12872 = vmatprep.subr.mxu0 %v16110_v4 }
0x1d89   : > { %12873 = vmatpush3.msra.mxu0 %v16110_v4 }
0x1d99   : > { %6896 = vrot.lane.b32.xlu1 %v11175_v26, %s17288_s21 }
0x1e00   : > { %v6651_v46 = vpop.xlane.xlu0 %6650 }
0x1e01   : > { %v6671_v54 = vmul.f32 0.03125, %v6651_v46 }
0x1e02   : > { %v6648_v1 = vpop.xlane.xlu1 %6647 }
0x1e03   : > { %v16114_v31 = vsub.f32 %v6635_v30, %v6671_v54  ;;  %v6670_v39 = vmul.f32 0.03125, %v6648_v1 }
0x1e05   : > { %v16116_v21 = vsub.f32 %v6634_v25, %v6670_v39  ;;  %v6687_v38 = vmul.f32 %v16114_v31, %v16114_v31 }
0x1e07   : > { %v6657_v37 = vpop.xlane.xlu0 %6656  ;;  %v6697_v48 = vsel %vm711_vm0, %v6687_v38, 0.0  ;;  %v6686_v5 = vmul.f32 %v16116_v21, %v16116_v21 }
0x1e08   : > { %v6673_v51 = vmul.f32 0.03125, %v6657_v37  ;;  %6698 = vadd.xlane.f32.xlu0 %v6697_v48 }
0x1e09   : > { %v6654_v43 = vpop.xlane.xlu1 %6653  ;;  %v6694_v19 = vsel %vm711_vm0, %v6686_v5, 0.0 }
0x1e0a   : > { %v16124_v8 = vsub.f32 %v6637_v20, %v6673_v51  ;;  %v6672_v41 = vmul.f32 0.03125, %v6654_v43  ;;  %6695 = vadd.xlane.f32.xlu1 %v6694_v19  ;;  %v6781_v20 = vld [vmem:[%s16158_s1 + $0x8] sm:$0xff]  ;;  %v16199_v51 = vld [vmem:[%s17240_s17 + $0x1] ss:$0 sm:$0xff] }
0x1e0b   : > { %v6663_v14 = vpop.xlane.xlu0 %6662  ;;  %v6791_v59 = vadd.f32 %v6781_v20, %v6779_v7 }
0x1e0c   : > { %v16126_v40 = vsub.f32 %v6636_v56, %v6672_v41  ;;  %v6675_v17 = vmul.f32 0.03125, %v6663_v14  ;;  %v6689_v23 = vmul.f32 %v16124_v8, %v16124_v8  ;;  %v11191_v56 = vld [vmem:[%s17230_s7 + $0x58] sm:$0xff] }
0x1e0d   : > { %v6660_v28 = vpop.xlane.xlu1 %6659  ;;  %12897 = vmatprep.subr.mxu0 %v11191_v56  ;;  %12875 = vmatmul.mubr.msk.f32.vlgmr.msra.gmra.mxu0 %vm711_vm0, %v6791_v59 }
0x1e0e   : > { %v16130_v13 = vsub.f32 %v6639_v16, %v6675_v17  ;;  %v6674_v22 = vmul.f32 0.03125, %v6660_v28  ;;  %v6703_v2 = vsel %vm711_vm0, %v6689_v23, 0.0  ;;  %v6688_v61 = vmul.f32 %v16126_v40, %v16126_v40  ;;  %12898 = vmatpush3.msra.mxu0 %v11191_v56  ;;  %v11171_v28 = vld [vmem:[%s17241_s18 + $0x1] ss:$0 sm:$0xff] }
0x1e0f   : > { %6704 = vadd.xlane.f32.xlu0 %v6703_v2  ;;  %v6669_v62 = vpop.xlane.xlu0 %6668  ;;  %12899 = vmatprep.subr.mxu0 %v11190_v42 }
0x1e10   : > { %v16135_v9 = vsub.f32 %v6638_v45, %v6674_v22  ;;  %v6677_v33 = vmul.f32 0.03125, %v6669_v62  ;;  %v6700_v26 = vsel %vm711_vm0, %v6688_v61, 0.0  ;;  %v6691_v18 = vmul.f32 %v16130_v13, %v16130_v13  ;;  %12900 = vmatpush3.msra.mxu0 %v11190_v42  ;;  %v16192_v45 = vld [vmem:[%s17229_s6 + $0x2] ss:$0 sm:$0xff]  ;;  %v13840_v42 = vld [vmem:[%s14107_s29 + $0x8] sm:$0xff] }
0x1e11   : > { %6701 = vadd.xlane.f32.xlu1 %v6700_v26  ;;  %v6666_v53 = vpop.xlane.xlu1 %6665  ;;  %12901 = vmatprep.subr.mxu0 %v11189_v32 }
0x1e12   : > { %v16140_v0 = vsub.f32 %v6641_v63, %v6677_v33  ;;  %v6709_v52 = vsel %vm711_vm0, %v6691_v18, 0.0  ;;  %v6690_v30 = vmul.f32 %v16135_v9, %v16135_v9  ;;  %12902 = vmatpush3.msra.mxu0 %v11189_v32  ;;  %v6676_v16 = vmul.f32 0.03125, %v6666_v53 }
0x1e13   : > { %6710 = vadd.xlane.f32.xlu0 %v6709_v52  ;;  %12903 = vmatprep.subr.mxu0 %v11188_v12 }
0x1e14   : > { %v6706_v27 = vsel %vm711_vm0, %v6690_v30, 0.0  ;;  %v6693_v25 = vmul.f32 %v16140_v0, %v16140_v0  ;;  %12904 = vmatpush3.msra.mxu0 %v11188_v12  ;;  %v16182_v3 = vsub.f32 %v16091_v58, %v6676_v16  ;;  %v13841_v12 = vld [vmem:[%s14107_s29 + $0x10] sm:$0xff] }
0x1e15   : > { %6707 = vadd.xlane.f32.xlu1 %v6706_v27  ;;  %v6897_v11 = vpop.permute.xlu1 %6896 }
0x1e16   : > { %v6715_v60 = vsel %vm711_vm0, %v6693_v25, 0.0  ;;  %12877 = vmatprep.subr.mxu1 %v6897_v11  ;;  %v6692_v49 = vmul.f32 %v16182_v3, %v16182_v3 }
0x1e17   : > { %6716 = vadd.xlane.f32.xlu0 %v6715_v60  ;;  %12878 = vmatpush3.msra.mxu1 %v6897_v11 }
0x1e18   : > { %v6712_v55 = vsel %vm711_vm0, %v6692_v49, 0.0  ;;  %v13842_v49 = vld [vmem:[%s14107_s29 + $0x18] sm:$0xff] }
0x1e26   : > { %6892 = vrot.lane.b32.xlu1 %v11173_v35, %s17288_s21 }
0x1e2d   : > { %6894 = vrot.lane.b32.xlu0 %v16100_v29, %s17288_s21 }
0x1e31   : > { %6902 = vrot.lane.b32.xlu0 %v16192_v45, %s17288_s21 }
0x1e4a   : > { %6713 = vadd.xlane.f32.xlu1 %v6712_v55 }
0x1e5b   : > { %6890 = vrot.lane.b32.xlu1 %v16110_v4, %s17288_s21 }
0x1e91   : > { %v6699_v6 = vpop.xlane.xlu0 %6698 }
0x1e92   : > { %v6719_v50 = vmul.f32 0.03125, %v6699_v6  ;;  %v13843_v6 = vld [vmem:[%s14107_s29 + $0x20] sm:$0xff] }
0x1e93   : > { %v6696_v57 = vpop.xlane.xlu1 %6695 }
0x1e94   : > { %v6727_v63 = vadd.f32 1e-05, %v6719_v50  ;;  %v6718_v10 = vmul.f32 0.03125, %v6696_v57 }
0x1e96   : > { %13724 = vrsqrt.f32 %v6727_v63  ;;  %v6726_v34 = vadd.f32 1e-05, %v6718_v10  ;;  %v13844_v63 = vld [vmem:[%s14107_s29 + $0x28] sm:$0xff] }
0x1e98   : > { %13726 = vrsqrt.f32 %v6726_v34  ;;  %v6705_v58 = vpop.xlane.xlu0 %6704 }
0x1e99   : > { %v6721_v36 = vmul.f32 0.03125, %v6705_v58 }
0x1e9a   : > { %v6702_v15 = vpop.xlane.xlu1 %6701 }
0x1e9b   : > { %v6729_v29 = vadd.f32 1e-05, %v6721_v36  ;;  %v6720_v35 = vmul.f32 0.03125, %v6702_v15 }
0x1e9c   : > { %v6711_v4 = vpop.xlane.xlu0 %6710 }
0x1e9d   : > { %13728 = vrsqrt.f32 %v6729_v29  ;;  %v6728_v46 = vadd.f32 1e-05, %v6720_v35  ;;  %v6723_v54 = vmul.f32 0.03125, %v6711_v4 }
0x1e9e   : > { %v6708_v1 = vpop.xlane.xlu1 %6707 }
0x1e9f   : > { %13730 = vrsqrt.f32 %v6728_v46  ;;  %v6731_v39 = vadd.f32 1e-05, %v6723_v54  ;;  %v6722_v38 = vmul.f32 0.03125, %v6708_v1 }
0x1ea0   : > { %v6717_v37 = vpop.xlane.xlu0 %6716 }
0x1ea1   : > { %13732 = vrsqrt.f32 %v6731_v39  ;;  %v6730_v48 = vadd.f32 1e-05, %v6722_v38 }
0x1ea2   : > { %v6893_v14 = vpop.permute.xlu1 %6892 }
0x1ea3   : > { %v13725_v5 = vpop.eup %13724  ;;  %13734 = vrsqrt.f32 %v6730_v48 }
0x1ea4   : > { %v6743_v43 = vmul.f32 %v13725_v5, %v16114_v31  ;;  %v6895_v19 = vpop.permute.xlu0 %6894 }
0x1ea5   : > { %v13727_v41 = vpop.eup %13726  ;;  %12879 = vmatprep.subr.mxu1 %v6895_v19 }
0x1ea6   : > { %12880 = vmatpush3.msra.mxu1 %v6895_v19  ;;  %v6742_v17 = vmul.f32 %v13727_v41, %v16116_v21  ;;  %v6757_v23 = vmul.f32 %v16199_v51, %v6743_v43  ;;  %v13839_v21 = vld [vmem:[%s14107_s29] sm:$0xff] }
0x1ea7   : > { %12881 = vmatprep.subr.mxu1 %v6893_v14 }
0x1ea8   : > { %12882 = vmatpush3.msra.mxu1 %v6893_v14  ;;  %v6756_v22 = vmul.f32 %v16199_v51, %v6742_v17  ;;  %v16210_v61 = vadd.f32 %v11171_v28, %v6757_v23 }
0x1eaa   : > { %v13729_v2 = vpop.eup %13728  ;;  %v16208_v31 = vadd.f32 %v11171_v28, %v6756_v22  ;;  %v16248_v32 = vadd.f32 %v13840_v42, %v16210_v61  ;;  %v11193_v22 = vld [vmem:[%s17231_s8 + $0x2] ss:$0 sm:$0xff] }
0x1eab   : > { %v6745_v62 = vmul.f32 %v13729_v2, %v16124_v8 }
0x1eac   : > { %v13731_v33 = vpop.eup %13730  ;;  %12905 = vmatprep.mubr.msk.f32.mxu0 %vm711_vm0, %v16208_v31  ;;  %v16217_v26 = vadd.f32 %v13839_v21, %v16208_v31 }
0x1ead   : > { %12906 = vmatmul.mubr.msk.f32.vlgmr.msra.gmra.mxu0 %vm711_vm0, %v16210_v61  ;;  %v6744_v18 = vmul.f32 %v13731_v33, %v16126_v40  ;;  %v6759_v52 = vmul.f32 %v16199_v51, %v6745_v62  ;;  %v6903_v33 = vpop.permute.xlu0 %6902 }
0x1eae   : > { %v13733_v53 = vpop.eup %13732  ;;  %12885 = vmatprep.mubr.msk.f32.mxu1 %vm711_vm0, %v16217_v26 }
0x1eaf   : > { %v6758_v8 = vmul.f32 %v16199_v51, %v6744_v18  ;;  %v6747_v30 = vmul.f32 %v13733_v53, %v16130_v13  ;;  %v16230_v60 = vadd.f32 %v11171_v28, %v6759_v52 }
0x1eb0   : > { %v13735_v27 = vpop.eup %13734 }
0x1eb1   : > { %v16227_v25 = vadd.f32 %v11171_v28, %v6758_v8  ;;  %v6746_v11 = vmul.f32 %v13735_v27, %v16135_v9  ;;  %v6761_v40 = vmul.f32 %v16199_v51, %v6747_v30  ;;  %v6725_v9 = vmul.f32 0.03125, %v6717_v37 }
0x1eb2   : > { %v16260_v55 = vadd.f32 %v13842_v49, %v16230_v60 }
0x1eb3   : > { %12908 = vmatprep.mubr.msk.f32.mxu0 %vm711_vm0, %v16227_v25  ;;  %v6760_v47 = vmul.f32 %v16199_v51, %v6746_v11  ;;  %v16240_v13 = vadd.f32 %v11171_v28, %v6761_v40  ;;  %v6733_v7 = vadd.f32 1e-05, %v6725_v9  ;;  %v16252_v16 = vadd.f32 %v13841_v12, %v16227_v25 }
0x1eb4   : > { %12909 = vmatmul.mubr.msk.f32.gmra.mxu0 %vm711_vm0, %v16230_v60 }
0x1eb5   : > { %v16238_v44 = vadd.f32 %v11171_v28, %v6760_v47  ;;  %13736 = vrsqrt.f32 %v6733_v7  ;;  %v16272_v10 = vadd.f32 %v13844_v63, %v16240_v13  ;;  %v16397_v63 = vld [vmem:[%s14262_s22] ss:$0 sm:$0xff] }
0x1eb7   : > { %12911 = vmatprep.mubr.msk.f32.mxu0 %vm711_vm0, %v16238_v44  ;;  %v16264_v50 = vadd.f32 %v13843_v6, %v16238_v44 }
0x1eb8   : > { %12912 = vmatmul.mubr.msk.f32.gmra.mxu0 %vm711_vm0, %v16240_v13 }
0x1ec2   : > { %v13737_v57 = vpop.eup %13736 }
0x1ec3   : > { %v6749_v34 = vmul.f32 %v13737_v57, %v16140_v0  ;;  %v13845_v0 = vld [vmem:[%s14107_s29 + $0x30] sm:$0xff] }
0x1ec5   : > { %v6763_v36 = vmul.f32 %v16199_v51, %v6749_v34 }
0x1ec7   : > { %v16282_v4 = vadd.f32 %v11171_v28, %v6763_v36 }
0x1ecd   : > { %v16279_v29 = vpop.f32.mrf.mxu0 }
0x1ece   : > { %v16392_v6 = vadd.f32 %v16279_v29, %v16192_v45 }
0x1ecf   : > { %v6877_v54 = vpop.f32.mrf.mxu0 }
0x1ed0   : > { %v16293_v39 = vadd.f32 %v16192_v45, %v6877_v54 }
0x1ed3   : > { %v6714_v20 = vpop.xlane.xlu1 %6713 }
0x1ed4   : > { %v6724_v24 = vmul.f32 0.03125, %v6714_v20 }
0x1ed6   : > { %v6732_v59 = vadd.f32 1e-05, %v6724_v24 }
0x1ed7   : > { %v6891_v56 = vpop.permute.xlu1 %6890 }
0x1ed8   : > { %13738 = vrsqrt.f32 %v6732_v59  ;;  %12883 = vmatprep.subr.mxu1 %v6891_v56 }
0x1ed9   : > { %12884 = vmatpush3.msra.mxu1 %v6891_v56 }
0x1eda   : > { %12886 = vmatmul.mubr.msk.f32.vlgmr.msra.gmra.mxu1 %vm711_vm0, %v16248_v32 }
0x1edb   : > { %12888 = vmatprep.mubr.msk.f32.mxu1 %vm711_vm0, %v16252_v16 }
0x1ede   : > { %12889 = vmatmul.mubr.msk.f32.gmra.mxu1 %vm711_vm0, %v16260_v55 }
0x1edf   : > { %12891 = vmatprep.mubr.msk.f32.mxu1 %vm711_vm0, %v16264_v50 }
0x1ee2   : > { %12892 = vmatmul.mubr.msk.f32.gmra.mxu1 %vm711_vm0, %v16272_v10 }
0x1ee5   : > { %v13739_v58 = vpop.eup %13738 }
0x1ee6   : > { %v6748_v15 = vmul.f32 %v13739_v58, %v16182_v3  ;;  %v13846_v3 = vld [vmem:[%s14107_s29 + $0x38] sm:$0xff] }
0x1ee7   : > { %v16299_v38 = vadd.f32 %v13846_v3, %v16282_v4 }
0x1ee8   : > { %v6762_v35 = vmul.f32 %v16199_v51, %v6748_v15 }
0x1eea   : > { %v16284_v46 = vadd.f32 %v11171_v28, %v6762_v35 }
0x1eec   : > { %12914 = vmatprep.mubr.msk.f32.mxu0 %vm711_vm0, %v16284_v46  ;;  %v16290_v1 = vadd.f32 %v13845_v0, %v16284_v46 }
0x1eed   : > { %12915 = vmatmul.mubr.msk.f32.gmra.mxu0 %vm711_vm0, %v16282_v4 }
0x1eee   : > { %12894 = vmatprep.mubr.msk.f32.mxu1 %vm711_vm0, %v16290_v1 }
0x1eef   : > { %12895 = vmatmul.mubr.msk.f32.gmra.mxu1 %vm711_vm0, %v16299_v38 }
0x1ef0   : > { %12933 = vmatprep.mubr.msk.f32.mxu1 %vm1015_vm1, %v16293_v39 }
0x1f6d   : > { %v12907_v37 = vpop.f32.mrf.mxu0 }
0x1f6e   : > { %v16348_v20 = vadd.f32 %v12907_v37, %v11193_v22 }
0x1f6f   : > { %v7137_v5 = vpop.f32.mrf.mxu0 }
0x1f70   : > { %v16356_v59 = vadd.f32 %v11193_v22, %v7137_v5 }
0x1f74   : > { %v12910_v43 = vpop.f32.mrf.mxu0 }
0x1f75   : > { %v16334_v47 = vadd.f32 %v12910_v43, %v11193_v22 }
0x1f76   : > { %v7147_v41 = vpop.f32.mrf.mxu0 }
0x1f77   : > { %v16342_v7 = vadd.f32 %v11193_v22, %v7147_v41 }
0x1f78   : > { %v12913_v17 = vpop.f32.mrf.mxu0 }
0x1f79   : > { %v16318_v27 = vadd.f32 %v12913_v17, %v11193_v22 }
0x1f7a   : > { %v7157_v28 = vpop.f32.mrf.mxu0 }
0x1f7b   : > { %v16328_v40 = vadd.f32 %v11193_v22, %v7157_v28 }
0x1f9a   : > { %v12887_v48 = vpop.f32.mrf.mxu1 }
0x1f9b   : > { %v16376_v12 = vadd.f32 %v12887_v48, %v6903_v33 }
0x1f9c   : > { %v6995_v51 = vpop.f32.mrf.mxu1 }
0x1f9d   : > { %v16382_v49 = vadd.f32 %v6995_v51, %v6903_v33 }
0x1f9e   : > { %v12890_v19 = vpop.f32.mrf.mxu1 }
0x1f9f   : > { %v16362_v56 = vadd.f32 %v12890_v19, %v6903_v33 }
0x1fa0   : > { %v7005_v14 = vpop.f32.mrf.mxu1 }
0x1fa1   : > { %v16370_v42 = vadd.f32 %v7005_v14, %v6903_v33 }
0x1fa2   : > { %v12893_v23 = vpop.f32.mrf.mxu1 }
0x1fa3   : > { %v16336_v9 = vadd.f32 %v12893_v23, %v6903_v33 }
0x1fa4   : > { %v7015_v2 = vpop.f32.mrf.mxu1 }
0x1fa5   : > { %v16350_v24 = vadd.f32 %v7015_v2, %v6903_v33 }
0x1fad   : > { %v12916_v62 = vpop.f32.mrf.mxu0 }
0x1fae   : > { %v16310_v21 = vadd.f32 %v12916_v62, %v11193_v22 }
0x1faf   : > { %v12896_v18 = vpop.f32.mrf.mxu1  ;;  %v7167_v53 = vpop.f32.mrf.mxu0 }
0x1fb0   : > { %v16312_v52 = vadd.f32 %v12896_v18, %v6903_v33  ;;  %v16314_v8 = vadd.f32 %v11193_v22, %v7167_v53  ;;  %12936 = vmatprep.subr.mxu0 %v16310_v21 }
0x1fb1   : > { %v7025_v30 = vpop.f32.mrf.mxu1  ;;  %12937 = vmatpush3.msra.mxu0 %v16310_v21 }
0x1fb2   : > { %v16320_v11 = vadd.f32 %v7025_v30, %v6903_v33  ;;  %12917 = vmatprep.subr.msk.mxu1 %vm1015_vm1, %v16312_v52  ;;  %12938 = vmatprep.subr.mxu0 %v16314_v8 }
0x1fb3   : > { %12918 = vmatpush3.xpose.msk.msra.mxu1 %vm1015_vm1, %v16312_v52  ;;  %12939 = vmatpush3.msra.mxu0 %v16314_v8 }
0x1fb4   : > { %12919 = vmatprep.subr.msk.mxu1 %vm1015_vm1, %v16320_v11  ;;  %12940 = vmatprep.subr.mxu0 %v16318_v27 }
0x1fb5   : > { %12941 = vmatpush3.msra.mxu0 %v16318_v27 }
0x1fb6   : > { %12942 = vmatprep.subr.mxu0 %v16328_v40 }
0x1fb7   : > { %12920 = vmatpush3.xpose.msk.msra.mxu1 %vm1015_vm1, %v16320_v11  ;;  %12943 = vmatpush3.msra.mxu0 %v16328_v40 }
0x1fb8   : > { %12921 = vmatprep.subr.msk.mxu1 %vm1015_vm1, %v16336_v9  ;;  %12944 = vmatprep.subr.mxu0 %v16334_v47 }
0x1fb9   : > { %12945 = vmatpush3.msra.mxu0 %v16334_v47 }
0x1fba   : > { %12946 = vmatprep.subr.mxu0 %v16342_v7 }
0x1fbb   : > { %12922 = vmatpush3.xpose.msk.msra.mxu1 %vm1015_vm1, %v16336_v9  ;;  %12947 = vmatpush3.msra.mxu0 %v16342_v7 }
0x1fbc   : > { %12923 = vmatprep.subr.msk.mxu1 %vm1015_vm1, %v16350_v24  ;;  %12948 = vmatprep.subr.mxu0 %v16348_v20 }
0x1fbd   : > { %12949 = vmatpush3.msra.mxu0 %v16348_v20 }
0x1fbe   : > { %12950 = vmatprep.subr.mxu0 %v16356_v59 }
0x1fbf   : > { %12924 = vmatpush3.xpose.msk.msra.mxu1 %vm1015_vm1, %v16350_v24  ;;  %12951 = vmatpush3.msra.mxu0 %v16356_v59 }
0x1fc0   : > { %12925 = vmatprep.subr.msk.mxu1 %vm1015_vm1, %v16362_v56 }
0x1fc3   : > { %12926 = vmatpush3.xpose.msk.msra.mxu1 %vm1015_vm1, %v16362_v56 }
0x1fc4   : > { %12927 = vmatprep.subr.msk.mxu1 %vm1015_vm1, %v16370_v42 }
0x1fc7   : > { %12928 = vmatpush3.xpose.msk.msra.mxu1 %vm1015_vm1, %v16370_v42 }
0x1fc8   : > { %12929 = vmatprep.subr.msk.mxu1 %vm1015_vm1, %v16376_v12 }
0x1fcb   : > { %12930 = vmatpush3.xpose.msk.msra.mxu1 %vm1015_vm1, %v16376_v12 }
0x1fcc   : > { %12931 = vmatprep.subr.msk.mxu1 %vm1015_vm1, %v16382_v49 }
0x1fcf   : > { %12932 = vmatpush3.xpose.msk.msra.mxu1 %vm1015_vm1, %v16382_v49 }
0x1fd2   : > { %12934 = vmatmul.mubr.msk.f32.vlgmr.msra.gmra.mxu1 %vm1015_vm1, %v16392_v6 }
0x2092   : > { %v12935_v57 = vpop.f32.mrf.mxu1 }
0x2093   : > { %v7283_v34 = vadd.f32 %v16397_v63, %v12935_v57 }
0x2094   : > { %v7277_v58 = vpop.f32.mrf.mxu1 }
0x2095   : > { %v7278_v36 = vadd.f32 %v16397_v63, %v7277_v58  ;;  %v7289_v15 = vsel %vm1153_vm2, %v7283_v34, -inf }
0x2096   : > { %7290 = vmax.xlane.f32.xlu0 %v7289_v15 }
0x2097   : > { %v7286_v35 = vsel %vm1153_vm2, %v7278_v36, -inf }
0x2098   : > { %7287 = vmax.xlane.f32.xlu1 %v7286_v35 }
0x211f   : > { %v7291_v54 = vpop.xlane.xlu0 %7290 }
0x2120   : > { %v7293_v45 = vsub.f32 %v7283_v34, %v7291_v54 }
0x2121   : > { %v7288_v29 = vpop.xlane.xlu1 %7287 }
0x2122   : > { %v7296_v0 = vmul.f32 1.442695, %v7293_v45  ;;  %v7292_v3 = vsub.f32 %v7278_v36, %v7288_v29 }
0x2124   : > { %13740 = vpow2.f32 %v7296_v0  ;;  %v7294_v37 = vmul.f32 1.442695, %v7292_v3 }
0x2126   : > { %13742 = vpow2.f32 %v7294_v37 }
0x2131   : > { %v13741_v48 = vpop.eup %13740 }
0x2132   : > { %v7301_v5 = vsel %vm1153_vm2, %v13741_v48, 0.0 }
0x2133   : > { %v13743_v51 = vpop.eup %13742  ;;  %7302 = vadd.xlane.f32.xlu1 %v7301_v5 }
0x2134   : > { %v7298_v43 = vsel %vm1153_vm2, %v13743_v51, 0.0 }
0x2135   : > { %7299 = vadd.xlane.f32.xlu0 %v7298_v43 }
0x2144   : > { %7405 = vrot.lane.b32.xlu1 %v16320_v11, %s17290_s20 }
0x2148   : > { %7403 = vrot.lane.b32.xlu1 %v16336_v9, %s17290_s20 }
0x214b   : > { %7407 = vrot.lane.b32.xlu0 %v16312_v52, %s17290_s20 }
0x214c   : > { %7399 = vrot.lane.b32.xlu1 %v16362_v56, %s17290_s20 }
0x214f   : > { %7401 = vrot.lane.b32.xlu0 %v16350_v24, %s17290_s20 }
0x2150   : > { %7395 = vrot.lane.b32.xlu1 %v16376_v12, %s17290_s20 }
0x2153   : > { %7397 = vrot.lane.b32.xlu0 %v16370_v42, %s17290_s20 }
0x2154   : > { %7389 = vrot.lane.b32.xlu1 %v16293_v39, %s17290_s20 }
0x2157   : > { %7393 = vrot.lane.b32.xlu0 %v16382_v49, %s17290_s20 }
0x215b   : > { %7391 = vrot.lane.b32.xlu0 %v16392_v6, %s17290_s20 }
0x21bc   : > { %v7303_v19 = vpop.xlane.xlu1 %7302 }
0x21bd   : > { %13744 = vrcp.f32 %v7303_v19 }
0x21be   : > { %v7300_v41 = vpop.xlane.xlu0 %7299 }
0x21bf   : > { %13746 = vrcp.f32 %v7300_v41 }
0x21c0   : > { %v7406_v14 = vpop.permute.xlu1 %7405 }
0x21c2   : > { %v7408_v17 = vpop.permute.xlu0 %7407 }
0x21c3   : > { %12955 = vmatprep.subr.msk.mxu0 %vm1015_vm1, %v7408_v17 }
0x21c4   : > { %v7404_v23 = vpop.permute.xlu1 %7403 }
0x21c6   : > { %v7402_v30 = vpop.permute.xlu0 %7401 }
0x21c8   : > { %v7400_v28 = vpop.permute.xlu1 %7399 }
0x21ca   : > { %v13745_v22 = vpop.eup %13744  ;;  %v7398_v57 = vpop.permute.xlu0 %7397 }
0x21cb   : > { %v7307_v18 = vmul.f32 %v13745_v22, %v13741_v48 }
0x21cc   : > { %v13747_v2 = vpop.eup %13746  ;;  %v7396_v62 = vpop.permute.xlu1 %7395 }
0x21cd   : > { %v7306_v33 = vmul.f32 %v13747_v2, %v13743_v51 }
0x21ce   : > { %v7394_v34 = vpop.permute.xlu0 %7393 }
0x21cf   : > { %12952 = vmatprep.mubr.msk.f32.mxu0 %vm1153_vm2, %v7306_v33 }
0x21d0   : > { %12953 = vmatmul.mubr.msk.f32.vlgmr.msra.gmra.mxu0 %vm1153_vm2, %v7307_v18  ;;  %v7390_v53 = vpop.permute.xlu1 %7389 }
0x21d1   : > { %12956 = vmatpush3.xpose.msk.msra.mxu0 %vm1015_vm1, %v7408_v17  ;;  %12971 = vmatprep.mubr.msk.f32.mxu0 %vm1015_vm1, %v7390_v53  ;;  %v11203_v53 = vld [vmem:[%s17232_s9 + $0x48] sm:$0xff] }
0x21d2   : > { %12957 = vmatprep.subr.msk.mxu0 %vm1015_vm1, %v7406_v14  ;;  %v7392_v58 = vpop.permute.xlu0 %7391 }
0x21d5   : > { %12958 = vmatpush3.xpose.msk.msra.mxu0 %vm1015_vm1, %v7406_v14 }
0x21d6   : > { %12959 = vmatprep.subr.msk.mxu0 %vm1015_vm1, %v7404_v23 }
0x21d9   : > { %12960 = vmatpush3.xpose.msk.msra.mxu0 %vm1015_vm1, %v7404_v23 }
0x21da   : > { %12961 = vmatprep.subr.msk.mxu0 %vm1015_vm1, %v7402_v30 }
0x21dd   : > { %12962 = vmatpush3.xpose.msk.msra.mxu0 %vm1015_vm1, %v7402_v30 }
0x21de   : > { %12963 = vmatprep.subr.msk.mxu0 %vm1015_vm1, %v7400_v28 }
0x21e1   : > { %12964 = vmatpush3.xpose.msk.msra.mxu0 %vm1015_vm1, %v7400_v28 }
0x21e2   : > { %12965 = vmatprep.subr.msk.mxu0 %vm1015_vm1, %v7398_v57 }
0x21e5   : > { %12966 = vmatpush3.xpose.msk.msra.mxu0 %vm1015_vm1, %v7398_v57 }
0x21e6   : > { %12967 = vmatprep.subr.msk.mxu0 %vm1015_vm1, %v7396_v62 }
0x21e9   : > { %12968 = vmatpush3.xpose.msk.msra.mxu0 %vm1015_vm1, %v7396_v62 }
0x21ea   : > { %12969 = vmatprep.subr.msk.mxu0 %vm1015_vm1, %v7394_v34 }
0x21ed   : > { %12970 = vmatpush3.xpose.msk.msra.mxu0 %vm1015_vm1, %v7394_v34 }
0x21ee   : > { %12993 = vmatprep.subr.mxu0 %v11203_v53 }
0x21f0   : > { %12972 = vmatmul.mubr.msk.f32.vlgmr.msra.gmra.mxu0 %vm1015_vm1, %v7392_v58 }
0x21f1   : > { %12994 = vmatpush3.msra.mxu0 %v11203_v53 }
0x2290   : > { %v16445_v36 = vpop.f32.mrf.mxu0 }
0x2292   : > { %v16447_v15 = vpop.f32.mrf.mxu0 }
0x22b0   : > { %v12973_v35 = vpop.f32.mrf.mxu0 }
0x22b1   : > { %v7501_v54 = vadd.f32 %v16397_v63, %v12973_v35  ;;  %v11202_v35 = vld [vmem:[%s17232_s9 + $0x40] sm:$0xff] }
0x22b2   : > { %v7495_v45 = vpop.f32.mrf.mxu0 }
0x22b3   : > { %v7496_v29 = vadd.f32 %v16397_v63, %v7495_v45  ;;  %v7507_v0 = vsel %vm1153_vm2, %v7501_v54, -inf }
0x22b4   : > { %7508 = vmax.xlane.f32.xlu0 %v7507_v0 }
0x22b5   : > { %v7504_v3 = vsel %vm1153_vm2, %v7496_v29, -inf }
0x22b6   : > { %7505 = vmax.xlane.f32.xlu1 %v7504_v3 }
0x22c7   : > { %7546 = vrot.lane.b32.xlu1 %v16314_v8, %s17290_s20 }
0x22ca   : > { %7548 = vrot.lane.b32.xlu0 %v16310_v21, %s17290_s20 }
0x22cb   : > { %7544 = vrot.lane.b32.xlu1 %v16318_v27, %s17290_s20 }
0x22ce   : > { %7542 = vrot.lane.b32.xlu0 %v16328_v40, %s17290_s20 }
0x22cf   : > { %7540 = vrot.lane.b32.xlu1 %v16334_v47, %s17290_s20 }
0x22d2   : > { %7538 = vrot.lane.b32.xlu0 %v16342_v7, %s17290_s20 }
0x233d   : > { %v7509_v37 = vpop.xlane.xlu0 %7508 }
0x233e   : > { %v7511_v48 = vsub.f32 %v7501_v54, %v7509_v37 }
0x233f   : > { %v7506_v5 = vpop.xlane.xlu1 %7505 }
0x2340   : > { %v7514_v51 = vmul.f32 1.442695, %v7511_v48  ;;  %v7510_v43 = vsub.f32 %v7496_v29, %v7506_v5 }
0x2341   : > { %v7549_v19 = vpop.permute.xlu0 %7548 }
0x2342   : > { %13748 = vpow2.f32 %v7514_v51  ;;  %v7512_v41 = vmul.f32 1.442695, %v7510_v43  ;;  %12974 = vmatprep.subr.mxu1 %v7549_v19 }
0x2343   : > { %12975 = vmatpush3.msra.mxu1 %v7549_v19  ;;  %v7547_v14 = vpop.permute.xlu1 %7546 }
0x2344   : > { %13750 = vpow2.f32 %v7512_v41  ;;  %12976 = vmatprep.subr.mxu1 %v7547_v14 }
0x2345   : > { %12977 = vmatpush3.msra.mxu1 %v7547_v14  ;;  %v7543_v17 = vpop.permute.xlu0 %7542 }
0x2347   : > { %v7545_v23 = vpop.permute.xlu1 %7544 }
0x2348   : > { %12978 = vmatprep.subr.mxu1 %v7545_v23 }
0x2349   : > { %12979 = vmatpush3.msra.mxu1 %v7545_v23  ;;  %v7539_v22 = vpop.permute.xlu0 %7538 }
0x234a   : > { %12980 = vmatprep.subr.mxu1 %v7543_v17 }
0x234b   : > { %12981 = vmatpush3.msra.mxu1 %v7543_v17  ;;  %v7541_v28 = vpop.permute.xlu1 %7540 }
0x234c   : > { %12982 = vmatprep.subr.mxu1 %v7541_v28 }
0x234d   : > { %12983 = vmatpush3.msra.mxu1 %v7541_v28 }
0x234e   : > { %12984 = vmatprep.subr.mxu1 %v7539_v22 }
0x234f   : > { %v13749_v2 = vpop.eup %13748  ;;  %12985 = vmatpush3.msra.mxu1 %v7539_v22 }
0x2350   : > { %v7519_v62 = vsel %vm1153_vm2, %v13749_v2, 0.0 }
0x2351   : > { %v13751_v33 = vpop.eup %13750  ;;  %7520 = vadd.xlane.f32.xlu1 %v7519_v62 }
0x2352   : > { %v7516_v18 = vsel %vm1153_vm2, %v13751_v33, 0.0 }
0x2353   : > { %7517 = vadd.xlane.f32.xlu0 %v7516_v18 }
0x2362   : > { %7536 = vrot.lane.b32.xlu1 %v16348_v20, %s17290_s20 }
0x2366   : > { %7819 = vrot.lane.b32.xlu1 %v16312_v52, %s17292_s26 }
0x2369   : > { %7534 = vrot.lane.b32.xlu0 %v16356_v59, %s17290_s20 }
0x236a   : > { %7815 = vrot.lane.b32.xlu1 %v16336_v9, %s17292_s26 }
0x236d   : > { %7817 = vrot.lane.b32.xlu0 %v16320_v11, %s17292_s26 }
0x236e   : > { %7811 = vrot.lane.b32.xlu1 %v16362_v56, %s17292_s26 }
0x2371   : > { %7813 = vrot.lane.b32.xlu0 %v16350_v24, %s17292_s26 }
0x2372   : > { %7807 = vrot.lane.b32.xlu1 %v16376_v12, %s17292_s26 }
0x2375   : > { %7809 = vrot.lane.b32.xlu0 %v16370_v42, %s17292_s26 }
0x2376   : > { %7801 = vrot.lane.b32.xlu1 %v16293_v39, %s17292_s26 }
0x2379   : > { %7805 = vrot.lane.b32.xlu0 %v16382_v49, %s17292_s26 }
0x237d   : > { %7803 = vrot.lane.b32.xlu0 %v16392_v6, %s17292_s26 }
0x23da   : > { %v7521_v30 = vpop.xlane.xlu1 %7520 }
0x23db   : > { %13752 = vrcp.f32 %v7521_v30 }
0x23dc   : > { %v7518_v57 = vpop.xlane.xlu0 %7517 }
0x23dd   : > { %13754 = vrcp.f32 %v7518_v57 }
0x23de   : > { %v7537_v34 = vpop.permute.xlu1 %7536 }
0x23df   : > { %12986 = vmatprep.subr.mxu1 %v7537_v34 }
0x23e0   : > { %v7535_v58 = vpop.permute.xlu0 %7534  ;;  %12987 = vmatpush3.msra.mxu1 %v7537_v34 }
0x23e1   : > { %12988 = vmatprep.subr.mxu1 %v7535_v58 }
0x23e2   : > { %12989 = vmatpush3.msra.mxu1 %v7535_v58  ;;  %v7820_v54 = vpop.permute.xlu1 %7819 }
0x23e3   : > { %13003 = vmatprep.subr.msk.mxu0 %vm1015_vm1, %v7820_v54  ;;  %12998 = vmatprep.subr.mxu1 %v11202_v35 }
0x23e4   : > { %v7818_v41 = vpop.permute.xlu0 %7817 }
0x23e6   : > { %v7816_v37 = vpop.permute.xlu1 %7815 }
0x23e8   : > { %v13753_v45 = vpop.eup %13752 }
0x23e9   : > { %v7525_v3 = vmul.f32 %v13753_v45, %v13749_v2 }
0x23ea   : > { %v13755_v29 = vpop.eup %13754  ;;  %v7812_v48 = vpop.permute.xlu1 %7811 }
0x23eb   : > { %v7524_v0 = vmul.f32 %v13755_v29, %v13751_v33 }
0x23ed   : > { %12990 = vmatprep.mubr.msk.f32.mxu1 %vm1153_vm2, %v7524_v0 }
0x23ee   : > { %12991 = vmatmul.mubr.msk.f32.vlgmr.msra.gmra.mxu1 %vm1153_vm2, %v7525_v3  ;;  %v7808_v5 = vpop.permute.xlu1 %7807 }
0x23ef   : > { %13000 = vmatprep.mubr.msk.f32.mxu1 %vm1015_vm1, %v16447_v15  ;;  %12999 = vmatpush3.msra.mxu1 %v11202_v35 }
0x23f2   : > { %13001 = vmatmul.mubr.msk.f32.vlgmr.msra.gmra.mxu1 %vm1015_vm1, %v16445_v36  ;;  %v7802_v19 = vpop.permute.xlu1 %7801  ;;  %v7814_v36 = vpop.permute.xlu0 %7813 }
0x23f6   : > { %v7810_v15 = vpop.permute.xlu0 %7809 }
0x23fa   : > { %v7806_v14 = vpop.permute.xlu0 %7805 }
0x23fe   : > { %v7804_v17 = vpop.permute.xlu0 %7803 }
0x24ae   : > { %v12992_v51 = vpop.f32.mrf.mxu1 }
0x24b0   : > { %v7630_v43 = vpop.f32.mrf.mxu1 }
0x24b1   : > { %12995 = vmatprep.mubr.msk.f32.mxu0 %vm1015_vm1, %v7630_v43 }
0x24b2   : > { %12996 = vmatmul.mubr.msk.f32.vlgmr.msra.gmra.mxu0 %vm1015_vm1, %v12992_v51 }
0x24b3   : > { %13004 = vmatpush3.xpose.msk.msra.mxu0 %vm1015_vm1, %v7820_v54  ;;  %13019 = vmatprep.mubr.msk.f32.mxu0 %vm1015_vm1, %v7802_v19 }
0x24b4   : > { %13005 = vmatprep.subr.msk.mxu0 %vm1015_vm1, %v7818_v41 }
0x24b7   : > { %13006 = vmatpush3.xpose.msk.msra.mxu0 %vm1015_vm1, %v7818_v41 }
0x24b8   : > { %13007 = vmatprep.subr.msk.mxu0 %vm1015_vm1, %v7816_v37 }
0x24bb   : > { %13008 = vmatpush3.xpose.msk.msra.mxu0 %vm1015_vm1, %v7816_v37 }
0x24bc   : > { %13009 = vmatprep.subr.msk.mxu0 %vm1015_vm1, %v7814_v36 }
0x24bf   : > { %13010 = vmatpush3.xpose.msk.msra.mxu0 %vm1015_vm1, %v7814_v36 }
0x24c0   : > { %13011 = vmatprep.subr.msk.mxu0 %vm1015_vm1, %v7812_v48 }
0x24c3   : > { %13012 = vmatpush3.xpose.msk.msra.mxu0 %vm1015_vm1, %v7812_v48 }
0x24c4   : > { %13013 = vmatprep.subr.msk.mxu0 %vm1015_vm1, %v7810_v15 }
0x24c7   : > { %13014 = vmatpush3.xpose.msk.msra.mxu0 %vm1015_vm1, %v7810_v15  ;;  %v13002_v15 = vpop.f32.mrf.mxu1 }
0x24c8   : > { %13015 = vmatprep.subr.msk.mxu0 %vm1015_vm1, %v7808_v5 }
0x24cb   : > { %13016 = vmatpush3.xpose.msk.msra.mxu0 %vm1015_vm1, %v7808_v5 }
0x24cc   : > { %13017 = vmatprep.subr.msk.mxu0 %vm1015_vm1, %v7806_v14 }
0x24cf   : > { %13018 = vmatpush3.xpose.msk.msra.mxu0 %vm1015_vm1, %v7806_v14  ;;  %v7792_v14 = vpop.f32.mrf.mxu1 }
0x24d2   : > { %13020 = vmatmul.mubr.msk.f32.vlgmr.msra.gmra.mxu0 %vm1015_vm1, %v7804_v17 }
0x2572   : > { %v16523_v23 = vpop.f32.mrf.mxu0 }
0x2574   : > { %v16525_v28 = vpop.f32.mrf.mxu0 }
0x2592   : > { %v13021_v22 = vpop.f32.mrf.mxu0 }
0x2593   : > { %v7913_v2 = vadd.f32 %v16397_v63, %v13021_v22 }
0x2594   : > { %v7907_v62 = vpop.f32.mrf.mxu0 }
0x2595   : > { %v7908_v33 = vadd.f32 %v16397_v63, %v7907_v62  ;;  %v7919_v18 = vsel %vm1153_vm2, %v7913_v2, -inf }
0x2596   : > { %7920 = vmax.xlane.f32.xlu0 %v7919_v18 }
0x2597   : > { %v7916_v53 = vsel %vm1153_vm2, %v7908_v33, -inf }
0x2598   : > { %7917 = vmax.xlane.f32.xlu1 %v7916_v53 }
0x25a9   : > { %7950 = vrot.lane.b32.xlu1 %v16314_v8, %s17292_s26 }
0x25ac   : > { %7952 = vrot.lane.b32.xlu0 %v16310_v21, %s17292_s26 }
0x25ad   : > { %7948 = vrot.lane.b32.xlu1 %v16318_v27, %s17292_s26 }
0x25b0   : > { %7946 = vrot.lane.b32.xlu0 %v16328_v40, %s17292_s26 }
0x25b1   : > { %7944 = vrot.lane.b32.xlu1 %v16334_v47, %s17292_s26 }
0x25b4   : > { %7942 = vrot.lane.b32.xlu0 %v16342_v7, %s17292_s26 }
0x261f   : > { %v7921_v30 = vpop.xlane.xlu0 %7920 }
0x2620   : > { %v7923_v57 = vsub.f32 %v7913_v2, %v7921_v30 }
0x2621   : > { %v7918_v34 = vpop.xlane.xlu1 %7917 }
0x2622   : > { %v7926_v58 = vmul.f32 1.442695, %v7923_v57  ;;  %v7922_v35 = vsub.f32 %v7908_v33, %v7918_v34  ;;  %v7798_v34 = vadd.f32 %v13002_v15, %v16523_v23 }
0x2623   : > { %v7953_v54 = vpop.permute.xlu0 %7952 }
0x2624   : > { %13756 = vpow2.f32 %v7926_v58  ;;  %v7924_v45 = vmul.f32 1.442695, %v7922_v35  ;;  %13022 = vmatprep.subr.mxu1 %v7953_v54  ;;  %v7793_v35 = vadd.f32 %v7792_v14, %v16525_v28 }
0x2625   : > { %13023 = vmatpush3.msra.mxu1 %v7953_v54  ;;  %v7951_v29 = vpop.permute.xlu1 %7950 }
0x2626   : > { %13758 = vpow2.f32 %v7924_v45  ;;  %13024 = vmatprep.subr.mxu1 %v7951_v29 }
0x2627   : > { %13025 = vmatpush3.msra.mxu1 %v7951_v29  ;;  %v7947_v0 = vpop.permute.xlu0 %7946 }
0x2629   : > { %v7949_v3 = vpop.permute.xlu1 %7948 }
0x262a   : > { %13026 = vmatprep.subr.mxu1 %v7949_v3 }
0x262b   : > { %13027 = vmatpush3.msra.mxu1 %v7949_v3  ;;  %v7943_v48 = vpop.permute.xlu0 %7942 }
0x262c   : > { %13028 = vmatprep.subr.mxu1 %v7947_v0 }
0x262d   : > { %13029 = vmatpush3.msra.mxu1 %v7947_v0  ;;  %v7945_v37 = vpop.permute.xlu1 %7944 }
0x262e   : > { %13030 = vmatprep.subr.mxu1 %v7945_v37 }
0x262f   : > { %13031 = vmatpush3.msra.mxu1 %v7945_v37 }
0x2630   : > { %13032 = vmatprep.subr.mxu1 %v7943_v48 }
0x2631   : > { %v13757_v5 = vpop.eup %13756  ;;  %13033 = vmatpush3.msra.mxu1 %v7943_v48 }
0x2632   : > { %v7931_v51 = vsel %vm1153_vm2, %v13757_v5, 0.0 }
0x2633   : > { %v13759_v43 = vpop.eup %13758  ;;  %7932 = vadd.xlane.f32.xlu1 %v7931_v51 }
0x2634   : > { %v7928_v19 = vsel %vm1153_vm2, %v13759_v43, 0.0 }
0x2635   : > { %7929 = vadd.xlane.f32.xlu0 %v7928_v19 }
0x2644   : > { %7940 = vrot.lane.b32.xlu1 %v16348_v20, %s17292_s26 }
0x2648   : > { %8144 = vrot.lane.b32.xlu1 %v16312_v52, %s17294_s27 }
0x264b   : > { %7938 = vrot.lane.b32.xlu0 %v16356_v59, %s17292_s26 }
0x264c   : > { %8140 = vrot.lane.b32.xlu1 %v16336_v9, %s17294_s27 }
0x264f   : > { %8142 = vrot.lane.b32.xlu0 %v16320_v11, %s17294_s27 }
0x2650   : > { %8136 = vrot.lane.b32.xlu1 %v16362_v56, %s17294_s27  ;;  %v11204_v56 = vld [vmem:[%s17232_s9 + $0x50] sm:$0xff] }
0x2653   : > { %8138 = vrot.lane.b32.xlu0 %v16350_v24, %s17294_s27 }
0x2654   : > { %8132 = vrot.lane.b32.xlu1 %v16376_v12, %s17294_s27 }
0x2657   : > { %8134 = vrot.lane.b32.xlu0 %v16370_v42, %s17294_s27 }
0x2658   : > { %8126 = vrot.lane.b32.xlu1 %v16293_v39, %s17294_s27 }
0x265b   : > { %8130 = vrot.lane.b32.xlu0 %v16382_v49, %s17294_s27 }
0x265f   : > { %8128 = vrot.lane.b32.xlu0 %v16392_v6, %s17294_s27 }
0x26bc   : > { %v7933_v52 = vpop.xlane.xlu1 %7932 }
0x26bd   : > { %13760 = vrcp.f32 %v7933_v52 }
0x26be   : > { %v7930_v11 = vpop.xlane.xlu0 %7929 }
0x26bf   : > { %13762 = vrcp.f32 %v7930_v11 }
0x26c0   : > { %v7941_v9 = vpop.permute.xlu1 %7940 }
0x26c1   : > { %13034 = vmatprep.subr.mxu1 %v7941_v9 }
0x26c2   : > { %v7939_v24 = vpop.permute.xlu0 %7938  ;;  %13035 = vmatpush3.msra.mxu1 %v7941_v9 }
0x26c3   : > { %13036 = vmatprep.subr.mxu1 %v7939_v24 }
0x26c4   : > { %13037 = vmatpush3.msra.mxu1 %v7939_v24  ;;  %v8145_v6 = vpop.permute.xlu1 %8144 }
0x26c5   : > { %13041 = vmatprep.subr.mxu1 %v11204_v56 }
0x26c6   : > { %v8143_v33 = vpop.permute.xlu0 %8142 }
0x26c8   : > { %v8141_v41 = vpop.permute.xlu1 %8140 }
0x26ca   : > { %v13761_v39 = vpop.eup %13760  ;;  %v8139_v18 = vpop.permute.xlu0 %8138 }
0x26cb   : > { %v7937_v49 = vmul.f32 %v13761_v39, %v13757_v5 }
0x26cc   : > { %v13763_v42 = vpop.eup %13762  ;;  %v8137_v36 = vpop.permute.xlu1 %8136 }
0x26cd   : > { %v7936_v12 = vmul.f32 %v13763_v42, %v13759_v43 }
0x26ce   : > { %v8135_v53 = vpop.permute.xlu0 %8134 }
0x26cf   : > { %13038 = vmatprep.mubr.msk.f32.mxu1 %vm1153_vm2, %v7936_v12 }
0x26d0   : > { %13039 = vmatmul.mubr.msk.f32.vlgmr.msra.gmra.mxu1 %vm1153_vm2, %v7937_v49  ;;  %v8133_v17 = vpop.permute.xlu1 %8132 }
0x26d1   : > { %13042 = vmatpush3.msra.mxu1 %v11204_v56 }
0x26d2   : > { %13046 = vmatprep.subr.msk.mxu1 %vm1015_vm1, %v8145_v6  ;;  %v8131_v30 = vpop.permute.xlu0 %8130 }
0x26d4   : > { %v8127_v62 = vpop.permute.xlu1 %8126 }
0x26d6   : > { %v8129_v57 = vpop.permute.xlu0 %8128 }
0x2790   : > { %v13040_v22 = vpop.f32.mrf.mxu1 }
0x2792   : > { %v8034_v2 = vpop.f32.mrf.mxu1 }
0x2793   : > { %13043 = vmatprep.mubr.msk.f32.mxu1 %vm1015_vm1, %v8034_v2 }
0x2794   : > { %13044 = vmatmul.mubr.msk.f32.vlgmr.msra.gmra.mxu1 %vm1015_vm1, %v13040_v22 }
0x2795   : > { %13047 = vmatpush3.xpose.msk.msra.mxu1 %vm1015_vm1, %v8145_v6  ;;  %13062 = vmatprep.mubr.msk.f32.mxu1 %vm1015_vm1, %v8127_v62  ;;  %v11263_v62 = vld [vmem:[%s17233_s10 + $0x2] ss:$0 sm:$0xff] }
0x2796   : > { %13048 = vmatprep.subr.msk.mxu1 %vm1015_vm1, %v8143_v33 }
0x2799   : > { %13049 = vmatpush3.xpose.msk.msra.mxu1 %vm1015_vm1, %v8143_v33  ;;  %v13848_v33 = vld [vmem:[%s16153_s0 + $0x8] sm:$0xff] }
0x279a   : > { %13050 = vmatprep.subr.msk.mxu1 %vm1015_vm1, %v8141_v41 }
0x279d   : > { %13051 = vmatpush3.xpose.msk.msra.mxu1 %vm1015_vm1, %v8141_v41 }
0x279e   : > { %13052 = vmatprep.subr.msk.mxu1 %vm1015_vm1, %v8139_v18 }
0x27a1   : > { %13053 = vmatpush3.xpose.msk.msra.mxu1 %vm1015_vm1, %v8139_v18 }
0x27a2   : > { %13054 = vmatprep.subr.msk.mxu1 %vm1015_vm1, %v8137_v36 }
0x27a5   : > { %13055 = vmatpush3.xpose.msk.msra.mxu1 %vm1015_vm1, %v8137_v36 }
0x27a6   : > { %13056 = vmatprep.subr.msk.mxu1 %vm1015_vm1, %v8135_v53 }
0x27a9   : > { %13057 = vmatpush3.xpose.msk.msra.mxu1 %vm1015_vm1, %v8135_v53 }
0x27aa   : > { %13058 = vmatprep.subr.msk.mxu1 %vm1015_vm1, %v8133_v17 }
0x27ad   : > { %13059 = vmatpush3.xpose.msk.msra.mxu1 %vm1015_vm1, %v8133_v17 }
0x27ae   : > { %13060 = vmatprep.subr.msk.mxu1 %vm1015_vm1, %v8131_v30 }
0x27b1   : > { %13061 = vmatpush3.xpose.msk.msra.mxu1 %vm1015_vm1, %v8131_v30  ;;  %v13849_v30 = vld [vmem:[%s16153_s0] sm:$0xff] }
0x27b4   : > { %13063 = vmatmul.mubr.msk.f32.vlgmr.msra.gmra.mxu1 %vm1015_vm1, %v8129_v57 }
0x2854   : > { %v13045_v58 = vpop.f32.mrf.mxu1 }
0x2855   : > { %v16596_v54 = vadd.f32 %v13045_v58, %v7798_v34 }
0x2856   : > { %v8115_v45 = vpop.f32.mrf.mxu1 }
0x2857   : > { %v16598_v29 = vadd.f32 %v8115_v45, %v7793_v35 }
0x2874   : > { %v13064_v0 = vpop.f32.mrf.mxu1 }
0x2875   : > { %v8238_v3 = vadd.f32 %v16397_v63, %v13064_v0 }
0x2876   : > { %v8232_v37 = vpop.f32.mrf.mxu1 }
0x2877   : > { %v8233_v48 = vadd.f32 %v16397_v63, %v8232_v37  ;;  %v8244_v5 = vsel %vm1153_vm2, %v8238_v3, -inf }
0x2878   : > { %8245 = vmax.xlane.f32.xlu0 %v8244_v5 }
0x2879   : > { %v8241_v51 = vsel %vm1153_vm2, %v8233_v48, -inf }
0x287a   : > { %8242 = vmax.xlane.f32.xlu1 %v8241_v51 }
0x288b   : > { %8275 = vrot.lane.b32.xlu1 %v16314_v8, %s17294_s27 }
0x288e   : > { %8277 = vrot.lane.b32.xlu0 %v16310_v21, %s17294_s27 }
0x288f   : > { %8273 = vrot.lane.b32.xlu1 %v16318_v27, %s17294_s27 }
0x2892   : > { %8271 = vrot.lane.b32.xlu0 %v16328_v40, %s17294_s27 }
0x2893   : > { %8269 = vrot.lane.b32.xlu1 %v16334_v47, %s17294_s27 }
0x2896   : > { %8267 = vrot.lane.b32.xlu0 %v16342_v7, %s17294_s27 }
0x2901   : > { %v8246_v63 = vpop.xlane.xlu0 %8245 }
0x2902   : > { %v8248_v23 = vsub.f32 %v8238_v3, %v8246_v63 }
0x2903   : > { %v8243_v28 = vpop.xlane.xlu1 %8242 }
0x2904   : > { %v8251_v43 = vmul.f32 1.442695, %v8248_v23  ;;  %v8247_v8 = vsub.f32 %v8233_v48, %v8243_v28  ;;  %v11271_v28 = vld [vmem:[%s17234_s11 + $0x58] sm:$0xff] }
0x2905   : > { %v8278_v19 = vpop.permute.xlu0 %8277 }
0x2906   : > { %13764 = vpow2.f32 %v8251_v43  ;;  %v8249_v21 = vmul.f32 1.442695, %v8247_v8  ;;  %13065 = vmatprep.subr.mxu0 %v8278_v19  ;;  %v11270_v43 = vld [vmem:[%s17234_s11 + $0x50] sm:$0xff]  ;;  %v11269_v8 = vld [vmem:[%s17234_s11 + $0x48] sm:$0xff] }
0x2907   : > { %13066 = vmatpush3.msra.mxu0 %v8278_v19  ;;  %v8276_v27 = vpop.permute.xlu1 %8275  ;;  %v11268_v19 = vld [vmem:[%s17234_s11 + $0x40] sm:$0xff] }
0x2908   : > { %13766 = vpow2.f32 %v8249_v21  ;;  %13067 = vmatprep.subr.mxu0 %v8276_v27  ;;  %v11283_v21 = vld [vmem:[%s17236_s13 + $0xb8] sm:$0xff] }
0x2909   : > { %13068 = vmatpush3.msra.mxu0 %v8276_v27  ;;  %v8272_v40 = vpop.permute.xlu0 %8271  ;;  %v11282_v27 = vld [vmem:[%s17236_s13 + $0xb0] sm:$0xff]  ;;  %13100 = vmatprep.subr.mxu1 %v11283_v21 }
0x290a   : > { %13101 = vmatpush3.msra.mxu1 %v11283_v21 }
0x290b   : > { %v8274_v52 = vpop.permute.xlu1 %8273  ;;  %13102 = vmatprep.subr.mxu1 %v11282_v27 }
0x290c   : > { %13069 = vmatprep.subr.mxu0 %v8274_v52  ;;  %13103 = vmatpush3.msra.mxu1 %v11282_v27 }
0x290d   : > { %13070 = vmatpush3.msra.mxu0 %v8274_v52  ;;  %v8268_v7 = vpop.permute.xlu0 %8267  ;;  %v11280_v52 = vld [vmem:[%s17236_s13 + $0xa0] sm:$0xff] }
0x290e   : > { %13071 = vmatprep.subr.mxu0 %v8272_v40 }
0x290f   : > { %13072 = vmatpush3.msra.mxu0 %v8272_v40  ;;  %v8270_v47 = vpop.permute.xlu1 %8269  ;;  %v11281_v40 = vld [vmem:[%s17236_s13 + $0xa8] sm:$0xff] }
0x2910   : > { %13073 = vmatprep.subr.mxu0 %v8270_v47  ;;  %13104 = vmatprep.subr.mxu1 %v11281_v40 }
0x2911   : > { %13074 = vmatpush3.msra.mxu0 %v8270_v47  ;;  %13105 = vmatpush3.msra.mxu1 %v11281_v40  ;;  %v11279_v47 = vld [vmem:[%s17236_s13 + $0x98] sm:$0xff] }
0x2912   : > { %13075 = vmatprep.subr.mxu0 %v8268_v7  ;;  %13106 = vmatprep.subr.mxu1 %v11280_v52 }
0x2913   : > { %v13765_v11 = vpop.eup %13764  ;;  %13076 = vmatpush3.msra.mxu0 %v8268_v7  ;;  %13107 = vmatpush3.msra.mxu1 %v11280_v52 }
0x2914   : > { %v8256_v9 = vsel %vm1153_vm2, %v13765_v11, 0.0  ;;  %13108 = vmatprep.subr.mxu1 %v11279_v47 }
0x2915   : > { %v13767_v24 = vpop.eup %13766  ;;  %8257 = vadd.xlane.f32.xlu1 %v8256_v9  ;;  %13109 = vmatpush3.msra.mxu1 %v11279_v47 }
0x2916   : > { %v8253_v56 = vsel %vm1153_vm2, %v13767_v24, 0.0 }
0x2917   : > { %8254 = vadd.xlane.f32.xlu0 %v8253_v56 }
0x2926   : > { %8265 = vrot.lane.b32.xlu1 %v16348_v20, %s17294_s27  ;;  %v11205_v20 = vld [vmem:[%s17232_s9 + $0x58] sm:$0xff] }
0x292d   : > { %8263 = vrot.lane.b32.xlu0 %v16356_v59, %s17294_s27 }
0x299e   : > { %v8258_v39 = vpop.xlane.xlu1 %8257 }
0x299f   : > { %13768 = vrcp.f32 %v8258_v39 }
0x29a0   : > { %v8255_v42 = vpop.xlane.xlu0 %8254 }
0x29a1   : > { %13770 = vrcp.f32 %v8255_v42 }
0x29a2   : > { %v8266_v12 = vpop.permute.xlu1 %8265 }
0x29a3   : > { %13077 = vmatprep.subr.mxu0 %v8266_v12 }
0x29a4   : > { %v8264_v49 = vpop.permute.xlu0 %8263  ;;  %13078 = vmatpush3.msra.mxu0 %v8266_v12  ;;  %v11266_v12 = vld [vmem:[%s17238_s15 + $0x2] ss:$0 sm:$0xff] }
0x29a5   : > { %13079 = vmatprep.subr.mxu0 %v8264_v49 }
0x29a6   : > { %13080 = vmatpush3.msra.mxu0 %v8264_v49 }
0x29a7   : > { %13084 = vmatprep.subr.mxu0 %v11205_v20 }
0x29ac   : > { %v13769_v6 = vpop.eup %13768 }
0x29ad   : > { %v8262_v15 = vmul.f32 %v13769_v6, %v13765_v11 }
0x29ae   : > { %v13771_v41 = vpop.eup %13770 }
0x29af   : > { %v8261_v36 = vmul.f32 %v13771_v41, %v13767_v24 }
0x29b1   : > { %13081 = vmatprep.mubr.msk.f32.mxu0 %vm1153_vm2, %v8261_v36 }
0x29b2   : > { %13082 = vmatmul.mubr.msk.f32.vlgmr.msra.gmra.mxu0 %vm1153_vm2, %v8262_v15  ;;  %v11267_v15 = vld [vmem:[%s17239_s16 + $0x2] ss:$0 sm:$0xff] }
0x29b3   : > { %13085 = vmatpush3.msra.mxu0 %v11205_v20 }
0x29b4   : > { %13089 = vmatprep.subr.mxu0 %v11271_v28 }
0x2a72   : > { %v13083_v59 = vpop.f32.mrf.mxu0 }
0x2a74   : > { %v8359_v14 = vpop.f32.mrf.mxu0 }
0x2a75   : > { %13086 = vmatprep.mubr.msk.f32.mxu0 %vm1015_vm1, %v8359_v14 }
0x2a76   : > { %13087 = vmatmul.mubr.msk.f32.vlgmr.msra.gmra.mxu0 %vm1015_vm1, %v13083_v59 }
0x2a77   : > { %13090 = vmatpush3.msra.mxu0 %v11271_v28 }
0x2a78   : > { %13091 = vmatprep.subr.mxu0 %v11270_v43 }
0x2a79   : > { %13092 = vmatpush3.msra.mxu0 %v11270_v43 }
0x2a7a   : > { %13093 = vmatprep.subr.mxu0 %v11269_v8 }
0x2a7b   : > { %13094 = vmatpush3.msra.mxu0 %v11269_v8 }
0x2a7c   : > { %13095 = vmatprep.subr.mxu0 %v11268_v19 }
0x2a7d   : > { %13096 = vmatpush3.msra.mxu0 %v11268_v19 }
0x2b36   : > { %v13088_v17 = vpop.f32.mrf.mxu0 }
0x2b37   : > { %v8450_v22 = vadd.f32 %v13088_v17, %v16596_v54  ;;  %v11278_v17 = vld [vmem:[%s17236_s13 + $0x90] sm:$0xff] }
0x2b38   : > { %v8440_v2 = vpop.f32.mrf.mxu0  ;;  %13110 = vmatprep.subr.mxu1 %v11278_v17 }
0x2b39   : > { %v8452_v18 = vadd.f32 %v13848_v33, %v8450_v22  ;;  %v8449_v53 = vadd.f32 %v8440_v2, %v16598_v29  ;;  %13111 = vmatpush3.msra.mxu1 %v11278_v17  ;;  %v11277_v22 = vld [vmem:[%s17236_s13 + $0x88] sm:$0xff]  ;;  %v11276_v2 = vld [vmem:[%s17236_s13 + $0x80] sm:$0xff] }
0x2b3a   : > { %13112 = vmatprep.subr.mxu1 %v11277_v22  ;;  %v11273_v33 = vld [vmem:[%s17235_s12 + $0x2] ss:$0 sm:$0xff] }
0x2b3b   : > { %v8451_v57 = vadd.f32 %v13849_v30, %v8449_v53  ;;  %v8462_v34 = vadd.f32 %v11263_v62, %v8452_v18  ;;  %13113 = vmatpush3.msra.mxu1 %v11277_v22 }
0x2b3c   : > { %13114 = vmatprep.subr.mxu1 %v11276_v2 }
0x2b3d   : > { %v8470_v58 = vsel %vm711_vm0, %v8462_v34, 0.0  ;;  %v8461_v35 = vadd.f32 %v11263_v62, %v8451_v57  ;;  %13115 = vmatpush3.msra.mxu1 %v11276_v2  ;;  %v11311_v62 = vld [vmem:[%s17230_s7 + $0x78] sm:$0xff] }
0x2b3e   : > { %8471 = vadd.xlane.f32.xlu0 %v8470_v58  ;;  %13150 = vmatprep.subr.mxu1 %v11311_v62 }
0x2b3f   : > { %v8467_v45 = vsel %vm711_vm0, %v8461_v35, 0.0 }
0x2b40   : > { %8468 = vadd.xlane.f32.xlu1 %v8467_v45  ;;  %v11309_v45 = vld [vmem:[%s17230_s7 + $0x68] sm:$0xff] }
0x2bc7   : > { %v8472_v54 = vpop.xlane.xlu0 %8471 }
0x2bc8   : > { %v8474_v0 = vmul.f32 0.03125, %v8472_v54  ;;  %v11308_v54 = vld [vmem:[%s17230_s7 + $0x60] sm:$0xff] }
0x2bc9   : > { %v8469_v3 = vpop.xlane.xlu1 %8468 }
0x2bca   : > { %v8476_v37 = vsub.f32 %v8462_v34, %v8474_v0  ;;  %v8473_v48 = vmul.f32 0.03125, %v8469_v3 }
0x2bcc   : > { %v8475_v5 = vsub.f32 %v8461_v35, %v8473_v48  ;;  %v8478_v51 = vmul.f32 %v8476_v37, %v8476_v37  ;;  %v11310_v35 = vld [vmem:[%s17230_s7 + $0x70] sm:$0xff] }
0x2bce   : > { %v8482_v63 = vsel %vm711_vm0, %v8478_v51, 0.0  ;;  %v8477_v29 = vmul.f32 %v8475_v5, %v8475_v5 }
0x2bcf   : > { %8483 = vadd.xlane.f32.xlu1 %v8482_v63 }
0x2bd0   : > { %v8479_v23 = vsel %vm711_vm0, %v8477_v29, 0.0  ;;  %v11313_v29 = vld [vmem:[%s17231_s8 + $0x3] ss:$0 sm:$0xff] }
0x2bd1   : > { %8480 = vadd.xlane.f32.xlu0 %v8479_v23 }
0x2c58   : > { %v8484_v7 = vpop.xlane.xlu1 %8483 }
0x2c59   : > { %v8486_v11 = vmul.f32 0.03125, %v8484_v7  ;;  %v11295_v7 = vld [vmem:[%s17228_s5 + $0x78] sm:$0xff] }
0x2c5a   : > { %v8481_v9 = vpop.xlane.xlu0 %8480  ;;  %13119 = vmatprep.subr.mxu0 %v11295_v7 }
0x2c5b   : > { %v8488_v24 = vadd.f32 1e-05, %v8486_v11  ;;  %v8485_v56 = vmul.f32 0.03125, %v8481_v9  ;;  %v11294_v11 = vld [vmem:[%s17228_s5 + $0x70] sm:$0xff]  ;;  %v11293_v9 = vld [vmem:[%s17228_s5 + $0x68] sm:$0xff] }
0x2c5d   : > { %13772 = vrsqrt.f32 %v8488_v24  ;;  %v8487_v39 = vadd.f32 1e-05, %v8485_v56  ;;  %v11292_v24 = vld [vmem:[%s17228_s5 + $0x60] sm:$0xff] }
0x2c5f   : > { %13774 = vrsqrt.f32 %v8487_v39 }
0x2c6a   : > { %v13773_v42 = vpop.eup %13772 }
0x2c6b   : > { %v8492_v49 = vmul.f32 %v13773_v42, %v8476_v37 }
0x2c6c   : > { %v13775_v6 = vpop.eup %13774 }
0x2c6d   : > { %v8491_v41 = vmul.f32 %v13775_v6, %v8475_v5  ;;  %v8500_v36 = vmul.f32 %v11266_v12, %v8492_v49 }
0x2c6f   : > { %v8499_v20 = vmul.f32 %v11266_v12, %v8491_v41  ;;  %v8508_v14 = vadd.f32 %v11267_v15, %v8500_v36 }
0x2c71   : > { %v8507_v59 = vadd.f32 %v11267_v15, %v8499_v20 }
0x2c73   : > { %13097 = vmatprep.mubr.msk.f32.mxu0 %vm711_vm0, %v8507_v59 }
0x2c74   : > { %13098 = vmatmul.mubr.msk.f32.vlgmr.msra.gmra.mxu0 %vm711_vm0, %v8508_v14 }
0x2c75   : > { %13120 = vmatpush3.msra.mxu0 %v11295_v7 }
0x2c76   : > { %13121 = vmatprep.subr.mxu0 %v11294_v11 }
0x2c77   : > { %13122 = vmatpush3.msra.mxu0 %v11294_v11 }
0x2c78   : > { %13123 = vmatprep.subr.mxu0 %v11293_v9 }
0x2c79   : > { %13124 = vmatpush3.msra.mxu0 %v11293_v9 }
0x2c7a   : > { %13125 = vmatprep.subr.mxu0 %v11292_v24 }
0x2c7b   : > { %13126 = vmatpush3.msra.mxu0 %v11292_v24 }
0x2d34   : > { %v13099_v18 = vpop.f32.mrf.mxu0 }
0x2d35   : > { %v8600_v53 = vadd.f32 %v13099_v18, %v11273_v33 }
0x2d36   : > { %v8594_v30 = vpop.f32.mrf.mxu0 }
0x2d37   : > { %v8595_v57 = vadd.f32 %v11273_v33, %v8594_v30  ;;  %v8604_v58 = vmax.f32 %v8600_v53, 0.0  ;;  %v11290_v30 = vld [vmem:[%s17240_s17 + $0x2] ss:$0 sm:$0xff] }
0x2d39   : > { %v8603_v34 = vmax.f32 %v8595_v57, 0.0 }
0x2d3b   : > { %13116 = vmatprep.mubr.msk.f32.mxu1 %vm1153_vm2, %v8603_v34 }
0x2d3c   : > { %13117 = vmatmul.mubr.msk.f32.vlgmr.msra.gmra.mxu1 %vm1153_vm2, %v8604_v58  ;;  %v11291_v58 = vld [vmem:[%s17241_s18 + $0x2] ss:$0 sm:$0xff] }
0x2d3d   : > { %13151 = vmatpush3.msra.mxu1 %v11311_v62  ;;  %13158 = vmatprep.mubr.msk.f32.mxu1 %vm711_vm0, %v16208_v31  ;;  %v11285_v31 = vld [vmem:[%s17237_s14 + $0x2] ss:$0 sm:$0xff] }
0x2d3e   : > { %13152 = vmatprep.subr.mxu1 %v11310_v35 }
0x2d3f   : > { %13153 = vmatpush3.msra.mxu1 %v11310_v35 }
0x2d40   : > { %13154 = vmatprep.subr.mxu1 %v11309_v45 }
0x2d41   : > { %13155 = vmatpush3.msra.mxu1 %v11309_v45 }
0x2d42   : > { %13156 = vmatprep.subr.mxu1 %v11308_v54 }
0x2d43   : > { %13157 = vmatpush3.msra.mxu1 %v11308_v54 }
0x2d44   : > { %13159 = vmatmul.mubr.msk.f32.vlgmr.msra.gmra.mxu1 %vm711_vm0, %v16210_v61 }
0x2d45   : > { %13161 = vmatprep.mubr.msk.f32.mxu1 %vm711_vm0, %v16227_v25 }
0x2d48   : > { %13162 = vmatmul.mubr.msk.f32.gmra.mxu1 %vm711_vm0, %v16230_v60 }
0x2d49   : > { %13164 = vmatprep.mubr.msk.f32.mxu1 %vm711_vm0, %v16238_v44 }
0x2d4c   : > { %13165 = vmatmul.mubr.msk.f32.gmra.mxu1 %vm711_vm0, %v16240_v13 }
0x2d4d   : > { %13167 = vmatprep.mubr.msk.f32.mxu1 %vm711_vm0, %v16284_v46 }
0x2d50   : > { %13168 = vmatmul.mubr.msk.f32.gmra.mxu1 %vm711_vm0, %v16282_v4 }
0x2dfc   : > { %v13118_v61 = vpop.f32.mrf.mxu1 }
0x2dfd   : > { %v8700_v25 = vadd.f32 %v13118_v61, %v11285_v31 }
0x2dfe   : > { %v8694_v0 = vpop.f32.mrf.mxu1 }
0x2dff   : > { %v8704_v60 = vadd.f32 %v8700_v25, %v8508_v14  ;;  %v8695_v3 = vadd.f32 %v11285_v31, %v8694_v0  ;;  %v13850_v0 = vld [vmem:[%s16158_s1] sm:$0xff] }
0x2e01   : > { %v8703_v37 = vadd.f32 %v8695_v3, %v8507_v59  ;;  %v8712_v44 = vsel %vm711_vm0, %v8704_v60, 0.0  ;;  %v16778_v59 = vld [vmem:[%s17229_s6 + $0x3] ss:$0 sm:$0xff]  ;;  %v13851_v3 = vld [vmem:[%s16158_s1 + $0x8] sm:$0xff]  ;;  %s11421_s1 = sshll.u32 %s17298_s3, 8 }
0x2e02   : > { %8713 = vadd.xlane.f32.xlu1 %v8712_v44 }
0x2e03   : > { %v8709_v13 = vsel %vm711_vm0, %v8703_v37, 0.0 }
0x2e04   : > { %v13160_v48 = vpop.f32.mrf.mxu1  ;;  %8710 = vadd.xlane.f32.xlu0 %v8709_v13 }
0x2e05   : > { %v16747_v52 = vadd.f32 %v13160_v48, %v11313_v29 }
0x2e06   : > { %v9050_v46 = vpop.f32.mrf.mxu1 }
0x2e07   : > { %v16751_v47 = vadd.f32 %v11313_v29, %v9050_v46 }
0x2e08   : > { %v13163_v5 = vpop.f32.mrf.mxu1 }
0x2e09   : > { %v16739_v27 = vadd.f32 %v13163_v5, %v11313_v29 }
0x2e0a   : > { %v9060_v4 = vpop.f32.mrf.mxu1 }
0x2e0b   : > { %v16743_v40 = vadd.f32 %v11313_v29, %v9060_v4 }
0x2e0c   : > { %v13166_v51 = vpop.f32.mrf.mxu1 }
0x2e0d   : > { %v16731_v19 = vadd.f32 %v13166_v51, %v11313_v29 }
0x2e0e   : > { %v9070_v63 = vpop.f32.mrf.mxu1 }
0x2e0f   : > { %v16735_v21 = vadd.f32 %v11313_v29, %v9070_v63 }
0x2e10   : > { %v13169_v23 = vpop.f32.mrf.mxu1 }
0x2e11   : > { %v16725_v28 = vadd.f32 %v13169_v23, %v11313_v29 }
0x2e12   : > { %v9080_v43 = vpop.f32.mrf.mxu1 }
0x2e13   : > { %v16727_v8 = vadd.f32 %v11313_v29, %v9080_v43  ;;  %13189 = vmatprep.subr.mxu1 %v16725_v28 }
0x2e14   : > { %13190 = vmatpush3.msra.mxu1 %v16725_v28 }
0x2e15   : > { %13191 = vmatprep.subr.mxu1 %v16727_v8 }
0x2e16   : > { %13192 = vmatpush3.msra.mxu1 %v16727_v8 }
0x2e17   : > { %13193 = vmatprep.subr.mxu1 %v16731_v19 }
0x2e18   : > { %13194 = vmatpush3.msra.mxu1 %v16731_v19 }
0x2e19   : > { %13195 = vmatprep.subr.mxu1 %v16735_v21 }
0x2e1a   : > { %13196 = vmatpush3.msra.mxu1 %v16735_v21 }
0x2e1b   : > { %13197 = vmatprep.subr.mxu1 %v16739_v27 }
0x2e1c   : > { %13198 = vmatpush3.msra.mxu1 %v16739_v27 }
0x2e1d   : > { %13199 = vmatprep.subr.mxu1 %v16743_v40 }
0x2e1e   : > { %13200 = vmatpush3.msra.mxu1 %v16743_v40 }
0x2e1f   : > { %13201 = vmatprep.subr.mxu1 %v16747_v52 }
0x2e20   : > { %13202 = vmatpush3.msra.mxu1 %v16747_v52 }
0x2e21   : > { %13203 = vmatprep.subr.mxu1 %v16751_v47 }
0x2e22   : > { %13204 = vmatpush3.msra.mxu1 %v16751_v47 }
0x2e8b   : > { %v8714_v56 = vpop.xlane.xlu1 %8713 }
0x2e8c   : > { %v8716_v39 = vmul.f32 0.03125, %v8714_v56 }
0x2e8d   : > { %v8711_v42 = vpop.xlane.xlu0 %8710 }
0x2e8e   : > { %v8718_v12 = vsub.f32 %v8704_v60, %v8716_v39  ;;  %v8715_v49 = vmul.f32 0.03125, %v8711_v42  ;;  %v16873_v39 = vld [vmem:[%s14262_s22] ss:$0 sm:$0xff]  ;;  %s651_s22 = scalar_lea.vmem [#allocation2], %s10791_s25  ;;  %s13922_s25 = smov [#allocation2]  }
0x2e8f   : > { %s13857_s23 = sshll.u32 %s13922_s25, 4  ;;  %s13858_s23 = int_to_ptr.vmem [resolvable:$false] %s13857_s23 }
0x2e90   : > { %v8717_v6 = vsub.f32 %v8703_v37, %v8715_v49  ;;  %v8720_v41 = vmul.f32 %v8718_v12, %v8718_v12  ;;  %s13859_s24 = scalar_lea.vmem %s13858_s23, 512 }
0x2e92   : > { %v8724_v36 = vsel %vm711_vm0, %v8720_v41, 0.0  ;;  %v8719_v15 = vmul.f32 %v8717_v6, %v8717_v6 }
0x2e93   : > { %8725 = vadd.xlane.f32.xlu1 %v8724_v36 }
0x2e94   : > { %v8721_v20 = vsel %vm711_vm0, %v8719_v15, 0.0 }
0x2e95   : > { %8722 = vadd.xlane.f32.xlu0 %v8721_v20 }
0x2ea4   : > { %8855 = vrot.lane.b32.xlu1 %v11294_v11, %s17288_s21 }
0x2ea8   : > { %8853 = vrot.lane.b32.xlu1 %v11293_v9, %s17288_s21 }
0x2eab   : > { %8857 = vrot.lane.b32.xlu0 %v11295_v7, %s17288_s21 }
0x2eac   : > { %8863 = vrot.lane.b32.xlu1 %v16778_v59, %s17288_s21 }
0x2eaf   : > { %8851 = vrot.lane.b32.xlu0 %v11292_v24, %s17288_s21 }
0x2f1c   : > { %v8726_v14 = vpop.xlane.xlu1 %8725 }
0x2f1d   : > { %v8728_v17 = vmul.f32 0.03125, %v8726_v14 }
0x2f1e   : > { %v8723_v22 = vpop.xlane.xlu0 %8722 }
0x2f1f   : > { %v8730_v2 = vadd.f32 1e-05, %v8728_v17  ;;  %v8727_v62 = vmul.f32 0.03125, %v8723_v22 }
0x2f20   : > { %v8856_v61 = vpop.permute.xlu1 %8855 }
0x2f21   : > { %13776 = vrsqrt.f32 %v8730_v2  ;;  %v8729_v33 = vadd.f32 1e-05, %v8727_v62 }
0x2f22   : > { %v8858_v18 = vpop.permute.xlu0 %8857 }
0x2f23   : > { %13778 = vrsqrt.f32 %v8729_v33  ;;  %13130 = vmatprep.subr.mxu0 %v8858_v18 }
0x2f24   : > { %v8854_v44 = vpop.permute.xlu1 %8853 }
0x2f26   : > { %v8852_v13 = vpop.permute.xlu0 %8851 }
0x2f28   : > { %v8864_v4 = vpop.permute.xlu1 %8863 }
0x2f2e   : > { %v13777_v53 = vpop.eup %13776 }
0x2f2f   : > { %v8734_v57 = vmul.f32 %v13777_v53, %v8718_v12 }
0x2f30   : > { %v13779_v34 = vpop.eup %13778 }
0x2f31   : > { %v8733_v35 = vmul.f32 %v13779_v34, %v8717_v6  ;;  %v8742_v45 = vmul.f32 %v11290_v30, %v8734_v57 }
0x2f33   : > { %v8741_v54 = vmul.f32 %v11290_v30, %v8733_v35  ;;  %v16788_v31 = vadd.f32 %v11291_v58, %v8742_v45 }
0x2f35   : > { %v16790_v25 = vadd.f32 %v11291_v58, %v8741_v54  ;;  %v8752_v37 = vadd.f32 %v13851_v3, %v16788_v31 }
0x2f37   : > { %v8751_v60 = vadd.f32 %v13850_v0, %v16790_v25 }
0x2f39   : > { %13127 = vmatprep.mubr.msk.f32.mxu0 %vm711_vm0, %v8751_v60 }
0x2f3a   : > { %13128 = vmatmul.mubr.msk.f32.vlgmr.msra.gmra.mxu0 %vm711_vm0, %v8752_v37 }
0x2f3b   : > { %13131 = vmatpush3.msra.mxu0 %v8858_v18  ;;  %13138 = vmatprep.mubr.msk.f32.mxu0 %vm711_vm0, %v16217_v26 }
0x2f3c   : > { %13132 = vmatprep.subr.mxu0 %v8856_v61 }
0x2f3d   : > { %13133 = vmatpush3.msra.mxu0 %v8856_v61 }
0x2f3e   : > { %13134 = vmatprep.subr.mxu0 %v8854_v44 }
0x2f3f   : > { %13135 = vmatpush3.msra.mxu0 %v8854_v44 }
0x2f40   : > { %13136 = vmatprep.subr.mxu0 %v8852_v13 }
0x2f41   : > { %13137 = vmatpush3.msra.mxu0 %v8852_v13 }
0x2f42   : > { %13139 = vmatmul.mubr.msk.f32.vlgmr.msra.gmra.mxu0 %vm711_vm0, %v16248_v32 }
0x2f43   : > { %13141 = vmatprep.mubr.msk.f32.mxu0 %vm711_vm0, %v16252_v16 }
0x2f46   : > { %13142 = vmatmul.mubr.msk.f32.gmra.mxu0 %vm711_vm0, %v16260_v55 }
0x2f47   : > { %13144 = vmatprep.mubr.msk.f32.mxu0 %vm711_vm0, %v16264_v50 }
0x2f4a   : > { %13145 = vmatmul.mubr.msk.f32.gmra.mxu0 %vm711_vm0, %v16272_v10 }
0x2f4b   : > { %13147 = vmatprep.mubr.msk.f32.mxu0 %vm711_vm0, %v16290_v1 }
0x2f4e   : > { %13148 = vmatmul.mubr.msk.f32.gmra.mxu0 %vm711_vm0, %v16299_v38 }
0x2ffa   : > { %v13129_v26 = vpop.f32.mrf.mxu0 }
0x2ffb   : > { %v16868_v24 = vadd.f32 %v13129_v26, %v16778_v59  ;;  %v11322_v26 = vld [vmem:[%s17232_s9 + $0x60] sm:$0xff] }
0x2ffc   : > { %v8838_v32 = vpop.f32.mrf.mxu0 }
0x2ffd   : > { %v16815_v48 = vadd.f32 %v16778_v59, %v8838_v32 }
0x2fff   : > { %13186 = vmatprep.mubr.msk.f32.mxu0 %vm1015_vm1, %v16815_v48 }
0x3002   : > { %v13140_v16 = vpop.f32.mrf.mxu0 }
0x3003   : > { %v16853_v11 = vadd.f32 %v13140_v16, %v8864_v4 }
0x3004   : > { %v8932_v55 = vpop.f32.mrf.mxu0 }
0x3005   : > { %v16859_v9 = vadd.f32 %v8932_v55, %v8864_v4 }
0x3006   : > { %v13143_v50 = vpop.f32.mrf.mxu0 }
0x3007   : > { %v16841_v43 = vadd.f32 %v13143_v50, %v8864_v4 }
0x3008   : > { %v8942_v46 = vpop.f32.mrf.mxu0 }
0x3009   : > { %v16847_v7 = vadd.f32 %v8942_v46, %v8864_v4 }
0x300a   : > { %v13146_v5 = vpop.f32.mrf.mxu0 }
0x300b   : > { %v16829_v29 = vadd.f32 %v13146_v5, %v8864_v4 }
0x300c   : > { %v8952_v10 = vpop.f32.mrf.mxu0 }
0x300d   : > { %v16835_v23 = vadd.f32 %v8952_v10, %v8864_v4 }
0x300e   : > { %v13149_v51 = vpop.f32.mrf.mxu0 }
0x300f   : > { %v16819_v1 = vadd.f32 %v13149_v51, %v8864_v4 }
0x3010   : > { %v8962_v63 = vpop.f32.mrf.mxu0 }
0x3011   : > { %v16821_v38 = vadd.f32 %v8962_v63, %v8864_v4  ;;  %13170 = vmatprep.subr.msk.mxu0 %vm1015_vm1, %v16819_v1 }
0x3012   : > { %13171 = vmatpush3.xpose.msk.msra.mxu0 %vm1015_vm1, %v16819_v1 }
0x3013   : > { %13172 = vmatprep.subr.msk.mxu0 %vm1015_vm1, %v16821_v38 }
0x3016   : > { %13173 = vmatpush3.xpose.msk.msra.mxu0 %vm1015_vm1, %v16821_v38 }
0x3017   : > { %13174 = vmatprep.subr.msk.mxu0 %vm1015_vm1, %v16829_v29 }
0x301a   : > { %13175 = vmatpush3.xpose.msk.msra.mxu0 %vm1015_vm1, %v16829_v29 }
0x301b   : > { %13176 = vmatprep.subr.msk.mxu0 %vm1015_vm1, %v16835_v23 }
0x301e   : > { %13177 = vmatpush3.xpose.msk.msra.mxu0 %vm1015_vm1, %v16835_v23 }
0x301f   : > { %13178 = vmatprep.subr.msk.mxu0 %vm1015_vm1, %v16841_v43 }
0x3022   : > { %13179 = vmatpush3.xpose.msk.msra.mxu0 %vm1015_vm1, %v16841_v43 }
0x3023   : > { %13180 = vmatprep.subr.msk.mxu0 %vm1015_vm1, %v16847_v7 }
0x3026   : > { %13181 = vmatpush3.xpose.msk.msra.mxu0 %vm1015_vm1, %v16847_v7 }
0x3027   : > { %13182 = vmatprep.subr.msk.mxu0 %vm1015_vm1, %v16853_v11 }
0x302a   : > { %13183 = vmatpush3.xpose.msk.msra.mxu0 %vm1015_vm1, %v16853_v11 }
0x302b   : > { %13184 = vmatprep.subr.msk.mxu0 %vm1015_vm1, %v16859_v9 }
0x302e   : > { %13185 = vmatpush3.xpose.msk.msra.mxu0 %vm1015_vm1, %v16859_v9 }
0x3031   : > { %13187 = vmatmul.mubr.msk.f32.vlgmr.msra.gmra.mxu0 %vm1015_vm1, %v16868_v24 }
0x30f1   : > { %v13188_v56 = vpop.f32.mrf.mxu0 }
0x30f2   : > { %v9196_v42 = vadd.f32 %v16873_v39, %v13188_v56 }
0x30f3   : > { %v9190_v12 = vpop.f32.mrf.mxu0 }
0x30f4   : > { %v9191_v49 = vadd.f32 %v16873_v39, %v9190_v12  ;;  %v9202_v6 = vsel %vm1153_vm2, %v9196_v42, -inf }
0x30f5   : > { %9203 = vmax.xlane.f32.xlu1 %v9202_v6 }
0x30f6   : > { %v9199_v41 = vsel %vm1153_vm2, %v9191_v49, -inf }
0x30f7   : > { %9200 = vmax.xlane.f32.xlu0 %v9199_v41 }
0x3106   : > { %9320 = vrot.lane.b32.xlu1 %v16819_v1, %s17290_s20 }
0x310a   : > { %9316 = vrot.lane.b32.xlu1 %v16829_v29, %s17290_s20 }
0x310e   : > { %9314 = vrot.lane.b32.xlu1 %v16835_v23, %s17290_s20 }
0x3112   : > { %9310 = vrot.lane.b32.xlu1 %v16847_v7, %s17290_s20 }
0x3116   : > { %9306 = vrot.lane.b32.xlu1 %v16859_v9, %s17290_s20 }
0x311a   : > { %9304 = vrot.lane.b32.xlu1 %v16868_v24, %s17290_s20 }
0x317e   : > { %v9204_v36 = vpop.xlane.xlu1 %9203 }
0x317f   : > { %v9206_v15 = vsub.f32 %v9196_v42, %v9204_v36 }
0x3180   : > { %v9201_v20 = vpop.xlane.xlu0 %9200 }
0x3181   : > { %v9205_v59 = vsub.f32 %v9191_v49, %v9201_v20  ;;  %v9209_v17 = vmul.f32 1.442695, %v9206_v15 }
0x3182   : > { %v9321_v14 = vpop.permute.xlu1 %9320 }
0x3183   : > { %v9207_v22 = vmul.f32 1.442695, %v9205_v59  ;;  %13208 = vmatprep.subr.msk.mxu1 %vm1015_vm1, %v9321_v14 }
0x3185   : > { %13780 = vpow2.f32 %v9207_v22 }
0x3186   : > { %13782 = vpow2.f32 %v9209_v17  ;;  %v9317_v60 = vpop.permute.xlu1 %9316 }
0x318a   : > { %v9315_v3 = vpop.permute.xlu1 %9314 }
0x318e   : > { %v9311_v37 = vpop.permute.xlu1 %9310 }
0x3192   : > { %v13781_v2 = vpop.eup %13780  ;;  %v9307_v44 = vpop.permute.xlu1 %9306 }
0x3193   : > { %v9211_v62 = vsel %vm1153_vm2, %v13781_v2, 0.0  ;;  %v13783_v33 = vpop.eup %13782 }
0x3194   : > { %9212 = vadd.xlane.f32.xlu0 %v9211_v62  ;;  %v9214_v18 = vsel %vm1153_vm2, %v13783_v33, 0.0 }
0x3196   : > { %v9305_v13 = vpop.permute.xlu1 %9304 }
0x3198   : > { %9215 = vadd.xlane.f32.xlu0 %v9214_v18 }
0x31ae   : > { %9318 = vrot.lane.b32.xlu0 %v16821_v38, %s17290_s20 }
0x31b2   : > { %9312 = vrot.lane.b32.xlu0 %v16841_v43, %s17290_s20 }
0x31b6   : > { %9308 = vrot.lane.b32.xlu0 %v16853_v11, %s17290_s20 }
0x31ba   : > { %9302 = vrot.lane.b32.xlu0 %v16815_v48, %s17290_s20 }
0x321d   : > { %v9213_v53 = vpop.xlane.xlu0 %9212 }
0x321e   : > { %13784 = vrcp.f32 %v9213_v53 }
0x3221   : > { %v9216_v30 = vpop.xlane.xlu0 %9215 }
0x3222   : > { %13786 = vrcp.f32 %v9216_v30  ;;  %v11323_v30 = vld [vmem:[%s17232_s9 + $0x68] sm:$0xff] }
0x3225   : > { %v9319_v57 = vpop.permute.xlu0 %9318 }
0x3229   : > { %v9313_v34 = vpop.permute.xlu0 %9312 }
0x322b   : > { %v13785_v58 = vpop.eup %13784 }
0x322c   : > { %v9219_v35 = vmul.f32 %v13785_v58, %v13781_v2 }
0x322d   : > { %v9309_v45 = vpop.permute.xlu0 %9308 }
0x322e   : > { %13205 = vmatprep.mubr.msk.f32.mxu1 %vm1153_vm2, %v9219_v35 }
0x322f   : > { %v13787_v54 = vpop.eup %13786 }
0x3230   : > { %v9220_v61 = vmul.f32 %v13787_v54, %v13783_v33 }
0x3231   : > { %v9303_v0 = vpop.permute.xlu0 %9302 }
0x3232   : > { %13206 = vmatmul.mubr.msk.f32.vlgmr.msra.gmra.mxu1 %vm1153_vm2, %v9220_v61 }
0x3233   : > { %13209 = vmatpush3.xpose.msk.msra.mxu1 %vm1015_vm1, %v9321_v14  ;;  %13224 = vmatprep.mubr.msk.f32.mxu1 %vm1015_vm1, %v9303_v0 }
0x3234   : > { %13210 = vmatprep.subr.msk.mxu1 %vm1015_vm1, %v9319_v57 }
0x3237   : > { %13211 = vmatpush3.xpose.msk.msra.mxu1 %vm1015_vm1, %v9319_v57 }
0x3238   : > { %13212 = vmatprep.subr.msk.mxu1 %vm1015_vm1, %v9317_v60 }
0x323b   : > { %13213 = vmatpush3.xpose.msk.msra.mxu1 %vm1015_vm1, %v9317_v60 }
0x323c   : > { %13214 = vmatprep.subr.msk.mxu1 %vm1015_vm1, %v9315_v3 }
0x323f   : > { %13215 = vmatpush3.xpose.msk.msra.mxu1 %vm1015_vm1, %v9315_v3 }
0x3240   : > { %13216 = vmatprep.subr.msk.mxu1 %vm1015_vm1, %v9313_v34 }
0x3243   : > { %13217 = vmatpush3.xpose.msk.msra.mxu1 %vm1015_vm1, %v9313_v34 }
0x3244   : > { %13218 = vmatprep.subr.msk.mxu1 %vm1015_vm1, %v9311_v37 }
0x3247   : > { %13219 = vmatpush3.xpose.msk.msra.mxu1 %vm1015_vm1, %v9311_v37 }
0x3248   : > { %13220 = vmatprep.subr.msk.mxu1 %vm1015_vm1, %v9309_v45 }
0x324b   : > { %13221 = vmatpush3.xpose.msk.msra.mxu1 %vm1015_vm1, %v9309_v45 }
0x324c   : > { %13222 = vmatprep.subr.msk.mxu1 %vm1015_vm1, %v9307_v44 }
0x324f   : > { %13223 = vmatpush3.xpose.msk.msra.mxu1 %vm1015_vm1, %v9307_v44 }
0x3250   : > { %13251 = vmatprep.subr.mxu1 %v11322_v26 }
0x3252   : > { %13225 = vmatmul.mubr.msk.f32.vlgmr.msra.gmra.mxu1 %vm1015_vm1, %v9305_v13 }
0x3253   : > { %13252 = vmatpush3.msra.mxu1 %v11322_v26 }
0x32f2   : > { %v13207_v32 = vpop.f32.mrf.mxu1 }
0x32f4   : > { %v9293_v16 = vpop.f32.mrf.mxu1 }
0x32f5   : > { %13253 = vmatprep.mubr.msk.f32.mxu1 %vm1015_vm1, %v9293_v16 }
0x32f6   : > { %13254 = vmatmul.mubr.msk.f32.vlgmr.msra.gmra.mxu1 %vm1015_vm1, %v13207_v32 }
0x3312   : > { %v13226_v55 = vpop.f32.mrf.mxu1 }
0x3313   : > { %v9414_v50 = vadd.f32 %v16873_v39, %v13226_v55 }
0x3314   : > { %v9408_v46 = vpop.f32.mrf.mxu1 }
0x3315   : > { %v9409_v5 = vadd.f32 %v16873_v39, %v9408_v46  ;;  %v9420_v10 = vsel %vm1153_vm2, %v9414_v50, -inf }
0x3316   : > { %9421 = vmax.xlane.f32.xlu1 %v9420_v10 }
0x3317   : > { %v9417_v4 = vsel %vm1153_vm2, %v9409_v5, -inf }
0x3318   : > { %9418 = vmax.xlane.f32.xlu0 %v9417_v4 }
0x3327   : > { %9461 = vrot.lane.b32.xlu1 %v16725_v28, %s17290_s20 }
0x332b   : > { %9457 = vrot.lane.b32.xlu1 %v16731_v19, %s17290_s20 }
0x332e   : > { %9459 = vrot.lane.b32.xlu0 %v16727_v8, %s17290_s20 }
0x332f   : > { %9455 = vrot.lane.b32.xlu1 %v16735_v21, %s17290_s20 }
0x3332   : > { %9453 = vrot.lane.b32.xlu0 %v16739_v27, %s17290_s20 }
0x3333   : > { %9451 = vrot.lane.b32.xlu1 %v16743_v40, %s17290_s20 }
0x3337   : > { %9447 = vrot.lane.b32.xlu1 %v16751_v47, %s17290_s20 }
0x333b   : > { %9730 = vrot.lane.b32.xlu1 %v16821_v38, %s17292_s26 }
0x333f   : > { %9726 = vrot.lane.b32.xlu1 %v16835_v23, %s17292_s26 }
0x3343   : > { %9722 = vrot.lane.b32.xlu1 %v16847_v7, %s17292_s26 }
0x3347   : > { %9718 = vrot.lane.b32.xlu1 %v16859_v9, %s17292_s26 }
0x334b   : > { %9716 = vrot.lane.b32.xlu1 %v16868_v24, %s17292_s26 }
0x339f   : > { %v9422_v51 = vpop.xlane.xlu1 %9421 }
0x33a0   : > { %v9424_v63 = vsub.f32 %v9414_v50, %v9422_v51 }
0x33a1   : > { %v9419_v56 = vpop.xlane.xlu0 %9418 }
0x33a2   : > { %v9427_v42 = vmul.f32 1.442695, %v9424_v63  ;;  %v9423_v12 = vsub.f32 %v9409_v5, %v9419_v56 }
0x33a3   : > { %v9462_v49 = vpop.permute.xlu1 %9461 }
0x33a4   : > { %13788 = vpow2.f32 %v9427_v42  ;;  %v9425_v6 = vmul.f32 1.442695, %v9423_v12  ;;  %13227 = vmatprep.subr.mxu0 %v9462_v49 }
0x33a5   : > { %13228 = vmatpush3.msra.mxu0 %v9462_v49  ;;  %v9460_v41 = vpop.permute.xlu0 %9459 }
0x33a6   : > { %13790 = vpow2.f32 %v9425_v6  ;;  %13229 = vmatprep.subr.mxu0 %v9460_v41 }
0x33a7   : > { %v9458_v36 = vpop.permute.xlu1 %9457  ;;  %13230 = vmatpush3.msra.mxu0 %v9460_v41 }
0x33a8   : > { %13231 = vmatprep.subr.mxu0 %v9458_v36 }
0x33a9   : > { %13232 = vmatpush3.msra.mxu0 %v9458_v36  ;;  %v9454_v20 = vpop.permute.xlu0 %9453 }
0x33ab   : > { %v9456_v15 = vpop.permute.xlu1 %9455 }
0x33ac   : > { %13233 = vmatprep.subr.mxu0 %v9456_v15 }
0x33ad   : > { %13234 = vmatpush3.msra.mxu0 %v9456_v15 }
0x33ae   : > { %13235 = vmatprep.subr.mxu0 %v9454_v20 }
0x33af   : > { %v9452_v59 = vpop.permute.xlu1 %9451  ;;  %13236 = vmatpush3.msra.mxu0 %v9454_v20 }
0x33b0   : > { %13237 = vmatprep.subr.mxu0 %v9452_v59 }
0x33b1   : > { %v13789_v14 = vpop.eup %13788  ;;  %13238 = vmatpush3.msra.mxu0 %v9452_v59 }
0x33b2   : > { %v9432_v17 = vsel %vm1153_vm2, %v13789_v14, 0.0 }
0x33b3   : > { %v13791_v22 = vpop.eup %13790  ;;  %9433 = vadd.xlane.f32.xlu0 %v9432_v17  ;;  %v9448_v53 = vpop.permute.xlu1 %9447 }
0x33b4   : > { %v9429_v2 = vsel %vm1153_vm2, %v13791_v22, 0.0 }
0x33b7   : > { %9430 = vadd.xlane.f32.xlu0 %v9429_v2  ;;  %v9731_v44 = vpop.permute.xlu1 %9730 }
0x33bb   : > { %v9727_v13 = vpop.permute.xlu1 %9726 }
0x33bf   : > { %v9723_v26 = vpop.permute.xlu1 %9722 }
0x33c3   : > { %v9719_v32 = vpop.permute.xlu1 %9718 }
0x33c7   : > { %v9717_v16 = vpop.permute.xlu1 %9716 }
0x33cd   : > { %9449 = vrot.lane.b32.xlu0 %v16747_v52, %s17290_s20  ;;  %s10680_s20 = sshll.u32 %s651_s22, 4  ;;  %s17179_s20 = int_to_ptr.vmem [resolvable:$true] %s10680_s20 }
0x33ce   : > { %s13853_s3 = scalar_lea.vmem %s17179_s20, 256  ;;  %p13860_p0 = scmp.lt.s32.totalorder %s17179_s20, %s13858_s23 }
0x33cf   : > { %p13854_p11 = scmp.ne.s32.totalorder %s17179_s20, %s13853_s3  ;;  %p13861_p1 = scmp.lt.s32.totalorder %s13859_s24, %s13853_s3 }
0x33d1   : > { %9732 = vrot.lane.b32.xlu0 %v16819_v1, %s17292_s26  ;;  %p13855_p12 = pnand %p13854_p11, %p14063_p5  ;;  %p13862_p2 = por %p13861_p1, %p13860_p0 }
0x33d3   : > { %p13856_p13 = pneg %p13855_p12 }
0x33d5   : > { %9728 = vrot.lane.b32.xlu0 %v16829_v29, %s17292_s26  ;;  %p13863_p3 = pnand %p13862_p2, %p13856_p13 }
0x33d9   : > { %9724 = vrot.lane.b32.xlu0 %v16841_v43, %s17292_s26 }
0x33dd   : > { %9720 = vrot.lane.b32.xlu0 %v16853_v11, %s17292_s26 }
0x33e1   : > { %9714 = vrot.lane.b32.xlu0 %v16815_v48, %s17292_s26 }
0x343c   : > { %v9434_v62 = vpop.xlane.xlu0 %9433 }
0x343d   : > { %13792 = vrcp.f32 %v9434_v62 }
0x3440   : > { %v9431_v33 = vpop.xlane.xlu0 %9430 }
0x3441   : > { %13794 = vrcp.f32 %v9431_v33 }
0x3444   : > { %v9450_v18 = vpop.permute.xlu0 %9449 }
0x3445   : > { %13239 = vmatprep.subr.mxu0 %v9450_v18 }
0x3446   : > { %13240 = vmatpush3.msra.mxu0 %v9450_v18 }
0x3447   : > { %13241 = vmatprep.subr.mxu0 %v9448_v53 }
0x3448   : > { %13242 = vmatpush3.msra.mxu0 %v9448_v53  ;;  %v9733_v45 = vpop.permute.xlu0 %9732 }
0x3449   : > { %13246 = vmatprep.subr.mxu0 %v11323_v30 }
0x344a   : > { %v13793_v57 = vpop.eup %13792 }
0x344b   : > { %v9438_v35 = vmul.f32 %v13793_v57, %v13789_v14 }
0x344c   : > { %v9729_v54 = vpop.permute.xlu0 %9728 }
0x344e   : > { %v13795_v34 = vpop.eup %13794 }
0x344f   : > { %v9437_v58 = vmul.f32 %v13795_v34, %v13791_v22 }
0x3450   : > { %v9725_v61 = vpop.permute.xlu0 %9724 }
0x3451   : > { %13243 = vmatprep.mubr.msk.f32.mxu0 %vm1153_vm2, %v9437_v58 }
0x3452   : > { %13244 = vmatmul.mubr.msk.f32.vlgmr.msra.gmra.mxu0 %vm1153_vm2, %v9438_v35 }
0x3453   : > { %13247 = vmatpush3.msra.mxu0 %v11323_v30  ;;  %v13255_v30 = vpop.f32.mrf.mxu1 }
0x3454   : > { %13256 = vmatprep.subr.msk.mxu0 %vm1015_vm1, %v9733_v45  ;;  %v9721_v0 = vpop.permute.xlu0 %9720 }
0x3455   : > { %v9705_v57 = vpop.f32.mrf.mxu1 }
0x3458   : > { %v9715_v37 = vpop.permute.xlu0 %9714 }
0x3512   : > { %v13245_v60 = vpop.f32.mrf.mxu0 }
0x3514   : > { %v9543_v3 = vpop.f32.mrf.mxu0 }
0x3515   : > { %13248 = vmatprep.mubr.msk.f32.mxu0 %vm1015_vm1, %v9543_v3 }
0x3516   : > { %13249 = vmatmul.mubr.msk.f32.vlgmr.msra.gmra.mxu0 %vm1015_vm1, %v13245_v60 }
0x3517   : > { %13257 = vmatpush3.xpose.msk.msra.mxu0 %vm1015_vm1, %v9733_v45  ;;  %13272 = vmatprep.mubr.msk.f32.mxu0 %vm1015_vm1, %v9715_v37 }
0x3518   : > { %13258 = vmatprep.subr.msk.mxu0 %vm1015_vm1, %v9731_v44 }
0x351b   : > { %13259 = vmatpush3.xpose.msk.msra.mxu0 %vm1015_vm1, %v9731_v44 }
0x351c   : > { %13260 = vmatprep.subr.msk.mxu0 %vm1015_vm1, %v9729_v54 }
0x351f   : > { %13261 = vmatpush3.xpose.msk.msra.mxu0 %vm1015_vm1, %v9729_v54 }
0x3520   : > { %13262 = vmatprep.subr.msk.mxu0 %vm1015_vm1, %v9727_v13 }
0x3523   : > { %13263 = vmatpush3.xpose.msk.msra.mxu0 %vm1015_vm1, %v9727_v13 }
0x3524   : > { %13264 = vmatprep.subr.msk.mxu0 %vm1015_vm1, %v9725_v61 }
0x3527   : > { %13265 = vmatpush3.xpose.msk.msra.mxu0 %vm1015_vm1, %v9725_v61 }
0x3528   : > { %13266 = vmatprep.subr.msk.mxu0 %vm1015_vm1, %v9723_v26 }
0x352b   : > { %13267 = vmatpush3.xpose.msk.msra.mxu0 %vm1015_vm1, %v9723_v26 }
0x352c   : > { %13268 = vmatprep.subr.msk.mxu0 %vm1015_vm1, %v9721_v0 }
0x352f   : > { %13269 = vmatpush3.xpose.msk.msra.mxu0 %vm1015_vm1, %v9721_v0 }
0x3530   : > { %13270 = vmatprep.subr.msk.mxu0 %vm1015_vm1, %v9719_v32 }
0x3533   : > { %13271 = vmatpush3.xpose.msk.msra.mxu0 %vm1015_vm1, %v9719_v32 }
0x3536   : > { %13273 = vmatmul.mubr.msk.f32.vlgmr.msra.gmra.mxu0 %vm1015_vm1, %v9717_v16 }
0x35d6   : > { %v16993_v55 = vpop.f32.mrf.mxu0 }
0x35d7   : > { %v9711_v37 = vadd.f32 %v13255_v30, %v16993_v55 }
0x35d8   : > { %v16995_v50 = vpop.f32.mrf.mxu0 }
0x35d9   : > { %v9706_v13 = vadd.f32 %v9705_v57, %v16995_v50 }
0x35f6   : > { %v13274_v46 = vpop.f32.mrf.mxu0 }
0x35f7   : > { %v9826_v5 = vadd.f32 %v16873_v39, %v13274_v46 }
0x35f8   : > { %v9820_v10 = vpop.f32.mrf.mxu0 }
0x35f9   : > { %v9821_v4 = vadd.f32 %v16873_v39, %v9820_v10  ;;  %v9832_v51 = vsel %vm1153_vm2, %v9826_v5, -inf }
0x35fa   : > { %9833 = vmax.xlane.f32.xlu1 %v9832_v51 }
0x35fb   : > { %v9829_v63 = vsel %vm1153_vm2, %v9821_v4, -inf }
0x35fc   : > { %9830 = vmax.xlane.f32.xlu0 %v9829_v63 }
0x360b   : > { %9865 = vrot.lane.b32.xlu1 %v16725_v28, %s17292_s26 }
0x360f   : > { %9861 = vrot.lane.b32.xlu1 %v16731_v19, %s17292_s26 }
0x3612   : > { %9863 = vrot.lane.b32.xlu0 %v16727_v8, %s17292_s26 }
0x3613   : > { %9859 = vrot.lane.b32.xlu1 %v16735_v21, %s17292_s26 }
0x3616   : > { %9857 = vrot.lane.b32.xlu0 %v16739_v27, %s17292_s26 }
0x3617   : > { %9855 = vrot.lane.b32.xlu1 %v16743_v40, %s17292_s26 }
0x361b   : > { %9851 = vrot.lane.b32.xlu1 %v16751_v47, %s17292_s26 }
0x361f   : > { %10055 = vrot.lane.b32.xlu1 %v16821_v38, %s17294_s27 }
0x3623   : > { %10051 = vrot.lane.b32.xlu1 %v16835_v23, %s17294_s27 }
0x3627   : > { %10047 = vrot.lane.b32.xlu1 %v16847_v7, %s17294_s27 }
0x362b   : > { %10043 = vrot.lane.b32.xlu1 %v16859_v9, %s17294_s27 }
0x362f   : > { %10041 = vrot.lane.b32.xlu1 %v16868_v24, %s17294_s27 }
0x3683   : > { %v9834_v56 = vpop.xlane.xlu1 %9833 }
0x3684   : > { %v9836_v42 = vsub.f32 %v9826_v5, %v9834_v56 }
0x3685   : > { %v9831_v12 = vpop.xlane.xlu0 %9830 }
0x3686   : > { %v9839_v49 = vmul.f32 1.442695, %v9836_v42  ;;  %v9835_v6 = vsub.f32 %v9821_v4, %v9831_v12 }
0x3687   : > { %v9866_v41 = vpop.permute.xlu1 %9865 }
0x3688   : > { %13796 = vpow2.f32 %v9839_v49  ;;  %v9837_v38 = vmul.f32 1.442695, %v9835_v6  ;;  %13275 = vmatprep.subr.mxu1 %v9866_v41 }
0x3689   : > { %13276 = vmatpush3.msra.mxu1 %v9866_v41  ;;  %v9864_v23 = vpop.permute.xlu0 %9863 }
0x368a   : > { %13798 = vpow2.f32 %v9837_v38  ;;  %13277 = vmatprep.subr.mxu1 %v9864_v23 }
0x368b   : > { %v9862_v7 = vpop.permute.xlu1 %9861  ;;  %13278 = vmatpush3.msra.mxu1 %v9864_v23 }
0x368c   : > { %13279 = vmatprep.subr.mxu1 %v9862_v7 }
0x368d   : > { %13280 = vmatpush3.msra.mxu1 %v9862_v7  ;;  %v9858_v24 = vpop.permute.xlu0 %9857 }
0x368f   : > { %v9860_v9 = vpop.permute.xlu1 %9859 }
0x3690   : > { %13281 = vmatprep.subr.mxu1 %v9860_v9 }
0x3691   : > { %13282 = vmatpush3.msra.mxu1 %v9860_v9 }
0x3692   : > { %13283 = vmatprep.subr.mxu1 %v9858_v24 }
0x3693   : > { %v9856_v36 = vpop.permute.xlu1 %9855  ;;  %13284 = vmatpush3.msra.mxu1 %v9858_v24 }
0x3694   : > { %13285 = vmatprep.subr.mxu1 %v9856_v36 }
0x3695   : > { %v13797_v15 = vpop.eup %13796  ;;  %13286 = vmatpush3.msra.mxu1 %v9856_v36 }
0x3696   : > { %v9844_v20 = vsel %vm1153_vm2, %v13797_v15, 0.0 }
0x3697   : > { %v13799_v59 = vpop.eup %13798  ;;  %9845 = vadd.xlane.f32.xlu0 %v9844_v20  ;;  %v9852_v62 = vpop.permute.xlu1 %9851 }
0x3698   : > { %v9841_v14 = vsel %vm1153_vm2, %v13799_v59, 0.0 }
0x369b   : > { %9842 = vadd.xlane.f32.xlu0 %v9841_v14  ;;  %v10056_v54 = vpop.permute.xlu1 %10055 }
0x369f   : > { %v10052_v61 = vpop.permute.xlu1 %10051 }
0x36a3   : > { %v10048_v0 = vpop.permute.xlu1 %10047 }
0x36a7   : > { %v10044_v60 = vpop.permute.xlu1 %10043 }
0x36ab   : > { %v10042_v3 = vpop.permute.xlu1 %10041 }
0x36b1   : > { %9853 = vrot.lane.b32.xlu0 %v16747_v52, %s17292_s26 }
0x36b5   : > { %10057 = vrot.lane.b32.xlu0 %v16819_v1, %s17294_s27  ;;  %v11324_v1 = vld [vmem:[%s17232_s9 + $0x70] sm:$0xff] }
0x36b9   : > { %10053 = vrot.lane.b32.xlu0 %v16829_v29, %s17294_s27 }
0x36bd   : > { %10049 = vrot.lane.b32.xlu0 %v16841_v43, %s17294_s27 }
0x36c1   : > { %10045 = vrot.lane.b32.xlu0 %v16853_v11, %s17294_s27 }
0x36c5   : > { %10039 = vrot.lane.b32.xlu0 %v16815_v48, %s17294_s27 }
0x3720   : > { %v9846_v17 = vpop.xlane.xlu0 %9845 }
0x3721   : > { %13800 = vrcp.f32 %v9846_v17 }
0x3724   : > { %v9843_v22 = vpop.xlane.xlu0 %9842 }
0x3725   : > { %13802 = vrcp.f32 %v9843_v22 }
0x3728   : > { %v9854_v2 = vpop.permute.xlu0 %9853 }
0x3729   : > { %13287 = vmatprep.subr.mxu1 %v9854_v2 }
0x372a   : > { %13288 = vmatpush3.msra.mxu1 %v9854_v2 }
0x372b   : > { %13289 = vmatprep.subr.mxu1 %v9852_v62 }
0x372c   : > { %13290 = vmatpush3.msra.mxu1 %v9852_v62  ;;  %v10058_v48 = vpop.permute.xlu0 %10057  ;;  %v11383_v62 = vld [vmem:[%s17233_s10 + $0x3] ss:$0 sm:$0xff] }
0x372d   : > { %13294 = vmatprep.subr.mxu1 %v11324_v1 }
0x372e   : > { %v13801_v29 = vpop.eup %13800 }
0x372f   : > { %v9850_v33 = vmul.f32 %v13801_v29, %v13797_v15 }
0x3730   : > { %v10054_v18 = vpop.permute.xlu0 %10053 }
0x3732   : > { %v13803_v43 = vpop.eup %13802 }
0x3733   : > { %v9849_v11 = vmul.f32 %v13803_v43, %v13799_v59 }
0x3734   : > { %v10050_v53 = vpop.permute.xlu0 %10049 }
0x3735   : > { %13291 = vmatprep.mubr.msk.f32.mxu1 %vm1153_vm2, %v9849_v11 }
0x3736   : > { %13292 = vmatmul.mubr.msk.f32.vlgmr.msra.gmra.mxu1 %vm1153_vm2, %v9850_v33 }
0x3737   : > { %13295 = vmatpush3.msra.mxu1 %v11324_v1 }
0x3738   : > { %13299 = vmatprep.subr.msk.mxu1 %vm1015_vm1, %v10058_v48  ;;  %v10046_v34 = vpop.permute.xlu0 %10045 }
0x373c   : > { %v10040_v45 = vpop.permute.xlu0 %10039 }
0x37f6   : > { %v13293_v58 = vpop.f32.mrf.mxu1 }
0x37f8   : > { %v9947_v35 = vpop.f32.mrf.mxu1 }
0x37f9   : > { %13296 = vmatprep.mubr.msk.f32.mxu1 %vm1015_vm1, %v9947_v35 }
0x37fa   : > { %13297 = vmatmul.mubr.msk.f32.vlgmr.msra.gmra.mxu1 %vm1015_vm1, %v13293_v58 }
0x37fb   : > { %13300 = vmatpush3.xpose.msk.msra.mxu1 %vm1015_vm1, %v10058_v48  ;;  %13315 = vmatprep.mubr.msk.f32.mxu1 %vm1015_vm1, %v10040_v45 }
0x37fc   : > { %13301 = vmatprep.subr.msk.mxu1 %vm1015_vm1, %v10056_v54 }
0x37ff   : > { %13302 = vmatpush3.xpose.msk.msra.mxu1 %vm1015_vm1, %v10056_v54 }
0x3800   : > { %13303 = vmatprep.subr.msk.mxu1 %vm1015_vm1, %v10054_v18 }
0x3803   : > { %13304 = vmatpush3.xpose.msk.msra.mxu1 %vm1015_vm1, %v10054_v18 }
0x3804   : > { %13305 = vmatprep.subr.msk.mxu1 %vm1015_vm1, %v10052_v61 }
0x3807   : > { %13306 = vmatpush3.xpose.msk.msra.mxu1 %vm1015_vm1, %v10052_v61  ;;  %v11391_v61 = vld [vmem:[%s17234_s11 + $0x78] sm:$0xff] }
0x3808   : > { %13307 = vmatprep.subr.msk.mxu1 %vm1015_vm1, %v10050_v53 }
0x380b   : > { %13308 = vmatpush3.xpose.msk.msra.mxu1 %vm1015_vm1, %v10050_v53 }
0x380c   : > { %13309 = vmatprep.subr.msk.mxu1 %vm1015_vm1, %v10048_v0 }
0x380f   : > { %13310 = vmatpush3.xpose.msk.msra.mxu1 %vm1015_vm1, %v10048_v0  ;;  %v11390_v0 = vld [vmem:[%s17234_s11 + $0x70] sm:$0xff] }
0x3810   : > { %13311 = vmatprep.subr.msk.mxu1 %vm1015_vm1, %v10046_v34 }
0x3813   : > { %13312 = vmatpush3.xpose.msk.msra.mxu1 %vm1015_vm1, %v10046_v34 }
0x3814   : > { %13313 = vmatprep.subr.msk.mxu1 %vm1015_vm1, %v10044_v60 }
0x3817   : > { %13314 = vmatpush3.xpose.msk.msra.mxu1 %vm1015_vm1, %v10044_v60  ;;  %v11389_v60 = vld [vmem:[%s17234_s11 + $0x68] sm:$0xff] }
0x381a   : > { %13316 = vmatmul.mubr.msk.f32.vlgmr.msra.gmra.mxu1 %vm1015_vm1, %v10042_v3  ;;  %v11388_v3 = vld [vmem:[%s17234_s11 + $0x60] sm:$0xff] }
0x38ba   : > { %v13298_v44 = vpop.f32.mrf.mxu1 }
0x38bb   : > { %v17066_v26 = vadd.f32 %v13298_v44, %v9711_v37  ;;  %v11403_v37 = vld [vmem:[%s17236_s13 + $0xf8] sm:$0xff]  ;;  %v11402_v44 = vld [vmem:[%s17236_s13 + $0xf0] sm:$0xff] }
0x38bc   : > { %v10028_v32 = vpop.f32.mrf.mxu1  ;;  %13353 = vmatprep.subr.mxu1 %v11403_v37 }
0x38bd   : > { %v17068_v16 = vadd.f32 %v10028_v32, %v9706_v13  ;;  %13354 = vmatpush3.msra.mxu1 %v11403_v37  ;;  %v11401_v13 = vld [vmem:[%s17236_s13 + $0xe8] sm:$0xff] }
0x38be   : > { %13355 = vmatprep.subr.mxu1 %v11402_v44 }
0x38bf   : > { %13356 = vmatpush3.msra.mxu1 %v11402_v44 }
0x38c0   : > { %13357 = vmatprep.subr.mxu1 %v11401_v13 }
0x38c1   : > { %13358 = vmatpush3.msra.mxu1 %v11401_v13 }
0x38da   : > { %v13317_v46 = vpop.f32.mrf.mxu1 }
0x38db   : > { %v10151_v5 = vadd.f32 %v16873_v39, %v13317_v46 }
0x38dc   : > { %v10145_v10 = vpop.f32.mrf.mxu1 }
0x38dd   : > { %v10146_v4 = vadd.f32 %v16873_v39, %v10145_v10  ;;  %v10157_v51 = vsel %vm1153_vm2, %v10151_v5, -inf }
0x38de   : > { %10158 = vmax.xlane.f32.xlu1 %v10157_v51 }
0x38df   : > { %v10154_v63 = vsel %vm1153_vm2, %v10146_v4, -inf }
0x38e0   : > { %10155 = vmax.xlane.f32.xlu0 %v10154_v63  ;;  %v11386_v63 = vld [vmem:[%s17238_s15 + $0x3] ss:$0 sm:$0xff] }
0x38ef   : > { %10190 = vrot.lane.b32.xlu1 %v16725_v28, %s17294_s27 }
0x38f3   : > { %10186 = vrot.lane.b32.xlu1 %v16731_v19, %s17294_s27 }
0x38f6   : > { %10188 = vrot.lane.b32.xlu0 %v16727_v8, %s17294_s27 }
0x38f7   : > { %10184 = vrot.lane.b32.xlu1 %v16735_v21, %s17294_s27 }
0x38fa   : > { %10182 = vrot.lane.b32.xlu0 %v16739_v27, %s17294_s27 }
0x38fb   : > { %10180 = vrot.lane.b32.xlu1 %v16743_v40, %s17294_s27 }
0x38ff   : > { %10176 = vrot.lane.b32.xlu1 %v16751_v47, %s17294_s27 }
0x3967   : > { %v10159_v39 = vpop.xlane.xlu1 %10158 }
0x3968   : > { %v10161_v28 = vsub.f32 %v10151_v5, %v10159_v39 }
0x3969   : > { %v10156_v55 = vpop.xlane.xlu0 %10155 }
0x396a   : > { %v10164_v50 = vmul.f32 1.442695, %v10161_v28  ;;  %v10160_v19 = vsub.f32 %v10146_v4, %v10156_v55  ;;  %v11387_v28 = vld [vmem:[%s17239_s16 + $0x3] ss:$0 sm:$0xff] }
0x396b   : > { %v10191_v56 = vpop.permute.xlu1 %10190 }
0x396c   : > { %13804 = vpow2.f32 %v10164_v50  ;;  %v10162_v8 = vmul.f32 1.442695, %v10160_v19  ;;  %13318 = vmatprep.subr.mxu0 %v10191_v56 }
0x396d   : > { %13319 = vmatpush3.msra.mxu0 %v10191_v56  ;;  %v10189_v21 = vpop.permute.xlu0 %10188 }
0x396e   : > { %13806 = vpow2.f32 %v10162_v8  ;;  %13320 = vmatprep.subr.mxu0 %v10189_v21 }
0x396f   : > { %v10187_v27 = vpop.permute.xlu1 %10186  ;;  %13321 = vmatpush3.msra.mxu0 %v10189_v21 }
0x3970   : > { %13322 = vmatprep.subr.mxu0 %v10187_v27 }
0x3971   : > { %13323 = vmatpush3.msra.mxu0 %v10187_v27  ;;  %v10183_v47 = vpop.permute.xlu0 %10182  ;;  %v11399_v27 = vld [vmem:[%s17236_s13 + $0xd8] sm:$0xff] }
0x3973   : > { %v10185_v40 = vpop.permute.xlu1 %10184 }
0x3974   : > { %13324 = vmatprep.subr.mxu0 %v10185_v40 }
0x3975   : > { %13325 = vmatpush3.msra.mxu0 %v10185_v40  ;;  %v11398_v40 = vld [vmem:[%s17236_s13 + $0xd0] sm:$0xff] }
0x3976   : > { %13326 = vmatprep.subr.mxu0 %v10183_v47 }
0x3977   : > { %v10181_v42 = vpop.permute.xlu1 %10180  ;;  %13327 = vmatpush3.msra.mxu0 %v10183_v47  ;;  %v11397_v47 = vld [vmem:[%s17236_s13 + $0xc8] sm:$0xff] }
0x3978   : > { %13328 = vmatprep.subr.mxu0 %v10181_v42 }
0x3979   : > { %v13805_v12 = vpop.eup %13804  ;;  %13329 = vmatpush3.msra.mxu0 %v10181_v42  ;;  %v11396_v42 = vld [vmem:[%s17236_s13 + $0xc0] sm:$0xff] }
0x397a   : > { %v10169_v49 = vsel %vm1153_vm2, %v13805_v12, 0.0 }
0x397b   : > { %v13807_v6 = vpop.eup %13806  ;;  %10170 = vadd.xlane.f32.xlu0 %v10169_v49  ;;  %v10177_v9 = vpop.permute.xlu1 %10176 }
0x397c   : > { %v10166_v41 = vsel %vm1153_vm2, %v13807_v6, 0.0 }
0x397f   : > { %10167 = vadd.xlane.f32.xlu0 %v10166_v41 }
0x3995   : > { %10178 = vrot.lane.b32.xlu0 %v16747_v52, %s17294_s27  ;;  %v11325_v52 = vld [vmem:[%s17232_s9 + $0x78] sm:$0xff]  ;;  %s17177_s27 = scalar_lea.hbm %s17300_s30, %s11421_s1 }
0x3a04   : > { %v10171_v38 = vpop.xlane.xlu0 %10170 }
0x3a05   : > { %13808 = vrcp.f32 %v10171_v38 }
0x3a08   : > { %v10168_v23 = vpop.xlane.xlu0 %10167 }
0x3a09   : > { %13810 = vrcp.f32 %v10168_v23 }
0x3a0c   : > { %v10179_v7 = vpop.permute.xlu0 %10178 }
0x3a0d   : > { %13330 = vmatprep.subr.mxu0 %v10179_v7 }
0x3a0e   : > { %13331 = vmatpush3.msra.mxu0 %v10179_v7 }
0x3a0f   : > { %13332 = vmatprep.subr.mxu0 %v10177_v9 }
0x3a10   : > { %13333 = vmatpush3.msra.mxu0 %v10177_v9  ;;  %v11405_v9 = vld [vmem:[%s17237_s14 + $0x3] ss:$0 sm:$0xff] }
0x3a11   : > { %13337 = vmatprep.subr.mxu0 %v11325_v52 }
0x3a12   : > { %v13809_v24 = vpop.eup %13808 }
0x3a13   : > { %v10175_v20 = vmul.f32 %v13809_v24, %v13805_v12  ;;  %v11393_v12 = vld [vmem:[%s17235_s12 + $0x3] ss:$0 sm:$0xff] }
0x3a16   : > { %v13811_v36 = vpop.eup %13810 }
0x3a17   : > { %v10174_v15 = vmul.f32 %v13811_v36, %v13807_v6 }
0x3a19   : > { %13334 = vmatprep.mubr.msk.f32.mxu0 %vm1153_vm2, %v10174_v15 }
0x3a1a   : > { %13335 = vmatmul.mubr.msk.f32.vlgmr.msra.gmra.mxu0 %vm1153_vm2, %v10175_v20 }
0x3a1b   : > { %13338 = vmatpush3.msra.mxu0 %v11325_v52 }
0x3a1c   : > { %13342 = vmatprep.subr.mxu0 %v11391_v61 }
0x3ada   : > { %v13336_v59 = vpop.f32.mrf.mxu0 }
0x3adc   : > { %v10272_v14 = vpop.f32.mrf.mxu0 }
0x3add   : > { %13339 = vmatprep.mubr.msk.f32.mxu0 %vm1015_vm1, %v10272_v14 }
0x3ade   : > { %13340 = vmatmul.mubr.msk.f32.vlgmr.msra.gmra.mxu0 %vm1015_vm1, %v13336_v59 }
0x3adf   : > { %13343 = vmatpush3.msra.mxu0 %v11391_v61  ;;  %v11411_v61 = vld [vmem:[%s17241_s18 + $0x3] ss:$0 sm:$0xff] }
0x3ae0   : > { %13344 = vmatprep.subr.mxu0 %v11390_v0 }
0x3ae1   : > { %13345 = vmatpush3.msra.mxu0 %v11390_v0 }
0x3ae2   : > { %13346 = vmatprep.subr.mxu0 %v11389_v60 }
0x3ae3   : > { %13347 = vmatpush3.msra.mxu0 %v11389_v60 }
0x3ae4   : > { %13348 = vmatprep.subr.mxu0 %v11388_v3 }
0x3ae5   : > { %13349 = vmatpush3.msra.mxu0 %v11388_v3 }
0x3b9e   : > { %v13341_v17 = vpop.f32.mrf.mxu0 }
0x3b9f   : > { %v10363_v22 = vadd.f32 %v13341_v17, %v17066_v26  ;;  %v11400_v26 = vld [vmem:[%s17236_s13 + $0xe0] sm:$0xff] }
0x3ba0   : > { %v10353_v2 = vpop.f32.mrf.mxu0  ;;  %13359 = vmatprep.subr.mxu1 %v11400_v26 }
0x3ba1   : > { %v10365_v1 = vadd.f32 %v10363_v22, %v16788_v31  ;;  %v10362_v29 = vadd.f32 %v10353_v2, %v17068_v16  ;;  %13360 = vmatpush3.msra.mxu1 %v11400_v26 }
0x3ba2   : > { %13361 = vmatprep.subr.mxu1 %v11399_v27 }
0x3ba3   : > { %v10364_v43 = vadd.f32 %v10362_v29, %v16790_v25  ;;  %v10375_v11 = vadd.f32 %v11383_v62, %v10365_v1  ;;  %13362 = vmatpush3.msra.mxu1 %v11399_v27 }
0x3ba4   : > { %13363 = vmatprep.subr.mxu1 %v11398_v40 }
0x3ba5   : > { %v10383_v33 = vsel %vm711_vm0, %v10375_v11, 0.0  ;;  %v10374_v48 = vadd.f32 %v11383_v62, %v10364_v43  ;;  %13364 = vmatpush3.msra.mxu1 %v11398_v40 }
0x3ba6   : > { %10384 = vadd.xlane.f32.xlu1 %v10383_v33  ;;  %13365 = vmatprep.subr.mxu1 %v11397_v47 }
0x3ba7   : > { %v10380_v18 = vsel %vm711_vm0, %v10374_v48, 0.0  ;;  %13366 = vmatpush3.msra.mxu1 %v11397_v47 }
0x3ba8   : > { %10381 = vadd.xlane.f32.xlu0 %v10380_v18  ;;  %13367 = vmatprep.subr.mxu1 %v11396_v42 }
0x3ba9   : > { %13368 = vmatpush3.msra.mxu1 %v11396_v42 }
0x3c2f   : > { %v10385_v53 = vpop.xlane.xlu1 %10384 }
0x3c30   : > { %v10387_v30 = vmul.f32 0.03125, %v10385_v53 }
0x3c31   : > { %v10382_v57 = vpop.xlane.xlu0 %10381 }
0x3c32   : > { %v10386_v34 = vmul.f32 0.03125, %v10382_v57  ;;  %v10389_v58 = vsub.f32 %v10375_v11, %v10387_v30 }
0x3c34   : > { %v10388_v35 = vsub.f32 %v10374_v48, %v10386_v34  ;;  %v10391_v54 = vmul.f32 %v10389_v58, %v10389_v58 }
0x3c36   : > { %v10390_v45 = vmul.f32 %v10388_v35, %v10388_v35  ;;  %v10395_v25 = vsel %vm711_vm0, %v10391_v54, 0.0 }
0x3c38   : > { %v10392_v31 = vsel %vm711_vm0, %v10390_v45, 0.0 }
0x3c39   : > { %10393 = vadd.xlane.f32.xlu0 %v10392_v31  ;;  %v11410_v31 = vld [vmem:[%s17240_s17 + $0x3] ss:$0 sm:$0xff] }
0x3c3d   : > { %10396 = vadd.xlane.f32.xlu0 %v10395_v25 }
0x3cc2   : > { %v10394_v32 = vpop.xlane.xlu0 %10393 }
0x3cc3   : > { %v10398_v16 = vmul.f32 0.03125, %v10394_v32 }
0x3cc5   : > { %v10400_v46 = vadd.f32 1e-05, %v10398_v16 }
0x3cc6   : > { %v10397_v5 = vpop.xlane.xlu0 %10396 }
0x3cc7   : > { %13812 = vrsqrt.f32 %v10400_v46  ;;  %v10399_v10 = vmul.f32 0.03125, %v10397_v5 }
0x3cc9   : > { %v10401_v4 = vadd.f32 1e-05, %v10399_v10 }
0x3ccb   : > { %13814 = vrsqrt.f32 %v10401_v4 }
0x3cd4   : > { %v13813_v51 = vpop.eup %13812 }
0x3cd5   : > { %v10404_v39 = vmul.f32 %v13813_v51, %v10388_v35 }
0x3cd7   : > { %v10412_v55 = vmul.f32 %v11386_v63, %v10404_v39 }
0x3cd8   : > { %v13815_v50 = vpop.eup %13814 }
0x3cd9   : > { %v10405_v19 = vmul.f32 %v13815_v50, %v10389_v58  ;;  %v10420_v56 = vadd.f32 %v11387_v28, %v10412_v55 }
0x3cdb   : > { %v10413_v8 = vmul.f32 %v11386_v63, %v10405_v19  ;;  %13350 = vmatprep.mubr.msk.f32.mxu0 %vm711_vm0, %v10420_v56 }
0x3cdd   : > { %v10421_v21 = vadd.f32 %v11387_v28, %v10413_v8 }
0x3cdf   : > { %13351 = vmatmul.mubr.msk.f32.vlgmr.msra.gmra.mxu0 %vm711_vm0, %v10421_v21 }
0x3d9f   : > { %v13352_v49 = vpop.f32.mrf.mxu0 }
0x3da0   : > { %v10513_v6 = vadd.f32 %v13352_v49, %v11393_v12 }
0x3da1   : > { %v10507_v41 = vpop.f32.mrf.mxu0 }
0x3da2   : > { %v10508_v38 = vadd.f32 %v11393_v12, %v10507_v41  ;;  %v10517_v7 = vmax.f32 %v10513_v6, 0.0 }
0x3da4   : > { %v10516_v23 = vmax.f32 %v10508_v38, 0.0 }
0x3da6   : > { %13369 = vmatprep.mubr.msk.f32.mxu1 %vm1153_vm2, %v10516_v23 }
0x3da7   : > { %13370 = vmatmul.mubr.msk.f32.vlgmr.msra.gmra.mxu1 %vm1153_vm2, %v10517_v7 }
0x3e67   : > { %v13371_v24 = vpop.f32.mrf.mxu1 }
0x3e68   : > { %v10613_v36 = vadd.f32 %v13371_v24, %v11405_v9 }
0x3e69   : > { %v10607_v15 = vpop.f32.mrf.mxu1 }
0x3e6a   : > { %v10617_v20 = vadd.f32 %v10613_v36, %v10421_v21  ;;  %v10608_v52 = vadd.f32 %v11405_v9, %v10607_v15 }
0x3e6c   : > { %v10616_v59 = vadd.f32 %v10608_v52, %v10420_v56  ;;  %v10625_v14 = vsel %vm711_vm0, %v10617_v20, 0.0 }
0x3e6d   : > { %10626 = vadd.xlane.f32.xlu0 %v10625_v14 }
0x3e6e   : > { %v10622_v17 = vsel %vm711_vm0, %v10616_v59, 0.0 }
0x3e6f   : > { %10623 = vadd.xlane.f32.xlu1 %v10622_v17 }
0x3ef6   : > { %v10627_v22 = vpop.xlane.xlu0 %10626 }
0x3ef7   : > { %v10629_v2 = vmul.f32 0.03125, %v10627_v22 }
0x3ef8   : > { %v10624_v62 = vpop.xlane.xlu1 %10623 }
0x3ef9   : > { %v10631_v1 = vsub.f32 %v10617_v20, %v10629_v2  ;;  %v10628_v29 = vmul.f32 0.03125, %v10624_v62 }
0x3efb   : > { %v10630_v43 = vsub.f32 %v10616_v59, %v10628_v29  ;;  %v10633_v11 = vmul.f32 %v10631_v1, %v10631_v1 }
0x3efd   : > { %v10637_v33 = vsel %vm711_vm0, %v10633_v11, 0.0  ;;  %v10632_v48 = vmul.f32 %v10630_v43, %v10630_v43 }
0x3efe   : > { %10638 = vadd.xlane.f32.xlu0 %v10637_v33 }
0x3eff   : > { %v10634_v18 = vsel %vm711_vm0, %v10632_v48, 0.0 }
0x3f00   : > { %10635 = vadd.xlane.f32.xlu1 %v10634_v18 }
0x3f87   : > { %v10639_v53 = vpop.xlane.xlu0 %10638 }
0x3f88   : > { %v10641_v30 = vmul.f32 0.03125, %v10639_v53 }
0x3f89   : > { %v10636_v57 = vpop.xlane.xlu1 %10635 }
0x3f8a   : > { %v10643_v34 = vadd.f32 1e-05, %v10641_v30  ;;  %v10640_v58 = vmul.f32 0.03125, %v10636_v57 }
0x3f8c   : > { %13816 = vrsqrt.f32 %v10643_v34  ;;  %v10642_v35 = vadd.f32 1e-05, %v10640_v58 }
0x3f8e   : > { %13818 = vrsqrt.f32 %v10642_v35 }
0x3f99   : > { %v13817_v45 = vpop.eup %13816 }
0x3f9a   : > { %v10647_v54 = vmul.f32 %v13817_v45, %v10631_v1 }
0x3f9b   : > { %v13819_v25 = vpop.eup %13818 }
0x3f9c   : > { %v10655_v0 = vmul.f32 %v11410_v31, %v10647_v54  ;;  %v10646_v60 = vmul.f32 %v13819_v25, %v10630_v43 }
0x3f9e   : > { %v10654_v3 = vmul.f32 %v11410_v31, %v10646_v60  ;;  %v10663_v37 = vadd.f32 %v11411_v61, %v10655_v0 }
0x3fa0   : > { %v10662_v44 = vadd.f32 %v11411_v61, %v10654_v3  ;;  %10665 = vst.msk [vmem:[%s651_s22 + $0x8] sm:$0xff] %vm711_vm0, %v10663_v37 }
0x3fa2   : > { %10664 = vst.msk [vmem:[%s651_s22] sm:$0xff] %vm711_vm0, %v10662_v44 }
0x3fa3   : > { %13866 = shalt.err (!%p13863_p3)
}
0x3fa4   : > { %s13867_s28 = scalar_lea.hbm %s17177_s27, 256  ;;  %s13871_s1 = scalar_lea.hbm %s17301_s2, 512 }
0x3fa5   : > { %p13868_p4 = scmp.ne.s32.totalorder %s17177_s27, %s13867_s28  ;;  %p13872_p9 = scmp.lt.s32.totalorder %s17177_s27, %s17301_s2 }
0x3fa6   : > { %p13873_p10 = scmp.lt.s32.totalorder %s13871_s1, %s13867_s28 }
0x3fa7   : > { %p13869_p7 = pnand %p13868_p4, %p14063_p5 }
0x3fa8   : > { %p13874_p11 = por %p13873_p10, %p13872_p9 }
0x3fa9   : > { %p13870_p8 = pneg %p13869_p7 }
0x3fab   : > { %p13875_p12 = pnand %p13874_p11, %p13870_p8 }
0x3fad   : > { %13878 = shalt.err (!%p13875_p12)
}
0x3fae   : > { %s13923_s26 = smov 128   ;;  %s13924_s30 = smov 8  }
0x3faf   : > { %13372 = dma.vmem_to_hbm [thread:$0]  (%p14063_p5), %s17179_s20, 256, %s17177_s27, %s17183_s4, %s13923_s26, %s13923_s26, %s13924_s30  }
0x3fb0 PF: > { %s17302_s3 = sld [smem:[#allocation8_spill]] }
0x3fb1   : > { %s17303_s25 = sld [smem:[#allocation5_spill]] }
0x3fb6   : > { %p13378_p13 = scmp.ge.s32.totalorder %s17302_s3, 2 }
0x3fb7   : > { %s10695_s24 = sand.u32 1, %s17303_s25  }
0x3fb8   : > { %p13375_p0 = pnand %p13378_p13, %p14067_p6  ;;  %s10696_s28 = scalar_lea.sflag [#allocation3], %s10695_s24 }
0x3fba   : > { %p13376_p1 = pneg %p13375_p0 }
0x3fbc   : > { %13896 = dma.done.wait (%p13376_p1), %s10696_s28, 256  }
0x3fbd   : > { %13898 = vsyncadd (%p13376_p1), %s10696_s28, 4294967040  ;;  %s17305_s21 = sld [smem:[#allocation10_spill]] }
0x3fbe   : > { %s17306_s0 = sld [smem:[#allocation6_spill]] }
0x3fbf   : > { %s17307_s30 = sld [smem:[#allocation7_spill]] }
0x3fc0   : > { %s17308_s20 = sld [smem:[#allocation11_spill]] }
0x3fc3   : > { %p29_p2 = scmp.ge.s32.totalorder %s17305_s21, 4  }
0x3fc5   :  { %31 = sbr.rel (!%p29_p2) target bundleno = 10 (0xa), region = 185 }
0x3fca   :  { %10701 = vsyncpa [#allocation3], 1 }
0x3fcb   :  { %10703 = vsyncpa [#allocation3 + $0x1], 1 }

</bundles_post_ra>
